<compile_context>
chip_gen: v7x
topology: tpu7x:2x2x1
jax: 0.10.0
libtpu: 0.0.40
codegen_flags: <defaults>
</compile_context>

<pallas_src>
import jax
import jax.numpy as jnp
from jax import lax
from jax.experimental import pallas as pl
from jax.experimental.pallas import tpu as pltpu


# ----------------------------------------------------------------------------
# Fused whole-network kernel
# ----------------------------------------------------------------------------

def make_stresnet_kernel(H, W, Cin, C, F, nb_res):
    HW = H * W

    def kernel(x_ref, w0_ref, b0_ref, bnsc_ref, bnsh_ref, rw_ref, rb_ref,
               wL_ref, bL_ref, fw_ref, extmap_ref, o_ref, abuf):
        # Grid = (batch, branch). branch (c/p/t) is the inner "arbitrary"
        # accumulation axis; batch is "parallel" (megacore split on v7x).
        b = pl.program_id(1)

        # Zero the conv staging buffer once per sample: the halo ring is never
        # written afterwards and the interior is fully overwritten before
        # every conv read, so no per-step re-zeroing is needed.
        @pl.when(b == 0)
        def _():
            abuf[...] = jnp.zeros_like(abuf)

        def stage(z):
            # flat (HW, C) activation -> interior of the zero-halo buffer.
            abuf[1:H + 1, 1:W + 1, :] = z.reshape(H, W, C)

        def conv_from_buf(tap_w, bias, cout):
            # 3x3 conv as 9 shifted (HW, C) x (C, cout) MXU dots read straight
            # from the zero-halo staging buffer (no im2col patch slab).
            acc = jnp.zeros((HW, cout), jnp.float32)
            for tap in range(9):
                dh, dw = tap // 3, tap % 3
                patch = abuf[dh:dh + H, dw:dw + W, :].reshape(HW, C)
                acc = acc + jnp.dot(patch, tap_w(tap),
                                    preferred_element_type=jnp.float32)
            return acc + bias

        # ---- conv0 (tiny Cin): 9-tap accumulation straight from the input --
        acc0 = jnp.zeros((HW, C), jnp.float32)
        for tap in range(9):
            dh, dw = tap // 3, tap % 3
            patch = x_ref[0, 0, dh:dh + H, dw:dw + W, :].reshape(HW, Cin)
            acc0 = acc0 + jnp.dot(patch, w0_ref[0, tap],
                                  preferred_element_type=jnp.float32)
        a = acc0 + b0_ref[0]

        # ---- residual units: BN -> ReLU -> conv -> BN -> ReLU -> conv (+x) -
        # The flat (HW, C) activation is carried as the loop value; the halo
        # buffer is only written when staging a conv input.
        def res_body(r, a):
            l1 = 2 * r
            l2 = 2 * r + 1
            z = jnp.maximum(a * bnsc_ref[0, l1] + bnsh_ref[0, l1], 0.0)
            stage(z)
            h = conv_from_buf(lambda t: rw_ref[0, l1, t], rb_ref[0, l1], C)
            z = jnp.maximum(h * bnsc_ref[0, l2] + bnsh_ref[0, l2], 0.0)
            stage(z)
            h = conv_from_buf(lambda t: rw_ref[0, l2, t], rb_ref[0, l2], C)
            return a + h

        a = lax.fori_loop(0, nb_res, res_body, a)

        # ---- final conv: C -> F flows ---------------------------------------
        stage(a)
        y = conv_from_buf(lambda t: wL_ref[0, t], bL_ref[0], F)   # (HW, F)
        contrib = fw_ref[0] * y                                    # (HW, F)

        last = pl.num_programs(1) - 1

        @pl.when(b == 0)
        def _():
            o_ref[0] = extmap_ref[0] + contrib

        @pl.when(b != 0)
        def _():
            o_ref[0] = o_ref[0] + contrib

        @pl.when(b == last)
        def _():
            o_ref[0] = jnp.tanh(o_ref[0])

    return kernel


# ----------------------------------------------------------------------------
# Parameter packing + forward (Pallas path)
# ----------------------------------------------------------------------------

def _pack_branch(bp, cin_max, C, F):
    cin = bp["conv0_w"].shape[2]
    w0 = bp["conv0_w"].reshape(9, cin, C)
    w0 = jnp.pad(w0, ((0, 0), (0, cin_max - cin), (0, 0)))
    b0 = bp["conv0_b"].reshape(1, C)
    bnsc, bnsh, rw, rb = [], [], [], []
    for ru in bp["res_units"]:
        bnsc += [ru["bn1_scale"], ru["bn2_scale"]]
        bnsh += [ru["bn1_shift"], ru["bn2_shift"]]
        rw += [ru["conv1_w"].reshape(9, C, C), ru["conv2_w"].reshape(9, C, C)]
        rb += [ru["conv1_b"].reshape(1, C), ru["conv2_b"].reshape(1, C)]
    bnsc = jnp.stack(bnsc)          # (2*nb_res, 1, C)
    bnsh = jnp.stack(bnsh)
    rw = jnp.stack(rw)              # (2*nb_res, 9, C, C)
    rb = jnp.stack(rb)              # (2*nb_res, 1, C)
    wL = bp["convL_w"].reshape(9, C, F)
    bL = bp["convL_b"].reshape(1, F)
    return w0, b0, bnsc, bnsh, rw, rb, wL, bL


def stresnet_forward(params, xc, xp, xt, ext):
    N = xc.shape[0]
    F, H, W = params["w_c"].shape
    HW = H * W
    C = 64
    nb_res = len(params["c"]["res_units"])
    cin_max = max(xc.shape[1], xp.shape[1], xt.shape[1])

    # NCHW -> NHWC, zero-pad channels to cin_max and the spatial halo (once).
    def prep(x):
        x = jnp.transpose(x, (0, 2, 3, 1))
        return jnp.pad(x, ((0, 0), (1, 1), (1, 1), (0, cin_max - x.shape[3])))

    x_stk = jnp.stack([prep(xc), prep(xp), prep(xt)])  # (3,N,H+2,W+2,cin_max)

    packed = [_pack_branch(params[k], cin_max, C, F) for k in ("c", "p", "t")]
    w0, b0, bnsc, bnsh, rw, rb, wL, bL = [jnp.stack(p) for p in zip(*packed)]

    # Branch fusion weights, HW-major so they match the conv output layout.
    fw = jnp.stack([params["w_c"].reshape(F, HW).T,
                    params["w_p"].reshape(F, HW).T,
                    params["w_t"].reshape(F, HW).T])   # (3, HW, F)

    # External MLP: one tiny batched GEMM in XLA (cheaper than N per-sample
    # M=1 matmuls in-kernel), re-laid-out to HW-major for the kernel.
    ep = params["ext"]
    h = jnp.maximum(ext @ ep["w1"] + ep["b1"], 0.0)
    ext_flat = h @ ep["w2"] + ep["b2"]                               # (N, F*HW)
    ext_map = jnp.transpose(ext_flat.reshape(N, F, HW), (0, 2, 1))   # (N,HW,F)

    kernel = make_stresnet_kernel(H, W, cin_max, C, F, nb_res)

    out = pl.pallas_call(
        kernel,
        grid=(N, 3),
        in_specs=[
            pl.BlockSpec((1, 1, H + 2, W + 2, cin_max),
                         lambda n, b: (b, n, 0, 0, 0)),
            pl.BlockSpec((1, 9, cin_max, C), lambda n, b: (b, 0, 0, 0)),
            pl.BlockSpec((1, 1, C), lambda n, b: (b, 0, 0)),
            pl.BlockSpec((1, 2 * nb_res, 1, C), lambda n, b: (b, 0, 0, 0)),
            pl.BlockSpec((1, 2 * nb_res, 1, C), lambda n, b: (b, 0, 0, 0)),
            pl.BlockSpec((1, 2 * nb_res, 9, C, C),
                         lambda n, b: (b, 0, 0, 0, 0)),
            pl.BlockSpec((1, 2 * nb_res, 1, C), lambda n, b: (b, 0, 0, 0)),
            pl.BlockSpec((1, 9, C, F), lambda n, b: (b, 0, 0, 0)),
            pl.BlockSpec((1, 1, F), lambda n, b: (b, 0, 0)),
            pl.BlockSpec((1, HW, F), lambda n, b: (b, 0, 0)),
            pl.BlockSpec((1, HW, F), lambda n, b: (n, 0, 0)),
        ],
        out_specs=pl.BlockSpec((1, HW, F), lambda n, b: (n, 0, 0)),
        out_shape=jax.ShapeDtypeStruct((N, HW, F), jnp.float32),
        scratch_shapes=[pltpu.VMEM((H + 2, W + 2, C), jnp.float32)],
        compiler_params=pltpu.CompilerParams(
            dimension_semantics=("parallel", "arbitrary"),
            # Footprint is ~2 MiB here (scratch no longer scales with batch),
            # so one conservative limit is safe on v5e / v6e / v7x alike.
            vmem_limit_bytes=32 * 1024 * 1024),
    )(x_stk, w0, b0, bnsc, bnsh, rw, rb, wL, bL, fw, ext_map)

    # (N, HW, F) -> NCHW; the tiny HW<->channel permute stays in XLA.
    return jnp.transpose(out.reshape(N, H, W, F), (0, 3, 1, 2))


# ----------------------------------------------------------------------------
# Pure-JAX reference (for verification)
# ----------------------------------------------------------------------------

def conv3x3_ref(x, w, b):
    y = jax.lax.conv_general_dilated(
        x, w, window_strides=(1, 1), padding="SAME",
        dimension_numbers=("NHWC", "HWIO", "NHWC"))
    return y + b.reshape(1, 1, 1, -1)


def forward_branch_ref(x, bp):
    x = conv3x3_ref(x, bp["conv0_w"], bp["conv0_b"])
    for ru in bp["res_units"]:
        z = jnp.maximum(x * ru["bn1_scale"] + ru["bn1_shift"], 0.0)
        z = conv3x3_ref(z, ru["conv1_w"], ru["conv1_b"])
        z = jnp.maximum(z * ru["bn2_scale"] + ru["bn2_shift"], 0.0)
        z = conv3x3_ref(z, ru["conv2_w"], ru["conv2_b"])
        x = z + x
    return conv3x3_ref(x, bp["convL_w"], bp["convL_b"])


def stresnet_forward_ref(params, xc, xp, xt, ext):
    to_nhwc = lambda a: jnp.transpose(a, (0, 2, 3, 1))
    nb_flow, H, W = params["w_c"].shape
    N = xc.shape[0]
    c_out = forward_branch_ref(to_nhwc(xc), params["c"])
    p_out = forward_branch_ref(to_nhwc(xp), params["p"])
    t_out = forward_branch_ref(to_nhwc(xt), params["t"])
    ep = params["ext"]
    h = jnp.maximum(ext @ ep["w1"] + ep["b1"], 0.0)
    ext_flat = h @ ep["w2"] + ep["b2"]
    ext_out = ext_flat.reshape(N, nb_flow, H, W).transpose(0, 2, 3, 1)
    wc = params["w_c"].transpose(1, 2, 0)
    wp = params["w_p"].transpose(1, 2, 0)
    wt = params["w_t"].transpose(1, 2, 0)
    res = wc * c_out + wp * p_out + wt * t_out + ext_out
    return jnp.tanh(res).transpose(0, 3, 1, 2)


# ----------------------------------------------------------------------------
# Deterministic parameter initialization
# ----------------------------------------------------------------------------

class KeyGen:
    def __init__(self, seed):
        self.key = jax.random.PRNGKey(seed)

    def __call__(self):
        self.key, sub = jax.random.split(self.key)
        return sub


def init_conv(kg, cin, cout):
    bound = 1.0 / jnp.sqrt(cin * 9.0)
    w = jax.random.uniform(kg(), (3, 3, cin, cout), jnp.float32, -bound, bound)
    b = jax.random.uniform(kg(), (cout,), jnp.float32, -bound, bound)
    return w, b


def init_bn(kg, c, eps=1e-5):
    gamma = jax.random.uniform(kg(), (c,), jnp.float32, 0.5, 1.5)
    beta = 0.1 * jax.random.normal(kg(), (c,), jnp.float32)
    mean = 0.1 * jax.random.normal(kg(), (c,), jnp.float32)
    var = jax.random.uniform(kg(), (c,), jnp.float32, 0.5, 1.5)
    scale = gamma / jnp.sqrt(var + eps)
    shift = beta - mean * scale
    return scale.reshape(1, c), shift.reshape(1, c)


def init_branch(kg, cin, nb_res, nb_flow):
    bp = {}
    bp["conv0_w"], bp["conv0_b"] = init_conv(kg, cin, 64)
    bp["res_units"] = []
    for _ in range(nb_res):
        ru = {}
        ru["bn1_scale"], ru["bn1_shift"] = init_bn(kg, 64)
        ru["conv1_w"], ru["conv1_b"] = init_conv(kg, 64, 64)
        ru["bn2_scale"], ru["bn2_shift"] = init_bn(kg, 64)
        ru["conv2_w"], ru["conv2_b"] = init_conv(kg, 64, 64)
        bp["res_units"].append(ru)
    bp["convL_w"], bp["convL_b"] = init_conv(kg, 64, nb_flow)
    return bp


def init_params(seed, len_c, len_p, len_t, ext_dim, H, W, nb_flow, nb_res):
    kg = KeyGen(seed)
    params = {
        "c": init_branch(kg, len_c * nb_flow, nb_res, nb_flow),
        "p": init_branch(kg, len_p * nb_flow, nb_res, nb_flow),
        "t": init_branch(kg, len_t * nb_flow, nb_res, nb_flow),
    }
    b1 = 1.0 / jnp.sqrt(jnp.float32(ext_dim))
    b2 = 1.0 / jnp.sqrt(jnp.float32(10))
    params["ext"] = {
        "w1": jax.random.uniform(kg(), (ext_dim, 10), jnp.float32, -b1, b1),
        "b1": jax.random.uniform(kg(), (1, 10), jnp.float32, -b1, b1),
        "w2": jax.random.uniform(kg(), (10, nb_flow * H * W), jnp.float32,
                                 -b2, b2),
        "b2": jax.random.uniform(kg(), (1, nb_flow * H * W), jnp.float32,
                                 -b2, b2),
    }
    params["w_c"] = jax.random.uniform(kg(), (nb_flow, H, W), jnp.float32)
    params["w_p"] = jax.random.uniform(kg(), (nb_flow, H, W), jnp.float32)
    params["w_t"] = jax.random.uniform(kg(), (nb_flow, H, W), jnp.float32)
    return params


# ----------------------------------------------------------------------------
# Main
# ----------------------------------------------------------------------------

if __name__ == "__main__":
    # small shapes consistent with the module's forward
    N, H, W = 2, 16, 16
    nb_flow, len_c, len_p, len_t = 2, 3, 1, 1
    ext_dim, nb_res = 28, 2

    params = init_params(42, len_c, len_p, len_t, ext_dim, H, W, nb_flow,
                         nb_res)

    dkey = jax.random.PRNGKey(0)
    k1, k2, k3, k4 = jax.random.split(dkey, 4)
    xc = jax.random.normal(k1, (N, len_c * nb_flow, H, W), jnp.float32)
    xp = jax.random.normal(k2, (N, len_p * nb_flow, H, W), jnp.float32)
    xt = jax.random.normal(k3, (N, len_t * nb_flow, H, W), jnp.float32)
    ext = jax.random.normal(k4, (N, ext_dim), jnp.float32)

    out = jax.jit(stresnet_forward)(params, xc, xp, xt, ext)
    out = jax.block_until_ready(out)

    ref = stresnet_forward_ref(params, xc, xp, xt, ext)
    assert out.shape == (N, nb_flow, H, W), out.shape
    max_err = float(jnp.max(jnp.abs(out - ref)))
    assert max_err < 1e-3, f"max abs error too large: {max_err}"

    print("KERNEL_OK")
</pallas_src>

<mosaic_0001>
module attributes {stable_mosaic.version = 11 : i64} {
  func.func @kernel(%arg0: i32, %arg1: i32, %arg2: memref<1x1x18x18x6xf32, #tpu.memory_space<vmem>>, %arg3: memref<1x9x6x64xf32, #tpu.memory_space<vmem>>, %arg4: memref<1x1x64xf32, #tpu.memory_space<vmem>>, %arg5: memref<1x4x1x64xf32, #tpu.memory_space<vmem>>, %arg6: memref<1x4x1x64xf32, #tpu.memory_space<vmem>>, %arg7: memref<1x4x9x64x64xf32, #tpu.memory_space<vmem>>, %arg8: memref<1x4x1x64xf32, #tpu.memory_space<vmem>>, %arg9: memref<1x9x64x2xf32, #tpu.memory_space<vmem>>, %arg10: memref<1x1x2xf32, #tpu.memory_space<vmem>>, %arg11: memref<1x256x2xf32, #tpu.memory_space<vmem>>, %arg12: memref<1x256x2xf32, #tpu.memory_space<vmem>>, %arg13: memref<1x256x2xf32, #tpu.memory_space<vmem>>, %arg14: memref<18x18x64xf32, #tpu.memory_space<vmem>>) attributes {dimension_semantics = [#tpu.dimension_semantics<parallel>, #tpu.dimension_semantics<arbitrary>], iteration_bounds = array<i64: 2, 3>, scalar_prefetch = 0 : i64, scratch_operands = 1 : i64, tpu.core_type = #tpu.core_type<tc>, window_params = [{transform_indices = @transform_0, window_bounds = array<i64: 1, 1, 18, 18, 6>}, {transform_indices = @transform_1, window_bounds = array<i64: 1, 9, 6, 64>}, {transform_indices = @transform_2, window_bounds = array<i64: 1, 1, 64>}, {transform_indices = @transform_3, window_bounds = array<i64: 1, 4, 1, 64>}, {transform_indices = @transform_4, window_bounds = array<i64: 1, 4, 1, 64>}, {transform_indices = @transform_5, window_bounds = array<i64: 1, 4, 9, 64, 64>}, {transform_indices = @transform_6, window_bounds = array<i64: 1, 4, 1, 64>}, {transform_indices = @transform_7, window_bounds = array<i64: 1, 9, 64, 2>}, {transform_indices = @transform_8, window_bounds = array<i64: 1, 1, 2>}, {transform_indices = @transform_9, window_bounds = array<i64: 1, 256, 2>}, {transform_indices = @transform_10, window_bounds = array<i64: 1, 256, 2>}, {transform_indices = @transform_11, window_bounds = array<i64: 1, 256, 2>}]} {
    %c0_i32 = arith.constant 0 : i32
    %0 = arith.cmpi eq, %arg1, %c0_i32 : i32
    %1 = arith.extui %0 : i1 to i32
    %c0_i32_0 = arith.constant 0 : i32
    %2 = arith.cmpi ne, %1, %c0_i32_0 : i32
    scf.if %2 {
      %cst_175 = arith.constant 0.000000e+00 : f32
      %146 = vector.broadcast %cst_175 : f32 to vector<18x18x64xf32>
      %c0_176 = arith.constant 0 : index
      %c0_177 = arith.constant 0 : index
      %c0_178 = arith.constant 0 : index
      %147 = vector.load %arg14[%c0_176, %c0_177, %c0_178] : memref<18x18x64xf32, #tpu.memory_space<vmem>>, vector<18x18x64xf32>
      tpu.vector_store %arg14[%c0_176, %c0_177, %c0_178], %146 {strides = array<i32>} : memref<18x18x64xf32, #tpu.memory_space<vmem>>, vector<18x18x64xf32>,
    } else {
    }
    %cst = arith.constant 0.000000e+00 : f32
    %3 = vector.broadcast %cst : f32 to vector<256x64xf32>
    %c0 = arith.constant 0 : index
    %c0_1 = arith.constant 0 : index
    %c0_2 = arith.constant 0 : index
    %c0_3 = arith.constant 0 : index
    %c0_4 = arith.constant 0 : index
    %4 = vector.load %arg2[%c0, %c0_1, %c0_2, %c0_3, %c0_4] : memref<1x1x18x18x6xf32, #tpu.memory_space<vmem>>, vector<1x1x16x16x6xf32>
    %5 = vector.shape_cast %4 : vector<1x1x16x16x6xf32> to vector<16x16x6xf32>
    %6 = vector.shape_cast %5 : vector<16x16x6xf32> to vector<256x6xf32>
    %c0_5 = arith.constant 0 : index
    %c0_6 = arith.constant 0 : index
    %c0_7 = arith.constant 0 : index
    %c0_8 = arith.constant 0 : index
    %7 = vector.load %arg3[%c0_5, %c0_6, %c0_7, %c0_8] : memref<1x9x6x64xf32, #tpu.memory_space<vmem>>, vector<1x1x6x64xf32>
    %8 = vector.shape_cast %7 : vector<1x1x6x64xf32> to vector<6x64xf32>
    %cst_9 = arith.constant dense<0.000000e+00> : vector<256x64xf32>
    %9 = tpu.matmul %6, %8, %cst_9 {dimension_numbers = #tpu.dot_dimension_numbers<[1], [0], [0], [1], [0, 0, 1, 1], [], []>} : vector<256x6xf32>, vector<6x64xf32>, vector<256x64xf32> -> vector<256x64xf32>
    %10 = arith.addf %3, %9 : vector<256x64xf32>
    %c0_10 = arith.constant 0 : index
    %c0_11 = arith.constant 0 : index
    %c0_12 = arith.constant 0 : index
    %c1 = arith.constant 1 : index
    %c0_13 = arith.constant 0 : index
    %11 = vector.load %arg2[%c0_10, %c0_11, %c0_12, %c1, %c0_13] : memref<1x1x18x18x6xf32, #tpu.memory_space<vmem>>, vector<1x1x16x16x6xf32>
    %12 = vector.shape_cast %11 : vector<1x1x16x16x6xf32> to vector<16x16x6xf32>
    %13 = vector.shape_cast %12 : vector<16x16x6xf32> to vector<256x6xf32>
    %c0_14 = arith.constant 0 : index
    %c1_15 = arith.constant 1 : index
    %c0_16 = arith.constant 0 : index
    %c0_17 = arith.constant 0 : index
    %14 = vector.load %arg3[%c0_14, %c1_15, %c0_16, %c0_17] : memref<1x9x6x64xf32, #tpu.memory_space<vmem>>, vector<1x1x6x64xf32>
    %15 = vector.shape_cast %14 : vector<1x1x6x64xf32> to vector<6x64xf32>
    %cst_18 = arith.constant dense<0.000000e+00> : vector<256x64xf32>
    %16 = tpu.matmul %13, %15, %cst_18 {dimension_numbers = #tpu.dot_dimension_numbers<[1], [0], [0], [1], [0, 0, 1, 1], [], []>} : vector<256x6xf32>, vector<6x64xf32>, vector<256x64xf32> -> vector<256x64xf32>
    %17 = arith.addf %10, %16 : vector<256x64xf32>
    %c0_19 = arith.constant 0 : index
    %c0_20 = arith.constant 0 : index
    %c0_21 = arith.constant 0 : index
    %c2 = arith.constant 2 : index
    %c0_22 = arith.constant 0 : index
    %18 = vector.load %arg2[%c0_19, %c0_20, %c0_21, %c2, %c0_22] : memref<1x1x18x18x6xf32, #tpu.memory_space<vmem>>, vector<1x1x16x16x6xf32>
    %19 = vector.shape_cast %18 : vector<1x1x16x16x6xf32> to vector<16x16x6xf32>
    %20 = vector.shape_cast %19 : vector<16x16x6xf32> to vector<256x6xf32>
    %c0_23 = arith.constant 0 : index
    %c2_24 = arith.constant 2 : index
    %c0_25 = arith.constant 0 : index
    %c0_26 = arith.constant 0 : index
    %21 = vector.load %arg3[%c0_23, %c2_24, %c0_25, %c0_26] : memref<1x9x6x64xf32, #tpu.memory_space<vmem>>, vector<1x1x6x64xf32>
    %22 = vector.shape_cast %21 : vector<1x1x6x64xf32> to vector<6x64xf32>
    %cst_27 = arith.constant dense<0.000000e+00> : vector<256x64xf32>
    %23 = tpu.matmul %20, %22, %cst_27 {dimension_numbers = #tpu.dot_dimension_numbers<[1], [0], [0], [1], [0, 0, 1, 1], [], []>} : vector<256x6xf32>, vector<6x64xf32>, vector<256x64xf32> -> vector<256x64xf32>
    %24 = arith.addf %17, %23 : vector<256x64xf32>
    %c0_28 = arith.constant 0 : index
    %c0_29 = arith.constant 0 : index
    %c1_30 = arith.constant 1 : index
    %c0_31 = arith.constant 0 : index
    %c0_32 = arith.constant 0 : index
    %25 = vector.load %arg2[%c0_28, %c0_29, %c1_30, %c0_31, %c0_32] : memref<1x1x18x18x6xf32, #tpu.memory_space<vmem>>, vector<1x1x16x16x6xf32>
    %26 = vector.shape_cast %25 : vector<1x1x16x16x6xf32> to vector<16x16x6xf32>
    %27 = vector.shape_cast %26 : vector<16x16x6xf32> to vector<256x6xf32>
    %c0_33 = arith.constant 0 : index
    %c3 = arith.constant 3 : index
    %c0_34 = arith.constant 0 : index
    %c0_35 = arith.constant 0 : index
    %28 = vector.load %arg3[%c0_33, %c3, %c0_34, %c0_35] : memref<1x9x6x64xf32, #tpu.memory_space<vmem>>, vector<1x1x6x64xf32>
    %29 = vector.shape_cast %28 : vector<1x1x6x64xf32> to vector<6x64xf32>
    %cst_36 = arith.constant dense<0.000000e+00> : vector<256x64xf32>
    %30 = tpu.matmul %27, %29, %cst_36 {dimension_numbers = #tpu.dot_dimension_numbers<[1], [0], [0], [1], [0, 0, 1, 1], [], []>} : vector<256x6xf32>, vector<6x64xf32>, vector<256x64xf32> -> vector<256x64xf32>
    %31 = arith.addf %24, %30 : vector<256x64xf32>
    %c0_37 = arith.constant 0 : index
    %c0_38 = arith.constant 0 : index
    %c1_39 = arith.constant 1 : index
    %c1_40 = arith.constant 1 : index
    %c0_41 = arith.constant 0 : index
    %32 = vector.load %arg2[%c0_37, %c0_38, %c1_39, %c1_40, %c0_41] : memref<1x1x18x18x6xf32, #tpu.memory_space<vmem>>, vector<1x1x16x16x6xf32>
    %33 = vector.shape_cast %32 : vector<1x1x16x16x6xf32> to vector<16x16x6xf32>
    %34 = vector.shape_cast %33 : vector<16x16x6xf32> to vector<256x6xf32>
    %c0_42 = arith.constant 0 : index
    %c4 = arith.constant 4 : index
    %c0_43 = arith.constant 0 : index
    %c0_44 = arith.constant 0 : index
    %35 = vector.load %arg3[%c0_42, %c4, %c0_43, %c0_44] : memref<1x9x6x64xf32, #tpu.memory_space<vmem>>, vector<1x1x6x64xf32>
    %36 = vector.shape_cast %35 : vector<1x1x6x64xf32> to vector<6x64xf32>
    %cst_45 = arith.constant dense<0.000000e+00> : vector<256x64xf32>
    %37 = tpu.matmul %34, %36, %cst_45 {dimension_numbers = #tpu.dot_dimension_numbers<[1], [0], [0], [1], [0, 0, 1, 1], [], []>} : vector<256x6xf32>, vector<6x64xf32>, vector<256x64xf32> -> vector<256x64xf32>
    %38 = arith.addf %31, %37 : vector<256x64xf32>
    %c0_46 = arith.constant 0 : index
    %c0_47 = arith.constant 0 : index
    %c1_48 = arith.constant 1 : index
    %c2_49 = arith.constant 2 : index
    %c0_50 = arith.constant 0 : index
    %39 = vector.load %arg2[%c0_46, %c0_47, %c1_48, %c2_49, %c0_50] : memref<1x1x18x18x6xf32, #tpu.memory_space<vmem>>, vector<1x1x16x16x6xf32>
    %40 = vector.shape_cast %39 : vector<1x1x16x16x6xf32> to vector<16x16x6xf32>
    %41 = vector.shape_cast %40 : vector<16x16x6xf32> to vector<256x6xf32>
    %c0_51 = arith.constant 0 : index
    %c5 = arith.constant 5 : index
    %c0_52 = arith.constant 0 : index
    %c0_53 = arith.constant 0 : index
    %42 = vector.load %arg3[%c0_51, %c5, %c0_52, %c0_53] : memref<1x9x6x64xf32, #tpu.memory_space<vmem>>, vector<1x1x6x64xf32>
    %43 = vector.shape_cast %42 : vector<1x1x6x64xf32> to vector<6x64xf32>
    %cst_54 = arith.constant dense<0.000000e+00> : vector<256x64xf32>
    %44 = tpu.matmul %41, %43, %cst_54 {dimension_numbers = #tpu.dot_dimension_numbers<[1], [0], [0], [1], [0, 0, 1, 1], [], []>} : vector<256x6xf32>, vector<6x64xf32>, vector<256x64xf32> -> vector<256x64xf32>
    %45 = arith.addf %38, %44 : vector<256x64xf32>
    %c0_55 = arith.constant 0 : index
    %c0_56 = arith.constant 0 : index
    %c2_57 = arith.constant 2 : index
    %c0_58 = arith.constant 0 : index
    %c0_59 = arith.constant 0 : index
    %46 = vector.load %arg2[%c0_55, %c0_56, %c2_57, %c0_58, %c0_59] : memref<1x1x18x18x6xf32, #tpu.memory_space<vmem>>, vector<1x1x16x16x6xf32>
    %47 = vector.shape_cast %46 : vector<1x1x16x16x6xf32> to vector<16x16x6xf32>
    %48 = vector.shape_cast %47 : vector<16x16x6xf32> to vector<256x6xf32>
    %c0_60 = arith.constant 0 : index
    %c6 = arith.constant 6 : index
    %c0_61 = arith.constant 0 : index
    %c0_62 = arith.constant 0 : index
    %49 = vector.load %arg3[%c0_60, %c6, %c0_61, %c0_62] : memref<1x9x6x64xf32, #tpu.memory_space<vmem>>, vector<1x1x6x64xf32>
    %50 = vector.shape_cast %49 : vector<1x1x6x64xf32> to vector<6x64xf32>
    %cst_63 = arith.constant dense<0.000000e+00> : vector<256x64xf32>
    %51 = tpu.matmul %48, %50, %cst_63 {dimension_numbers = #tpu.dot_dimension_numbers<[1], [0], [0], [1], [0, 0, 1, 1], [], []>} : vector<256x6xf32>, vector<6x64xf32>, vector<256x64xf32> -> vector<256x64xf32>
    %52 = arith.addf %45, %51 : vector<256x64xf32>
    %c0_64 = arith.constant 0 : index
    %c0_65 = arith.constant 0 : index
    %c2_66 = arith.constant 2 : index
    %c1_67 = arith.constant 1 : index
    %c0_68 = arith.constant 0 : index
    %53 = vector.load %arg2[%c0_64, %c0_65, %c2_66, %c1_67, %c0_68] : memref<1x1x18x18x6xf32, #tpu.memory_space<vmem>>, vector<1x1x16x16x6xf32>
    %54 = vector.shape_cast %53 : vector<1x1x16x16x6xf32> to vector<16x16x6xf32>
    %55 = vector.shape_cast %54 : vector<16x16x6xf32> to vector<256x6xf32>
    %c0_69 = arith.constant 0 : index
    %c7 = arith.constant 7 : index
    %c0_70 = arith.constant 0 : index
    %c0_71 = arith.constant 0 : index
    %56 = vector.load %arg3[%c0_69, %c7, %c0_70, %c0_71] : memref<1x9x6x64xf32, #tpu.memory_space<vmem>>, vector<1x1x6x64xf32>
    %57 = vector.shape_cast %56 : vector<1x1x6x64xf32> to vector<6x64xf32>
    %cst_72 = arith.constant dense<0.000000e+00> : vector<256x64xf32>
    %58 = tpu.matmul %55, %57, %cst_72 {dimension_numbers = #tpu.dot_dimension_numbers<[1], [0], [0], [1], [0, 0, 1, 1], [], []>} : vector<256x6xf32>, vector<6x64xf32>, vector<256x64xf32> -> vector<256x64xf32>
    %59 = arith.addf %52, %58 : vector<256x64xf32>
    %c0_73 = arith.constant 0 : index
    %c0_74 = arith.constant 0 : index
    %c2_75 = arith.constant 2 : index
    %c2_76 = arith.constant 2 : index
    %c0_77 = arith.constant 0 : index
    %60 = vector.load %arg2[%c0_73, %c0_74, %c2_75, %c2_76, %c0_77] : memref<1x1x18x18x6xf32, #tpu.memory_space<vmem>>, vector<1x1x16x16x6xf32>
    %61 = vector.shape_cast %60 : vector<1x1x16x16x6xf32> to vector<16x16x6xf32>
    %62 = vector.shape_cast %61 : vector<16x16x6xf32> to vector<256x6xf32>
    %c0_78 = arith.constant 0 : index
    %c8 = arith.constant 8 : index
    %c0_79 = arith.constant 0 : index
    %c0_80 = arith.constant 0 : index
    %63 = vector.load %arg3[%c0_78, %c8, %c0_79, %c0_80] : memref<1x9x6x64xf32, #tpu.memory_space<vmem>>, vector<1x1x6x64xf32>
    %64 = vector.shape_cast %63 : vector<1x1x6x64xf32> to vector<6x64xf32>
    %cst_81 = arith.constant dense<0.000000e+00> : vector<256x64xf32>
    %65 = tpu.matmul %62, %64, %cst_81 {dimension_numbers = #tpu.dot_dimension_numbers<[1], [0], [0], [1], [0, 0, 1, 1], [], []>} : vector<256x6xf32>, vector<6x64xf32>, vector<256x64xf32> -> vector<256x64xf32>
    %66 = arith.addf %59, %65 : vector<256x64xf32>
    %c0_82 = arith.constant 0 : index
    %c0_83 = arith.constant 0 : index
    %c0_84 = arith.constant 0 : index
    %67 = vector.load %arg4[%c0_82, %c0_83, %c0_84] : memref<1x1x64xf32, #tpu.memory_space<vmem>>, vector<1x1x64xf32>
    %68 = vector.shape_cast %67 : vector<1x1x64xf32> to vector<1x64xf32>
    %69 = vector.broadcast %68 : vector<1x64xf32> to vector<256x64xf32>
    %70 = arith.addf %66, %69 : vector<256x64xf32>
    %c0_i32_85 = arith.constant 0 : i32
    %c2_i32 = arith.constant 2 : i32
    %71 = arith.addi %c0_i32_85, %c2_i32 : i32
    %c1_i32 = arith.constant 1 : i32
    %72 = scf.for %arg15 = %c0_i32_85 to %71 step %c1_i32 iter_args(%arg16 = %70) -> (vector<256x64xf32>)  : i32 {
      %c2_i32_175 = arith.constant 2 : i32
      %146 = arith.muli %c2_i32_175, %arg15 : i32
      %c2_i32_176 = arith.constant 2 : i32
      %147 = arith.muli %c2_i32_176, %arg15 : i32
      %c1_i32_177 = arith.constant 1 : i32
      %148 = arith.addi %147, %c1_i32_177 : i32
      %c0_178 = arith.constant 0 : index
      %149 = arith.index_cast %146 : i32 to index
      %c0_179 = arith.constant 0 : index
      %c0_180 = arith.constant 0 : index
      %150 = vector.load %arg5[%c0_178, %149, %c0_179, %c0_180] : memref<1x4x1x64xf32, #tpu.memory_space<vmem>>, vector<1x1x1x64xf32>
      %151 = vector.shape_cast %150 : vector<1x1x1x64xf32> to vector<1x64xf32>
      %152 = vector.broadcast %151 : vector<1x64xf32> to vector<256x64xf32>
      %153 = arith.mulf %arg16, %152 : vector<256x64xf32>
      %c0_181 = arith.constant 0 : index
      %154 = arith.index_cast %146 : i32 to index
      %c0_182 = arith.constant 0 : index
      %c0_183 = arith.constant 0 : index
      %155 = vector.load %arg6[%c0_181, %154, %c0_182, %c0_183] : memref<1x4x1x64xf32, #tpu.memory_space<vmem>>, vector<1x1x1x64xf32>
      %156 = vector.shape_cast %155 : vector<1x1x1x64xf32> to vector<1x64xf32>
      %157 = vector.broadcast %156 : vector<1x64xf32> to vector<256x64xf32>
      %158 = arith.addf %153, %157 : vector<256x64xf32>
      %cst_184 = arith.constant 0.000000e+00 : f32
      %159 = vector.broadcast %cst_184 : f32 to vector<256x64xf32>
      %160 = arith.maximumf %158, %159 : vector<256x64xf32>
      %161 = vector.shape_cast %160 : vector<256x64xf32> to vector<16x16x64xf32>
      %c1_185 = arith.constant 1 : index
      %c1_186 = arith.constant 1 : index
      %c0_187 = arith.constant 0 : index
      %162 = vector.load %arg14[%c1_185, %c1_186, %c0_187] : memref<18x18x64xf32, #tpu.memory_space<vmem>>, vector<16x16x64xf32>
      tpu.vector_store %arg14[%c1_185, %c1_186, %c0_187], %161 {strides = array<i32>} : memref<18x18x64xf32, #tpu.memory_space<vmem>>, vector<16x16x64xf32>,
      %c0_188 = arith.constant 0 : index
      %163 = arith.index_cast %146 : i32 to index
      %c0_189 = arith.constant 0 : index
      %c0_190 = arith.constant 0 : index
      %164 = vector.load %arg8[%c0_188, %163, %c0_189, %c0_190] : memref<1x4x1x64xf32, #tpu.memory_space<vmem>>, vector<1x1x1x64xf32>
      %165 = vector.shape_cast %164 : vector<1x1x1x64xf32> to vector<1x64xf32>
      %cst_191 = arith.constant 0.000000e+00 : f32
      %166 = vector.broadcast %cst_191 : f32 to vector<256x64xf32>
      %c0_192 = arith.constant 0 : index
      %c0_193 = arith.constant 0 : index
      %c0_194 = arith.constant 0 : index
      %167 = vector.load %arg14[%c0_192, %c0_193, %c0_194] : memref<18x18x64xf32, #tpu.memory_space<vmem>>, vector<16x16x64xf32>
      %168 = vector.shape_cast %167 : vector<16x16x64xf32> to vector<256x64xf32>
      %c0_195 = arith.constant 0 : index
      %169 = arith.index_cast %146 : i32 to index
      %c0_196 = arith.constant 0 : index
      %c0_197 = arith.constant 0 : index
      %c0_198 = arith.constant 0 : index
      %170 = vector.load %arg7[%c0_195, %169, %c0_196, %c0_197, %c0_198] : memref<1x4x9x64x64xf32, #tpu.memory_space<vmem>>, vector<1x1x1x64x64xf32>
      %171 = vector.shape_cast %170 : vector<1x1x1x64x64xf32> to vector<64x64xf32>
      %cst_199 = arith.constant dense<0.000000e+00> : vector<256x64xf32>
      %172 = tpu.matmul %168, %171, %cst_199 {dimension_numbers = #tpu.dot_dimension_numbers<[1], [0], [0], [1], [0, 0, 1, 1], [], []>} : vector<256x64xf32>, vector<64x64xf32>, vector<256x64xf32> -> vector<256x64xf32>
      %173 = arith.addf %166, %172 : vector<256x64xf32>
      %c0_200 = arith.constant 0 : index
      %c1_201 = arith.constant 1 : index
      %c0_202 = arith.constant 0 : index
      %174 = vector.load %arg14[%c0_200, %c1_201, %c0_202] : memref<18x18x64xf32, #tpu.memory_space<vmem>>, vector<16x16x64xf32>
      %175 = vector.shape_cast %174 : vector<16x16x64xf32> to vector<256x64xf32>
      %c0_203 = arith.constant 0 : index
      %176 = arith.index_cast %146 : i32 to index
      %c1_204 = arith.constant 1 : index
      %c0_205 = arith.constant 0 : index
      %c0_206 = arith.constant 0 : index
      %177 = vector.load %arg7[%c0_203, %176, %c1_204, %c0_205, %c0_206] : memref<1x4x9x64x64xf32, #tpu.memory_space<vmem>>, vector<1x1x1x64x64xf32>
      %178 = vector.shape_cast %177 : vector<1x1x1x64x64xf32> to vector<64x64xf32>
      %cst_207 = arith.constant dense<0.000000e+00> : vector<256x64xf32>
      %179 = tpu.matmul %175, %178, %cst_207 {dimension_numbers = #tpu.dot_dimension_numbers<[1], [0], [0], [1], [0, 0, 1, 1], [], []>} : vector<256x64xf32>, vector<64x64xf32>, vector<256x64xf32> -> vector<256x64xf32>
      %180 = arith.addf %173, %179 : vector<256x64xf32>
      %c0_208 = arith.constant 0 : index
      %c2_209 = arith.constant 2 : index
      %c0_210 = arith.constant 0 : index
      %181 = vector.load %arg14[%c0_208, %c2_209, %c0_210] : memref<18x18x64xf32, #tpu.memory_space<vmem>>, vector<16x16x64xf32>
      %182 = vector.shape_cast %181 : vector<16x16x64xf32> to vector<256x64xf32>
      %c0_211 = arith.constant 0 : index
      %183 = arith.index_cast %146 : i32 to index
      %c2_212 = arith.constant 2 : index
      %c0_213 = arith.constant 0 : index
      %c0_214 = arith.constant 0 : index
      %184 = vector.load %arg7[%c0_211, %183, %c2_212, %c0_213, %c0_214] : memref<1x4x9x64x64xf32, #tpu.memory_space<vmem>>, vector<1x1x1x64x64xf32>
      %185 = vector.shape_cast %184 : vector<1x1x1x64x64xf32> to vector<64x64xf32>
      %cst_215 = arith.constant dense<0.000000e+00> : vector<256x64xf32>
      %186 = tpu.matmul %182, %185, %cst_215 {dimension_numbers = #tpu.dot_dimension_numbers<[1], [0], [0], [1], [0, 0, 1, 1], [], []>} : vector<256x64xf32>, vector<64x64xf32>, vector<256x64xf32> -> vector<256x64xf32>
      %187 = arith.addf %180, %186 : vector<256x64xf32>
      %c1_216 = arith.constant 1 : index
      %c0_217 = arith.constant 0 : index
      %c0_218 = arith.constant 0 : index
      %188 = vector.load %arg14[%c1_216, %c0_217, %c0_218] : memref<18x18x64xf32, #tpu.memory_space<vmem>>, vector<16x16x64xf32>
      %189 = vector.shape_cast %188 : vector<16x16x64xf32> to vector<256x64xf32>
      %c0_219 = arith.constant 0 : index
      %190 = arith.index_cast %146 : i32 to index
      %c3_220 = arith.constant 3 : index
      %c0_221 = arith.constant 0 : index
      %c0_222 = arith.constant 0 : index
      %191 = vector.load %arg7[%c0_219, %190, %c3_220, %c0_221, %c0_222] : memref<1x4x9x64x64xf32, #tpu.memory_space<vmem>>, vector<1x1x1x64x64xf32>
      %192 = vector.shape_cast %191 : vector<1x1x1x64x64xf32> to vector<64x64xf32>
      %cst_223 = arith.constant dense<0.000000e+00> : vector<256x64xf32>
      %193 = tpu.matmul %189, %192, %cst_223 {dimension_numbers = #tpu.dot_dimension_numbers<[1], [0], [0], [1], [0, 0, 1, 1], [], []>} : vector<256x64xf32>, vector<64x64xf32>, vector<256x64xf32> -> vector<256x64xf32>
      %194 = arith.addf %187, %193 : vector<256x64xf32>
      %c1_224 = arith.constant 1 : index
      %c1_225 = arith.constant 1 : index
      %c0_226 = arith.constant 0 : index
      %195 = vector.load %arg14[%c1_224, %c1_225, %c0_226] : memref<18x18x64xf32, #tpu.memory_space<vmem>>, vector<16x16x64xf32>
      %196 = vector.shape_cast %195 : vector<16x16x64xf32> to vector<256x64xf32>
      %c0_227 = arith.constant 0 : index
      %197 = arith.index_cast %146 : i32 to index
      %c4_228 = arith.constant 4 : index
      %c0_229 = arith.constant 0 : index
      %c0_230 = arith.constant 0 : index
      %198 = vector.load %arg7[%c0_227, %197, %c4_228, %c0_229, %c0_230] : memref<1x4x9x64x64xf32, #tpu.memory_space<vmem>>, vector<1x1x1x64x64xf32>
      %199 = vector.shape_cast %198 : vector<1x1x1x64x64xf32> to vector<64x64xf32>
      %cst_231 = arith.constant dense<0.000000e+00> : vector<256x64xf32>
      %200 = tpu.matmul %196, %199, %cst_231 {dimension_numbers = #tpu.dot_dimension_numbers<[1], [0], [0], [1], [0, 0, 1, 1], [], []>} : vector<256x64xf32>, vector<64x64xf32>, vector<256x64xf32> -> vector<256x64xf32>
      %201 = arith.addf %194, %200 : vector<256x64xf32>
      %c1_232 = arith.constant 1 : index
      %c2_233 = arith.constant 2 : index
      %c0_234 = arith.constant 0 : index
      %202 = vector.load %arg14[%c1_232, %c2_233, %c0_234] : memref<18x18x64xf32, #tpu.memory_space<vmem>>, vector<16x16x64xf32>
      %203 = vector.shape_cast %202 : vector<16x16x64xf32> to vector<256x64xf32>
      %c0_235 = arith.constant 0 : index
      %204 = arith.index_cast %146 : i32 to index
      %c5_236 = arith.constant 5 : index
      %c0_237 = arith.constant 0 : index
      %c0_238 = arith.constant 0 : index
      %205 = vector.load %arg7[%c0_235, %204, %c5_236, %c0_237, %c0_238] : memref<1x4x9x64x64xf32, #tpu.memory_space<vmem>>, vector<1x1x1x64x64xf32>
      %206 = vector.shape_cast %205 : vector<1x1x1x64x64xf32> to vector<64x64xf32>
      %cst_239 = arith.constant dense<0.000000e+00> : vector<256x64xf32>
      %207 = tpu.matmul %203, %206, %cst_239 {dimension_numbers = #tpu.dot_dimension_numbers<[1], [0], [0], [1], [0, 0, 1, 1], [], []>} : vector<256x64xf32>, vector<64x64xf32>, vector<256x64xf32> -> vector<256x64xf32>
      %208 = arith.addf %201, %207 : vector<256x64xf32>
      %c2_240 = arith.constant 2 : index
      %c0_241 = arith.constant 0 : index
      %c0_242 = arith.constant 0 : index
      %209 = vector.load %arg14[%c2_240, %c0_241, %c0_242] : memref<18x18x64xf32, #tpu.memory_space<vmem>>, vector<16x16x64xf32>
      %210 = vector.shape_cast %209 : vector<16x16x64xf32> to vector<256x64xf32>
      %c0_243 = arith.constant 0 : index
      %211 = arith.index_cast %146 : i32 to index
      %c6_244 = arith.constant 6 : index
      %c0_245 = arith.constant 0 : index
      %c0_246 = arith.constant 0 : index
      %212 = vector.load %arg7[%c0_243, %211, %c6_244, %c0_245, %c0_246] : memref<1x4x9x64x64xf32, #tpu.memory_space<vmem>>, vector<1x1x1x64x64xf32>
      %213 = vector.shape_cast %212 : vector<1x1x1x64x64xf32> to vector<64x64xf32>
      %cst_247 = arith.constant dense<0.000000e+00> : vector<256x64xf32>
      %214 = tpu.matmul %210, %213, %cst_247 {dimension_numbers = #tpu.dot_dimension_numbers<[1], [0], [0], [1], [0, 0, 1, 1], [], []>} : vector<256x64xf32>, vector<64x64xf32>, vector<256x64xf32> -> vector<256x64xf32>
      %215 = arith.addf %208, %214 : vector<256x64xf32>
      %c2_248 = arith.constant 2 : index
      %c1_249 = arith.constant 1 : index
      %c0_250 = arith.constant 0 : index
      %216 = vector.load %arg14[%c2_248, %c1_249, %c0_250] : memref<18x18x64xf32, #tpu.memory_space<vmem>>, vector<16x16x64xf32>
      %217 = vector.shape_cast %216 : vector<16x16x64xf32> to vector<256x64xf32>
      %c0_251 = arith.constant 0 : index
      %218 = arith.index_cast %146 : i32 to index
      %c7_252 = arith.constant 7 : index
      %c0_253 = arith.constant 0 : index
      %c0_254 = arith.constant 0 : index
      %219 = vector.load %arg7[%c0_251, %218, %c7_252, %c0_253, %c0_254] : memref<1x4x9x64x64xf32, #tpu.memory_space<vmem>>, vector<1x1x1x64x64xf32>
      %220 = vector.shape_cast %219 : vector<1x1x1x64x64xf32> to vector<64x64xf32>
      %cst_255 = arith.constant dense<0.000000e+00> : vector<256x64xf32>
      %221 = tpu.matmul %217, %220, %cst_255 {dimension_numbers = #tpu.dot_dimension_numbers<[1], [0], [0], [1], [0, 0, 1, 1], [], []>} : vector<256x64xf32>, vector<64x64xf32>, vector<256x64xf32> -> vector<256x64xf32>
      %222 = arith.addf %215, %221 : vector<256x64xf32>
      %c2_256 = arith.constant 2 : index
      %c2_257 = arith.constant 2 : index
      %c0_258 = arith.constant 0 : index
      %223 = vector.load %arg14[%c2_256, %c2_257, %c0_258] : memref<18x18x64xf32, #tpu.memory_space<vmem>>, vector<16x16x64xf32>
      %224 = vector.shape_cast %223 : vector<16x16x64xf32> to vector<256x64xf32>
      %c0_259 = arith.constant 0 : index
      %225 = arith.index_cast %146 : i32 to index
      %c8_260 = arith.constant 8 : index
      %c0_261 = arith.constant 0 : index
      %c0_262 = arith.constant 0 : index
      %226 = vector.load %arg7[%c0_259, %225, %c8_260, %c0_261, %c0_262] : memref<1x4x9x64x64xf32, #tpu.memory_space<vmem>>, vector<1x1x1x64x64xf32>
      %227 = vector.shape_cast %226 : vector<1x1x1x64x64xf32> to vector<64x64xf32>
      %cst_263 = arith.constant dense<0.000000e+00> : vector<256x64xf32>
      %228 = tpu.matmul %224, %227, %cst_263 {dimension_numbers = #tpu.dot_dimension_numbers<[1], [0], [0], [1], [0, 0, 1, 1], [], []>} : vector<256x64xf32>, vector<64x64xf32>, vector<256x64xf32> -> vector<256x64xf32>
      %229 = arith.addf %222, %228 : vector<256x64xf32>
      %230 = vector.broadcast %165 : vector<1x64xf32> to vector<256x64xf32>
      %231 = arith.addf %229, %230 : vector<256x64xf32>
      %c0_264 = arith.constant 0 : index
      %232 = arith.index_cast %148 : i32 to index
      %c0_265 = arith.constant 0 : index
      %c0_266 = arith.constant 0 : index
      %233 = vector.load %arg5[%c0_264, %232, %c0_265, %c0_266] : memref<1x4x1x64xf32, #tpu.memory_space<vmem>>, vector<1x1x1x64xf32>
      %234 = vector.shape_cast %233 : vector<1x1x1x64xf32> to vector<1x64xf32>
      %235 = vector.broadcast %234 : vector<1x64xf32> to vector<256x64xf32>
      %236 = arith.mulf %231, %235 : vector<256x64xf32>
      %c0_267 = arith.constant 0 : index
      %237 = arith.index_cast %148 : i32 to index
      %c0_268 = arith.constant 0 : index
      %c0_269 = arith.constant 0 : index
      %238 = vector.load %arg6[%c0_267, %237, %c0_268, %c0_269] : memref<1x4x1x64xf32, #tpu.memory_space<vmem>>, vector<1x1x1x64xf32>
      %239 = vector.shape_cast %238 : vector<1x1x1x64xf32> to vector<1x64xf32>
      %240 = vector.broadcast %239 : vector<1x64xf32> to vector<256x64xf32>
      %241 = arith.addf %236, %240 : vector<256x64xf32>
      %cst_270 = arith.constant 0.000000e+00 : f32
      %242 = vector.broadcast %cst_270 : f32 to vector<256x64xf32>
      %243 = arith.maximumf %241, %242 : vector<256x64xf32>
      %244 = vector.shape_cast %243 : vector<256x64xf32> to vector<16x16x64xf32>
      %c1_271 = arith.constant 1 : index
      %c1_272 = arith.constant 1 : index
      %c0_273 = arith.constant 0 : index
      %245 = vector.load %arg14[%c1_271, %c1_272, %c0_273] : memref<18x18x64xf32, #tpu.memory_space<vmem>>, vector<16x16x64xf32>
      tpu.vector_store %arg14[%c1_271, %c1_272, %c0_273], %244 {strides = array<i32>} : memref<18x18x64xf32, #tpu.memory_space<vmem>>, vector<16x16x64xf32>,
      %c0_274 = arith.constant 0 : index
      %246 = arith.index_cast %148 : i32 to index
      %c0_275 = arith.constant 0 : index
      %c0_276 = arith.constant 0 : index
      %247 = vector.load %arg8[%c0_274, %246, %c0_275, %c0_276] : memref<1x4x1x64xf32, #tpu.memory_space<vmem>>, vector<1x1x1x64xf32>
      %248 = vector.shape_cast %247 : vector<1x1x1x64xf32> to vector<1x64xf32>
      %cst_277 = arith.constant 0.000000e+00 : f32
      %249 = vector.broadcast %cst_277 : f32 to vector<256x64xf32>
      %c0_278 = arith.constant 0 : index
      %c0_279 = arith.constant 0 : index
      %c0_280 = arith.constant 0 : index
      %250 = vector.load %arg14[%c0_278, %c0_279, %c0_280] : memref<18x18x64xf32, #tpu.memory_space<vmem>>, vector<16x16x64xf32>
      %251 = vector.shape_cast %250 : vector<16x16x64xf32> to vector<256x64xf32>
      %c0_281 = arith.constant 0 : index
      %252 = arith.index_cast %148 : i32 to index
      %c0_282 = arith.constant 0 : index
      %c0_283 = arith.constant 0 : index
      %c0_284 = arith.constant 0 : index
      %253 = vector.load %arg7[%c0_281, %252, %c0_282, %c0_283, %c0_284] : memref<1x4x9x64x64xf32, #tpu.memory_space<vmem>>, vector<1x1x1x64x64xf32>
      %254 = vector.shape_cast %253 : vector<1x1x1x64x64xf32> to vector<64x64xf32>
      %cst_285 = arith.constant dense<0.000000e+00> : vector<256x64xf32>
      %255 = tpu.matmul %251, %254, %cst_285 {dimension_numbers = #tpu.dot_dimension_numbers<[1], [0], [0], [1], [0, 0, 1, 1], [], []>} : vector<256x64xf32>, vector<64x64xf32>, vector<256x64xf32> -> vector<256x64xf32>
      %256 = arith.addf %249, %255 : vector<256x64xf32>
      %c0_286 = arith.constant 0 : index
      %c1_287 = arith.constant 1 : index
      %c0_288 = arith.constant 0 : index
      %257 = vector.load %arg14[%c0_286, %c1_287, %c0_288] : memref<18x18x64xf32, #tpu.memory_space<vmem>>, vector<16x16x64xf32>
      %258 = vector.shape_cast %257 : vector<16x16x64xf32> to vector<256x64xf32>
      %c0_289 = arith.constant 0 : index
      %259 = arith.index_cast %148 : i32 to index
      %c1_290 = arith.constant 1 : index
      %c0_291 = arith.constant 0 : index
      %c0_292 = arith.constant 0 : index
      %260 = vector.load %arg7[%c0_289, %259, %c1_290, %c0_291, %c0_292] : memref<1x4x9x64x64xf32, #tpu.memory_space<vmem>>, vector<1x1x1x64x64xf32>
      %261 = vector.shape_cast %260 : vector<1x1x1x64x64xf32> to vector<64x64xf32>
      %cst_293 = arith.constant dense<0.000000e+00> : vector<256x64xf32>
      %262 = tpu.matmul %258, %261, %cst_293 {dimension_numbers = #tpu.dot_dimension_numbers<[1], [0], [0], [1], [0, 0, 1, 1], [], []>} : vector<256x64xf32>, vector<64x64xf32>, vector<256x64xf32> -> vector<256x64xf32>
      %263 = arith.addf %256, %262 : vector<256x64xf32>
      %c0_294 = arith.constant 0 : index
      %c2_295 = arith.constant 2 : index
      %c0_296 = arith.constant 0 : index
      %264 = vector.load %arg14[%c0_294, %c2_295, %c0_296] : memref<18x18x64xf32, #tpu.memory_space<vmem>>, vector<16x16x64xf32>
      %265 = vector.shape_cast %264 : vector<16x16x64xf32> to vector<256x64xf32>
      %c0_297 = arith.constant 0 : index
      %266 = arith.index_cast %148 : i32 to index
      %c2_298 = arith.constant 2 : index
      %c0_299 = arith.constant 0 : index
      %c0_300 = arith.constant 0 : index
      %267 = vector.load %arg7[%c0_297, %266, %c2_298, %c0_299, %c0_300] : memref<1x4x9x64x64xf32, #tpu.memory_space<vmem>>, vector<1x1x1x64x64xf32>
      %268 = vector.shape_cast %267 : vector<1x1x1x64x64xf32> to vector<64x64xf32>
      %cst_301 = arith.constant dense<0.000000e+00> : vector<256x64xf32>
      %269 = tpu.matmul %265, %268, %cst_301 {dimension_numbers = #tpu.dot_dimension_numbers<[1], [0], [0], [1], [0, 0, 1, 1], [], []>} : vector<256x64xf32>, vector<64x64xf32>, vector<256x64xf32> -> vector<256x64xf32>
      %270 = arith.addf %263, %269 : vector<256x64xf32>
      %c1_302 = arith.constant 1 : index
      %c0_303 = arith.constant 0 : index
      %c0_304 = arith.constant 0 : index
      %271 = vector.load %arg14[%c1_302, %c0_303, %c0_304] : memref<18x18x64xf32, #tpu.memory_space<vmem>>, vector<16x16x64xf32>
      %272 = vector.shape_cast %271 : vector<16x16x64xf32> to vector<256x64xf32>
      %c0_305 = arith.constant 0 : index
      %273 = arith.index_cast %148 : i32 to index
      %c3_306 = arith.constant 3 : index
      %c0_307 = arith.constant 0 : index
      %c0_308 = arith.constant 0 : index
      %274 = vector.load %arg7[%c0_305, %273, %c3_306, %c0_307, %c0_308] : memref<1x4x9x64x64xf32, #tpu.memory_space<vmem>>, vector<1x1x1x64x64xf32>
      %275 = vector.shape_cast %274 : vector<1x1x1x64x64xf32> to vector<64x64xf32>
      %cst_309 = arith.constant dense<0.000000e+00> : vector<256x64xf32>
      %276 = tpu.matmul %272, %275, %cst_309 {dimension_numbers = #tpu.dot_dimension_numbers<[1], [0], [0], [1], [0, 0, 1, 1], [], []>} : vector<256x64xf32>, vector<64x64xf32>, vector<256x64xf32> -> vector<256x64xf32>
      %277 = arith.addf %270, %276 : vector<256x64xf32>
      %c1_310 = arith.constant 1 : index
      %c1_311 = arith.constant 1 : index
      %c0_312 = arith.constant 0 : index
      %278 = vector.load %arg14[%c1_310, %c1_311, %c0_312] : memref<18x18x64xf32, #tpu.memory_space<vmem>>, vector<16x16x64xf32>
      %279 = vector.shape_cast %278 : vector<16x16x64xf32> to vector<256x64xf32>
      %c0_313 = arith.constant 0 : index
      %280 = arith.index_cast %148 : i32 to index
      %c4_314 = arith.constant 4 : index
      %c0_315 = arith.constant 0 : index
      %c0_316 = arith.constant 0 : index
      %281 = vector.load %arg7[%c0_313, %280, %c4_314, %c0_315, %c0_316] : memref<1x4x9x64x64xf32, #tpu.memory_space<vmem>>, vector<1x1x1x64x64xf32>
      %282 = vector.shape_cast %281 : vector<1x1x1x64x64xf32> to vector<64x64xf32>
      %cst_317 = arith.constant dense<0.000000e+00> : vector<256x64xf32>
      %283 = tpu.matmul %279, %282, %cst_317 {dimension_numbers = #tpu.dot_dimension_numbers<[1], [0], [0], [1], [0, 0, 1, 1], [], []>} : vector<256x64xf32>, vector<64x64xf32>, vector<256x64xf32> -> vector<256x64xf32>
      %284 = arith.addf %277, %283 : vector<256x64xf32>
      %c1_318 = arith.constant 1 : index
      %c2_319 = arith.constant 2 : index
      %c0_320 = arith.constant 0 : index
      %285 = vector.load %arg14[%c1_318, %c2_319, %c0_320] : memref<18x18x64xf32, #tpu.memory_space<vmem>>, vector<16x16x64xf32>
      %286 = vector.shape_cast %285 : vector<16x16x64xf32> to vector<256x64xf32>
      %c0_321 = arith.constant 0 : index
      %287 = arith.index_cast %148 : i32 to index
      %c5_322 = arith.constant 5 : index
      %c0_323 = arith.constant 0 : index
      %c0_324 = arith.constant 0 : index
      %288 = vector.load %arg7[%c0_321, %287, %c5_322, %c0_323, %c0_324] : memref<1x4x9x64x64xf32, #tpu.memory_space<vmem>>, vector<1x1x1x64x64xf32>
      %289 = vector.shape_cast %288 : vector<1x1x1x64x64xf32> to vector<64x64xf32>
      %cst_325 = arith.constant dense<0.000000e+00> : vector<256x64xf32>
      %290 = tpu.matmul %286, %289, %cst_325 {dimension_numbers = #tpu.dot_dimension_numbers<[1], [0], [0], [1], [0, 0, 1, 1], [], []>} : vector<256x64xf32>, vector<64x64xf32>, vector<256x64xf32> -> vector<256x64xf32>
      %291 = arith.addf %284, %290 : vector<256x64xf32>
      %c2_326 = arith.constant 2 : index
      %c0_327 = arith.constant 0 : index
      %c0_328 = arith.constant 0 : index
      %292 = vector.load %arg14[%c2_326, %c0_327, %c0_328] : memref<18x18x64xf32, #tpu.memory_space<vmem>>, vector<16x16x64xf32>
      %293 = vector.shape_cast %292 : vector<16x16x64xf32> to vector<256x64xf32>
      %c0_329 = arith.constant 0 : index
      %294 = arith.index_cast %148 : i32 to index
      %c6_330 = arith.constant 6 : index
      %c0_331 = arith.constant 0 : index
      %c0_332 = arith.constant 0 : index
      %295 = vector.load %arg7[%c0_329, %294, %c6_330, %c0_331, %c0_332] : memref<1x4x9x64x64xf32, #tpu.memory_space<vmem>>, vector<1x1x1x64x64xf32>
      %296 = vector.shape_cast %295 : vector<1x1x1x64x64xf32> to vector<64x64xf32>
      %cst_333 = arith.constant dense<0.000000e+00> : vector<256x64xf32>
      %297 = tpu.matmul %293, %296, %cst_333 {dimension_numbers = #tpu.dot_dimension_numbers<[1], [0], [0], [1], [0, 0, 1, 1], [], []>} : vector<256x64xf32>, vector<64x64xf32>, vector<256x64xf32> -> vector<256x64xf32>
      %298 = arith.addf %291, %297 : vector<256x64xf32>
      %c2_334 = arith.constant 2 : index
      %c1_335 = arith.constant 1 : index
      %c0_336 = arith.constant 0 : index
      %299 = vector.load %arg14[%c2_334, %c1_335, %c0_336] : memref<18x18x64xf32, #tpu.memory_space<vmem>>, vector<16x16x64xf32>
      %300 = vector.shape_cast %299 : vector<16x16x64xf32> to vector<256x64xf32>
      %c0_337 = arith.constant 0 : index
      %301 = arith.index_cast %148 : i32 to index
      %c7_338 = arith.constant 7 : index
      %c0_339 = arith.constant 0 : index
      %c0_340 = arith.constant 0 : index
      %302 = vector.load %arg7[%c0_337, %301, %c7_338, %c0_339, %c0_340] : memref<1x4x9x64x64xf32, #tpu.memory_space<vmem>>, vector<1x1x1x64x64xf32>
      %303 = vector.shape_cast %302 : vector<1x1x1x64x64xf32> to vector<64x64xf32>
      %cst_341 = arith.constant dense<0.000000e+00> : vector<256x64xf32>
      %304 = tpu.matmul %300, %303, %cst_341 {dimension_numbers = #tpu.dot_dimension_numbers<[1], [0], [0], [1], [0, 0, 1, 1], [], []>} : vector<256x64xf32>, vector<64x64xf32>, vector<256x64xf32> -> vector<256x64xf32>
      %305 = arith.addf %298, %304 : vector<256x64xf32>
      %c2_342 = arith.constant 2 : index
      %c2_343 = arith.constant 2 : index
      %c0_344 = arith.constant 0 : index
      %306 = vector.load %arg14[%c2_342, %c2_343, %c0_344] : memref<18x18x64xf32, #tpu.memory_space<vmem>>, vector<16x16x64xf32>
      %307 = vector.shape_cast %306 : vector<16x16x64xf32> to vector<256x64xf32>
      %c0_345 = arith.constant 0 : index
      %308 = arith.index_cast %148 : i32 to index
      %c8_346 = arith.constant 8 : index
      %c0_347 = arith.constant 0 : index
      %c0_348 = arith.constant 0 : index
      %309 = vector.load %arg7[%c0_345, %308, %c8_346, %c0_347, %c0_348] : memref<1x4x9x64x64xf32, #tpu.memory_space<vmem>>, vector<1x1x1x64x64xf32>
      %310 = vector.shape_cast %309 : vector<1x1x1x64x64xf32> to vector<64x64xf32>
      %cst_349 = arith.constant dense<0.000000e+00> : vector<256x64xf32>
      %311 = tpu.matmul %307, %310, %cst_349 {dimension_numbers = #tpu.dot_dimension_numbers<[1], [0], [0], [1], [0, 0, 1, 1], [], []>} : vector<256x64xf32>, vector<64x64xf32>, vector<256x64xf32> -> vector<256x64xf32>
      %312 = arith.addf %305, %311 : vector<256x64xf32>
      %313 = vector.broadcast %248 : vector<1x64xf32> to vector<256x64xf32>
      %314 = arith.addf %312, %313 : vector<256x64xf32>
      %315 = arith.addf %arg16, %314 : vector<256x64xf32>
      scf.yield %315 : vector<256x64xf32>
    }
    %c2_i32_86 = arith.constant 2 : i32
    %73 = vector.shape_cast %72 : vector<256x64xf32> to vector<16x16x64xf32>
    %c1_87 = arith.constant 1 : index
    %c1_88 = arith.constant 1 : index
    %c0_89 = arith.constant 0 : index
    %74 = vector.load %arg14[%c1_87, %c1_88, %c0_89] : memref<18x18x64xf32, #tpu.memory_space<vmem>>, vector<16x16x64xf32>
    tpu.vector_store %arg14[%c1_87, %c1_88, %c0_89], %73 {strides = array<i32>} : memref<18x18x64xf32, #tpu.memory_space<vmem>>, vector<16x16x64xf32>,
    %c0_90 = arith.constant 0 : index
    %c0_91 = arith.constant 0 : index
    %c0_92 = arith.constant 0 : index
    %75 = vector.load %arg10[%c0_90, %c0_91, %c0_92] : memref<1x1x2xf32, #tpu.memory_space<vmem>>, vector<1x1x2xf32>
    %76 = vector.shape_cast %75 : vector<1x1x2xf32> to vector<1x2xf32>
    %cst_93 = arith.constant 0.000000e+00 : f32
    %77 = vector.broadcast %cst_93 : f32 to vector<256x2xf32>
    %c0_94 = arith.constant 0 : index
    %c0_95 = arith.constant 0 : index
    %c0_96 = arith.constant 0 : index
    %78 = vector.load %arg14[%c0_94, %c0_95, %c0_96] : memref<18x18x64xf32, #tpu.memory_space<vmem>>, vector<16x16x64xf32>
    %79 = vector.shape_cast %78 : vector<16x16x64xf32> to vector<256x64xf32>
    %c0_97 = arith.constant 0 : index
    %c0_98 = arith.constant 0 : index
    %c0_99 = arith.constant 0 : index
    %c0_100 = arith.constant 0 : index
    %80 = vector.load %arg9[%c0_97, %c0_98, %c0_99, %c0_100] : memref<1x9x64x2xf32, #tpu.memory_space<vmem>>, vector<1x1x64x2xf32>
    %81 = vector.shape_cast %80 : vector<1x1x64x2xf32> to vector<64x2xf32>
    %cst_101 = arith.constant dense<0.000000e+00> : vector<256x2xf32>
    %82 = tpu.matmul %79, %81, %cst_101 {dimension_numbers = #tpu.dot_dimension_numbers<[1], [0], [0], [1], [0, 0, 1, 1], [], []>} : vector<256x64xf32>, vector<64x2xf32>, vector<256x2xf32> -> vector<256x2xf32>
    %83 = arith.addf %77, %82 : vector<256x2xf32>
    %c0_102 = arith.constant 0 : index
    %c1_103 = arith.constant 1 : index
    %c0_104 = arith.constant 0 : index
    %84 = vector.load %arg14[%c0_102, %c1_103, %c0_104] : memref<18x18x64xf32, #tpu.memory_space<vmem>>, vector<16x16x64xf32>
    %85 = vector.shape_cast %84 : vector<16x16x64xf32> to vector<256x64xf32>
    %c0_105 = arith.constant 0 : index
    %c1_106 = arith.constant 1 : index
    %c0_107 = arith.constant 0 : index
    %c0_108 = arith.constant 0 : index
    %86 = vector.load %arg9[%c0_105, %c1_106, %c0_107, %c0_108] : memref<1x9x64x2xf32, #tpu.memory_space<vmem>>, vector<1x1x64x2xf32>
    %87 = vector.shape_cast %86 : vector<1x1x64x2xf32> to vector<64x2xf32>
    %cst_109 = arith.constant dense<0.000000e+00> : vector<256x2xf32>
    %88 = tpu.matmul %85, %87, %cst_109 {dimension_numbers = #tpu.dot_dimension_numbers<[1], [0], [0], [1], [0, 0, 1, 1], [], []>} : vector<256x64xf32>, vector<64x2xf32>, vector<256x2xf32> -> vector<256x2xf32>
    %89 = arith.addf %83, %88 : vector<256x2xf32>
    %c0_110 = arith.constant 0 : index
    %c2_111 = arith.constant 2 : index
    %c0_112 = arith.constant 0 : index
    %90 = vector.load %arg14[%c0_110, %c2_111, %c0_112] : memref<18x18x64xf32, #tpu.memory_space<vmem>>, vector<16x16x64xf32>
    %91 = vector.shape_cast %90 : vector<16x16x64xf32> to vector<256x64xf32>
    %c0_113 = arith.constant 0 : index
    %c2_114 = arith.constant 2 : index
    %c0_115 = arith.constant 0 : index
    %c0_116 = arith.constant 0 : index
    %92 = vector.load %arg9[%c0_113, %c2_114, %c0_115, %c0_116] : memref<1x9x64x2xf32, #tpu.memory_space<vmem>>, vector<1x1x64x2xf32>
    %93 = vector.shape_cast %92 : vector<1x1x64x2xf32> to vector<64x2xf32>
    %cst_117 = arith.constant dense<0.000000e+00> : vector<256x2xf32>
    %94 = tpu.matmul %91, %93, %cst_117 {dimension_numbers = #tpu.dot_dimension_numbers<[1], [0], [0], [1], [0, 0, 1, 1], [], []>} : vector<256x64xf32>, vector<64x2xf32>, vector<256x2xf32> -> vector<256x2xf32>
    %95 = arith.addf %89, %94 : vector<256x2xf32>
    %c1_118 = arith.constant 1 : index
    %c0_119 = arith.constant 0 : index
    %c0_120 = arith.constant 0 : index
    %96 = vector.load %arg14[%c1_118, %c0_119, %c0_120] : memref<18x18x64xf32, #tpu.memory_space<vmem>>, vector<16x16x64xf32>
    %97 = vector.shape_cast %96 : vector<16x16x64xf32> to vector<256x64xf32>
    %c0_121 = arith.constant 0 : index
    %c3_122 = arith.constant 3 : index
    %c0_123 = arith.constant 0 : index
    %c0_124 = arith.constant 0 : index
    %98 = vector.load %arg9[%c0_121, %c3_122, %c0_123, %c0_124] : memref<1x9x64x2xf32, #tpu.memory_space<vmem>>, vector<1x1x64x2xf32>
    %99 = vector.shape_cast %98 : vector<1x1x64x2xf32> to vector<64x2xf32>
    %cst_125 = arith.constant dense<0.000000e+00> : vector<256x2xf32>
    %100 = tpu.matmul %97, %99, %cst_125 {dimension_numbers = #tpu.dot_dimension_numbers<[1], [0], [0], [1], [0, 0, 1, 1], [], []>} : vector<256x64xf32>, vector<64x2xf32>, vector<256x2xf32> -> vector<256x2xf32>
    %101 = arith.addf %95, %100 : vector<256x2xf32>
    %c1_126 = arith.constant 1 : index
    %c1_127 = arith.constant 1 : index
    %c0_128 = arith.constant 0 : index
    %102 = vector.load %arg14[%c1_126, %c1_127, %c0_128] : memref<18x18x64xf32, #tpu.memory_space<vmem>>, vector<16x16x64xf32>
    %103 = vector.shape_cast %102 : vector<16x16x64xf32> to vector<256x64xf32>
    %c0_129 = arith.constant 0 : index
    %c4_130 = arith.constant 4 : index
    %c0_131 = arith.constant 0 : index
    %c0_132 = arith.constant 0 : index
    %104 = vector.load %arg9[%c0_129, %c4_130, %c0_131, %c0_132] : memref<1x9x64x2xf32, #tpu.memory_space<vmem>>, vector<1x1x64x2xf32>
    %105 = vector.shape_cast %104 : vector<1x1x64x2xf32> to vector<64x2xf32>
    %cst_133 = arith.constant dense<0.000000e+00> : vector<256x2xf32>
    %106 = tpu.matmul %103, %105, %cst_133 {dimension_numbers = #tpu.dot_dimension_numbers<[1], [0], [0], [1], [0, 0, 1, 1], [], []>} : vector<256x64xf32>, vector<64x2xf32>, vector<256x2xf32> -> vector<256x2xf32>
    %107 = arith.addf %101, %106 : vector<256x2xf32>
    %c1_134 = arith.constant 1 : index
    %c2_135 = arith.constant 2 : index
    %c0_136 = arith.constant 0 : index
    %108 = vector.load %arg14[%c1_134, %c2_135, %c0_136] : memref<18x18x64xf32, #tpu.memory_space<vmem>>, vector<16x16x64xf32>
    %109 = vector.shape_cast %108 : vector<16x16x64xf32> to vector<256x64xf32>
    %c0_137 = arith.constant 0 : index
    %c5_138 = arith.constant 5 : index
    %c0_139 = arith.constant 0 : index
    %c0_140 = arith.constant 0 : index
    %110 = vector.load %arg9[%c0_137, %c5_138, %c0_139, %c0_140] : memref<1x9x64x2xf32, #tpu.memory_space<vmem>>, vector<1x1x64x2xf32>
    %111 = vector.shape_cast %110 : vector<1x1x64x2xf32> to vector<64x2xf32>
    %cst_141 = arith.constant dense<0.000000e+00> : vector<256x2xf32>
    %112 = tpu.matmul %109, %111, %cst_141 {dimension_numbers = #tpu.dot_dimension_numbers<[1], [0], [0], [1], [0, 0, 1, 1], [], []>} : vector<256x64xf32>, vector<64x2xf32>, vector<256x2xf32> -> vector<256x2xf32>
    %113 = arith.addf %107, %112 : vector<256x2xf32>
    %c2_142 = arith.constant 2 : index
    %c0_143 = arith.constant 0 : index
    %c0_144 = arith.constant 0 : index
    %114 = vector.load %arg14[%c2_142, %c0_143, %c0_144] : memref<18x18x64xf32, #tpu.memory_space<vmem>>, vector<16x16x64xf32>
    %115 = vector.shape_cast %114 : vector<16x16x64xf32> to vector<256x64xf32>
    %c0_145 = arith.constant 0 : index
    %c6_146 = arith.constant 6 : index
    %c0_147 = arith.constant 0 : index
    %c0_148 = arith.constant 0 : index
    %116 = vector.load %arg9[%c0_145, %c6_146, %c0_147, %c0_148] : memref<1x9x64x2xf32, #tpu.memory_space<vmem>>, vector<1x1x64x2xf32>
    %117 = vector.shape_cast %116 : vector<1x1x64x2xf32> to vector<64x2xf32>
    %cst_149 = arith.constant dense<0.000000e+00> : vector<256x2xf32>
    %118 = tpu.matmul %115, %117, %cst_149 {dimension_numbers = #tpu.dot_dimension_numbers<[1], [0], [0], [1], [0, 0, 1, 1], [], []>} : vector<256x64xf32>, vector<64x2xf32>, vector<256x2xf32> -> vector<256x2xf32>
    %119 = arith.addf %113, %118 : vector<256x2xf32>
    %c2_150 = arith.constant 2 : index
    %c1_151 = arith.constant 1 : index
    %c0_152 = arith.constant 0 : index
    %120 = vector.load %arg14[%c2_150, %c1_151, %c0_152] : memref<18x18x64xf32, #tpu.memory_space<vmem>>, vector<16x16x64xf32>
    %121 = vector.shape_cast %120 : vector<16x16x64xf32> to vector<256x64xf32>
    %c0_153 = arith.constant 0 : index
    %c7_154 = arith.constant 7 : index
    %c0_155 = arith.constant 0 : index
    %c0_156 = arith.constant 0 : index
    %122 = vector.load %arg9[%c0_153, %c7_154, %c0_155, %c0_156] : memref<1x9x64x2xf32, #tpu.memory_space<vmem>>, vector<1x1x64x2xf32>
    %123 = vector.shape_cast %122 : vector<1x1x64x2xf32> to vector<64x2xf32>
    %cst_157 = arith.constant dense<0.000000e+00> : vector<256x2xf32>
    %124 = tpu.matmul %121, %123, %cst_157 {dimension_numbers = #tpu.dot_dimension_numbers<[1], [0], [0], [1], [0, 0, 1, 1], [], []>} : vector<256x64xf32>, vector<64x2xf32>, vector<256x2xf32> -> vector<256x2xf32>
    %125 = arith.addf %119, %124 : vector<256x2xf32>
    %c2_158 = arith.constant 2 : index
    %c2_159 = arith.constant 2 : index
    %c0_160 = arith.constant 0 : index
    %126 = vector.load %arg14[%c2_158, %c2_159, %c0_160] : memref<18x18x64xf32, #tpu.memory_space<vmem>>, vector<16x16x64xf32>
    %127 = vector.shape_cast %126 : vector<16x16x64xf32> to vector<256x64xf32>
    %c0_161 = arith.constant 0 : index
    %c8_162 = arith.constant 8 : index
    %c0_163 = arith.constant 0 : index
    %c0_164 = arith.constant 0 : index
    %128 = vector.load %arg9[%c0_161, %c8_162, %c0_163, %c0_164] : memref<1x9x64x2xf32, #tpu.memory_space<vmem>>, vector<1x1x64x2xf32>
    %129 = vector.shape_cast %128 : vector<1x1x64x2xf32> to vector<64x2xf32>
    %cst_165 = arith.constant dense<0.000000e+00> : vector<256x2xf32>
    %130 = tpu.matmul %127, %129, %cst_165 {dimension_numbers = #tpu.dot_dimension_numbers<[1], [0], [0], [1], [0, 0, 1, 1], [], []>} : vector<256x64xf32>, vector<64x2xf32>, vector<256x2xf32> -> vector<256x2xf32>
    %131 = arith.addf %125, %130 : vector<256x2xf32>
    %132 = vector.broadcast %76 : vector<1x2xf32> to vector<256x2xf32>
    %133 = arith.addf %131, %132 : vector<256x2xf32>
    %c0_166 = arith.constant 0 : index
    %c0_167 = arith.constant 0 : index
    %c0_168 = arith.constant 0 : index
    %134 = vector.load %arg11[%c0_166, %c0_167, %c0_168] : memref<1x256x2xf32, #tpu.memory_space<vmem>>, vector<1x256x2xf32>
    %135 = vector.shape_cast %134 : vector<1x256x2xf32> to vector<256x2xf32>
    %136 = arith.mulf %135, %133 : vector<256x2xf32>
    %c0_i32_169 = arith.constant 0 : i32
    %137 = arith.cmpi eq, %arg1, %c0_i32_169 : i32
    %138 = arith.extui %137 : i1 to i32
    %c0_i32_170 = arith.constant 0 : i32
    %139 = arith.cmpi ne, %138, %c0_i32_170 : i32
    scf.if %139 {
      %c0_175 = arith.constant 0 : index
      %c0_176 = arith.constant 0 : index
      %c0_177 = arith.constant 0 : index
      %146 = vector.load %arg12[%c0_175, %c0_176, %c0_177] : memref<1x256x2xf32, #tpu.memory_space<vmem>>, vector<1x256x2xf32>
      %147 = vector.shape_cast %146 : vector<1x256x2xf32> to vector<256x2xf32>
      %148 = arith.addf %147, %136 : vector<256x2xf32>
      %c0_178 = arith.constant 0 : index
      %c0_179 = arith.constant 0 : index
      %c0_180 = arith.constant 0 : index
      %149 = vector.load %arg13[%c0_178, %c0_179, %c0_180] : memref<1x256x2xf32, #tpu.memory_space<vmem>>, vector<1x256x2xf32>
      %150 = vector.shape_cast %149 : vector<1x256x2xf32> to vector<256x2xf32>
      %151 = vector.shape_cast %148 : vector<256x2xf32> to vector<1x256x2xf32>
      tpu.vector_store %arg13[%c0_178, %c0_179, %c0_180], %151 {strides = array<i32>} : memref<1x256x2xf32, #tpu.memory_space<vmem>>, vector<1x256x2xf32>,
    } else {
    }
    %c0_i32_171 = arith.constant 0 : i32
    %140 = arith.cmpi ne, %arg1, %c0_i32_171 : i32
    %141 = arith.extui %140 : i1 to i32
    %c0_i32_172 = arith.constant 0 : i32
    %142 = arith.cmpi ne, %141, %c0_i32_172 : i32
    scf.if %142 {
      %c0_175 = arith.constant 0 : index
      %c0_176 = arith.constant 0 : index
      %c0_177 = arith.constant 0 : index
      %146 = vector.load %arg13[%c0_175, %c0_176, %c0_177] : memref<1x256x2xf32, #tpu.memory_space<vmem>>, vector<1x256x2xf32>
      %147 = vector.shape_cast %146 : vector<1x256x2xf32> to vector<256x2xf32>
      %148 = arith.addf %147, %136 : vector<256x2xf32>
      %c0_178 = arith.constant 0 : index
      %c0_179 = arith.constant 0 : index
      %c0_180 = arith.constant 0 : index
      %149 = vector.load %arg13[%c0_178, %c0_179, %c0_180] : memref<1x256x2xf32, #tpu.memory_space<vmem>>, vector<1x256x2xf32>
      %150 = vector.shape_cast %149 : vector<1x256x2xf32> to vector<256x2xf32>
      %151 = vector.shape_cast %148 : vector<256x2xf32> to vector<1x256x2xf32>
      tpu.vector_store %arg13[%c0_178, %c0_179, %c0_180], %151 {strides = array<i32>} : memref<1x256x2xf32, #tpu.memory_space<vmem>>, vector<1x256x2xf32>,
    } else {
    }
    %c2_i32_173 = arith.constant 2 : i32
    %143 = arith.cmpi eq, %arg1, %c2_i32_173 : i32
    %144 = arith.extui %143 : i1 to i32
    %c0_i32_174 = arith.constant 0 : i32
    %145 = arith.cmpi ne, %144, %c0_i32_174 : i32
    scf.if %145 {
      %c0_175 = arith.constant 0 : index
      %c0_176 = arith.constant 0 : index
      %c0_177 = arith.constant 0 : index
      %146 = vector.load %arg13[%c0_175, %c0_176, %c0_177] : memref<1x256x2xf32, #tpu.memory_space<vmem>>, vector<1x256x2xf32>
      %147 = vector.shape_cast %146 : vector<1x256x2xf32> to vector<256x2xf32>
      %148 = math.tanh %147 : vector<256x2xf32>
      %c0_178 = arith.constant 0 : index
      %c0_179 = arith.constant 0 : index
      %c0_180 = arith.constant 0 : index
      %149 = vector.load %arg13[%c0_178, %c0_179, %c0_180] : memref<1x256x2xf32, #tpu.memory_space<vmem>>, vector<1x256x2xf32>
      %150 = vector.shape_cast %149 : vector<1x256x2xf32> to vector<256x2xf32>
      %151 = vector.shape_cast %148 : vector<256x2xf32> to vector<1x256x2xf32>
      tpu.vector_store %arg13[%c0_178, %c0_179, %c0_180], %151 {strides = array<i32>} : memref<1x256x2xf32, #tpu.memory_space<vmem>>, vector<1x256x2xf32>,
    } else {
    }
    return
  }
  func.func @transform_0(%arg0: i32, %arg1: i32) -> (i32, i32, i32, i32, i32) {
    %c0_i32 = arith.constant 0 : i32
    %c0_i32_0 = arith.constant 0 : i32
    %c0_i32_1 = arith.constant 0 : i32
    %c0_i32_2 = arith.constant 0 : i32
    return %arg1, %arg0, %c0_i32, %c0_i32_0, %c0_i32_1 : i32, i32, i32, i32, i32
  }
  func.func @transform_1(%arg0: i32, %arg1: i32) -> (i32, i32, i32, i32) {
    %c0_i32 = arith.constant 0 : i32
    %c0_i32_0 = arith.constant 0 : i32
    %c0_i32_1 = arith.constant 0 : i32
    %c0_i32_2 = arith.constant 0 : i32
    return %arg1, %c0_i32, %c0_i32_0, %c0_i32_1 : i32, i32, i32, i32
  }
  func.func @transform_2(%arg0: i32, %arg1: i32) -> (i32, i32, i32) {
    %c0_i32 = arith.constant 0 : i32
    %c0_i32_0 = arith.constant 0 : i32
    %c0_i32_1 = arith.constant 0 : i32
    return %arg1, %c0_i32, %c0_i32_0 : i32, i32, i32
  }
  func.func @transform_3(%arg0: i32, %arg1: i32) -> (i32, i32, i32, i32) {
    %c0_i32 = arith.constant 0 : i32
    %c0_i32_0 = arith.constant 0 : i32
    %c0_i32_1 = arith.constant 0 : i32
    %c0_i32_2 = arith.constant 0 : i32
    return %arg1, %c0_i32, %c0_i32_0, %c0_i32_1 : i32, i32, i32, i32
  }
  func.func @transform_4(%arg0: i32, %arg1: i32) -> (i32, i32, i32, i32) {
    %c0_i32 = arith.constant 0 : i32
    %c0_i32_0 = arith.constant 0 : i32
    %c0_i32_1 = arith.constant 0 : i32
    %c0_i32_2 = arith.constant 0 : i32
    return %arg1, %c0_i32, %c0_i32_0, %c0_i32_1 : i32, i32, i32, i32
  }
  func.func @transform_5(%arg0: i32, %arg1: i32) -> (i32, i32, i32, i32, i32) {
    %c0_i32 = arith.constant 0 : i32
    %c0_i32_0 = arith.constant 0 : i32
    %c0_i32_1 = arith.constant 0 : i32
    %c0_i32_2 = arith.constant 0 : i32
    %c0_i32_3 = arith.constant 0 : i32
    return %arg1, %c0_i32, %c0_i32_0, %c0_i32_1, %c0_i32_2 : i32, i32, i32, i32, i32
  }
  func.func @transform_6(%arg0: i32, %arg1: i32) -> (i32, i32, i32, i32) {
    %c0_i32 = arith.constant 0 : i32
    %c0_i32_0 = arith.constant 0 : i32
    %c0_i32_1 = arith.constant 0 : i32
    %c0_i32_2 = arith.constant 0 : i32
    return %arg1, %c0_i32, %c0_i32_0, %c0_i32_1 : i32, i32, i32, i32
  }
  func.func @transform_7(%arg0: i32, %arg1: i32) -> (i32, i32, i32, i32) {
    %c0_i32 = arith.constant 0 : i32
    %c0_i32_0 = arith.constant 0 : i32
    %c0_i32_1 = arith.constant 0 : i32
    %c0_i32_2 = arith.constant 0 : i32
    return %arg1, %c0_i32, %c0_i32_0, %c0_i32_1 : i32, i32, i32, i32
  }
  func.func @transform_8(%arg0: i32, %arg1: i32) -> (i32, i32, i32) {
    %c0_i32 = arith.constant 0 : i32
    %c0_i32_0 = arith.constant 0 : i32
    %c0_i32_1 = arith.constant 0 : i32
    return %arg1, %c0_i32, %c0_i32_0 : i32, i32, i32
  }
  func.func @transform_9(%arg0: i32, %arg1: i32) -> (i32, i32, i32) {
    %c0_i32 = arith.constant 0 : i32
    %c0_i32_0 = arith.constant 0 : i32
    %c0_i32_1 = arith.constant 0 : i32
    return %arg1, %c0_i32, %c0_i32_0 : i32, i32, i32
  }
  func.func @transform_10(%arg0: i32, %arg1: i32) -> (i32, i32, i32) {
    %c0_i32 = arith.constant 0 : i32
    %c0_i32_0 = arith.constant 0 : i32
    %c0_i32_1 = arith.constant 0 : i32
    return %arg0, %c0_i32, %c0_i32_0 : i32, i32, i32
  }
  func.func @transform_11(%arg0: i32, %arg1: i32) -> (i32, i32, i32) {
    %c0_i32 = arith.constant 0 : i32
    %c0_i32_0 = arith.constant 0 : i32
    %c0_i32_1 = arith.constant 0 : i32
    return %arg0, %c0_i32, %c0_i32_0 : i32, i32, i32
  }
}

</mosaic_0001>

<bundles_post_ra>
// kernel: stresnet_forward.1
= control target key start
LH: loop header
LB: loop body
LE: loop exit
PB: predicated region body
PF: predicated region fallthrough
CT: control target
= control target key end

     0   :  { %s23235_s17 = smov 0   ;;  %s23237_s18 = smov 0   ;;  %s28150_s0 = inlined_call_operand.vmem [shape: f32[3,2,18,18,6], index: 0, kind: input, shape index: {}]   ;;  %s28151_s1 = inlined_call_operand.vmem [shape: f32[3,9,6,64], index: 1, kind: input, shape index: {}]   ;;  %s28152_s2 = inlined_call_operand.vmem [shape: f32[3,1,64], index: 2, kind: input, shape index: {}]   ;;  %s28153_s3 = inlined_call_operand.vmem [shape: f32[3,4,1,64], index: 3, kind: input, shape index: {}]   ;;  %s28154_s4 = inlined_call_operand.vmem [shape: f32[3,4,1,64], index: 4, kind: input, shape index: {}]   ;;  %s28155_s5 = inlined_call_operand.vmem [shape: f32[3,4,9,64,64], index: 5, kind: input, shape index: {}]   ;;  %s28156_s6 = inlined_call_operand.vmem [shape: f32[3,4,1,64], index: 6, kind: input, shape index: {}]   ;;  %s28157_s7 = inlined_call_operand.vmem [shape: f32[3,9,64,2], index: 7, kind: input, shape index: {}]   ;;  %s28158_s8 = inlined_call_operand.vmem [shape: f32[3,1,2], index: 8, kind: input, shape index: {}]   ;;  %s28159_s9 = inlined_call_operand.vmem [shape: f32[3,256,2], index: 9, kind: input, shape index: {}]   ;;  %s28160_s10 = inlined_call_operand.vmem [shape: f32[2,256,2], index: 10, kind: input, shape index: {}]   ;;  %s28161_s11 = inlined_call_operand.vmem [shape: f32[2,256,2], index: 11, kind: output, shape index: {}]  }
   0x1   :  { %28416 = sst [smem:[#allocation116_spill]] %s28150_s0  ;;  %s23239_s19 = smov 0  }
   0x2   :  { %28417 = sst [smem:[#allocation117_spill]] %s28152_s2  ;;  %s23241_s20 = smov 0  }
   0x3   :  { %28418 = sst [smem:[#allocation118_spill]] %s28160_s10  ;;  %s23243_s21 = smov 0  }
   0x4   :  { %28419 = sst [smem:[#allocation119_spill]] %s28161_s11 }
   0x5 LB: > { %28420 = sst [smem:[#allocation3_spill]] %s23024_s17  ;;  %s30_s22 = sadd.s32 1, %s23032_s19  ;;  %s23040_s21 = sphi %s23243_s21, %s21_s21   ;;  %s23036_s20 = sphi %s23241_s20, %s28882_s20   ;;  %s23032_s19 = sphi %s23239_s19, %s28881_s19   ;;  %s23028_s18 = sphi %s23237_s18, %s28880_s18   ;;  %s23024_s17 = sphi %s23235_s17, %s28879_s17  }
   0x6   : > { %28421 = sst [smem:[#allocation4_spill]] %s23032_s19  ;;  %s33_s23 = sadd.s32 1, %s23036_s20 }
   0x7   : > { %28422 = sst [smem:[#allocation5_spill]] %s23036_s20  ;;  %p31_p0 = scmp.ge.s32.totalorder %s30_s22, 3 }
   0x8   : > { %28423 = sst [smem:[#allocation6_spill]] %s23040_s21  ;;  %p15857_p1 = scmp.ge.s32.totalorder %s23040_s21, 1 }
   0x9   : > { %p448_p2 = scmp.lt.s32.totalorder %s23040_s21, 7  ;;  %s28884_s22 = smov (%p31_p0, %s30_s22), 0 }
   0xa   : > { %28424 = sst [smem:[#allocation7_spill]] %s28884_s22  ;;  %s28886_s23 = smov (!%p31_p0, %s33_s23), %s23036_s20 }
   0xb   : > { %p449_p3 = pnand %p15857_p1, %p448_p2  ;;  %p35_p4 = scmp.ge.s32.totalorder %s28886_s23, 2 }
   0xd   : > { %s28888_s23 = smov (%p35_p4, %s28886_s23), 0  ;;  %452 = sbr.rel (%p449_p3) target bundleno = 2726 (0xaa6), region = 64 }
   0xe   : > { %28425 = sst [smem:[#allocation8_spill]] %s28888_s23 }
  0x14   : > { %p535_p5 = scmp.lt.s32.totalorder %s23024_s17, 2  ;;  %p537_p6 = scmp.lt.s32.totalorder %s23028_s18, 1 }
  0x15   : > { %s28427_s0 = sld [smem:[#allocation116_spill]]  ;;  %s28429_s26 = sld [smem:[#allocation119_spill]] }
  0x16   : > { %s23269_s24 = scalar_select %p535_p5, %s23024_s17, 2 }
  0x17   : > { %s28890_s18 = smov (!%p537_p6, %s23028_s18), 1  ;;  %s28430_s20 = sld [smem:[#allocation3_spill]] }
  0x18   : > { %s22497_s25 = smul.u32 108, %s23269_s24  ;;  %s23277_s30 = sshll.u32 %s23269_s24, 2 }
  0x19   : > { %s22496_s29 = smul.u32 54, %s28890_s18  ;;  %s17473_s13 = sshll.u32 %s28890_s18, 8 }
  0x1a   : > { %s22498_s12 = smul.u32 72, %s23269_s24 }
  0x1b   : > { %s541_s16 = sadd.s32 %s22497_s25, %s22496_s29  ;;  %s22499_s11 = smul.u32 2304, %s23269_s24 }
  0x1c   : > { %s15858_s19 = sshll.u32 %s541_s16, 3  ;;  %s23291_s28 = scalar_lea.vmem %s28151_s1, %s22498_s12 }
  0x1d   : > { %s23296_s17 = scalar_lea.vmem %s28427_s0, %s15858_s19  ;;  %s22500_s29 = smul.u32 576, %s23269_s24 }
  0x1e   : > { %s23307_s23 = scalar_lea.vmem %s28155_s5, %s22499_s11  ;;  %s17472_s19 = sshll.u32 %s23269_s24, 8 }
  0x1f   : > { %s23316_s2 = scalar_lea.vmem %s28157_s7, %s22500_s29  ;;  %s23322_s10 = scalar_lea.vmem %s28159_s9, %s17472_s19 }
  0x20   : > { %s28428_s11 = sld [smem:[#allocation118_spill]]  ;;  %s23332_s12 = scalar_lea.vmem %s28429_s26, %s17473_s13 }
  0x21   : > { %p15871_p7 = scmp.ne.s32.totalorder %s28430_s20, 0 }
  0x22   : > { %vm596_vm0 = vcmask (!%p15871_p7), 523264   ;;  %vm599_vm1 = vcmask (!%p15871_p7), 517120   ;;  %v23174_v0 = vmov (!%p15871_p7), 0.0  }
  0x23   : > { %595 = sbr.rel (%p15871_p7) target bundleno = 62 (0x3e), region = 68  ;;  %597 = vst.msk [vmem:[#allocation2] sm:$0xff] (!%p15871_p7), %vm596_vm0, %v23174_v0  ;;  %598 = vst.msk [vmem:[#allocation2 + $0x8] sm:$0xff] (!%p15871_p7), %vm596_vm0, %v23174_v0 }
  0x24   : > { %601 = vst.msk [vmem:[#allocation2 + $0x18] sm:$0xff] (!%p15871_p7), %vm596_vm0, %v23174_v0  ;;  %602 = vst.msk [vmem:[#allocation2 + $0x20] sm:$0xff] (!%p15871_p7), %vm596_vm0, %v23174_v0 }
  0x25   : > { %604 = vst.msk [vmem:[#allocation2 + $0x30] sm:$0xff] (!%p15871_p7), %vm596_vm0, %v23174_v0  ;;  %605 = vst.msk [vmem:[#allocation2 + $0x38] sm:$0xff] (!%p15871_p7), %vm596_vm0, %v23174_v0 }
  0x26   : > { %s23327_s22 = scalar_lea.vmem %s28428_s11, %s17473_s13  ;;  %607 = vst.msk [vmem:[#allocation2 + $0x48] sm:$0xff] (!%p15871_p7), %vm596_vm0, %v23174_v0  ;;  %608 = vst.msk [vmem:[#allocation2 + $0x50] sm:$0xff] (!%p15871_p7), %vm596_vm0, %v23174_v0 }
  0x27   : > { %610 = vst.msk [vmem:[#allocation2 + $0x60] sm:$0xff] (!%p15871_p7), %vm596_vm0, %v23174_v0  ;;  %611 = vst.msk [vmem:[#allocation2 + $0x68] sm:$0xff] (!%p15871_p7), %vm596_vm0, %v23174_v0 }
  0x28   : > { %613 = vst.msk [vmem:[#allocation2 + $0x78] sm:$0xff] (!%p15871_p7), %vm596_vm0, %v23174_v0  ;;  %614 = vst.msk [vmem:[#allocation2 + $0x80] sm:$0xff] (!%p15871_p7), %vm596_vm0, %v23174_v0 }
  0x29   : > { %616 = vst.msk [vmem:[#allocation2 + $0x90] sm:$0xff] (!%p15871_p7), %vm596_vm0, %v23174_v0  ;;  %617 = vst.msk [vmem:[#allocation2 + $0x98] sm:$0xff] (!%p15871_p7), %vm596_vm0, %v23174_v0 }
  0x2a   : > { %619 = vst.msk [vmem:[#allocation2 + $0xa8] sm:$0xff] %vm596_vm0, %v23174_v0  ;;  %620 = vst.msk [vmem:[#allocation2 + $0xb0] sm:$0xff] %vm596_vm0, %v23174_v0 }
  0x2b   : > { %622 = vst.msk [vmem:[#allocation2 + $0xc0] sm:$0xff] %vm596_vm0, %v23174_v0  ;;  %623 = vst.msk [vmem:[#allocation2 + $0xc8] sm:$0xff] %vm596_vm0, %v23174_v0 }
  0x2c   : > { %625 = vst.msk [vmem:[#allocation2 + $0xd8] sm:$0xff] %vm596_vm0, %v23174_v0  ;;  %626 = vst.msk [vmem:[#allocation2 + $0xe0] sm:$0xff] %vm596_vm0, %v23174_v0 }
  0x2d   : > { %628 = vst.msk [vmem:[#allocation2 + $0xf0] sm:$0xff] %vm596_vm0, %v23174_v0  ;;  %629 = vst.msk [vmem:[#allocation2 + $0xf8] sm:$0xff] %vm596_vm0, %v23174_v0 }
  0x2e   : > { %631 = vst.msk [vmem:[#allocation2 + $0x108] sm:$0xff] %vm596_vm0, %v23174_v0  ;;  %632 = vst.msk [vmem:[#allocation2 + $0x110] sm:$0xff] %vm596_vm0, %v23174_v0 }
  0x2f   : > { %634 = vst.msk [vmem:[#allocation2 + $0x120] sm:$0xff] %vm596_vm0, %v23174_v0  ;;  %635 = vst.msk [vmem:[#allocation2 + $0x128] sm:$0xff] %vm596_vm0, %v23174_v0 }
  0x30   : > { %637 = vst.msk [vmem:[#allocation2 + $0x138] sm:$0xff] %vm596_vm0, %v23174_v0  ;;  %638 = vst.msk [vmem:[#allocation2 + $0x140] sm:$0xff] %vm596_vm0, %v23174_v0 }
  0x31   : > { %640 = vst.msk [vmem:[#allocation2 + $0x150] sm:$0xff] %vm596_vm0, %v23174_v0  ;;  %641 = vst.msk [vmem:[#allocation2 + $0x158] sm:$0xff] %vm596_vm0, %v23174_v0 }
  0x32   : > { %643 = vst.msk [vmem:[#allocation2 + $0x168] sm:$0xff] %vm596_vm0, %v23174_v0  ;;  %644 = vst.msk [vmem:[#allocation2 + $0x170] sm:$0xff] %vm596_vm0, %v23174_v0 }
  0x33   : > { %646 = vst.msk [vmem:[#allocation2 + $0x180] sm:$0xff] %vm596_vm0, %v23174_v0  ;;  %647 = vst.msk [vmem:[#allocation2 + $0x188] sm:$0xff] %vm596_vm0, %v23174_v0 }
  0x34   : > { %649 = vst.msk [vmem:[#allocation2 + $0x198] sm:$0xff] %vm596_vm0, %v23174_v0  ;;  %650 = vst.msk [vmem:[#allocation2 + $0x1a0] sm:$0xff] %vm596_vm0, %v23174_v0 }
  0x35   : > { %600 = vst.msk [vmem:[#allocation2 + $0x10] sm:$0x3] %vm599_vm1, %v23174_v0  ;;  %603 = vst.msk [vmem:[#allocation2 + $0x28] sm:$0x3] %vm599_vm1, %v23174_v0 }
  0x36   : > { %606 = vst.msk [vmem:[#allocation2 + $0x40] sm:$0x3] %vm599_vm1, %v23174_v0  ;;  %609 = vst.msk [vmem:[#allocation2 + $0x58] sm:$0x3] %vm599_vm1, %v23174_v0 }
  0x37   : > { %612 = vst.msk [vmem:[#allocation2 + $0x70] sm:$0x3] %vm599_vm1, %v23174_v0  ;;  %615 = vst.msk [vmem:[#allocation2 + $0x88] sm:$0x3] %vm599_vm1, %v23174_v0 }
  0x38   : > { %618 = vst.msk [vmem:[#allocation2 + $0xa0] sm:$0x3] %vm599_vm1, %v23174_v0  ;;  %621 = vst.msk [vmem:[#allocation2 + $0xb8] sm:$0x3] %vm599_vm1, %v23174_v0 }
  0x39   : > { %624 = vst.msk [vmem:[#allocation2 + $0xd0] sm:$0x3] %vm599_vm1, %v23174_v0  ;;  %627 = vst.msk [vmem:[#allocation2 + $0xe8] sm:$0x3] %vm599_vm1, %v23174_v0 }
  0x3a   : > { %630 = vst.msk [vmem:[#allocation2 + $0x100] sm:$0x3] %vm599_vm1, %v23174_v0  ;;  %633 = vst.msk [vmem:[#allocation2 + $0x118] sm:$0x3] %vm599_vm1, %v23174_v0 }
  0x3b   : > { %636 = vst.msk [vmem:[#allocation2 + $0x130] sm:$0x3] %vm599_vm1, %v23174_v0  ;;  %639 = vst.msk [vmem:[#allocation2 + $0x148] sm:$0x3] %vm599_vm1, %v23174_v0 }
  0x3c   : > { %642 = vst.msk [vmem:[#allocation2 + $0x160] sm:$0x3] %vm599_vm1, %v23174_v0  ;;  %645 = vst.msk [vmem:[#allocation2 + $0x178] sm:$0x3] %vm599_vm1, %v23174_v0 }
  0x3d   : > { %648 = vst.msk [vmem:[#allocation2 + $0x190] sm:$0x3] %vm599_vm1, %v23174_v0  ;;  %651 = vst.msk [vmem:[#allocation2 + $0x1a8] sm:$0x3] %vm599_vm1, %v23174_v0 }
  0x3e PF: > { %v15872_v1 = vld [vmem:[%s23291_s28 + $0x8] sm:$0x3f]  ;;  %vm816_vm2 = vcmask 1045504   ;;  %v23393_v2 = vld [vmem:[%s23291_s28 + $0x20] sm:$0x3f]  ;;  %vm719_vm3 = vcmask 48128  }
  0x3f   : > { %v685_v3 = vld [vmem:[%s23296_s17 + $0x1] sm:$0xff]  ;;  %18852 = vmatprep.subr.msk.mxu1 %vm816_vm2, %v15872_v1  ;;  %19052 = vmatprep.subr.msk.mxu0 %vm816_vm2, %v23393_v2  ;;  %v16039_v4 = vld [vmem:[%s23296_s17 + $0x19] sm:$0xff]  ;;  %v686_v5 = vld [vmem:[%s23296_s17 + $0x9] sm:$0xff]  ;;  %s28495_s18 = sld [smem:[#allocation117_spill]]  ;;  %s24455_s15 = smov 0  }
  0x40   : > { %v684_v6 = vld [vmem:[%s23291_s28] sm:$0x3f]  ;;  %18853 = vmatpush3.msk.msra.mxu1 %vm816_vm2, %v15872_v1  ;;  %18854 = vmatprep.mubr.msk.f32.mxu1 %vm719_vm3, %v685_v3  ;;  %v16137_v8 = vld [vmem:[%s23291_s28 + $0x28] sm:$0x3f]  ;;  %v23412_v9 = vld [vmem:[%s23296_s17 + $0x31] sm:$0xff] }
  0x41   : > { %v16040_v7 = vld [vmem:[%s23296_s17 + $0x21] sm:$0xff]  ;;  %19053 = vmatpush3.msk.msra.mxu0 %vm816_vm2, %v23393_v2  ;;  %19054 = vmatprep.mubr.msk.f32.mxu0 %vm719_vm3, %v16039_v4  ;;  %v23419_v10 = vld [vmem:[%s23296_s17 + $0x39] sm:$0xff]  ;;  %v23425_v11 = vld [vmem:[%s23296_s17 + $0x49] sm:$0xff] }
  0x42   : > { %18855 = vmatmul.mubr.msk.f32.vlgmr.msra.gmra.mrb[0].mxu1 %vm719_vm3, %v686_v5  ;;  %18902 = vmatprep.subr.msk.mxu1 %vm816_vm2, %v684_v6  ;;  %v16203_v12 = vld [vmem:[%s23291_s28 + $0x30] sm:$0x3f]  ;;  %v23440_v14 = vld [vmem:[%s23296_s17 + $0x61] sm:$0xff]  ;;  %v23454_v16 = vld [vmem:[%s23296_s17 + $0x79] sm:$0xff] }
  0x43   : > { %19055 = vmatmul.mubr.msk.f32.vlgmr.msra.gmra.mrb[0].mxu0 %vm719_vm3, %v16040_v7  ;;  %19102 = vmatprep.subr.msk.mxu0 %vm816_vm2, %v16137_v8  ;;  %v23436_v13 = vld [vmem:[%s23296_s17 + $0x51] sm:$0xff]  ;;  %v23451_v15 = vld [vmem:[%s23296_s17 + $0x69] sm:$0xff]  ;;  %v23465_v17 = vld [vmem:[%s23296_s17 + $0x81] sm:$0xff] }
  0x44   : > { %18903 = vmatpush3.msk.msra.mxu1 %vm816_vm2, %v684_v6  ;;  %19103 = vmatpush3.msk.msra.mxu0 %vm816_vm2, %v16137_v8  ;;  %v23468_v18 = vld [vmem:[%s23291_s28 + $0x10] sm:$0x3f]  ;;  %v23484_v20 = vld [vmem:[%s23296_s17 + $0x99] sm:$0xff]  ;;  %v23501_v23 = vld [vmem:[%s23296_s17 + $0xc1] sm:$0xff] }
  0x45   : > { %18857 = vmatprep.mubr.msk.f32.mxu1 %vm719_vm3, %v16039_v4  ;;  %19057 = vmatprep.mubr.msk.f32.mxu0 %vm719_vm3, %v23412_v9  ;;  %v23471_v19 = vld [vmem:[%s23296_s17 + $0x91] sm:$0xff]  ;;  %v23487_v21 = vld [vmem:[%s23296_s17 + $0xa9] sm:$0xff]  ;;  %v23515_v25 = vld [vmem:[%s23296_s17 + $0x1a] sm:$0xff] }
  0x46   : > { %18858 = vmatmul.mubr.msk.f32.gmra.mrb[2].mxu1 %vm719_vm3, %v16040_v7  ;;  %19152 = vmatprep.subr.msk.mxu0 %vm816_vm2, %v16203_v12  ;;  %v23498_v22 = vld [vmem:[%s23296_s17 + $0xb1] sm:$0xff]  ;;  %v23512_v24 = vld [vmem:[%s23296_s17 + $0xc9] sm:$0xff]  ;;  %v23529_v27 = vld [vmem:[%s23296_s17 + $0xd9] sm:$0xff] }
  0x47   : > { %19058 = vmatmul.mubr.msk.f32.gmra.mrb[2].mxu0 %vm719_vm3, %v23419_v10  ;;  %18860 = vmatprep.mubr.msk.f32.mxu1 %vm719_vm3, %v23412_v9  ;;  %v23526_v26 = vld [vmem:[%s23296_s17 + $0x22] sm:$0xff]  ;;  %v23532_v28 = vld [vmem:[%s23296_s17 + $0x32] sm:$0xff]  ;;  %v23550_v31 = vld [vmem:[%s23296_s17 + $0x3a] sm:$0xff] }
  0x48   : > { %19060 = vmatprep.mubr.msk.f32.mxu0 %vm719_vm3, %v23425_v11  ;;  %18952 = vmatprep.subr.msk.mxu1 %vm816_vm2, %v23468_v18  ;;  %v23537_v29 = vld [vmem:[%s23291_s28 + $0x38] sm:$0x3f]  ;;  %v23544_v30 = vld [vmem:[%s23296_s17 + $0xe1] sm:$0xff]  ;;  %v23556_v33 = vld [vmem:[%s23296_s17 + $0x4a] sm:$0xff] }
  0x49   : > { %28431 = vst [vmem:[#allocation9_spill] sm:$0xff] %v23544_v30  ;;  %v23553_v32 = vld [vmem:[%s23296_s17 + $0xf1] sm:$0xff]  ;;  %v23567_v34 = vld [vmem:[%s23296_s17 + $0xf9] sm:$0xff]  ;;  %v23575_v36 = vld [vmem:[%s23296_s17 + $0x109] sm:$0xff] }
  0x4a   : > { %18861 = vmatmul.mubr.msk.f32.gmra.mrb[4].mxu1 %vm719_vm3, %v23419_v10  ;;  %28432 = vst [vmem:[#allocation10_spill] sm:$0xff] %v23553_v32  ;;  %28433 = vst [vmem:[#allocation11_spill] sm:$0xff] %v23567_v34  ;;  %v23572_v35 = vld [vmem:[%s23296_s17 + $0x52] sm:$0xff]  ;;  %v23578_v37 = vld [vmem:[%s23296_s17 + $0x62] sm:$0xff] }
  0x4b   : > { %19061 = vmatmul.mubr.msk.f32.gmra.mrb[4].mxu0 %vm719_vm3, %v23436_v13  ;;  %18863 = vmatprep.mubr.msk.f32.mxu1 %vm719_vm3, %v23425_v11  ;;  %28434 = vst [vmem:[#allocation12_spill] sm:$0xff] %v23575_v36  ;;  %v23587_v38 = vld [vmem:[%s23296_s17 + $0x111] sm:$0xff]  ;;  %v23595_v40 = vld [vmem:[%s23296_s17 + $0x121] sm:$0xff]  ;;  %v23607_v42 = vld [vmem:[%s23296_s17 + $0x129] sm:$0xff] }
  0x4c   : > { %19063 = vmatprep.mubr.msk.f32.mxu0 %vm719_vm3, %v23440_v14  ;;  %28435 = vst [vmem:[#allocation13_spill] sm:$0xff] %v23587_v38  ;;  %v23592_v39 = vld [vmem:[%s23296_s17 + $0x6a] sm:$0xff]  ;;  %28436 = vst [vmem:[#allocation14_spill] sm:$0xff] %v23595_v40  ;;  %v23598_v41 = vld [vmem:[%s23296_s17 + $0x7a] sm:$0xff] }
  0x4d   : > { %28437 = vst [vmem:[#allocation15_spill] sm:$0xff] %v23607_v42  ;;  %v23612_v43 = vld [vmem:[%s23296_s17 + $0x82] sm:$0xff]  ;;  %v23615_v44 = vld [vmem:[%s23296_s17 + $0x139] sm:$0xff]  ;;  %v23635_v48 = vld [vmem:[%s23296_s17 + $0x151] sm:$0xff] }
  0x4e   : > { %18864 = vmatmul.mubr.msk.f32.gmra.mrb[6].mxu1 %vm719_vm3, %v23436_v13  ;;  %28438 = vst [vmem:[#allocation16_spill] sm:$0xff] %v23615_v44  ;;  %v23618_v45 = vld [vmem:[%s23296_s17 + $0x92] sm:$0xff]  ;;  %v23627_v46 = vld [vmem:[%s23296_s17 + $0x141] sm:$0xff]  ;;  %28440 = vst [vmem:[#allocation18_spill] sm:$0xff] %v23635_v48 }
  0x4f   : > { %19064 = vmatmul.mubr.msk.f32.gmra.mrb[6].mxu0 %vm719_vm3, %v23451_v15  ;;  %18866 = vmatprep.mubr.msk.f32.mxu1 %vm719_vm3, %v23440_v14  ;;  %28439 = vst [vmem:[#allocation17_spill] sm:$0xff] %v23627_v46  ;;  %v23632_v47 = vld [vmem:[%s23296_s17 + $0x9a] sm:$0xff]  ;;  %v23638_v49 = vld [vmem:[%s23296_s17 + $0xaa] sm:$0xff]  ;;  %v23652_v51 = vld [vmem:[%s23296_s17 + $0xb2] sm:$0xff] }
  0x50   : > { %19066 = vmatprep.mubr.msk.f32.mxu0 %vm719_vm3, %v23454_v16  ;;  %v23647_v50 = vld [vmem:[%s23296_s17 + $0x159] sm:$0xff]  ;;  %v23655_v52 = vld [vmem:[%s23296_s17 + $0x169] sm:$0xff]  ;;  %v23667_v54 = vld [vmem:[%s23296_s17 + $0x171] sm:$0xff] }
  0x51   : > { %28441 = vst [vmem:[#allocation19_spill] sm:$0xff] %v23647_v50  ;;  %28442 = vst [vmem:[#allocation20_spill] sm:$0xff] %v23655_v52  ;;  %v23658_v53 = vld [vmem:[%s23296_s17 + $0xc2] sm:$0xff]  ;;  %v23672_v55 = vld [vmem:[%s23296_s17 + $0xca] sm:$0xff] }
  0x52   : > { %18867 = vmatmul.mubr.msk.f32.gmra.mrb[8].mxu1 %vm719_vm3, %v23451_v15  ;;  %28443 = vst [vmem:[#allocation21_spill] sm:$0xff] %v23667_v54  ;;  %v652_v56 = vld [vmem:[%s23296_s17] sm:$0xff]  ;;  %v653_v58 = vld [vmem:[%s23296_s17 + $0x8] sm:$0xff]  ;;  %v23690_v60 = vld [vmem:[%s23296_s17 + $0x18] sm:$0xff] }
  0x53   : > { %19067 = vmatmul.mubr.msk.f32.gmra.mrb[8].mxu0 %vm719_vm3, %v23465_v17  ;;  %18869 = vmatprep.mubr.msk.f32.mxu1 %vm719_vm3, %v23454_v16  ;;  %v23676_v57 = vld [vmem:[%s23296_s17 + $0xda] sm:$0xff]  ;;  %v23687_v59 = vld [vmem:[%s23296_s17 + $0xe2] sm:$0xff]  ;;  %28444 = vst [vmem:[#allocation22_spill] sm:$0xff] %v23690_v60  ;;  %v23693_v61 = vld [vmem:[%s23296_s17 + $0xf2] sm:$0xff] }
  0x54   : > { %19069 = vmatprep.mubr.msk.f32.mxu0 %vm719_vm3, %v23471_v19  ;;  %v23697_v62 = vld [vmem:[%s23291_s28 + $0x18] sm:$0x3f]  ;;  %v23704_v63 = vld [vmem:[%s23296_s17 + $0x20] sm:$0xff]  ;;  %v23714_v1 = vld [vmem:[%s23296_s17 + $0x30] sm:$0xff] }
  0x55   : > { %28445 = vst [vmem:[#allocation23_spill] sm:$0xff] %v23704_v63  ;;  %v23711_v0 = vld [vmem:[%s23296_s17 + $0xfa] sm:$0xff]  ;;  %28446 = vst [vmem:[#allocation24_spill] sm:$0xff] %v23714_v1  ;;  %v23717_v3 = vld [vmem:[%s23296_s17 + $0x10a] sm:$0xff] }
  0x56   : > { %18870 = vmatmul.mubr.msk.f32.gmra.mrb[10].mxu1 %vm719_vm3, %v23465_v17  ;;  %v23728_v4 = vld [vmem:[%s23296_s17 + $0x38] sm:$0xff]  ;;  %v23736_v6 = vld [vmem:[%s23296_s17 + $0x48] sm:$0xff]  ;;  %v23748_v8 = vld [vmem:[%s23296_s17 + $0x50] sm:$0xff] }
  0x57   : > { %19070 = vmatmul.mubr.msk.f32.gmra.mrb[10].mxu0 %vm719_vm3, %v23484_v20  ;;  %18872 = vmatprep.mubr.msk.f32.mxu1 %vm719_vm3, %v23471_v19  ;;  %28447 = vst [vmem:[#allocation25_spill] sm:$0xff] %v23728_v4  ;;  %v23733_v5 = vld [vmem:[%s23296_s17 + $0x112] sm:$0xff]  ;;  %28448 = vst [vmem:[#allocation26_spill] sm:$0xff] %v23736_v6  ;;  %v23739_v7 = vld [vmem:[%s23296_s17 + $0x122] sm:$0xff] }
  0x58   : > { %19072 = vmatprep.mubr.msk.f32.mxu0 %vm719_vm3, %v23487_v21  ;;  %28449 = vst [vmem:[#allocation27_spill] sm:$0xff] %v23748_v8 }
  0x5a   : > { %18873 = vmatmul.mubr.msk.f32.gmra.mrb[12].mxu1 %vm719_vm3, %v23484_v20 }
  0x5b   : > { %19073 = vmatmul.mubr.msk.f32.gmra.mrb[12].mxu0 %vm719_vm3, %v23498_v22  ;;  %18875 = vmatprep.mubr.msk.f32.mxu1 %vm719_vm3, %v23487_v21 }
  0x5c   : > { %19075 = vmatprep.mubr.msk.f32.mxu0 %vm719_vm3, %v23501_v23 }
  0x5e   : > { %18876 = vmatmul.mubr.msk.f32.gmra.mrb[14].mxu1 %vm719_vm3, %v23498_v22 }
  0x5f   : > { %19076 = vmatmul.mubr.msk.f32.gmra.mrb[14].mxu0 %vm719_vm3, %v23512_v24  ;;  %18878 = vmatprep.mubr.msk.f32.mxu1 %vm719_vm3, %v23501_v23 }
  0x60   : > { %19104 = vmatprep.mubr.msk.f32.mxu0 %vm719_vm3, %v23515_v25 }
  0x62   : > { %18879 = vmatmul.mubr.msk.f32.gmra.mrb[16].mxu1 %vm719_vm3, %v23512_v24 }
  0x63   : > { %19105 = vmatmul.mubr.msk.f32.vlgmr.msra.gmra.mrb[0].mxu0 %vm719_vm3, %v23526_v26  ;;  %18881 = vmatprep.mubr.msk.f32.mxu1 %vm719_vm3, %v23529_v27 }
  0x64   : > { %19153 = vmatpush3.msk.msra.mxu0 %vm816_vm2, %v16203_v12  ;;  %19107 = vmatprep.mubr.msk.f32.mxu0 %vm719_vm3, %v23532_v28  ;;  %v23753_v12 = vld [vmem:[%s23296_s17 + $0x12a] sm:$0xff] }
  0x65   : > { %19202 = vmatprep.subr.msk.mxu0 %vm816_vm2, %v23537_v29 }
  0x66   : > { %18882 = vmatmul.mubr.msk.f32.gmra.mrb[18].mxu1 %vm719_vm3, %v23544_v30  ;;  %v23845_v30 = vld [vmem:[%s23296_s17 + $0xc8] sm:$0xff] }
  0x67   : > { %19108 = vmatmul.mubr.msk.f32.gmra.mrb[2].mxu0 %vm719_vm3, %v23550_v31  ;;  %18884 = vmatprep.mubr.msk.f32.mxu1 %vm719_vm3, %v23553_v32  ;;  %v23833_v32 = vld [vmem:[%s23296_s17 + $0x18a] sm:$0xff] }
  0x68   : > { %19110 = vmatprep.mubr.msk.f32.mxu0 %vm719_vm3, %v23556_v33  ;;  %28460 = vst [vmem:[#allocation38_spill] sm:$0xff] %v23833_v32 }
  0x6a   : > { %18885 = vmatmul.mubr.msk.f32.gmra.mrb[20].mxu1 %vm719_vm3, %v23567_v34  ;;  %v23819_v34 = vld [vmem:[%s23296_s17 + $0x182] sm:$0xff] }
  0x6b   : > { %19111 = vmatmul.mubr.msk.f32.gmra.mrb[4].mxu0 %vm719_vm3, %v23572_v35  ;;  %18887 = vmatprep.mubr.msk.f32.mxu1 %vm719_vm3, %v23575_v36  ;;  %v23816_v36 = vld [vmem:[%s23296_s17 + $0xa8] sm:$0xff]  ;;  %28458 = vst [vmem:[#allocation36_spill] sm:$0xff] %v23819_v34 }
  0x6c   : > { %19113 = vmatprep.mubr.msk.f32.mxu0 %vm719_vm3, %v23578_v37  ;;  %28457 = vst [vmem:[#allocation35_spill] sm:$0xff] %v23816_v36 }
  0x6e   : > { %18888 = vmatmul.mubr.msk.f32.gmra.mrb[22].mxu1 %vm719_vm3, %v23587_v38  ;;  %v23813_v38 = vld [vmem:[%s23296_s17 + $0x172] sm:$0xff] }
  0x6f   : > { %19114 = vmatmul.mubr.msk.f32.gmra.mrb[6].mxu0 %vm719_vm3, %v23592_v39  ;;  %18890 = vmatprep.mubr.msk.f32.mxu1 %vm719_vm3, %v23595_v40  ;;  %v23808_v40 = vld [vmem:[%s23296_s17 + $0x98] sm:$0xff]  ;;  %28456 = vst [vmem:[#allocation34_spill] sm:$0xff] %v23813_v38 }
  0x70   : > { %19116 = vmatprep.mubr.msk.f32.mxu0 %vm719_vm3, %v23598_v41  ;;  %28455 = vst [vmem:[#allocation33_spill] sm:$0xff] %v23808_v40 }
  0x72   : > { %18891 = vmatmul.mubr.msk.f32.gmra.mrb[24].mxu1 %vm719_vm3, %v23607_v42  ;;  %v23799_v42 = vld [vmem:[%s23296_s17 + $0x16a] sm:$0xff] }
  0x73   : > { %19117 = vmatmul.mubr.msk.f32.gmra.mrb[8].mxu0 %vm719_vm3, %v23612_v43  ;;  %18893 = vmatprep.mubr.msk.f32.mxu1 %vm719_vm3, %v23615_v44  ;;  %v23796_v44 = vld [vmem:[%s23296_s17 + $0x90] sm:$0xff] }
  0x74   : > { %19119 = vmatprep.mubr.msk.f32.mxu0 %vm719_vm3, %v23618_v45  ;;  %28454 = vst [vmem:[#allocation32_spill] sm:$0xff] %v23796_v44 }
  0x76   : > { %18894 = vmatmul.mubr.msk.f32.gmra.mrb[26].mxu1 %vm719_vm3, %v23627_v46  ;;  %v23793_v46 = vld [vmem:[%s23296_s17 + $0x15a] sm:$0xff] }
  0x77   : > { %19120 = vmatmul.mubr.msk.f32.gmra.mrb[10].mxu0 %vm719_vm3, %v23632_v47  ;;  %18896 = vmatprep.mubr.msk.f32.mxu1 %vm719_vm3, %v23635_v48  ;;  %v23788_v48 = vld [vmem:[%s23296_s17 + $0x80] sm:$0xff] }
  0x78   : > { %19122 = vmatprep.mubr.msk.f32.mxu0 %vm719_vm3, %v23638_v49  ;;  %28453 = vst [vmem:[#allocation31_spill] sm:$0xff] %v23788_v48 }
  0x7a   : > { %18897 = vmatmul.mubr.msk.f32.gmra.mrb[28].mxu1 %vm719_vm3, %v23647_v50  ;;  %v23779_v50 = vld [vmem:[%s23296_s17 + $0x152] sm:$0xff] }
  0x7b   : > { %19123 = vmatmul.mubr.msk.f32.gmra.mrb[12].mxu0 %vm719_vm3, %v23652_v51  ;;  %18899 = vmatprep.mubr.msk.f32.mxu1 %vm719_vm3, %v23655_v52  ;;  %v23776_v52 = vld [vmem:[%s23296_s17 + $0x78] sm:$0xff] }
  0x7c   : > { %19125 = vmatprep.mubr.msk.f32.mxu0 %vm719_vm3, %v23658_v53  ;;  %28452 = vst [vmem:[#allocation30_spill] sm:$0xff] %v23776_v52 }
  0x7e   : > { %18900 = vmatmul.mubr.msk.f32.gmra.mrb[30].mxu1 %vm719_vm3, %v23667_v54  ;;  %v23773_v54 = vld [vmem:[%s23296_s17 + $0x142] sm:$0xff] }
  0x7f   : > { %19126 = vmatmul.mubr.msk.f32.gmra.mrb[14].mxu0 %vm719_vm3, %v23672_v55  ;;  %18904 = vmatprep.mubr.msk.f32.mxu1 %vm719_vm3, %v652_v56  ;;  %v23759_v56 = vld [vmem:[%s23296_s17 + $0x13a] sm:$0xff] }
  0x80   : > { %19128 = vmatprep.mubr.msk.f32.mxu0 %vm719_vm3, %v23676_v57 }
  0x82   : > { %18905 = vmatmul.mubr.msk.f32.vlgmr.msra.gmra.mrb[0].mxu1 %vm719_vm3, %v653_v58  ;;  %v23768_v58 = vld [vmem:[%s23296_s17 + $0x68] sm:$0xff] }
  0x83   : > { %19129 = vmatmul.mubr.msk.f32.gmra.mrb[16].mxu0 %vm719_vm3, %v23687_v59  ;;  %18953 = vmatpush3.msk.msra.mxu1 %vm816_vm2, %v23468_v18  ;;  %v23756_v18 = vld [vmem:[%s23296_s17 + $0x60] sm:$0xff]  ;;  %28451 = vst [vmem:[#allocation29_spill] sm:$0xff] %v23768_v58 }
  0x84   : > { %18907 = vmatprep.mubr.msk.f32.mxu1 %vm719_vm3, %v23690_v60  ;;  %19131 = vmatprep.mubr.msk.f32.mxu0 %vm719_vm3, %v23693_v61  ;;  %28450 = vst [vmem:[#allocation28_spill] sm:$0xff] %v23756_v18  ;;  %v23836_v60 = vld [vmem:[%s23296_s17 + $0xc0] sm:$0xff] }
  0x85   : > { %19002 = vmatprep.subr.msk.mxu1 %vm816_vm2, %v23697_v62  ;;  %28461 = vst [vmem:[#allocation39_spill] sm:$0xff] %v23836_v60 }
  0x86   : > { %18908 = vmatmul.mubr.msk.f32.gmra.mrb[2].mxu1 %vm719_vm3, %v23704_v63  ;;  %v23828_v63 = vld [vmem:[%s23296_s17 + $0xb0] sm:$0xff] }
  0x87   : > { %19132 = vmatmul.mubr.msk.f32.gmra.mrb[18].mxu0 %vm719_vm3, %v23711_v0  ;;  %18910 = vmatprep.mubr.msk.f32.mxu1 %vm719_vm3, %v23714_v1  ;;  %28459 = vst [vmem:[#allocation37_spill] sm:$0xff] %v23828_v63 }
  0x88   : > { %19134 = vmatprep.mubr.msk.f32.mxu0 %vm719_vm3, %v23717_v3 }
  0x8a   : > { %18911 = vmatmul.mubr.msk.f32.gmra.mrb[4].mxu1 %vm719_vm3, %v23728_v4 }
  0x8b   : > { %19135 = vmatmul.mubr.msk.f32.gmra.mrb[20].mxu0 %vm719_vm3, %v23733_v5  ;;  %18913 = vmatprep.mubr.msk.f32.mxu1 %vm719_vm3, %v23736_v6 }
  0x8c   : > { %19137 = vmatprep.mubr.msk.f32.mxu0 %vm719_vm3, %v23739_v7 }
  0x8e   : > { %18914 = vmatmul.mubr.msk.f32.gmra.mrb[6].mxu1 %vm719_vm3, %v23748_v8 }
  0x8f   : > { %19138 = vmatmul.mubr.msk.f32.gmra.mrb[22].mxu0 %vm719_vm3, %v23753_v12  ;;  %18916 = vmatprep.mubr.msk.f32.mxu1 %vm719_vm3, %v23756_v18 }
  0x90   : > { %19140 = vmatprep.mubr.msk.f32.mxu0 %vm719_vm3, %v23759_v56 }
  0x92   : > { %18917 = vmatmul.mubr.msk.f32.gmra.mrb[8].mxu1 %vm719_vm3, %v23768_v58 }
  0x93   : > { %19141 = vmatmul.mubr.msk.f32.gmra.mrb[24].mxu0 %vm719_vm3, %v23773_v54  ;;  %18919 = vmatprep.mubr.msk.f32.mxu1 %vm719_vm3, %v23776_v52 }
  0x94   : > { %19143 = vmatprep.mubr.msk.f32.mxu0 %vm719_vm3, %v23779_v50 }
  0x96   : > { %18920 = vmatmul.mubr.msk.f32.gmra.mrb[10].mxu1 %vm719_vm3, %v23788_v48 }
  0x97   : > { %19144 = vmatmul.mubr.msk.f32.gmra.mrb[26].mxu0 %vm719_vm3, %v23793_v46  ;;  %18922 = vmatprep.mubr.msk.f32.mxu1 %vm719_vm3, %v23796_v44 }
  0x98   : > { %19146 = vmatprep.mubr.msk.f32.mxu0 %vm719_vm3, %v23799_v42 }
  0x9a   : > { %18923 = vmatmul.mubr.msk.f32.gmra.mrb[12].mxu1 %vm719_vm3, %v23808_v40 }
  0x9b   : > { %19147 = vmatmul.mubr.msk.f32.gmra.mrb[28].mxu0 %vm719_vm3, %v23813_v38  ;;  %18925 = vmatprep.mubr.msk.f32.mxu1 %vm719_vm3, %v23816_v36  ;;  %v23855_v38 = vld [vmem:[%s23291_s28 + $0x40] sm:$0x3f]  ;;  %s28496_s28 = scalar_lea.vmem %s28495_s18, %s23269_s24 }
  0x9c   : > { %19149 = vmatprep.mubr.msk.f32.mxu0 %vm719_vm3, %v23819_v34  ;;  %v23850_v34 = vld [vmem:[%s23296_s17 + $0xd8] sm:$0xff] }
  0x9e   : > { %18926 = vmatmul.mubr.msk.f32.gmra.mrb[14].mxu1 %vm719_vm3, %v23828_v63 }
  0x9f   : > { %19150 = vmatmul.mubr.msk.f32.gmra.mrb[30].mxu0 %vm719_vm3, %v23833_v32  ;;  %18928 = vmatprep.mubr.msk.f32.mxu1 %vm719_vm3, %v23836_v60  ;;  %v23862_v32 = vld [vmem:[%s23296_s17 + $0xe0] sm:$0xff] }
  0xa0   : > { %19154 = vmatprep.mubr.msk.f32.mxu0 %vm719_vm3, %v23714_v1  ;;  %v23869_v1 = vld [vmem:[%s23296_s17 + $0xf0] sm:$0xff] }
  0xa2   : > { %18929 = vmatmul.mubr.msk.f32.gmra.mrb[16].mxu1 %vm719_vm3, %v23845_v30 }
  0xa3   : > { %19155 = vmatmul.mubr.msk.f32.vlgmr.msra.gmra.mrb[0].mxu0 %vm719_vm3, %v23728_v4  ;;  %18931 = vmatprep.mubr.msk.f32.mxu1 %vm719_vm3, %v23850_v34  ;;  %v23899_v4 = vld [vmem:[%s23296_s17 + $0x120] sm:$0xff] }
  0xa4   : > { %19203 = vmatpush3.msk.msra.mxu0 %vm816_vm2, %v23537_v29  ;;  %19157 = vmatprep.mubr.msk.f32.mxu0 %vm719_vm3, %v23736_v6  ;;  %v23880_v29 = vld [vmem:[%s23296_s17 + $0xf8] sm:$0xff]  ;;  %v23885_v6 = vld [vmem:[%s23296_s17 + $0x108] sm:$0xff] }
  0xa5   : > { %19252 = vmatprep.subr.msk.mxu0 %vm816_vm2, %v23855_v38 }
  0xa6   : > { %18932 = vmatmul.mubr.msk.f32.gmra.mrb[18].mxu1 %vm719_vm3, %v23862_v32 }
  0xa7   : > { %19158 = vmatmul.mubr.msk.f32.gmra.mrb[2].mxu0 %vm719_vm3, %v23748_v8  ;;  %18934 = vmatprep.mubr.msk.f32.mxu1 %vm719_vm3, %v23869_v1  ;;  %v23894_v8 = vld [vmem:[%s23296_s17 + $0x110] sm:$0xff] }
  0xa8   : > { %19160 = vmatprep.mubr.msk.f32.mxu0 %vm719_vm3, %v23756_v18  ;;  %v23913_v18 = vld [vmem:[%s23296_s17 + $0x138] sm:$0xff] }
  0xaa   : > { %18935 = vmatmul.mubr.msk.f32.gmra.mrb[20].mxu1 %vm719_vm3, %v23880_v29 }
  0xab   : > { %19161 = vmatmul.mubr.msk.f32.gmra.mrb[4].mxu0 %vm719_vm3, %v23768_v58  ;;  %18937 = vmatprep.mubr.msk.f32.mxu1 %vm719_vm3, %v23885_v6  ;;  %v23908_v58 = vld [vmem:[%s23296_s17 + $0x128] sm:$0xff] }
  0xac   : > { %19163 = vmatprep.mubr.msk.f32.mxu0 %vm719_vm3, %v23776_v52  ;;  %v23927_v52 = vld [vmem:[%s23296_s17 + $0x150] sm:$0xff] }
  0xae   : > { %18938 = vmatmul.mubr.msk.f32.gmra.mrb[22].mxu1 %vm719_vm3, %v23894_v8 }
  0xaf   : > { %19164 = vmatmul.mubr.msk.f32.gmra.mrb[6].mxu0 %vm719_vm3, %v23788_v48  ;;  %18940 = vmatprep.mubr.msk.f32.mxu1 %vm719_vm3, %v23899_v4  ;;  %v23922_v48 = vld [vmem:[%s23296_s17 + $0x140] sm:$0xff] }
  0xb0   : > { %19166 = vmatprep.mubr.msk.f32.mxu0 %vm719_vm3, %v23796_v44  ;;  %v23941_v44 = vld [vmem:[%s23296_s17 + $0x168] sm:$0xff] }
  0xb2   : > { %18941 = vmatmul.mubr.msk.f32.gmra.mrb[24].mxu1 %vm719_vm3, %v23908_v58 }
  0xb3   : > { %19167 = vmatmul.mubr.msk.f32.gmra.mrb[8].mxu0 %vm719_vm3, %v23808_v40  ;;  %18943 = vmatprep.mubr.msk.f32.mxu1 %vm719_vm3, %v23913_v18  ;;  %v23936_v40 = vld [vmem:[%s23296_s17 + $0x158] sm:$0xff] }
  0xb4   : > { %19169 = vmatprep.mubr.msk.f32.mxu0 %vm719_vm3, %v23816_v36  ;;  %v1369_v36 = vld [vmem:[%s23296_s17 + $0x2] sm:$0xff] }
  0xb6   : > { %18944 = vmatmul.mubr.msk.f32.gmra.mrb[26].mxu1 %vm719_vm3, %v23922_v48 }
  0xb7   : > { %19170 = vmatmul.mubr.msk.f32.gmra.mrb[10].mxu0 %vm719_vm3, %v23828_v63  ;;  %18946 = vmatprep.mubr.msk.f32.mxu1 %vm719_vm3, %v23927_v52  ;;  %v23950_v63 = vld [vmem:[%s23296_s17 + $0x170] sm:$0xff] }
  0xb8   : > { %19172 = vmatprep.mubr.msk.f32.mxu0 %vm719_vm3, %v23836_v60  ;;  %v1370_v60 = vld [vmem:[%s23296_s17 + $0xa] sm:$0xff] }
  0xba   : > { %18947 = vmatmul.mubr.msk.f32.gmra.mrb[28].mxu1 %vm719_vm3, %v23936_v40 }
  0xbb   : > { %19173 = vmatmul.mubr.msk.f32.gmra.mrb[12].mxu0 %vm719_vm3, %v23845_v30  ;;  %18949 = vmatprep.mubr.msk.f32.mxu1 %vm719_vm3, %v23941_v44 }
  0xbc   : > { %19175 = vmatprep.mubr.msk.f32.mxu0 %vm719_vm3, %v23850_v34 }
  0xbe   : > { %18950 = vmatmul.mubr.msk.f32.gmra.mrb[30].mxu1 %vm719_vm3, %v23950_v63 }
  0xbf   : > { %19176 = vmatmul.mubr.msk.f32.gmra.mrb[14].mxu0 %vm719_vm3, %v23862_v32  ;;  %18954 = vmatprep.mubr.msk.f32.mxu1 %vm719_vm3, %v1369_v36  ;;  %v16201_v36 = vld [vmem:[%s23296_s17 + $0x198] sm:$0xff] }
  0xc0   : > { %19178 = vmatprep.mubr.msk.f32.mxu0 %vm719_vm3, %v23869_v1 }
  0xc2   : > { %18955 = vmatmul.mubr.msk.f32.vlgmr.msra.gmra.mrb[0].mxu1 %vm719_vm3, %v1370_v60  ;;  %v16202_v60 = vld [vmem:[%s23296_s17 + $0x1a0] sm:$0xff] }
  0xc3   : > { %19179 = vmatmul.mubr.msk.f32.gmra.mrb[16].mxu0 %vm719_vm3, %v23880_v29  ;;  %19003 = vmatpush3.msk.msra.mxu1 %vm816_vm2, %v23697_v62  ;;  %v28478_v62 = vld [vmem:[#allocation29_spill] sm:$0xff] }
  0xc4   : > { %18957 = vmatprep.mubr.msk.f32.mxu1 %vm719_vm3, %v23515_v25  ;;  %19181 = vmatprep.mubr.msk.f32.mxu0 %vm719_vm3, %v23885_v6  ;;  %v24007_v25 = vld [vmem:[%s23296_s17 + $0x180] sm:$0xff] }
  0xc5   : > { %21462 = vmatprep.subr.msk.mxu1 %vm816_vm2, %v23393_v2 }
  0xc6   : > { %18958 = vmatmul.mubr.msk.f32.gmra.mrb[2].mxu1 %vm719_vm3, %v23526_v26  ;;  %v24018_v26 = vld [vmem:[%s23296_s17 + $0x188] sm:$0xff] }
  0xc7   : > { %19182 = vmatmul.mubr.msk.f32.gmra.mrb[18].mxu0 %vm719_vm3, %v23894_v8  ;;  %18960 = vmatprep.mubr.msk.f32.mxu1 %vm719_vm3, %v23532_v28 }
  0xc8   : > { %19184 = vmatprep.mubr.msk.f32.mxu0 %vm719_vm3, %v23899_v4 }
  0xca   : > { %18961 = vmatmul.mubr.msk.f32.gmra.mrb[4].mxu1 %vm719_vm3, %v23550_v31 }
  0xcb   : > { %19185 = vmatmul.mubr.msk.f32.gmra.mrb[20].mxu0 %vm719_vm3, %v23908_v58  ;;  %18963 = vmatprep.mubr.msk.f32.mxu1 %vm719_vm3, %v23556_v33 }
  0xcc   : > { %19187 = vmatprep.mubr.msk.f32.mxu0 %vm719_vm3, %v23913_v18 }
  0xce   : > { %18964 = vmatmul.mubr.msk.f32.gmra.mrb[6].mxu1 %vm719_vm3, %v23572_v35 }
  0xcf   : > { %19188 = vmatmul.mubr.msk.f32.gmra.mrb[22].mxu0 %vm719_vm3, %v23922_v48  ;;  %18966 = vmatprep.mubr.msk.f32.mxu1 %vm719_vm3, %v23578_v37 }
  0xd0   : > { %19190 = vmatprep.mubr.msk.f32.mxu0 %vm719_vm3, %v23927_v52 }
  0xd2   : > { %18967 = vmatmul.mubr.msk.f32.gmra.mrb[8].mxu1 %vm719_vm3, %v23592_v39 }
  0xd3   : > { %19191 = vmatmul.mubr.msk.f32.gmra.mrb[24].mxu0 %vm719_vm3, %v23936_v40  ;;  %18969 = vmatprep.mubr.msk.f32.mxu1 %vm719_vm3, %v23598_v41 }
  0xd4   : > { %19193 = vmatprep.mubr.msk.f32.mxu0 %vm719_vm3, %v23941_v44 }
  0xd6   : > { %18970 = vmatmul.mubr.msk.f32.gmra.mrb[10].mxu1 %vm719_vm3, %v23612_v43 }
  0xd7   : > { %19194 = vmatmul.mubr.msk.f32.gmra.mrb[26].mxu0 %vm719_vm3, %v23950_v63  ;;  %18972 = vmatprep.mubr.msk.f32.mxu1 %vm719_vm3, %v23618_v45 }
  0xd8   : > { %19196 = vmatprep.mubr.msk.f32.mxu0 %vm719_vm3, %v24007_v25 }
  0xda   : > { %18973 = vmatmul.mubr.msk.f32.gmra.mrb[12].mxu1 %vm719_vm3, %v23632_v47 }
  0xdb   : > { %19197 = vmatmul.mubr.msk.f32.gmra.mrb[28].mxu0 %vm719_vm3, %v24018_v26  ;;  %18975 = vmatprep.mubr.msk.f32.mxu1 %vm719_vm3, %v23638_v49 }
  0xdc   : > { %19199 = vmatprep.mubr.msk.f32.mxu0 %vm719_vm3, %v16201_v36  ;;  %v28479_v36 = vld [vmem:[#allocation17_spill] sm:$0xff] }
  0xde   : > { %18976 = vmatmul.mubr.msk.f32.gmra.mrb[14].mxu1 %vm719_vm3, %v23652_v51 }
  0xdf   : > { %19200 = vmatmul.mubr.msk.f32.gmra.mrb[30].mxu0 %vm719_vm3, %v16202_v60  ;;  %18978 = vmatprep.mubr.msk.f32.mxu1 %vm719_vm3, %v23658_v53  ;;  %v28480_v60 = vld [vmem:[#allocation30_spill] sm:$0xff] }
  0xe0   : > { %19204 = vmatprep.mubr.msk.f32.mxu0 %vm719_vm3, %v23412_v9  ;;  %v28462_v9 = vld [vmem:[#allocation34_spill] sm:$0xff] }
  0xe2   : > { %18979 = vmatmul.mubr.msk.f32.gmra.mrb[16].mxu1 %vm719_vm3, %v23672_v55 }
  0xe3   : > { %19205 = vmatmul.mubr.msk.f32.vlgmr.msra.gmra.mrb[0].mxu0 %vm719_vm3, %v23419_v10  ;;  %18981 = vmatprep.mubr.msk.f32.mxu1 %vm719_vm3, %v23676_v57  ;;  %v28463_v10 = vld [vmem:[#allocation9_spill] sm:$0xff] }
  0xe4   : > { %19253 = vmatpush3.msk.msra.mxu0 %vm816_vm2, %v23855_v38  ;;  %19207 = vmatprep.mubr.msk.f32.mxu0 %vm719_vm3, %v23425_v11  ;;  %v28464_v11 = vld [vmem:[#allocation22_spill] sm:$0xff]  ;;  %v28477_v38 = vld [vmem:[#allocation16_spill] sm:$0xff] }
  0xe6   : > { %18982 = vmatmul.mubr.msk.f32.gmra.mrb[18].mxu1 %vm719_vm3, %v23687_v59 }
  0xe7   : > { %19208 = vmatmul.mubr.msk.f32.gmra.mrb[2].mxu0 %vm719_vm3, %v23436_v13  ;;  %18984 = vmatprep.mubr.msk.f32.mxu1 %vm719_vm3, %v23693_v61  ;;  %v28465_v13 = vld [vmem:[#allocation10_spill] sm:$0xff] }
  0xe8   : > { %19210 = vmatprep.mubr.msk.f32.mxu0 %vm719_vm3, %v23440_v14  ;;  %v28466_v14 = vld [vmem:[#allocation23_spill] sm:$0xff] }
  0xea   : > { %18985 = vmatmul.mubr.msk.f32.gmra.mrb[20].mxu1 %vm719_vm3, %v23711_v0 }
  0xeb   : > { %19211 = vmatmul.mubr.msk.f32.gmra.mrb[4].mxu0 %vm719_vm3, %v23451_v15  ;;  %18987 = vmatprep.mubr.msk.f32.mxu1 %vm719_vm3, %v23717_v3  ;;  %v28467_v15 = vld [vmem:[#allocation11_spill] sm:$0xff] }
  0xec   : > { %19213 = vmatprep.mubr.msk.f32.mxu0 %vm719_vm3, %v23454_v16  ;;  %v28468_v16 = vld [vmem:[#allocation24_spill] sm:$0xff] }
  0xee   : > { %18988 = vmatmul.mubr.msk.f32.gmra.mrb[22].mxu1 %vm719_vm3, %v23733_v5 }
  0xef   : > { %19214 = vmatmul.mubr.msk.f32.gmra.mrb[6].mxu0 %vm719_vm3, %v23465_v17  ;;  %18990 = vmatprep.mubr.msk.f32.mxu1 %vm719_vm3, %v23739_v7  ;;  %v28469_v17 = vld [vmem:[#allocation12_spill] sm:$0xff] }
  0xf0   : > { %19216 = vmatprep.mubr.msk.f32.mxu0 %vm719_vm3, %v23471_v19  ;;  %v28470_v19 = vld [vmem:[#allocation25_spill] sm:$0xff] }
  0xf2   : > { %18991 = vmatmul.mubr.msk.f32.gmra.mrb[24].mxu1 %vm719_vm3, %v23753_v12 }
  0xf3   : > { %19217 = vmatmul.mubr.msk.f32.gmra.mrb[8].mxu0 %vm719_vm3, %v23484_v20  ;;  %18993 = vmatprep.mubr.msk.f32.mxu1 %vm719_vm3, %v23759_v56  ;;  %v28471_v20 = vld [vmem:[#allocation13_spill] sm:$0xff] }
  0xf4   : > { %19219 = vmatprep.mubr.msk.f32.mxu0 %vm719_vm3, %v23487_v21  ;;  %v28472_v21 = vld [vmem:[#allocation26_spill] sm:$0xff] }
  0xf6   : > { %18994 = vmatmul.mubr.msk.f32.gmra.mrb[26].mxu1 %vm719_vm3, %v23773_v54 }
  0xf7   : > { %19220 = vmatmul.mubr.msk.f32.gmra.mrb[10].mxu0 %vm719_vm3, %v23498_v22  ;;  %18996 = vmatprep.mubr.msk.f32.mxu1 %vm719_vm3, %v23779_v50  ;;  %v28473_v22 = vld [vmem:[#allocation14_spill] sm:$0xff] }
  0xf8   : > { %19222 = vmatprep.mubr.msk.f32.mxu0 %vm719_vm3, %v23501_v23  ;;  %v28475_v23 = vld [vmem:[#allocation15_spill] sm:$0xff] }
  0xfa   : > { %18997 = vmatmul.mubr.msk.f32.gmra.mrb[28].mxu1 %vm719_vm3, %v23793_v46 }
  0xfb   : > { %19223 = vmatmul.mubr.msk.f32.gmra.mrb[12].mxu0 %vm719_vm3, %v23512_v24  ;;  %18999 = vmatprep.mubr.msk.f32.mxu1 %vm719_vm3, %v23799_v42  ;;  %v28476_v24 = vld [vmem:[#allocation28_spill] sm:$0xff] }
  0xfc   : > { %19225 = vmatprep.mubr.msk.f32.mxu0 %vm719_vm3, %v23529_v27 }
  0xfe   : > { %19000 = vmatmul.mubr.msk.f32.gmra.mrb[30].mxu1 %vm719_vm3, %v28462_v9  ;;  %v28489_v9 = vld [vmem:[#allocation37_spill] sm:$0xff] }
  0xff   : > { %19226 = vmatmul.mubr.msk.f32.gmra.mrb[14].mxu0 %vm719_vm3, %v28463_v10  ;;  %19004 = vmatprep.mubr.msk.f32.mxu1 %vm719_vm3, %v28464_v11  ;;  %v28481_v11 = vld [vmem:[#allocation18_spill] sm:$0xff] }
 0x100   : > { %19228 = vmatprep.mubr.msk.f32.mxu0 %vm719_vm3, %v28465_v13 }
 0x102   : > { %19005 = vmatmul.mubr.msk.f32.vlgmr.msra.gmra.mrb[0].mxu1 %vm719_vm3, %v28466_v14  ;;  %v28482_v14 = vld [vmem:[#allocation31_spill] sm:$0xff] }
 0x103   : > { %19229 = vmatmul.mubr.msk.f32.gmra.mrb[16].mxu0 %vm719_vm3, %v28467_v15  ;;  %21463 = vmatpush3.msk.msra.mxu1 %vm816_vm2, %v23393_v2  ;;  %v28474_v2 = vld [vmem:[#allocation27_spill] sm:$0xff] }
 0x104   : > { %19007 = vmatprep.mubr.msk.f32.mxu1 %vm719_vm3, %v28468_v16  ;;  %19231 = vmatprep.mubr.msk.f32.mxu0 %vm719_vm3, %v28469_v17  ;;  %v28483_v16 = vld [vmem:[#allocation19_spill] sm:$0xff] }
 0x106   : > { %19008 = vmatmul.mubr.msk.f32.gmra.mrb[2].mxu1 %vm719_vm3, %v28470_v19  ;;  %v28484_v19 = vld [vmem:[#allocation32_spill] sm:$0xff] }
 0x107   : > { %19232 = vmatmul.mubr.msk.f32.gmra.mrb[18].mxu0 %vm719_vm3, %v28471_v20  ;;  %19010 = vmatprep.mubr.msk.f32.mxu1 %vm719_vm3, %v28472_v21  ;;  %v28485_v21 = vld [vmem:[#allocation20_spill] sm:$0xff] }
 0x108   : > { %19234 = vmatprep.mubr.msk.f32.mxu0 %vm719_vm3, %v28473_v22 }
 0x10a   : > { %19011 = vmatmul.mubr.msk.f32.gmra.mrb[4].mxu1 %vm719_vm3, %v28474_v2  ;;  %v24145_v2 = vld [vmem:[%s23296_s17 + $0x181] sm:$0xff] }
 0x10b   : > { %19235 = vmatmul.mubr.msk.f32.gmra.mrb[20].mxu0 %vm719_vm3, %v28475_v23  ;;  %19013 = vmatprep.mubr.msk.f32.mxu1 %vm719_vm3, %v28476_v24  ;;  %v28486_v24 = vld [vmem:[#allocation33_spill] sm:$0xff] }
 0x10c   : > { %19237 = vmatprep.mubr.msk.f32.mxu0 %vm719_vm3, %v28477_v38 }
 0x10e   : > { %19014 = vmatmul.mubr.msk.f32.gmra.mrb[6].mxu1 %vm719_vm3, %v28478_v62  ;;  %v28487_v62 = vld [vmem:[#allocation21_spill] sm:$0xff] }
 0x10f   : > { %19238 = vmatmul.mubr.msk.f32.gmra.mrb[22].mxu0 %vm719_vm3, %v28479_v36  ;;  %19016 = vmatprep.mubr.msk.f32.mxu1 %vm719_vm3, %v28480_v60  ;;  %v28488_v60 = vld [vmem:[#allocation35_spill] sm:$0xff] }
 0x110   : > { %19240 = vmatprep.mubr.msk.f32.mxu0 %vm719_vm3, %v28481_v11 }
 0x112   : > { %19017 = vmatmul.mubr.msk.f32.gmra.mrb[8].mxu1 %vm719_vm3, %v28482_v14  ;;  %v24156_v14 = vld [vmem:[%s23296_s17 + $0x189] sm:$0xff] }
 0x113   : > { %19241 = vmatmul.mubr.msk.f32.gmra.mrb[24].mxu0 %vm719_vm3, %v28483_v16  ;;  %19019 = vmatprep.mubr.msk.f32.mxu1 %vm719_vm3, %v28484_v19  ;;  %v16267_v19 = vld [vmem:[%s23296_s17 + $0x199] sm:$0xff] }
 0x114   : > { %19243 = vmatprep.mubr.msk.f32.mxu0 %vm719_vm3, %v28485_v21  ;;  %v28490_v21 = vld [vmem:[#allocation39_spill] sm:$0xff] }
 0x116   : > { %19020 = vmatmul.mubr.msk.f32.gmra.mrb[10].mxu1 %vm719_vm3, %v28486_v24  ;;  %v16268_v24 = vld [vmem:[%s23296_s17 + $0x1a1] sm:$0xff] }
 0x117   : > { %19244 = vmatmul.mubr.msk.f32.gmra.mrb[26].mxu0 %vm719_vm3, %v28487_v62  ;;  %19022 = vmatprep.mubr.msk.f32.mxu1 %vm719_vm3, %v28488_v60 }
 0x118   : > { %19246 = vmatprep.mubr.msk.f32.mxu0 %vm719_vm3, %v24145_v2 }
 0x11a   : > { %19023 = vmatmul.mubr.msk.f32.gmra.mrb[12].mxu1 %vm719_vm3, %v28489_v9 }
 0x11b   : > { %19247 = vmatmul.mubr.msk.f32.gmra.mrb[28].mxu0 %vm719_vm3, %v24156_v14  ;;  %19025 = vmatprep.mubr.msk.f32.mxu1 %vm719_vm3, %v28490_v21 }
 0x11c   : > { %19249 = vmatprep.mubr.msk.f32.mxu0 %vm719_vm3, %v16267_v19 }
 0x11e   : > { %19026 = vmatmul.mubr.msk.f32.gmra.mrb[14].mxu1 %vm719_vm3, %v23845_v30  ;;  %v28493_v30 = vld [vmem:[#allocation36_spill] sm:$0xff] }
 0x11f   : > { %19250 = vmatmul.mubr.msk.f32.gmra.mrb[30].mxu0 %vm719_vm3, %v16268_v24  ;;  %19028 = vmatprep.mubr.msk.f32.mxu1 %vm719_vm3, %v23850_v34 }
 0x120   : > { %19254 = vmatprep.mubr.msk.f32.mxu0 %vm719_vm3, %v23532_v28  ;;  %v28492_v28 = vld [vmem:[#allocation20_spill] sm:$0xff] }
 0x122   : > { %19029 = vmatmul.mubr.msk.f32.gmra.mrb[16].mxu1 %vm719_vm3, %v23862_v32  ;;  %v28494_v32 = vld [vmem:[#allocation38_spill] sm:$0xff] }
 0x123   : > { %19255 = vmatmul.mubr.msk.f32.vlgmr.msra.gmra.mrb[0].mxu0 %vm719_vm3, %v23550_v31  ;;  %19031 = vmatprep.mubr.msk.f32.mxu1 %vm719_vm3, %v23869_v1  ;;  %v16333_v31 = vld [vmem:[%s23296_s17 + $0x19a] sm:$0xff] }
 0x124   : > { %19257 = vmatprep.mubr.msk.f32.mxu0 %vm719_vm3, %v23556_v33  ;;  %v16334_v33 = vld [vmem:[%s23296_s17 + $0x1a2] sm:$0xff] }
 0x126   : > { %19032 = vmatmul.mubr.msk.f32.gmra.mrb[18].mxu1 %vm719_vm3, %v23880_v29 }
 0x127   : > { %19258 = vmatmul.mubr.msk.f32.gmra.mrb[2].mxu0 %vm719_vm3, %v23572_v35  ;;  %19034 = vmatprep.mubr.msk.f32.mxu1 %vm719_vm3, %v23885_v6 }
 0x128   : > { %19260 = vmatprep.mubr.msk.f32.mxu0 %vm719_vm3, %v23578_v37 }
 0x12a   : > { %19035 = vmatmul.mubr.msk.f32.gmra.mrb[20].mxu1 %vm719_vm3, %v23894_v8 }
 0x12b   : > { %19261 = vmatmul.mubr.msk.f32.gmra.mrb[4].mxu0 %vm719_vm3, %v23592_v39  ;;  %19037 = vmatprep.mubr.msk.f32.mxu1 %vm719_vm3, %v23899_v4 }
 0x12c   : > { %19263 = vmatprep.mubr.msk.f32.mxu0 %vm719_vm3, %v23598_v41 }
 0x12e   : > { %19038 = vmatmul.mubr.msk.f32.gmra.mrb[22].mxu1 %vm719_vm3, %v23908_v58 }
 0x12f   : > { %19264 = vmatmul.mubr.msk.f32.gmra.mrb[6].mxu0 %vm719_vm3, %v23612_v43  ;;  %19040 = vmatprep.mubr.msk.f32.mxu1 %vm719_vm3, %v23913_v18 }
 0x130   : > { %19266 = vmatprep.mubr.msk.f32.mxu0 %vm719_vm3, %v23618_v45 }
 0x132   : > { %19041 = vmatmul.mubr.msk.f32.gmra.mrb[24].mxu1 %vm719_vm3, %v23922_v48 }
 0x133   : > { %19267 = vmatmul.mubr.msk.f32.gmra.mrb[8].mxu0 %vm719_vm3, %v23632_v47  ;;  %19043 = vmatprep.mubr.msk.f32.mxu1 %vm719_vm3, %v23927_v52 }
 0x134   : > { %19269 = vmatprep.mubr.msk.f32.mxu0 %vm719_vm3, %v23638_v49 }
 0x136   : > { %19044 = vmatmul.mubr.msk.f32.gmra.mrb[26].mxu1 %vm719_vm3, %v23936_v40 }
 0x137   : > { %19270 = vmatmul.mubr.msk.f32.gmra.mrb[10].mxu0 %vm719_vm3, %v23652_v51  ;;  %19046 = vmatprep.mubr.msk.f32.mxu1 %vm719_vm3, %v23941_v44 }
 0x138   : > { %19272 = vmatprep.mubr.msk.f32.mxu0 %vm719_vm3, %v23658_v53  ;;  %v24303_v53 = vld [vmem:[%s28496_s28] ss:$0 sm:$0xff] }
 0x13a   : > { %19047 = vmatmul.mubr.msk.f32.gmra.mrb[28].mxu1 %vm719_vm3, %v23950_v63 }
 0x13b   : > { %19273 = vmatmul.mubr.msk.f32.gmra.mrb[12].mxu0 %vm719_vm3, %v23672_v55  ;;  %19049 = vmatprep.mubr.msk.f32.mxu1 %vm719_vm3, %v24007_v25 }
 0x13c   : > { %19275 = vmatprep.mubr.msk.f32.mxu0 %vm719_vm3, %v23676_v57 }
 0x13e   : > { %19050 = vmatmul.mubr.msk.f32.gmra.mrb[30].mxu1 %vm719_vm3, %v24018_v26 }
 0x13f   : > { %19276 = vmatmul.mubr.msk.f32.gmra.mrb[14].mxu0 %vm719_vm3, %v23687_v59  ;;  %19078 = vmatprep.mubr.msk.f32.mxu1 %vm719_vm3, %v23529_v27  ;;  %v28491_v27 = vld [vmem:[#allocation34_spill] sm:$0xff] }
 0x140   : > { %19278 = vmatprep.mubr.msk.f32.mxu0 %vm719_vm3, %v23693_v61 }
 0x142   : > { %19079 = vmatmul.mubr.msk.f32.vlgmr.msra.gmra.mrb[16].mxu1 %vm719_vm3, %v28463_v10 }
 0x143   : > { %19279 = vmatmul.mubr.msk.f32.gmra.mrb[16].mxu0 %vm719_vm3, %v23711_v0  ;;  %19081 = vmatprep.mubr.msk.f32.mxu1 %vm719_vm3, %v28465_v13 }
 0x144   : > { %19281 = vmatprep.mubr.msk.f32.mxu0 %vm719_vm3, %v23717_v3 }
 0x146   : > { %19082 = vmatmul.mubr.msk.f32.gmra.mrb[18].mxu1 %vm719_vm3, %v28467_v15 }
 0x147   : > { %19282 = vmatmul.mubr.msk.f32.gmra.mrb[18].mxu0 %vm719_vm3, %v23733_v5  ;;  %19084 = vmatprep.mubr.msk.f32.mxu1 %vm719_vm3, %v28469_v17 }
 0x148   : > { %19284 = vmatprep.mubr.msk.f32.mxu0 %vm719_vm3, %v23739_v7 }
 0x14a   : > { %19085 = vmatmul.mubr.msk.f32.gmra.mrb[20].mxu1 %vm719_vm3, %v28471_v20 }
 0x14b   : > { %19285 = vmatmul.mubr.msk.f32.gmra.mrb[20].mxu0 %vm719_vm3, %v23753_v12  ;;  %19087 = vmatprep.mubr.msk.f32.mxu1 %vm719_vm3, %v28473_v22 }
 0x14c   : > { %19287 = vmatprep.mubr.msk.f32.mxu0 %vm719_vm3, %v23759_v56 }
 0x14e   : > { %19088 = vmatmul.mubr.msk.f32.gmra.mrb[22].mxu1 %vm719_vm3, %v28475_v23 }
 0x14f   : > { %19288 = vmatmul.mubr.msk.f32.gmra.mrb[22].mxu0 %vm719_vm3, %v23773_v54  ;;  %19090 = vmatprep.mubr.msk.f32.mxu1 %vm719_vm3, %v28477_v38 }
 0x150   : > { %19290 = vmatprep.mubr.msk.f32.mxu0 %vm719_vm3, %v23779_v50 }
 0x152   : > { %19091 = vmatmul.mubr.msk.f32.gmra.mrb[24].mxu1 %vm719_vm3, %v28479_v36 }
 0x153   : > { %19291 = vmatmul.mubr.msk.f32.gmra.mrb[24].mxu0 %vm719_vm3, %v23793_v46  ;;  %19093 = vmatprep.mubr.msk.f32.mxu1 %vm719_vm3, %v28481_v11 }
 0x154   : > { %19293 = vmatprep.mubr.msk.f32.mxu0 %vm719_vm3, %v23799_v42 }
 0x156   : > { %19094 = vmatmul.mubr.msk.f32.gmra.mrb[26].mxu1 %vm719_vm3, %v28483_v16 }
 0x157   : > { %19294 = vmatmul.mubr.msk.f32.gmra.mrb[26].mxu0 %vm719_vm3, %v28491_v27  ;;  %19096 = vmatprep.mubr.msk.f32.mxu1 %vm719_vm3, %v28492_v28 }
 0x158   : > { %19296 = vmatprep.mubr.msk.f32.mxu0 %vm719_vm3, %v28493_v30 }
 0x15a   : > { %19097 = vmatmul.mubr.msk.f32.gmra.mrb[28].mxu1 %vm719_vm3, %v28487_v62 }
 0x15b   : > { %19297 = vmatmul.mubr.msk.f32.gmra.mrb[28].mxu0 %vm719_vm3, %v28494_v32  ;;  %19099 = vmatprep.mubr.msk.f32.mxu1 %vm719_vm3, %v24145_v2 }
 0x15c   : > { %19299 = vmatprep.mubr.msk.f32.mxu0 %vm719_vm3, %v16333_v31 }
 0x15e   : > { %19100 = vmatmul.mubr.msk.f32.gmra.mrb[30].mxu1 %vm719_vm3, %v24156_v14 }
 0x15f   : > { %19300 = vmatmul.mubr.msk.f32.gmra.mrb[30].mxu0 %vm719_vm3, %v16334_v33 }
 0x1d5   : > { %v19006_v34 = vpop.f32.mrb[0].mxu1 }
 0x1d6   : > { %v1959_v35 = vpop.f32.mrb[1].mxu1 }
 0x1d9   : > { %v19009_v37 = vpop.f32.mrb[2].mxu1 }
 0x1da   : > { %v1969_v39 = vpop.f32.mrb[3].mxu1 }
 0x1dd   : > { %v19012_v40 = vpop.f32.mrb[4].mxu1 }
 0x1de   : > { %v1979_v41 = vpop.f32.mrb[5].mxu1 }
 0x1e1   : > { %v19015_v42 = vpop.f32.mrb[6].mxu1 }
 0x1e2   : > { %v1989_v43 = vpop.f32.mrb[7].mxu1 }
 0x1e5   : > { %v19018_v44 = vpop.f32.mrb[8].mxu1 }
 0x1e6   : > { %v1999_v45 = vpop.f32.mrb[9].mxu1 }
 0x1e9   : > { %v19021_v46 = vpop.f32.mrb[10].mxu1 }
 0x1ea   : > { %v2009_v47 = vpop.f32.mrb[11].mxu1 }
 0x1ed   : > { %v19024_v48 = vpop.f32.mrb[12].mxu1 }
 0x1ee   : > { %v2019_v49 = vpop.f32.mrb[13].mxu1 }
 0x1f1   : > { %v19027_v50 = vpop.f32.mrb[14].mxu1 }
 0x1f2   : > { %v2029_v51 = vpop.f32.mrb[15].mxu1 }
 0x1f6   : > { %v19256_v52 = vpop.f32.mrb[0].mxu0 }
 0x1f7   : > { %v21464_v54 = vadd.f32 %v19256_v52, %v19006_v34  ;;  %v3910_v55 = vpop.f32.mrb[1].mxu0 }
 0x1f8   : > { %v21465_v57 = vadd.f32 %v3910_v55, %v1959_v35 }
 0x1f9   : > { %v24306_v59 = vadd.f32 %v21464_v54, %v24303_v53  }
 0x1fa   : > { %v24309_v61 = vadd.f32 %v21465_v57, %v24303_v53   ;;  %v19259_v63 = vpop.f32.mrb[2].mxu0 }
 0x1fb   : > { %v21466_v0 = vadd.f32 %v19259_v63, %v19009_v37  ;;  %v3920_v1 = vpop.f32.mrb[3].mxu0 }
 0x1fc   : > { %v21467_v3 = vadd.f32 %v3920_v1, %v1969_v39 }
 0x1fd   : > { %v24312_v4 = vadd.f32 %v21466_v0, %v24303_v53  }
 0x1fe   : > { %v24315_v5 = vadd.f32 %v21467_v3, %v24303_v53   ;;  %v19262_v6 = vpop.f32.mrb[4].mxu0 }
 0x1ff   : > { %v21468_v7 = vadd.f32 %v19262_v6, %v19012_v40  ;;  %v3930_v8 = vpop.f32.mrb[5].mxu0 }
 0x200   : > { %v21469_v12 = vadd.f32 %v3930_v8, %v1979_v41 }
 0x201   : > { %v24318_v18 = vadd.f32 %v21468_v7, %v24303_v53  }
 0x202   : > { %v24321_v56 = vadd.f32 %v21469_v12, %v24303_v53   ;;  %v19265_v58 = vpop.f32.mrb[6].mxu0 }
 0x203   : > { %v21470_v29 = vadd.f32 %v19265_v58, %v19015_v42  ;;  %v3940_v25 = vpop.f32.mrb[7].mxu0 }
 0x204   : > { %v21471_v26 = vadd.f32 %v3940_v25, %v1989_v43 }
 0x205   : > { %v24324_v9 = vadd.f32 %v21470_v29, %v24303_v53  }
 0x206   : > { %v24327_v10 = vadd.f32 %v21471_v26, %v24303_v53   ;;  %v19268_v13 = vpop.f32.mrb[8].mxu0 }
 0x207   : > { %v21472_v15 = vadd.f32 %v19268_v13, %v19018_v44  ;;  %v3950_v17 = vpop.f32.mrb[9].mxu0 }
 0x208   : > { %v21473_v20 = vadd.f32 %v3950_v17, %v1999_v45 }
 0x209   : > { %v24330_v22 = vadd.f32 %v21472_v15, %v24303_v53  }
 0x20a   : > { %v24333_v23 = vadd.f32 %v21473_v20, %v24303_v53   ;;  %v19271_v38 = vpop.f32.mrb[10].mxu0 }
 0x20b   : > { %v21474_v36 = vadd.f32 %v19271_v38, %v19021_v46  ;;  %v3960_v11 = vpop.f32.mrb[11].mxu0 }
 0x20c   : > { %v21475_v16 = vadd.f32 %v3960_v11, %v2009_v47 }
 0x20d   : > { %v24336_v21 = vadd.f32 %v21474_v36, %v24303_v53  }
 0x20e   : > { %v24339_v2 = vadd.f32 %v21475_v16, %v24303_v53   ;;  %v19274_v62 = vpop.f32.mrb[12].mxu0 }
 0x20f   : > { %v21476_v60 = vadd.f32 %v19274_v62, %v19024_v48  ;;  %v3970_v14 = vpop.f32.mrb[13].mxu0 }
 0x210   : > { %v21477_v19 = vadd.f32 %v3970_v14, %v2019_v49 }
 0x211   : > { %v24342_v24 = vadd.f32 %v21476_v60, %v24303_v53  }
 0x212   : > { %v24345_v27 = vadd.f32 %v21477_v19, %v24303_v53   ;;  %v19277_v28 = vpop.f32.mrb[14].mxu0 }
 0x213   : > { %v21478_v30 = vadd.f32 %v19277_v28, %v19027_v50  ;;  %v3980_v31 = vpop.f32.mrb[15].mxu0 }
 0x214   : > { %v21479_v32 = vadd.f32 %v3980_v31, %v2029_v51 }
 0x215   : > { %v24348_v33 = vadd.f32 %v21478_v30, %v24303_v53   ;;  %v19080_v34 = vpop.f32.mrb[16].mxu1 }
 0x216   : > { %v24351_v35 = vadd.f32 %v21479_v32, %v24303_v53   ;;  %v19280_v37 = vpop.f32.mrb[16].mxu0  ;;  %v2429_v39 = vpop.f32.mrb[17].mxu1 }
 0x217   : > { %v21480_v40 = vadd.f32 %v19280_v37, %v19080_v34  ;;  %v3990_v41 = vpop.f32.mrb[17].mxu0 }
 0x218   : > { %v21481_v42 = vadd.f32 %v3990_v41, %v2429_v39 }
 0x219   : > { %v24354_v43 = vadd.f32 %v21480_v40, %v24303_v53   ;;  %v19083_v44 = vpop.f32.mrb[18].mxu1 }
 0x21a   : > { %v24357_v45 = vadd.f32 %v21481_v42, %v24303_v53   ;;  %v19283_v46 = vpop.f32.mrb[18].mxu0  ;;  %v2439_v47 = vpop.f32.mrb[19].mxu1 }
 0x21b   : > { %v21482_v48 = vadd.f32 %v19283_v46, %v19083_v44  ;;  %v4000_v49 = vpop.f32.mrb[19].mxu0 }
 0x21c   : > { %v21483_v50 = vadd.f32 %v4000_v49, %v2439_v47 }
 0x21d   : > { %v4127_v51 = vadd.f32 %v21482_v48, %v24303_v53   ;;  %v19086_v52 = vpop.f32.mrb[20].mxu1 }
 0x21e   : > { %v4126_v54 = vadd.f32 %v21483_v50, %v24303_v53   ;;  %v19286_v55 = vpop.f32.mrb[20].mxu0  ;;  %v2449_v57 = vpop.f32.mrb[21].mxu1 }
 0x21f   : > { %v21484_v63 = vadd.f32 %v19286_v55, %v19086_v52  ;;  %v4010_v0 = vpop.f32.mrb[21].mxu0 }
 0x220   : > { %v21485_v1 = vadd.f32 %v4010_v0, %v2449_v57 }
 0x221   : > { %v4129_v3 = vadd.f32 %v21484_v63, %v24303_v53   ;;  %v19089_v6 = vpop.f32.mrb[22].mxu1 }
 0x222   : > { %v4128_v7 = vadd.f32 %v21485_v1, %v24303_v53   ;;  %v19289_v8 = vpop.f32.mrb[22].mxu0  ;;  %v2459_v12 = vpop.f32.mrb[23].mxu1 }
 0x223   : > { %v21486_v58 = vadd.f32 %v19289_v8, %v19089_v6  ;;  %v4020_v29 = vpop.f32.mrb[23].mxu0 }
 0x224   : > { %v21487_v25 = vadd.f32 %v4020_v29, %v2459_v12 }
 0x225   : > { %v4131_v26 = vadd.f32 %v21486_v58, %v24303_v53   ;;  %v19092_v13 = vpop.f32.mrb[24].mxu1 }
 0x226   : > { %v4130_v15 = vadd.f32 %v21487_v25, %v24303_v53   ;;  %v19292_v17 = vpop.f32.mrb[24].mxu0  ;;  %v2469_v20 = vpop.f32.mrb[25].mxu1 }
 0x227   : > { %v21488_v38 = vadd.f32 %v19292_v17, %v19092_v13  ;;  %v4030_v36 = vpop.f32.mrb[25].mxu0 }
 0x228   : > { %v21489_v11 = vadd.f32 %v4030_v36, %v2469_v20 }
 0x229   : > { %v4133_v16 = vadd.f32 %v21488_v38, %v24303_v53   ;;  %v19095_v62 = vpop.f32.mrb[26].mxu1 }
 0x22a   : > { %v4132_v60 = vadd.f32 %v21489_v11, %v24303_v53   ;;  %v19295_v14 = vpop.f32.mrb[26].mxu0  ;;  %v2479_v19 = vpop.f32.mrb[27].mxu1 }
 0x22b   : > { %v21490_v28 = vadd.f32 %v19295_v14, %v19095_v62  ;;  %v4040_v30 = vpop.f32.mrb[27].mxu0 }
 0x22c   : > { %v21491_v31 = vadd.f32 %v4040_v30, %v2479_v19 }
 0x22d   : > { %v4135_v32 = vadd.f32 %v21490_v28, %v24303_v53   ;;  %v19098_v34 = vpop.f32.mrb[28].mxu1 }
 0x22e   : > { %v4134_v37 = vadd.f32 %v21491_v31, %v24303_v53   ;;  %v19298_v39 = vpop.f32.mrb[28].mxu0  ;;  %v2489_v40 = vpop.f32.mrb[29].mxu1 }
 0x22f   : > { %v21492_v41 = vadd.f32 %v19298_v39, %v19098_v34  ;;  %v4050_v42 = vpop.f32.mrb[29].mxu0 }
 0x230   : > { %v21493_v44 = vadd.f32 %v4050_v42, %v2489_v40 }
 0x231   : > { %v4137_v46 = vadd.f32 %v21492_v41, %v24303_v53   ;;  %v19101_v47 = vpop.f32.mrb[30].mxu1 }
 0x232   : > { %v4136_v48 = vadd.f32 %v21493_v44, %v24303_v53   ;;  %v19301_v49 = vpop.f32.mrb[30].mxu0  ;;  %v2499_v50 = vpop.f32.mrb[31].mxu1 }
 0x233   : > { %v21494_v52 = vadd.f32 %v19301_v49, %v19101_v47  ;;  %v4060_v55 = vpop.f32.mrb[31].mxu0 }
 0x234   : > { %v21495_v57 = vadd.f32 %v4060_v55, %v2499_v50 }
 0x235   : > { %v4139_v63 = vadd.f32 %v21494_v52, %v24303_v53  }
 0x236   : > { %v4138_v0 = vadd.f32 %v21495_v57, %v24303_v53  }
 0x237 LB: >> { %28497 = vst [vmem:[#allocation40_spill] sm:$0xff] %v23044_v63  ;;  %28498 = vst [vmem:[#allocation41_spill] sm:$0xff] %v23048_v0  ;;  %vm4293_vm4 = vcmask 523264   ;;  %v4370_v53 = vld [vmem:[#allocation2 + $0x1] sm:$0xff]  ;;  %s16373_s25 = smul.u32 1152, %s23172_s15  ;;  %s24559_s29 = sshll.u32 %s23172_s15, 1  ;;  %s23172_s15 = sphi %s24455_s15, %s28791_s15   ;;  %v23168_v61 = vphi %v24309_v61, %v28790_v61   ;;  %v23164_v59 = vphi %v24306_v59, %v28789_v59   ;;  %v23160_v5 = vphi %v24315_v5, %v28788_v5   ;;  %v23156_v4 = vphi %v24312_v4, %v28787_v4   ;;  %v23152_v56 = vphi %v24321_v56, %v28786_v56   ;;  %v23148_v18 = vphi %v24318_v18, %v28785_v18   ;;  %v23144_v10 = vphi %v24327_v10, %v28784_v10   ;;  %v23140_v9 = vphi %v24324_v9, %v28783_v9   ;;  %v23136_v23 = vphi %v24333_v23, %v28782_v23   ;;  %v23132_v22 = vphi %v24330_v22, %v28781_v22   ;;  %v23128_v2 = vphi %v24339_v2, %v28780_v2   ;;  %v23124_v21 = vphi %v24336_v21, %v28779_v21   ;;  %v23120_v27 = vphi %v24345_v27, %v28778_v27   ;;  %v23116_v24 = vphi %v24342_v24, %v28777_v24   ;;  %v23112_v35 = vphi %v24351_v35, %v28776_v35   ;;  %v23108_v33 = vphi %v24348_v33, %v28775_v33   ;;  %v23104_v45 = vphi %v24357_v45, %v28774_v45   ;;  %v23100_v43 = vphi %v24354_v43, %v28773_v43   ;;  %v23096_v54 = vphi %v4126_v54, %v28772_v54   ;;  %v23092_v51 = vphi %v4127_v51, %v28771_v51   ;;  %v23088_v7 = vphi %v4128_v7, %v28770_v7   ;;  %v23084_v3 = vphi %v4129_v3, %v28769_v3   ;;  %v23080_v15 = vphi %v4130_v15, %v28768_v15   ;;  %v23076_v26 = vphi %v4131_v26, %v28767_v26   ;;  %v23072_v60 = vphi %v4132_v60, %v28766_v60   ;;  %v23068_v16 = vphi %v4133_v16, %v28765_v16   ;;  %v23064_v37 = vphi %v4134_v37, %v28764_v37   ;;  %v23060_v32 = vphi %v4135_v32, %v28763_v32   ;;  %v23056_v48 = vphi %v4136_v48, %v28762_v48   ;;  %v23052_v46 = vphi %v4137_v46, %v28761_v46   ;;  %v23048_v0 = vphi %v4138_v0, %v28759_v0   ;;  %v23044_v63 = vphi %v4139_v63, %v28757_v63  }
 0x238   : >> { %28499 = vst [vmem:[#allocation42_spill] sm:$0xff] %v23052_v46  ;;  %28500 = vst [vmem:[#allocation43_spill] sm:$0xff] %v23056_v48  ;;  %19318 = vmatprep.mubr.msk.f32.mxu0 %vm4293_vm4, %v4370_v53  ;;  %s28529_s21 = scalar_lea.vmem %s28153_s3, %s23277_s30  ;;  %s28530_s16 = scalar_lea.vmem %s28154_s4, %s23277_s30 }
 0x239   : >> { %28501 = vst [vmem:[#allocation44_spill] sm:$0xff] %v23060_v32  ;;  %28502 = vst [vmem:[#allocation45_spill] sm:$0xff] %v23064_v37  ;;  %s24567_s13 = scalar_lea.vmem %s28529_s21, %s24559_s29  ;;  %s24575_s26 = scalar_lea.vmem %s28530_s16, %s24559_s29 }
 0x23a   : >> { %28503 = vst [vmem:[#allocation46_spill] sm:$0xff] %v23068_v16  ;;  %28504 = vst [vmem:[#allocation47_spill] sm:$0xff] %v23072_v60  ;;  %s24578_s20 = scalar_lea.vmem %s23307_s23, %s16373_s25  ;;  %v24581_v1 = vld [vmem:[%s24567_s13] ss:$0 sm:$0xff]  ;;  %s28609_s18 = scalar_lea.vmem %s28156_s6, %s23277_s30 }
 0x23b   : >> { %28505 = vst [vmem:[#allocation48_spill] sm:$0xff] %v23076_v26  ;;  %28506 = vst [vmem:[#allocation49_spill] sm:$0xff] %v23080_v15  ;;  %v24584_v6 = vld [vmem:[%s24575_s26] ss:$0 sm:$0xff]  ;;  %v16375_v12 = vld [vmem:[%s24578_s20 + $0x48] sm:$0xff]  ;;  %v4188_v29 = vmul.f32 %v23168_v61, %v24581_v1  ;;  %v4189_v25 = vmul.f32 %v23164_v59, %v24581_v1  ;;  %v4190_v13 = vmul.f32 %v23160_v5, %v24581_v1  ;;  %s25558_s28 = scalar_lea.vmem %s28609_s18, %s24559_s29  ;;  %s4145_s25 = sadd.s32 1, %s23172_s15  }
 0x23c   : >> { %28507 = vst [vmem:[#allocation50_spill] sm:$0xff] %v23084_v3  ;;  %28508 = vst [vmem:[#allocation51_spill] sm:$0xff] %v23088_v7  ;;  %v16374_v8 = vld [vmem:[%s24578_s20 + $0x40] sm:$0xff]  ;;  %v16376_v58 = vld [vmem:[%s24578_s20 + $0x50] sm:$0xff]  ;;  %v4191_v17 = vmul.f32 %v23156_v4, %v24581_v1  ;;  %v4192_v62 = vmul.f32 %v23152_v56, %v24581_v1  ;;  %v4193_v14 = vmul.f32 %v23148_v18, %v24581_v1  ;;  %p26616_p8 = scmp.ge.s32.totalorder %s4145_s25, 2   ;;  %s28791_s15 = smov %s4145_s25 }
 0x23d   : >> { %28509 = vst [vmem:[#allocation52_spill] sm:$0xff] %v23092_v51  ;;  %28510 = vst [vmem:[#allocation53_spill] sm:$0xff] %v23096_v54  ;;  %v21030_v20 = vpack.c.bf16 %v16375_v12, %v16374_v8  ;;  %v16377_v38 = vld [vmem:[%s24578_s20 + $0x58] sm:$0xff]  ;;  %v16378_v36 = vld [vmem:[%s24578_s20 + $0x60] sm:$0xff]  ;;  %v4194_v19 = vmul.f32 %v23144_v10, %v24581_v1  ;;  %v4228_v40 = vadd.f32 %v24584_v6, %v4188_v29 }
 0x23e   : >> { %28511 = vst [vmem:[#allocation54_spill] sm:$0xff] %v23100_v43  ;;  %28512 = vst [vmem:[#allocation55_spill] sm:$0xff] %v23104_v45  ;;  %v16379_v11 = vld [vmem:[%s24578_s20 + $0x68] sm:$0xff]  ;;  %v21034_v28 = vpack.c.bf16 %v16377_v38, %v16376_v58  ;;  %v16380_v31 = vld [vmem:[%s24578_s20 + $0x70] sm:$0xff]  ;;  %v4229_v41 = vadd.f32 %v24584_v6, %v4189_v25  ;;  %v4230_v47 = vadd.f32 %v24584_v6, %v4190_v13 }
 0x23f   : >> { %28513 = vst [vmem:[#allocation56_spill] sm:$0xff] %v23108_v33  ;;  %28514 = vst [vmem:[#allocation57_spill] sm:$0xff] %v23112_v35  ;;  %v21038_v30 = vpack.c.bf16 %v16379_v11, %v16378_v36  ;;  %v16381_v34 = vld [vmem:[%s24578_s20 + $0x78] sm:$0xff]  ;;  %v4362_v39 = vld [vmem:[%s24578_s20] sm:$0xff]  ;;  %21031 = vmatprep.subr.bf16.mxu0 %v21030_v20  ;;  %v4231_v49 = vadd.f32 %v24584_v6, %v4191_v17  ;;  %v4232_v50 = vadd.f32 %v24584_v6, %v4192_v62 }
 0x240   : >> { %28515 = vst [vmem:[#allocation58_spill] sm:$0xff] %v23116_v24  ;;  %28516 = vst [vmem:[#allocation59_spill] sm:$0xff] %v23120_v27  ;;  %v21042_v42 = vpack.c.bf16 %v16381_v34, %v16380_v31  ;;  %v4363_v44 = vld [vmem:[%s24578_s20 + $0x8] sm:$0xff]  ;;  %v4364_v52 = vld [vmem:[%s24578_s20 + $0x10] sm:$0xff]  ;;  %21033 = vmatpush3.bf16.msra.mxu0 %v21030_v20  ;;  %v4260_v53 = vmax.f32 %v4228_v40, 0.0  ;;  %v4261_v8 = vmax.f32 %v4229_v41, 0.0  ;;  %v4233_v12 = vadd.f32 %v24584_v6, %v4193_v14 }
 0x241   : >> { %28517 = vst [vmem:[#allocation60_spill] sm:$0xff] %v23124_v21  ;;  %28518 = vst [vmem:[#allocation61_spill] sm:$0xff] %v23128_v2  ;;  %v4365_v55 = vld [vmem:[%s24578_s20 + $0x18] sm:$0xff]  ;;  %v24617_v57 = vpack.c.bf16 %v4363_v44, %v4362_v39  ;;  %21035 = vmatprep.subr.bf16.mxu0 %v21034_v28  ;;  %v4262_v58 = vmax.f32 %v4230_v47, 0.0  ;;  %v4263_v29 = vmax.f32 %v4231_v49, 0.0  ;;  %v4264_v25 = vmax.f32 %v4232_v50, 0.0 }
 0x242   : >> { %28519 = vst [vmem:[#allocation62_spill] sm:$0xff] %v23132_v22  ;;  %28520 = vst [vmem:[#allocation63_spill] sm:$0xff] %v23136_v23  ;;  %v4234_v38 = vadd.f32 %v24584_v6, %v4194_v19  ;;  %v4265_v13 = vmax.f32 %v4233_v12, 0.0  ;;  %v4195_v17 = vmul.f32 %v23140_v9, %v24581_v1  ;;  %v24625_v20 = vpack.c.bf16 %v4365_v55, %v4364_v52  ;;  %v4366_v41 = vld [vmem:[%s24578_s20 + $0x20] sm:$0xff]  ;;  %v4367_v44 = vld [vmem:[%s24578_s20 + $0x28] sm:$0xff] }
 0x243   : >> { %28521 = vst [vmem:[#allocation64_spill] sm:$0xff] %v23140_v9  ;;  %28522 = vst [vmem:[#allocation65_spill] sm:$0xff] %v23144_v10  ;;  %v4196_v11 = vmul.f32 %v23136_v23, %v24581_v1  ;;  %v4197_v14 = vmul.f32 %v23132_v22, %v24581_v1  ;;  %v4198_v19 = vmul.f32 %v23128_v2, %v24581_v1 }
 0x244   : >> { %28523 = vst [vmem:[#allocation66_spill] sm:$0xff] %v23148_v18  ;;  %28524 = vst [vmem:[#allocation67_spill] sm:$0xff] %v23152_v56  ;;  %v4266_v36 = vmax.f32 %v4234_v38, 0.0  ;;  %21037 = vmatpush3.bf16.msra.mxu0 %v21034_v28  ;;  %v4235_v62 = vadd.f32 %v24584_v6, %v4195_v17  ;;  %v4199_v40 = vmul.f32 %v23124_v21, %v24581_v1  ;;  %v4371_v38 = vld [vmem:[#allocation2 + $0x9] sm:$0xff] }
 0x245   : >> { %28525 = vst [vmem:[#allocation68_spill] sm:$0xff] %v23156_v4  ;;  %28526 = vst [vmem:[#allocation69_spill] sm:$0xff] %v23160_v5  ;;  %21039 = vmatprep.subr.bf16.mxu0 %v21038_v30  ;;  %v4236_v31 = vadd.f32 %v24584_v6, %v4196_v11  ;;  %v4237_v39 = vadd.f32 %v24584_v6, %v4197_v14  ;;  %v4238_v28 = vadd.f32 %v24584_v6, %v4198_v19 }
 0x246   : >> { %28527 = vst [vmem:[#allocation70_spill] sm:$0xff] %v23164_v59  ;;  %28528 = vst [vmem:[#allocation71_spill] sm:$0xff] %v23168_v61  ;;  %v4267_v34 = vmax.f32 %v4235_v62, 0.0  ;;  %v4239_v52 = vadd.f32 %v24584_v6, %v4199_v40  ;;  %v4200_v55 = vmul.f32 %v23120_v27, %v24581_v1  ;;  %v4204_v14 = vmul.f32 %v23104_v45, %v24581_v1  ;;  %v16487_v45 = vld [vmem:[%s24578_s20 + $0xc8] sm:$0xff] }
 0x247   : >> { %4294 = vst.msk [vmem:[#allocation2 + $0x19] sm:$0xff] %vm4293_vm4, %v4260_v53  ;;  %4295 = vst.msk [vmem:[#allocation2 + $0x21] sm:$0xff] %vm4293_vm4, %v4261_v8  ;;  %v4268_v47 = vmax.f32 %v4236_v31, 0.0  ;;  %v4269_v49 = vmax.f32 %v4237_v39, 0.0  ;;  %v4270_v50 = vmax.f32 %v4238_v28, 0.0  ;;  %v4201_v53 = vmul.f32 %v23116_v24, %v24581_v1 }
 0x248   : >> { %4296 = vst.msk [vmem:[#allocation2 + $0x31] sm:$0xff] %vm4293_vm4, %v4262_v58  ;;  %4297 = vst.msk [vmem:[#allocation2 + $0x39] sm:$0xff] %vm4293_vm4, %v4263_v29  ;;  %21041 = vmatpush3.bf16.msra.mxu0 %v21038_v30  ;;  %v24653_v8 = vpack.c.bf16 %v4367_v44, %v4366_v41  ;;  %v4271_v30 = vmax.f32 %v4239_v52, 0.0  ;;  %v4240_v12 = vadd.f32 %v24584_v6, %v4200_v55  ;;  %v4369_v52 = vld [vmem:[%s24578_s20 + $0x38] sm:$0xff] }
 0x249   : >> { %4298 = vst.msk [vmem:[#allocation2 + $0x49] sm:$0xff] %vm4293_vm4, %v4264_v25  ;;  %4299 = vst.msk [vmem:[#allocation2 + $0x51] sm:$0xff] %vm4293_vm4, %v4265_v13  ;;  %21043 = vmatprep.subr.bf16.mxu0 %v21042_v42  ;;  %v4202_v58 = vmul.f32 %v23112_v35, %v24581_v1  ;;  %v4241_v29 = vadd.f32 %v24584_v6, %v4201_v53  ;;  %v4203_v25 = vmul.f32 %v23108_v33, %v24581_v1 }
 0x24a   : >> { %4300 = vst.msk [vmem:[#allocation2 + $0x61] sm:$0xff] %vm4293_vm4, %v4266_v36  ;;  %4301 = vst.msk [vmem:[#allocation2 + $0x69] sm:$0xff] %vm4293_vm4, %v4267_v34  ;;  %v4272_v13 = vmax.f32 %v4240_v12, 0.0  ;;  %v4205_v19 = vmul.f32 %v23100_v43, %v24581_v1  ;;  %v4244_v34 = vadd.f32 %v24584_v6, %v4204_v14  ;;  %v4206_v40 = vmul.f32 %v23096_v54, %v24581_v1  ;;  %v16452_v54 = vld [vmem:[%s24578_s20 + $0xb0] sm:$0xff] }
 0x24b   : >> { %4302 = vst.msk [vmem:[#allocation2 + $0x79] sm:$0xff] %vm4293_vm4, %v4268_v47  ;;  %4303 = vst.msk [vmem:[#allocation2 + $0x81] sm:$0xff] %vm4293_vm4, %v4269_v49  ;;  %v4242_v17 = vadd.f32 %v24584_v6, %v4202_v58  ;;  %v4273_v11 = vmax.f32 %v4241_v29, 0.0  ;;  %v4243_v62 = vadd.f32 %v24584_v6, %v4203_v25  ;;  %v4208_v49 = vmul.f32 %v23088_v7, %v24581_v1 }
 0x24c   : >> { %4304 = vst.msk [vmem:[#allocation2 + $0x91] sm:$0xff] %vm4293_vm4, %v4270_v50  ;;  %21045 = vmatpush3.bf16.msra.mxu0 %v21042_v42  ;;  %4305 = vst.msk [vmem:[#allocation2 + $0x99] sm:$0xff] %vm4293_vm4, %v4271_v30  ;;  %v4245_v39 = vadd.f32 %v24584_v6, %v4205_v19  ;;  %v4276_v44 = vmax.f32 %v4244_v34, 0.0  ;;  %v4368_v50 = vld [vmem:[%s24578_s20 + $0x30] sm:$0xff]  ;;  %v4246_v55 = vadd.f32 %v24584_v6, %v4206_v40 }
 0x24d   : >> { %21047 = vmatprep.subr.bf16.mxu0 %v24617_v57  ;;  %4306 = vst.msk [vmem:[#allocation2 + $0xa9] sm:$0xff] %vm4293_vm4, %v4272_v13  ;;  %v4274_v42 = vmax.f32 %v4242_v17, 0.0  ;;  %4307 = vst.msk [vmem:[#allocation2 + $0xb1] sm:$0xff] %vm4293_vm4, %v4273_v11  ;;  %v4275_v31 = vmax.f32 %v4243_v62, 0.0  ;;  %v4248_v30 = vadd.f32 %v24584_v6, %v4208_v49  ;;  %v4209_v12 = vmul.f32 %v23084_v3, %v24581_v1  ;;  %v16447_v49 = vld [vmem:[%s24578_s20 + $0x88] sm:$0xff] }
 0x24e   : >> { %v4372_v36 = vld [vmem:[#allocation2 + $0x19] sm:$0xff]  ;;  %v24678_v28 = vld [vmem:[#allocation2 + $0x21] sm:$0xff]  ;;  %v4277_v47 = vmax.f32 %v4245_v39, 0.0  ;;  %4310 = vst.msk [vmem:[#allocation2 + $0xd9] sm:$0xff] %vm4293_vm4, %v4276_v44  ;;  %v4278_v29 = vmax.f32 %v4246_v55, 0.0  ;;  %v4210_v25 = vmul.f32 %v23080_v15, %v24581_v1  ;;  %v4211_v62 = vmul.f32 %v23076_v26, %v24581_v1 }
 0x24f   : >> { %19319 = vmatmul.mubr.msk.f32.vlgmr.msra.gmra.mrb[0].mxu0 %vm4293_vm4, %v4371_v38  ;;  %4308 = vst.msk [vmem:[#allocation2 + $0xc1] sm:$0xff] %vm4293_vm4, %v4274_v42  ;;  %v24683_v41 = vld [vmem:[#allocation2 + $0x31] sm:$0xff]  ;;  %4309 = vst.msk [vmem:[#allocation2 + $0xc9] sm:$0xff] %vm4293_vm4, %v4275_v31  ;;  %v24704_v58 = vld [vmem:[#allocation2 + $0x39] sm:$0xff]  ;;  %v21058_v38 = vpack.c.bf16 %v4369_v52, %v4368_v50  ;;  %v4249_v11 = vadd.f32 %v24584_v6, %v4209_v12  ;;  %v4212_v34 = vmul.f32 %v23072_v60, %v24581_v1 }
 0x250   : >> { %21049 = vmatpush3.bf16.msra.mxu0 %v24617_v57  ;;  %19321 = vmatprep.mubr.msk.f32.mxu0 %vm4293_vm4, %v4372_v36  ;;  %v4207_v57 = vmul.f32 %v23092_v51, %v24581_v1  ;;  %4311 = vst.msk [vmem:[#allocation2 + $0xe1] sm:$0xff] %vm4293_vm4, %v4277_v47  ;;  %v24709_v13 = vld [vmem:[#allocation2 + $0x49] sm:$0xff]  ;;  %v4280_v36 = vmax.f32 %v4248_v30, 0.0  ;;  %4312 = vst.msk [vmem:[#allocation2 + $0xf1] sm:$0xff] %vm4293_vm4, %v4278_v29  ;;  %v4251_v19 = vadd.f32 %v24584_v6, %v4211_v62  ;;  %v24724_v42 = vld [vmem:[#allocation2 + $0x51] sm:$0xff] }
 0x251   : >> { %21051 = vmatprep.subr.bf16.mxu0 %v24625_v20  ;;  %v4281_v14 = vmax.f32 %v4249_v11, 0.0  ;;  %v4213_v39 = vmul.f32 %v23068_v16, %v24581_v1  ;;  %v24731_v40 = vld [vmem:[#allocation2 + $0x61] sm:$0xff]  ;;  %v4214_v47 = vmul.f32 %v23064_v37, %v24581_v1  ;;  %v4215_v55 = vmul.f32 %v23060_v32, %v24581_v1  ;;  %v24751_v30 = vld [vmem:[#allocation2 + $0x69] sm:$0xff]  ;;  %v16449_v37 = vld [vmem:[%s24578_s20 + $0x98] sm:$0xff] }
 0x252   : >> { %v4247_v53 = vadd.f32 %v24584_v6, %v4207_v57  ;;  %4314 = vst.msk [vmem:[#allocation2 + $0x109] sm:$0xff] %vm4293_vm4, %v4280_v36  ;;  %v4283_v44 = vmax.f32 %v4251_v19, 0.0  ;;  %v16446_v57 = vld [vmem:[%s24578_s20 + $0x80] sm:$0xff]  ;;  %v4329_v32 = vld [vmem:[#allocation2 + $0x8] sm:$0xff]  ;;  %v24860_v60 = vld [vmem:[#allocation2 + $0x18] sm:$0xff]  ;;  %v4218_v56 = vmul.f32 %v23048_v0, %v24581_v1  ;;  %v4219_v5 = vmul.f32 %v23044_v63, %v24581_v1 }
 0x253   : >> { %19322 = vmatmul.mubr.msk.f32.gmra.mrb[2].mxu0 %vm4293_vm4, %v24678_v28  ;;  %4315 = vst.msk [vmem:[#allocation2 + $0x111] sm:$0xff] %vm4293_vm4, %v4281_v14  ;;  %v4253_v50 = vadd.f32 %v24584_v6, %v4213_v39  ;;  %v4254_v52 = vadd.f32 %v24584_v6, %v4214_v47  ;;  %v4255_v11 = vadd.f32 %v24584_v6, %v4215_v55  ;;  %v16450_v15 = vld [vmem:[%s24578_s20 + $0xa0] sm:$0xff]  ;;  %v16451_v26 = vld [vmem:[%s24578_s20 + $0xa8] sm:$0xff]  ;;  %v24870_v3 = vld [vmem:[#allocation2 + $0x30] sm:$0xff] }
 0x254   : >> { %19324 = vmatprep.mubr.msk.f32.mxu0 %vm4293_vm4, %v24683_v41  ;;  %21053 = vmatpush3.bf16.msra.mxu0 %v24625_v20  ;;  %v4279_v17 = vmax.f32 %v4247_v53, 0.0  ;;  %v4250_v20 = vadd.f32 %v24584_v6, %v4210_v25  ;;  %4317 = vst.msk [vmem:[#allocation2 + $0x129] sm:$0xff] %vm4293_vm4, %v4283_v44  ;;  %v4216_v53 = vmul.f32 %v23056_v48, %v24581_v1  ;;  %v24781_v44 = vld [vmem:[#allocation2 + $0x99] sm:$0xff]  ;;  %v24783_v47 = vld [vmem:[#allocation2 + $0xa9] sm:$0xff] }
 0x255   : >> { %21055 = vmatprep.subr.bf16.mxu0 %v24653_v8  ;;  %v4285_v29 = vmax.f32 %v4253_v50, 0.0  ;;  %v24753_v25 = vpack.c.bf16 %v16447_v49, %v16446_v57  ;;  %v4286_v36 = vmax.f32 %v4254_v52, 0.0  ;;  %v24789_v57 = vld [vmem:[#allocation2 + $0xb1] sm:$0xff]  ;;  %v24799_v50 = vld [vmem:[#allocation2 + $0xd9] sm:$0xff]  ;;  %v4258_v4 = vadd.f32 %v24584_v6, %v4218_v56 }
 0x256   : >> { %4313 = vst.msk [vmem:[#allocation2 + $0xf9] sm:$0xff] %vm4293_vm4, %v4279_v17  ;;  %v4282_v31 = vmax.f32 %v4250_v20, 0.0  ;;  %v24755_v17 = vld [vmem:[#allocation2 + $0x79] sm:$0xff]  ;;  %v4256_v62 = vadd.f32 %v24584_v6, %v4216_v53  ;;  %v4217_v20 = vmul.f32 %v23052_v46, %v24581_v1  ;;  %v24791_v49 = vld [vmem:[#allocation2 + $0xc1] sm:$0xff]  ;;  %v16448_v46 = vld [vmem:[%s24578_s20 + $0x90] sm:$0xff]  ;;  %v4259_v61 = vadd.f32 %v24584_v6, %v4219_v5 }
 0x257   : >> { %19325 = vmatmul.mubr.msk.f32.gmra.mrb[4].mxu0 %vm4293_vm4, %v24704_v58  ;;  %4319 = vst.msk [vmem:[#allocation2 + $0x141] sm:$0xff] %vm4293_vm4, %v4285_v29  ;;  %4320 = vst.msk [vmem:[#allocation2 + $0x151] sm:$0xff] %vm4293_vm4, %v4286_v36  ;;  %v24805_v52 = vld [vmem:[#allocation2 + $0xe1] sm:$0xff]  ;;  %v24807_v55 = vld [vmem:[#allocation2 + $0xf1] sm:$0xff]  ;;  %v21066_v16 = vpack.c.bf16 %v16449_v37, %v16448_v46  ;;  %v4290_v0 = vmax.f32 %v4258_v4, 0.0 }
 0x258   : >> { %19327 = vmatprep.mubr.msk.f32.mxu0 %vm4293_vm4, %v24709_v13  ;;  %21057 = vmatpush3.bf16.msra.mxu0 %v24653_v8  ;;  %4316 = vst.msk [vmem:[#allocation2 + $0x121] sm:$0xff] %vm4293_vm4, %v4282_v31  ;;  %v4252_v8 = vadd.f32 %v24584_v6, %v4212_v34  ;;  %v4288_v14 = vmax.f32 %v4256_v62, 0.0  ;;  %v4257_v19 = vadd.f32 %v24584_v6, %v4217_v20  ;;  %v24770_v31 = vld [vmem:[#allocation2 + $0x81] sm:$0xff]  ;;  %v24772_v34 = vld [vmem:[#allocation2 + $0x91] sm:$0xff] }
 0x259   : >> { %21059 = vmatprep.subr.bf16.mxu0 %v21058_v38  ;;  %v4328_v48 = vld [vmem:[#allocation2] sm:$0xff]  ;;  %v16453_v51 = vld [vmem:[%s24578_s20 + $0xb8] sm:$0xff]  ;;  %v24880_v37 = vld [vmem:[#allocation2 + $0x48] sm:$0xff]  ;;  %4324 = vst.msk [vmem:[#allocation2 + $0x181] sm:$0xff] %vm4293_vm4, %v4290_v0 }
 0x25a   : >> { %v4284_v12 = vmax.f32 %v4252_v8, 0.0  ;;  %4322 = vst.msk [vmem:[#allocation2 + $0x169] sm:$0xff] %vm4293_vm4, %v4288_v14  ;;  %v4289_v39 = vmax.f32 %v4257_v19, 0.0  ;;  %v24797_v8 = vld [vmem:[#allocation2 + $0xc9] sm:$0xff]  ;;  %v24821_v29 = vld [vmem:[#allocation2 + $0x111] sm:$0xff]  ;;  %v24868_v7 = vld [vmem:[#allocation2 + $0x20] sm:$0xff]  ;;  %v21074_v46 = vpack.c.bf16 %v16453_v51, %v16452_v54 }
 0x25b   : >> { %19328 = vmatmul.mubr.msk.f32.gmra.mrb[6].mxu0 %vm4293_vm4, %v24724_v42  ;;  %v24898_v51 = vld [vmem:[#allocation2 + $0x68] sm:$0xff]  ;;  %v24900_v54 = vld [vmem:[#allocation2 + $0x78] sm:$0xff]  ;;  %v24925_v35 = vld [vmem:[#allocation2 + $0xc0] sm:$0xff] }
 0x25c   : >> { %19330 = vmatprep.mubr.msk.f32.mxu0 %vm4293_vm4, %v24731_v40  ;;  %21061 = vmatpush3.bf16.msra.mxu0 %v21058_v38  ;;  %4318 = vst.msk [vmem:[#allocation2 + $0x139] sm:$0xff] %vm4293_vm4, %v4284_v12  ;;  %v4287_v38 = vmax.f32 %v4255_v11, 0.0  ;;  %4323 = vst.msk [vmem:[#allocation2 + $0x171] sm:$0xff] %vm4293_vm4, %v4289_v39  ;;  %v24815_v12 = vld [vmem:[#allocation2 + $0x109] sm:$0xff]  ;;  %v24933_v27 = vld [vmem:[#allocation2 + $0xd8] sm:$0xff] }
 0x25d   : >> { %21063 = vmatprep.subr.bf16.mxu0 %v24753_v25  ;;  %v24813_v53 = vld [vmem:[#allocation2 + $0xf9] sm:$0xff]  ;;  %v24829_v11 = vld [vmem:[#allocation2 + $0x129] sm:$0xff] }
 0x25e   : >> { %4321 = vst.msk [vmem:[#allocation2 + $0x159] sm:$0xff] %vm4293_vm4, %v4287_v38  ;;  %28532 = vst [vmem:[#allocation73_spill] sm:$0xff] %v24829_v11  ;;  %v24837_v20 = vld [vmem:[#allocation2 + $0x141] sm:$0xff]  ;;  %v24839_v38 = vld [vmem:[#allocation2 + $0x151] sm:$0xff] }
 0x25f   : >> { %19331 = vmatmul.mubr.msk.f32.gmra.mrb[8].mxu0 %vm4293_vm4, %v24751_v30  ;;  %v24823_v36 = vld [vmem:[#allocation2 + $0x121] sm:$0xff]  ;;  %28534 = vst [vmem:[#allocation75_spill] sm:$0xff] %v24837_v20  ;;  %28535 = vst [vmem:[#allocation76_spill] sm:$0xff] %v24839_v38  ;;  %v24941_v2 = vld [vmem:[#allocation2 + $0xf0] sm:$0xff] }
 0x260   : >> { %19333 = vmatprep.mubr.msk.f32.mxu0 %vm4293_vm4, %v24755_v17  ;;  %28531 = vst [vmem:[#allocation72_spill] sm:$0xff] %v24823_v36  ;;  %v24931_v33 = vld [vmem:[#allocation2 + $0xc8] sm:$0xff]  ;;  %v24939_v24 = vld [vmem:[#allocation2 + $0xe0] sm:$0xff]  ;;  %v24947_v21 = vld [vmem:[#allocation2 + $0xf8] sm:$0xff] }
 0x261   : >> { %v24847_v19 = vld [vmem:[#allocation2 + $0x169] sm:$0xff]  ;;  %v24957_v10 = vld [vmem:[#allocation2 + $0x120] sm:$0xff]  ;;  %v16489_v1 = vld [vmem:[%s24578_s20 + $0xd8] sm:$0xff] }
 0x262   : >> { %28537 = vst [vmem:[#allocation78_spill] sm:$0xff] %v24847_v19  ;;  %v24949_v23 = vld [vmem:[#allocation2 + $0x108] sm:$0xff]  ;;  %v24955_v22 = vld [vmem:[#allocation2 + $0x110] sm:$0xff] }
 0x263   : >> { %19334 = vmatmul.mubr.msk.f32.gmra.mrb[10].mxu0 %vm4293_vm4, %v24770_v31  ;;  %v24831_v62 = vld [vmem:[#allocation2 + $0x139] sm:$0xff]  ;;  %v24853_v39 = vld [vmem:[#allocation2 + $0x171] sm:$0xff]  ;;  %v24963_v9 = vld [vmem:[#allocation2 + $0x128] sm:$0xff] }
 0x264   : >> { %19336 = vmatprep.mubr.msk.f32.mxu0 %vm4293_vm4, %v24772_v34  ;;  %28533 = vst [vmem:[#allocation74_spill] sm:$0xff] %v24831_v62  ;;  %28538 = vst [vmem:[#allocation79_spill] sm:$0xff] %v24853_v39  ;;  %v24967_v18 = vld [vmem:[#allocation2 + $0x138] sm:$0xff]  ;;  %v24977_v59 = vld [vmem:[#allocation2 + $0x140] sm:$0xff] }
 0x265   : >> { %v24845_v14 = vld [vmem:[#allocation2 + $0x159] sm:$0xff]  ;;  %v24989_v56 = vld [vmem:[#allocation2 + $0x168] sm:$0xff]  ;;  %v16488_v0 = vld [vmem:[%s24578_s20 + $0xd0] sm:$0xff] }
 0x266   : >> { %28536 = vst [vmem:[#allocation77_spill] sm:$0xff] %v24845_v14  ;;  %v24987_v5 = vld [vmem:[#allocation2 + $0x158] sm:$0xff]  ;;  %v5054_v4 = vld [vmem:[#allocation2 + $0x2] sm:$0xff]  ;;  %v5055_v6 = vld [vmem:[#allocation2 + $0xa] sm:$0xff]  ;;  %v21082_v63 = vpack.c.bf16 %v16489_v1, %v16488_v0 }
 0x267   : >> { %19337 = vmatmul.mubr.msk.f32.gmra.mrb[12].mxu0 %vm4293_vm4, %v24781_v44  ;;  %v25020_v0 = vld [vmem:[#allocation2 + $0x3a] sm:$0xff] }
 0x268   : >> { %19339 = vmatprep.mubr.msk.f32.mxu0 %vm4293_vm4, %v24783_v47 }
 0x26b   : >> { %19340 = vmatmul.mubr.msk.f32.gmra.mrb[14].mxu0 %vm4293_vm4, %v24789_v57 }
 0x26c   : >> { %19342 = vmatprep.mubr.msk.f32.mxu0 %vm4293_vm4, %v24791_v49 }
 0x26f   : >> { %19343 = vmatmul.mubr.msk.f32.gmra.mrb[16].mxu0 %vm4293_vm4, %v24797_v8 }
 0x270   : >> { %19345 = vmatprep.mubr.msk.f32.mxu0 %vm4293_vm4, %v24799_v50 }
 0x273   : >> { %19346 = vmatmul.mubr.msk.f32.gmra.mrb[18].mxu0 %vm4293_vm4, %v24805_v52 }
 0x274   : >> { %19348 = vmatprep.mubr.msk.f32.mxu0 %vm4293_vm4, %v24807_v55 }
 0x277   : >> { %19349 = vmatmul.mubr.msk.f32.gmra.mrb[20].mxu0 %vm4293_vm4, %v24813_v53 }
 0x278   : >> { %19351 = vmatprep.mubr.msk.f32.mxu0 %vm4293_vm4, %v24815_v12 }
 0x27b   : >> { %19352 = vmatmul.mubr.msk.f32.gmra.mrb[22].mxu0 %vm4293_vm4, %v24821_v29 }
 0x27c   : >> { %19354 = vmatprep.mubr.msk.f32.mxu0 %vm4293_vm4, %v24823_v36  ;;  %v16493_v36 = vld [vmem:[%s24578_s20 + $0xf8] sm:$0xff] }
 0x27f   : >> { %19355 = vmatmul.mubr.msk.f32.gmra.mrb[24].mxu0 %vm4293_vm4, %v24829_v11  ;;  %v16492_v11 = vld [vmem:[%s24578_s20 + $0xf0] sm:$0xff] }
 0x280   : >> { %19357 = vmatprep.mubr.msk.f32.mxu0 %vm4293_vm4, %v24831_v62  ;;  %v25012_v62 = vld [vmem:[#allocation2 + $0x32] sm:$0xff]  ;;  %v21090_v1 = vpack.c.bf16 %v16493_v36, %v16492_v11  ;;  %v25040_v36 = vld [vmem:[#allocation2 + $0x7a] sm:$0xff]  ;;  %v25046_v11 = vld [vmem:[#allocation2 + $0x82] sm:$0xff] }
 0x281   : >> { %28540 = vst [vmem:[#allocation81_spill] sm:$0xff] %v25012_v62  ;;  %28544 = vst [vmem:[#allocation85_spill] sm:$0xff] %v25040_v36 }
 0x282   : >> { %28545 = vst [vmem:[#allocation86_spill] sm:$0xff] %v25046_v11 }
 0x283   : >> { %19358 = vmatmul.mubr.msk.f32.gmra.mrb[26].mxu0 %vm4293_vm4, %v24837_v20  ;;  %v25010_v20 = vld [vmem:[#allocation2 + $0x22] sm:$0xff] }
 0x284   : >> { %19360 = vmatprep.mubr.msk.f32.mxu0 %vm4293_vm4, %v24839_v38  ;;  %v16491_v38 = vld [vmem:[%s24578_s20 + $0xe8] sm:$0xff] }
 0x287   : >> { %19361 = vmatmul.mubr.msk.f32.gmra.mrb[28].mxu0 %vm4293_vm4, %v24845_v14  ;;  %v16490_v14 = vld [vmem:[%s24578_s20 + $0xe0] sm:$0xff] }
 0x288   : >> { %19363 = vmatprep.mubr.msk.f32.mxu0 %vm4293_vm4, %v24847_v19  ;;  %v4291_v19 = vmax.f32 %v4259_v61, 0.0  ;;  %v24995_v61 = vld [vmem:[#allocation2 + $0x170] sm:$0xff] }
 0x28a   : >> { %4325 = vst.msk [vmem:[#allocation2 + $0x189] sm:$0xff] %vm4293_vm4, %v4291_v19  ;;  %v25002_v19 = vld [vmem:[#allocation2 + $0x1a] sm:$0xff] }
 0x28b   : >> { %19364 = vmatmul.mubr.msk.f32.gmra.mrb[30].mxu0 %vm4293_vm4, %v24853_v39  ;;  %v24979_v39 = vld [vmem:[#allocation2 + $0x150] sm:$0xff]  ;;  %28539 = vst [vmem:[#allocation80_spill] sm:$0xff] %v25002_v19 }
 0x28c   : >> { %19382 = vmatprep.mubr.msk.f32.mxu0 %vm4293_vm4, %v4328_v48  ;;  %v21070_v48 = vpack.c.bf16 %v16451_v26, %v16450_v15  ;;  %v24888_v26 = vld [vmem:[#allocation2 + $0x50] sm:$0xff]  ;;  %v24890_v15 = vld [vmem:[#allocation2 + $0x60] sm:$0xff] }
 0x28f   : >> { %19383 = vmatmul.mubr.msk.f32.vlgmr.msra.gmra.mrb[0].mxu0 %vm4293_vm4, %v4329_v32  ;;  %v24878_v32 = vld [vmem:[#allocation2 + $0x38] sm:$0xff] }
 0x290   : >> { %21065 = vmatpush3.bf16.msra.mxu0 %v24753_v25  ;;  %19385 = vmatprep.mubr.msk.f32.mxu0 %vm4293_vm4, %v24860_v60  ;;  %v16486_v25 = vld [vmem:[%s24578_s20 + $0xc0] sm:$0xff] }
 0x291   : >> { %21067 = vmatprep.subr.bf16.mxu0 %v21066_v16  ;;  %v24892_v43 = vpack.c.bf16 %v16487_v45, %v16486_v25  ;;  %v24907_v45 = vld [vmem:[#allocation2 + $0x80] sm:$0xff]  ;;  %v24923_v25 = vld [vmem:[#allocation2 + $0xb0] sm:$0xff] }
 0x293   : >> { %19386 = vmatmul.mubr.msk.f32.gmra.mrb[2].mxu0 %vm4293_vm4, %v24868_v7 }
 0x294   : >> { %19388 = vmatprep.mubr.msk.f32.mxu0 %vm4293_vm4, %v24870_v3  ;;  %21069 = vmatpush3.bf16.msra.mxu0 %v21066_v16  ;;  %v24909_v16 = vld [vmem:[#allocation2 + $0x90] sm:$0xff] }
 0x295   : >> { %21071 = vmatprep.subr.bf16.mxu0 %v21070_v48 }
 0x297   : >> { %19389 = vmatmul.mubr.msk.f32.gmra.mrb[4].mxu0 %vm4293_vm4, %v24878_v32 }
 0x298   : >> { %19391 = vmatprep.mubr.msk.f32.mxu0 %vm4293_vm4, %v24880_v37  ;;  %21073 = vmatpush3.bf16.msra.mxu0 %v21070_v48  ;;  %v24915_v48 = vld [vmem:[#allocation2 + $0x98] sm:$0xff] }
 0x299   : >> { %21075 = vmatprep.subr.bf16.mxu0 %v21074_v46 }
 0x29b   : >> { %19392 = vmatmul.mubr.msk.f32.gmra.mrb[6].mxu0 %vm4293_vm4, %v24888_v26 }
 0x29c   : >> { %19394 = vmatprep.mubr.msk.f32.mxu0 %vm4293_vm4, %v24890_v15  ;;  %21077 = vmatpush3.bf16.msra.mxu0 %v21074_v46  ;;  %v24917_v46 = vld [vmem:[#allocation2 + $0xa8] sm:$0xff] }
 0x29d   : >> { %21079 = vmatprep.subr.bf16.mxu0 %v24892_v43 }
 0x29f   : >> { %19395 = vmatmul.mubr.msk.f32.gmra.mrb[8].mxu0 %vm4293_vm4, %v24898_v51 }
 0x2a0   : >> { %19397 = vmatprep.mubr.msk.f32.mxu0 %vm4293_vm4, %v24900_v54 }
 0x2a3   : >> { %19398 = vmatmul.mubr.msk.f32.gmra.mrb[10].mxu0 %vm4293_vm4, %v24907_v45 }
 0x2a4   : >> { %19400 = vmatprep.mubr.msk.f32.mxu0 %vm4293_vm4, %v24909_v16 }
 0x2a7   : >> { %19401 = vmatmul.mubr.msk.f32.gmra.mrb[12].mxu0 %vm4293_vm4, %v24915_v48 }
 0x2a8   : >> { %19403 = vmatprep.mubr.msk.f32.mxu0 %vm4293_vm4, %v24917_v46 }
 0x2ab   : >> { %19404 = vmatmul.mubr.msk.f32.gmra.mrb[14].mxu0 %vm4293_vm4, %v24923_v25 }
 0x2ac   : >> { %19406 = vmatprep.mubr.msk.f32.mxu0 %vm4293_vm4, %v24925_v35 }
 0x2af   : >> { %19407 = vmatmul.mubr.msk.f32.gmra.mrb[16].mxu0 %vm4293_vm4, %v24931_v33 }
 0x2b0   : >> { %19409 = vmatprep.mubr.msk.f32.mxu0 %vm4293_vm4, %v24933_v27 }
 0x2b3   : >> { %19410 = vmatmul.mubr.msk.f32.gmra.mrb[18].mxu0 %vm4293_vm4, %v24939_v24 }
 0x2b4   : >> { %19412 = vmatprep.mubr.msk.f32.mxu0 %vm4293_vm4, %v24941_v2 }
 0x2b7   : >> { %19413 = vmatmul.mubr.msk.f32.gmra.mrb[20].mxu0 %vm4293_vm4, %v24947_v21 }
 0x2b8   : >> { %19415 = vmatprep.mubr.msk.f32.mxu0 %vm4293_vm4, %v24949_v23 }
 0x2bb   : >> { %19416 = vmatmul.mubr.msk.f32.gmra.mrb[22].mxu0 %vm4293_vm4, %v24955_v22 }
 0x2bc   : >> { %19418 = vmatprep.mubr.msk.f32.mxu0 %vm4293_vm4, %v24957_v10 }
 0x2bf   : >> { %19419 = vmatmul.mubr.msk.f32.gmra.mrb[24].mxu0 %vm4293_vm4, %v24963_v9 }
 0x2c0   : >> { %19421 = vmatprep.mubr.msk.f32.mxu0 %vm4293_vm4, %v24967_v18 }
 0x2c3   : >> { %19422 = vmatmul.mubr.msk.f32.gmra.mrb[26].mxu0 %vm4293_vm4, %v24977_v59 }
 0x2c4   : >> { %19424 = vmatprep.mubr.msk.f32.mxu0 %vm4293_vm4, %v24979_v39 }
 0x2c7   : >> { %19425 = vmatmul.mubr.msk.f32.gmra.mrb[28].mxu0 %vm4293_vm4, %v24987_v5 }
 0x2c8   : >> { %19427 = vmatprep.mubr.msk.f32.mxu0 %vm4293_vm4, %v24989_v56 }
 0x2cb   : >> { %19428 = vmatmul.mubr.msk.f32.gmra.mrb[30].mxu0 %vm4293_vm4, %v24995_v61 }
 0x2cc   : >> { %19446 = vmatprep.mubr.msk.f32.mxu0 %vm4293_vm4, %v5054_v4  ;;  %v21086_v4 = vpack.c.bf16 %v16491_v38, %v16490_v14  ;;  %v25030_v38 = vld [vmem:[#allocation2 + $0x52] sm:$0xff]  ;;  %v25032_v14 = vld [vmem:[#allocation2 + $0x62] sm:$0xff] }
 0x2cd   : >> { %28541 = vst [vmem:[#allocation82_spill] sm:$0xff] %v25030_v38  ;;  %28542 = vst [vmem:[#allocation83_spill] sm:$0xff] %v25032_v14 }
 0x2cf   : >> { %19447 = vmatmul.mubr.msk.f32.vlgmr.msra.gmra.mrb[0].mxu0 %vm4293_vm4, %v5055_v6  ;;  %v16526_v6 = vld [vmem:[%s24578_s20 + $0x100] sm:$0xff] }
 0x2d0   : >> { %21081 = vmatpush3.bf16.msra.mxu0 %v24892_v43  ;;  %19449 = vmatprep.mubr.msk.f32.mxu0 %vm4293_vm4, %v25002_v19  ;;  %v25022_v43 = vld [vmem:[#allocation2 + $0x4a] sm:$0xff] }
 0x2d1   : >> { %21083 = vmatprep.subr.bf16.mxu0 %v21082_v63  ;;  %v16527_v19 = vld [vmem:[%s24578_s20 + $0x108] sm:$0xff] }
 0x2d3   : >> { %19450 = vmatmul.mubr.msk.f32.gmra.mrb[2].mxu0 %vm4293_vm4, %v25010_v20 }
 0x2d4   : >> { %19452 = vmatprep.mubr.msk.f32.mxu0 %vm4293_vm4, %v25012_v62  ;;  %21085 = vmatpush3.bf16.msra.mxu0 %v21082_v63  ;;  %v21094_v62 = vpack.c.bf16 %v16527_v19, %v16526_v6  ;;  %v25038_v63 = vld [vmem:[#allocation2 + $0x6a] sm:$0xff]  ;;  %v25048_v19 = vld [vmem:[#allocation2 + $0x92] sm:$0xff] }
 0x2d5   : >> { %21087 = vmatprep.subr.bf16.mxu0 %v21086_v4  ;;  %28543 = vst [vmem:[#allocation84_spill] sm:$0xff] %v25038_v63  ;;  %28546 = vst [vmem:[#allocation87_spill] sm:$0xff] %v25048_v19  ;;  %v25062_v6 = vld [vmem:[#allocation2 + $0xb2] sm:$0xff] }
 0x2d6   : >> { %28549 = vst [vmem:[#allocation90_spill] sm:$0xff] %v25062_v6 }
 0x2d7   : >> { %19453 = vmatmul.mubr.msk.f32.gmra.mrb[4].mxu0 %vm4293_vm4, %v25020_v0 }
 0x2d8   : >> { %19455 = vmatprep.mubr.msk.f32.mxu0 %vm4293_vm4, %v25022_v43  ;;  %21089 = vmatpush3.bf16.msra.mxu0 %v21086_v4  ;;  %v25054_v4 = vld [vmem:[#allocation2 + $0x9a] sm:$0xff] }
 0x2d9   : >> { %21091 = vmatprep.subr.bf16.mxu0 %v21090_v1  ;;  %28547 = vst [vmem:[#allocation88_spill] sm:$0xff] %v25054_v4 }
 0x2db   : >> { %19456 = vmatmul.mubr.msk.f32.gmra.mrb[6].mxu0 %vm4293_vm4, %v25030_v38  ;;  %v16533_v38 = vld [vmem:[%s24578_s20 + $0x138] sm:$0xff] }
 0x2dc   : >> { %19458 = vmatprep.mubr.msk.f32.mxu0 %vm4293_vm4, %v25032_v14  ;;  %21093 = vmatpush3.bf16.msra.mxu0 %v21090_v1  ;;  %v25056_v1 = vld [vmem:[#allocation2 + $0xaa] sm:$0xff] }
 0x2dd   : >> { %21095 = vmatprep.subr.bf16.mxu0 %v21094_v62  ;;  %28548 = vst [vmem:[#allocation89_spill] sm:$0xff] %v25056_v1  ;;  %v16531_v14 = vld [vmem:[%s24578_s20 + $0x128] sm:$0xff] }
 0x2df   : >> { %19459 = vmatmul.mubr.msk.f32.gmra.mrb[8].mxu0 %vm4293_vm4, %v25038_v63  ;;  %v16529_v63 = vld [vmem:[%s24578_s20 + $0x118] sm:$0xff] }
 0x2e0   : >> { %19461 = vmatprep.mubr.msk.f32.mxu0 %vm4293_vm4, %v25040_v36  ;;  %v25064_v36 = vld [vmem:[#allocation2 + $0xc2] sm:$0xff] }
 0x2e1   : >> { %28550 = vst [vmem:[#allocation91_spill] sm:$0xff] %v25064_v36 }
 0x2e3   : >> { %19462 = vmatmul.mubr.msk.f32.gmra.mrb[10].mxu0 %vm4293_vm4, %v25046_v11  ;;  %v25072_v11 = vld [vmem:[#allocation2 + $0xda] sm:$0xff] }
 0x2e4   : >> { %19464 = vmatprep.mubr.msk.f32.mxu0 %vm4293_vm4, %v25048_v19  ;;  %v25070_v19 = vld [vmem:[#allocation2 + $0xca] sm:$0xff]  ;;  %28552 = vst [vmem:[#allocation93_spill] sm:$0xff] %v25072_v11 }
 0x2e5   : >> { %28551 = vst [vmem:[#allocation92_spill] sm:$0xff] %v25070_v19 }
 0x2e7   : >> { %19465 = vmatmul.mubr.msk.f32.gmra.mrb[12].mxu0 %vm4293_vm4, %v25054_v4  ;;  %v25080_v4 = vld [vmem:[#allocation2 + $0xf2] sm:$0xff] }
 0x2e8   : >> { %19467 = vmatprep.mubr.msk.f32.mxu0 %vm4293_vm4, %v25056_v1  ;;  %v25078_v1 = vld [vmem:[#allocation2 + $0xe2] sm:$0xff]  ;;  %28554 = vst [vmem:[#allocation95_spill] sm:$0xff] %v25080_v4 }
 0x2e9   : >> { %28553 = vst [vmem:[#allocation94_spill] sm:$0xff] %v25078_v1 }
 0x2eb   : >> { %19468 = vmatmul.mubr.msk.f32.gmra.mrb[14].mxu0 %vm4293_vm4, %v25062_v6  ;;  %v25088_v6 = vld [vmem:[#allocation2 + $0x10a] sm:$0xff] }
 0x2ec   : >> { %19470 = vmatprep.mubr.msk.f32.mxu0 %vm4293_vm4, %v25064_v36  ;;  %v25086_v36 = vld [vmem:[#allocation2 + $0xfa] sm:$0xff]  ;;  %28556 = vst [vmem:[#allocation97_spill] sm:$0xff] %v25088_v6 }
 0x2ed   : >> { %28555 = vst [vmem:[#allocation96_spill] sm:$0xff] %v25086_v36 }
 0x2ef   : >> { %19471 = vmatmul.mubr.msk.f32.gmra.mrb[16].mxu0 %vm4293_vm4, %v25070_v19  ;;  %v25096_v19 = vld [vmem:[#allocation2 + $0x122] sm:$0xff] }
 0x2f0   : >> { %19473 = vmatprep.mubr.msk.f32.mxu0 %vm4293_vm4, %v25072_v11  ;;  %v25094_v11 = vld [vmem:[#allocation2 + $0x112] sm:$0xff]  ;;  %28558 = vst [vmem:[#allocation99_spill] sm:$0xff] %v25096_v19 }
 0x2f1   : >> { %28557 = vst [vmem:[#allocation98_spill] sm:$0xff] %v25094_v11 }
 0x2f3   : >> { %19474 = vmatmul.mubr.msk.f32.gmra.mrb[18].mxu0 %vm4293_vm4, %v25078_v1  ;;  %v25104_v1 = vld [vmem:[#allocation2 + $0x13a] sm:$0xff] }
 0x2f4   : >> { %19476 = vmatprep.mubr.msk.f32.mxu0 %vm4293_vm4, %v25080_v4  ;;  %v25102_v4 = vld [vmem:[#allocation2 + $0x12a] sm:$0xff]  ;;  %28560 = vst [vmem:[#allocation101_spill] sm:$0xff] %v25104_v1 }
 0x2f5   : >> { %28559 = vst [vmem:[#allocation100_spill] sm:$0xff] %v25102_v4 }
 0x2f7   : >> { %19477 = vmatmul.mubr.msk.f32.gmra.mrb[20].mxu0 %vm4293_vm4, %v25086_v36  ;;  %v25112_v36 = vld [vmem:[#allocation2 + $0x152] sm:$0xff] }
 0x2f8   : >> { %19479 = vmatprep.mubr.msk.f32.mxu0 %vm4293_vm4, %v25088_v6  ;;  %v25110_v6 = vld [vmem:[#allocation2 + $0x142] sm:$0xff]  ;;  %28562 = vst [vmem:[#allocation103_spill] sm:$0xff] %v25112_v36 }
 0x2f9   : >> { %28561 = vst [vmem:[#allocation102_spill] sm:$0xff] %v25110_v6 }
 0x2fb   : >> { %19480 = vmatmul.mubr.msk.f32.gmra.mrb[22].mxu0 %vm4293_vm4, %v25094_v11  ;;  %v25120_v11 = vld [vmem:[#allocation2 + $0x16a] sm:$0xff] }
 0x2fc   : >> { %19482 = vmatprep.mubr.msk.f32.mxu0 %vm4293_vm4, %v25096_v19  ;;  %v25118_v19 = vld [vmem:[#allocation2 + $0x15a] sm:$0xff]  ;;  %28564 = vst [vmem:[#allocation105_spill] sm:$0xff] %v25120_v11 }
 0x2fd   : >> { %28563 = vst [vmem:[#allocation104_spill] sm:$0xff] %v25118_v19 }
 0x2ff   : >> { %19483 = vmatmul.mubr.msk.f32.gmra.mrb[24].mxu0 %vm4293_vm4, %v25102_v4  ;;  %v16528_v4 = vld [vmem:[%s24578_s20 + $0x110] sm:$0xff] }
 0x300   : >> { %19485 = vmatprep.mubr.msk.f32.mxu0 %vm4293_vm4, %v25104_v1  ;;  %v25126_v1 = vld [vmem:[#allocation2 + $0x172] sm:$0xff] }
 0x301   : >> { %28565 = vst [vmem:[#allocation106_spill] sm:$0xff] %v25126_v1 }
 0x303   : >> { %19486 = vmatmul.mubr.msk.f32.gmra.mrb[26].mxu0 %vm4293_vm4, %v25110_v6  ;;  %v16530_v6 = vld [vmem:[%s24578_s20 + $0x120] sm:$0xff] }
 0x304   : >> { %19488 = vmatprep.mubr.msk.f32.mxu0 %vm4293_vm4, %v25112_v36  ;;  %v21098_v36 = vpack.c.bf16 %v16529_v63, %v16528_v4  ;;  %v16566_v63 = vld [vmem:[%s24578_s20 + $0x140] sm:$0xff]  ;;  %v16567_v4 = vld [vmem:[%s24578_s20 + $0x148] sm:$0xff] }
 0x307   : >> { %19489 = vmatmul.mubr.msk.f32.gmra.mrb[28].mxu0 %vm4293_vm4, %v25118_v19  ;;  %v16532_v19 = vld [vmem:[%s24578_s20 + $0x130] sm:$0xff] }
 0x308   : >> { %19491 = vmatprep.mubr.msk.f32.mxu0 %vm4293_vm4, %v25120_v11  ;;  %v21102_v11 = vpack.c.bf16 %v16531_v14, %v16530_v6  ;;  %v5844_v14 = vld [vmem:[#allocation2 + $0x19] sm:$0xff] }
 0x309   : >> { %v16570_v6 = vld [vmem:[%s24578_s20 + $0x160] sm:$0xff] }
 0x30b   : >> { %19492 = vmatmul.mubr.msk.f32.gmra.mrb[30].mxu0 %vm4293_vm4, %v25126_v1 }
 0x30c   : >> { %19510 = vmatprep.mubr.msk.f32.mxu0 %vm4293_vm4, %v24860_v60  ;;  %v21106_v60 = vpack.c.bf16 %v16533_v38, %v16532_v19  ;;  %v25202_v38 = vld [vmem:[#allocation2 + $0x188] sm:$0xff] }
 0x30f   : >> { %19511 = vmatmul.mubr.msk.f32.vlgmr.msra.gmra.mrb[0].mxu0 %vm4293_vm4, %v24868_v7  ;;  %v21110_v7 = vpack.c.bf16 %v16567_v4, %v16566_v63  ;;  %v16572_v4 = vld [vmem:[%s24578_s20 + $0x170] sm:$0xff] }
 0x310   : >> { %21097 = vmatpush3.bf16.msra.mxu0 %v21094_v62  ;;  %19513 = vmatprep.mubr.msk.f32.mxu0 %vm4293_vm4, %v24870_v3  ;;  %v25196_v62 = vld [vmem:[#allocation2 + $0x180] sm:$0xff] }
 0x311   : >> { %21099 = vmatprep.subr.bf16.mxu0 %v21098_v36  ;;  %28566 = vst [vmem:[#allocation107_spill] sm:$0xff] %v25196_v62 }
 0x313   : >> { %19514 = vmatmul.mubr.msk.f32.gmra.mrb[2].mxu0 %vm4293_vm4, %v24878_v32 }
 0x314   : >> { %19516 = vmatprep.mubr.msk.f32.mxu0 %vm4293_vm4, %v24880_v37  ;;  %21101 = vmatpush3.bf16.msra.mxu0 %v21098_v36  ;;  %v16568_v36 = vld [vmem:[%s24578_s20 + $0x150] sm:$0xff] }
 0x315   : >> { %21103 = vmatprep.subr.bf16.mxu0 %v21102_v11 }
 0x317   : >> { %19517 = vmatmul.mubr.msk.f32.gmra.mrb[4].mxu0 %vm4293_vm4, %v24888_v26 }
 0x318   : >> { %19519 = vmatprep.mubr.msk.f32.mxu0 %vm4293_vm4, %v24890_v15  ;;  %21105 = vmatpush3.bf16.msra.mxu0 %v21102_v11  ;;  %v16569_v11 = vld [vmem:[%s24578_s20 + $0x158] sm:$0xff] }
 0x319   : >> { %21107 = vmatprep.subr.bf16.mxu0 %v21106_v60  ;;  %v21114_v19 = vpack.c.bf16 %v16569_v11, %v16568_v36  ;;  %v16606_v36 = vld [vmem:[%s24578_s20 + $0x180] sm:$0xff]  ;;  %v16607_v11 = vld [vmem:[%s24578_s20 + $0x188] sm:$0xff] }
 0x31b   : >> { %19520 = vmatmul.mubr.msk.f32.gmra.mrb[6].mxu0 %vm4293_vm4, %v24898_v51 }
 0x31c   : >> { %19522 = vmatprep.mubr.msk.f32.mxu0 %vm4293_vm4, %v24900_v54  ;;  %21109 = vmatpush3.bf16.msra.mxu0 %v21106_v60  ;;  %v16571_v60 = vld [vmem:[%s24578_s20 + $0x168] sm:$0xff] }
 0x31d   : >> { %21111 = vmatprep.subr.bf16.mxu0 %v21110_v7  ;;  %v21118_v63 = vpack.c.bf16 %v16571_v60, %v16570_v6  ;;  %v28578_v6 = vld [vmem:[#allocation83_spill] sm:$0xff] }
 0x31f   : >> { %19523 = vmatmul.mubr.msk.f32.gmra.mrb[8].mxu0 %vm4293_vm4, %v24907_v45 }
 0x320   : >> { %19525 = vmatprep.mubr.msk.f32.mxu0 %vm4293_vm4, %v24909_v16 }
 0x323   : >> { %19526 = vmatmul.mubr.msk.f32.gmra.mrb[10].mxu0 %vm4293_vm4, %v24915_v48 }
 0x324   : >> { %19528 = vmatprep.mubr.msk.f32.mxu0 %vm4293_vm4, %v24917_v46 }
 0x327   : >> { %19529 = vmatmul.mubr.msk.f32.gmra.mrb[12].mxu0 %vm4293_vm4, %v24923_v25 }
 0x328   : >> { %19531 = vmatprep.mubr.msk.f32.mxu0 %vm4293_vm4, %v24925_v35 }
 0x32b   : >> { %19532 = vmatmul.mubr.msk.f32.gmra.mrb[14].mxu0 %vm4293_vm4, %v24931_v33 }
 0x32c   : >> { %19534 = vmatprep.mubr.msk.f32.mxu0 %vm4293_vm4, %v24933_v27 }
 0x32f   : >> { %19535 = vmatmul.mubr.msk.f32.gmra.mrb[16].mxu0 %vm4293_vm4, %v24939_v24 }
 0x330   : >> { %19537 = vmatprep.mubr.msk.f32.mxu0 %vm4293_vm4, %v24941_v2 }
 0x333   : >> { %19538 = vmatmul.mubr.msk.f32.gmra.mrb[18].mxu0 %vm4293_vm4, %v24947_v21 }
 0x334   : >> { %19540 = vmatprep.mubr.msk.f32.mxu0 %vm4293_vm4, %v24949_v23 }
 0x337   : >> { %19541 = vmatmul.mubr.msk.f32.gmra.mrb[20].mxu0 %vm4293_vm4, %v24955_v22 }
 0x338   : >> { %19543 = vmatprep.mubr.msk.f32.mxu0 %vm4293_vm4, %v24957_v10 }
 0x33b   : >> { %19544 = vmatmul.mubr.msk.f32.gmra.mrb[22].mxu0 %vm4293_vm4, %v24963_v9 }
 0x33c   : >> { %19546 = vmatprep.mubr.msk.f32.mxu0 %vm4293_vm4, %v24967_v18 }
 0x33f   : >> { %19547 = vmatmul.mubr.msk.f32.gmra.mrb[24].mxu0 %vm4293_vm4, %v24977_v59 }
 0x340   : >> { %19549 = vmatprep.mubr.msk.f32.mxu0 %vm4293_vm4, %v24979_v39 }
 0x343   : >> { %19550 = vmatmul.mubr.msk.f32.gmra.mrb[26].mxu0 %vm4293_vm4, %v24987_v5 }
 0x344   : >> { %19552 = vmatprep.mubr.msk.f32.mxu0 %vm4293_vm4, %v24989_v56 }
 0x347   : >> { %19553 = vmatmul.mubr.msk.f32.gmra.mrb[28].mxu0 %vm4293_vm4, %v24995_v61 }
 0x348   : >> { %19555 = vmatprep.mubr.msk.f32.mxu0 %vm4293_vm4, %v25196_v62  ;;  %v16573_v62 = vld [vmem:[%s24578_s20 + $0x178] sm:$0xff] }
 0x34b   : >> { %19556 = vmatmul.mubr.msk.f32.gmra.mrb[30].mxu0 %vm4293_vm4, %v25202_v38 }
 0x34c   : >> { %19574 = vmatprep.mubr.msk.f32.mxu0 %vm4293_vm4, %v5844_v14  ;;  %v21122_v14 = vpack.c.bf16 %v16573_v62, %v16572_v4  ;;  %v16646_v62 = vld [vmem:[%s24578_s20 + $0x1c0] sm:$0xff]  ;;  %v28580_v4 = vld [vmem:[#allocation85_spill] sm:$0xff] }
 0x34f   : >> { %19575 = vmatmul.mubr.msk.f32.vlgmr.msra.gmra.mrb[0].mxu0 %vm4293_vm4, %v24678_v28  ;;  %v21126_v28 = vpack.c.bf16 %v16607_v11, %v16606_v36  ;;  %v28582_v36 = vld [vmem:[#allocation87_spill] sm:$0xff]  ;;  %v28583_v11 = vld [vmem:[#allocation88_spill] sm:$0xff] }
 0x350   : >> { %21113 = vmatpush3.bf16.msra.mxu0 %v21110_v7  ;;  %19577 = vmatprep.mubr.msk.f32.mxu0 %vm4293_vm4, %v24683_v41  ;;  %v28567_v41 = vld [vmem:[#allocation72_spill] sm:$0xff] }
 0x351   : >> { %21115 = vmatprep.subr.bf16.mxu0 %v21114_v19 }
 0x353   : >> { %19578 = vmatmul.mubr.msk.f32.gmra.mrb[2].mxu0 %vm4293_vm4, %v24704_v58  ;;  %v28568_v58 = vld [vmem:[#allocation73_spill] sm:$0xff] }
 0x354   : >> { %19580 = vmatprep.mubr.msk.f32.mxu0 %vm4293_vm4, %v24709_v13  ;;  %21117 = vmatpush3.bf16.msra.mxu0 %v21114_v19  ;;  %v28569_v13 = vld [vmem:[#allocation74_spill] sm:$0xff]  ;;  %v16647_v19 = vld [vmem:[%s24578_s20 + $0x1c8] sm:$0xff] }
 0x355   : >> { %21119 = vmatprep.subr.bf16.mxu0 %v21118_v63  ;;  %v21142_v60 = vpack.c.bf16 %v16647_v19, %v16646_v62  ;;  %v16648_v62 = vld [vmem:[%s24578_s20 + $0x1d0] sm:$0xff]  ;;  %v16649_v19 = vld [vmem:[%s24578_s20 + $0x1d8] sm:$0xff] }
 0x357   : >> { %19581 = vmatmul.mubr.msk.f32.gmra.mrb[4].mxu0 %vm4293_vm4, %v24724_v42  ;;  %v28570_v42 = vld [vmem:[#allocation75_spill] sm:$0xff] }
 0x358   : >> { %19583 = vmatprep.mubr.msk.f32.mxu0 %vm4293_vm4, %v24731_v40  ;;  %21121 = vmatpush3.bf16.msra.mxu0 %v21118_v63  ;;  %v28571_v40 = vld [vmem:[#allocation76_spill] sm:$0xff] }
 0x359   : >> { %21123 = vmatprep.subr.bf16.mxu0 %v21122_v14  ;;  %v28579_v63 = vld [vmem:[#allocation84_spill] sm:$0xff] }
 0x35b   : >> { %19584 = vmatmul.mubr.msk.f32.gmra.mrb[6].mxu0 %vm4293_vm4, %v24751_v30  ;;  %v28572_v30 = vld [vmem:[#allocation77_spill] sm:$0xff] }
 0x35c   : >> { %19586 = vmatprep.mubr.msk.f32.mxu0 %vm4293_vm4, %v24755_v17  ;;  %21125 = vmatpush3.bf16.msra.mxu0 %v21122_v14  ;;  %v28573_v17 = vld [vmem:[#allocation78_spill] sm:$0xff] }
 0x35d   : >> { %21127 = vmatprep.subr.bf16.mxu0 %v21126_v28  ;;  %v28581_v14 = vld [vmem:[#allocation86_spill] sm:$0xff] }
 0x35f   : >> { %19587 = vmatmul.mubr.msk.f32.gmra.mrb[8].mxu0 %vm4293_vm4, %v24770_v31  ;;  %v25271_v31 = vld [vmem:[#allocation2 + $0x181] sm:$0xff] }
 0x360   : >> { %19589 = vmatprep.mubr.msk.f32.mxu0 %vm4293_vm4, %v24772_v34  ;;  %v28574_v34 = vld [vmem:[#allocation79_spill] sm:$0xff] }
 0x363   : >> { %19590 = vmatmul.mubr.msk.f32.gmra.mrb[10].mxu0 %vm4293_vm4, %v24781_v44  ;;  %v25277_v44 = vld [vmem:[#allocation2 + $0x189] sm:$0xff] }
 0x364   : >> { %19592 = vmatprep.mubr.msk.f32.mxu0 %vm4293_vm4, %v24783_v47  ;;  %v16608_v47 = vld [vmem:[%s24578_s20 + $0x190] sm:$0xff] }
 0x367   : >> { %19593 = vmatmul.mubr.msk.f32.gmra.mrb[12].mxu0 %vm4293_vm4, %v24789_v57  ;;  %v16609_v57 = vld [vmem:[%s24578_s20 + $0x198] sm:$0xff] }
 0x368   : >> { %19595 = vmatprep.mubr.msk.f32.mxu0 %vm4293_vm4, %v24791_v49  ;;  %v28575_v49 = vld [vmem:[#allocation80_spill] sm:$0xff] }
 0x36b   : >> { %19596 = vmatmul.mubr.msk.f32.gmra.mrb[14].mxu0 %vm4293_vm4, %v24797_v8  ;;  %v21130_v8 = vpack.c.bf16 %v16609_v57, %v16608_v47  ;;  %v28593_v47 = vld [vmem:[#allocation98_spill] sm:$0xff]  ;;  %v28594_v57 = vld [vmem:[#allocation99_spill] sm:$0xff] }
 0x36c   : >> { %19598 = vmatprep.mubr.msk.f32.mxu0 %vm4293_vm4, %v24799_v50  ;;  %v16610_v50 = vld [vmem:[%s24578_s20 + $0x1a0] sm:$0xff] }
 0x36f   : >> { %19599 = vmatmul.mubr.msk.f32.gmra.mrb[16].mxu0 %vm4293_vm4, %v24805_v52  ;;  %v16611_v52 = vld [vmem:[%s24578_s20 + $0x1a8] sm:$0xff] }
 0x370   : >> { %19601 = vmatprep.mubr.msk.f32.mxu0 %vm4293_vm4, %v24807_v55  ;;  %v28576_v55 = vld [vmem:[#allocation81_spill] sm:$0xff] }
 0x373   : >> { %19602 = vmatmul.mubr.msk.f32.gmra.mrb[18].mxu0 %vm4293_vm4, %v24813_v53  ;;  %v21134_v53 = vpack.c.bf16 %v16611_v52, %v16610_v50  ;;  %v28597_v50 = vld [vmem:[#allocation102_spill] sm:$0xff]  ;;  %v28598_v52 = vld [vmem:[#allocation103_spill] sm:$0xff] }
 0x374   : >> { %19604 = vmatprep.mubr.msk.f32.mxu0 %vm4293_vm4, %v24815_v12  ;;  %v16612_v12 = vld [vmem:[%s24578_s20 + $0x1b0] sm:$0xff] }
 0x377   : >> { %19605 = vmatmul.mubr.msk.f32.gmra.mrb[20].mxu0 %vm4293_vm4, %v24821_v29  ;;  %v16613_v29 = vld [vmem:[%s24578_s20 + $0x1b8] sm:$0xff] }
 0x378   : >> { %19607 = vmatprep.mubr.msk.f32.mxu0 %vm4293_vm4, %v28567_v41  ;;  %v21138_v7 = vpack.c.bf16 %v16613_v29, %v16612_v12  ;;  %v28585_v41 = vld [vmem:[#allocation90_spill] sm:$0xff]  ;;  %v28600_v12 = vld [vmem:[#allocation105_spill] sm:$0xff]  ;;  %v25347_v29 = vld [vmem:[#allocation2 + $0x182] sm:$0xff] }
 0x379   : >> { %28601 = vst [vmem:[#allocation72_spill] sm:$0xff] %v25347_v29 }
 0x37b   : >> { %19608 = vmatmul.mubr.msk.f32.gmra.mrb[22].mxu0 %vm4293_vm4, %v28568_v58  ;;  %v28586_v58 = vld [vmem:[#allocation91_spill] sm:$0xff] }
 0x37c   : >> { %19610 = vmatprep.mubr.msk.f32.mxu0 %vm4293_vm4, %v28569_v13  ;;  %v28587_v13 = vld [vmem:[#allocation92_spill] sm:$0xff] }
 0x37f   : >> { %19611 = vmatmul.mubr.msk.f32.gmra.mrb[24].mxu0 %vm4293_vm4, %v28570_v42  ;;  %v28588_v42 = vld [vmem:[#allocation93_spill] sm:$0xff] }
 0x380   : >> { %19613 = vmatprep.mubr.msk.f32.mxu0 %vm4293_vm4, %v28571_v40  ;;  %v28589_v40 = vld [vmem:[#allocation94_spill] sm:$0xff] }
 0x383   : >> { %19614 = vmatmul.mubr.msk.f32.gmra.mrb[26].mxu0 %vm4293_vm4, %v28572_v30  ;;  %v28590_v30 = vld [vmem:[#allocation95_spill] sm:$0xff] }
 0x384   : >> { %19616 = vmatprep.mubr.msk.f32.mxu0 %vm4293_vm4, %v28573_v17  ;;  %v28591_v17 = vld [vmem:[#allocation96_spill] sm:$0xff] }
 0x387   : >> { %19617 = vmatmul.mubr.msk.f32.gmra.mrb[28].mxu0 %vm4293_vm4, %v28574_v34  ;;  %v28592_v34 = vld [vmem:[#allocation97_spill] sm:$0xff] }
 0x388   : >> { %19619 = vmatprep.mubr.msk.f32.mxu0 %vm4293_vm4, %v25271_v31 }
 0x38b   : >> { %19620 = vmatmul.mubr.msk.f32.gmra.mrb[30].mxu0 %vm4293_vm4, %v25277_v44 }
 0x38c   : >> { %19638 = vmatprep.mubr.msk.f32.mxu0 %vm4293_vm4, %v28575_v49  ;;  %v28595_v49 = vld [vmem:[#allocation100_spill] sm:$0xff] }
 0x38f   : >> { %19639 = vmatmul.mubr.msk.f32.vlgmr.msra.gmra.mrb[0].mxu0 %vm4293_vm4, %v25010_v20  ;;  %v28577_v20 = vld [vmem:[#allocation82_spill] sm:$0xff] }
 0x390   : >> { %21129 = vmatpush3.bf16.msra.mxu0 %v21126_v28  ;;  %19641 = vmatprep.mubr.msk.f32.mxu0 %vm4293_vm4, %v28576_v55  ;;  %v28584_v28 = vld [vmem:[#allocation89_spill] sm:$0xff] }
 0x391   : >> { %21131 = vmatprep.subr.bf16.mxu0 %v21130_v8 }
 0x393   : >> { %19642 = vmatmul.mubr.msk.f32.gmra.mrb[2].mxu0 %vm4293_vm4, %v25020_v0 }
 0x394   : >> { %19644 = vmatprep.mubr.msk.f32.mxu0 %vm4293_vm4, %v25022_v43  ;;  %21133 = vmatpush3.bf16.msra.mxu0 %v21130_v8  ;;  %v28596_v8 = vld [vmem:[#allocation101_spill] sm:$0xff] }
 0x395   : >> { %21135 = vmatprep.subr.bf16.mxu0 %v21134_v53 }
 0x397   : >> { %19645 = vmatmul.mubr.msk.f32.gmra.mrb[4].mxu0 %vm4293_vm4, %v28577_v20 }
 0x398   : >> { %19647 = vmatprep.mubr.msk.f32.mxu0 %vm4293_vm4, %v28578_v6  ;;  %21137 = vmatpush3.bf16.msra.mxu0 %v21134_v53  ;;  %v28599_v53 = vld [vmem:[#allocation104_spill] sm:$0xff] }
 0x399   : >> { %21139 = vmatprep.subr.bf16.mxu0 %v21138_v7 }
 0x39b   : >> { %19648 = vmatmul.mubr.msk.f32.gmra.mrb[6].mxu0 %vm4293_vm4, %v28579_v63 }
 0x39c   : >> { %19650 = vmatprep.mubr.msk.f32.mxu0 %vm4293_vm4, %v28580_v4  ;;  %21141 = vmatpush3.bf16.msra.mxu0 %v21138_v7  ;;  %v25353_v7 = vld [vmem:[#allocation2 + $0x18a] sm:$0xff] }
 0x39d   : >> { %21143 = vmatprep.subr.bf16.mxu0 %v21142_v60 }
 0x39f   : >> { %19651 = vmatmul.mubr.msk.f32.gmra.mrb[8].mxu0 %vm4293_vm4, %v28581_v14 }
 0x3a0   : >> { %19653 = vmatprep.mubr.msk.f32.mxu0 %vm4293_vm4, %v28582_v36 }
 0x3a3   : >> { %19654 = vmatmul.mubr.msk.f32.gmra.mrb[10].mxu0 %vm4293_vm4, %v28583_v11 }
 0x3a4   : >> { %19656 = vmatprep.mubr.msk.f32.mxu0 %vm4293_vm4, %v28584_v28 }
 0x3a7   : >> { %19657 = vmatmul.mubr.msk.f32.gmra.mrb[12].mxu0 %vm4293_vm4, %v28585_v41 }
 0x3a8   : >> { %19659 = vmatprep.mubr.msk.f32.mxu0 %vm4293_vm4, %v28586_v58 }
 0x3ab   : >> { %19660 = vmatmul.mubr.msk.f32.gmra.mrb[14].mxu0 %vm4293_vm4, %v28587_v13 }
 0x3ac   : >> { %19662 = vmatprep.mubr.msk.f32.mxu0 %vm4293_vm4, %v28588_v42 }
 0x3af   : >> { %19663 = vmatmul.mubr.msk.f32.gmra.mrb[16].mxu0 %vm4293_vm4, %v28589_v40 }
 0x3b0   : >> { %19665 = vmatprep.mubr.msk.f32.mxu0 %vm4293_vm4, %v28590_v30 }
 0x3b3   : >> { %19666 = vmatmul.mubr.msk.f32.gmra.mrb[18].mxu0 %vm4293_vm4, %v28591_v17 }
 0x3b4   : >> { %19668 = vmatprep.mubr.msk.f32.mxu0 %vm4293_vm4, %v28592_v34 }
 0x3b7   : >> { %19669 = vmatmul.mubr.msk.f32.gmra.mrb[20].mxu0 %vm4293_vm4, %v28593_v47 }
 0x3b8   : >> { %19671 = vmatprep.mubr.msk.f32.mxu0 %vm4293_vm4, %v28594_v57 }
 0x3bb   : >> { %19672 = vmatmul.mubr.msk.f32.gmra.mrb[22].mxu0 %vm4293_vm4, %v28595_v49 }
 0x3bc   : >> { %19674 = vmatprep.mubr.msk.f32.mxu0 %vm4293_vm4, %v28596_v8 }
 0x3bf   : >> { %19675 = vmatmul.mubr.msk.f32.gmra.mrb[24].mxu0 %vm4293_vm4, %v28597_v50  ;;  %v16653_v50 = vld [vmem:[%s24578_s20 + $0x1f8] sm:$0xff] }
 0x3c0   : >> { %19677 = vmatprep.mubr.msk.f32.mxu0 %vm4293_vm4, %v28598_v52  ;;  %v16651_v52 = vld [vmem:[%s24578_s20 + $0x1e8] sm:$0xff] }
 0x3c3   : >> { %19678 = vmatmul.mubr.msk.f32.gmra.mrb[26].mxu0 %vm4293_vm4, %v28599_v53  ;;  %v16650_v53 = vld [vmem:[%s24578_s20 + $0x1e0] sm:$0xff] }
 0x3c4   : >> { %19680 = vmatprep.mubr.msk.f32.mxu0 %vm4293_vm4, %v28600_v12  ;;  %v21146_v12 = vpack.c.bf16 %v16649_v19, %v16648_v62  ;;  %v16686_v62 = vld [vmem:[%s24578_s20 + $0x200] sm:$0xff]  ;;  %v16687_v19 = vld [vmem:[%s24578_s20 + $0x208] sm:$0xff] }
 0x3c7   : >> { %19681 = vmatmul.mubr.msk.f32.gmra.mrb[28].mxu0 %vm4293_vm4, %v25126_v1  ;;  %v16652_v1 = vld [vmem:[%s24578_s20 + $0x1f0] sm:$0xff] }
 0x3c8   : >> { %19683 = vmatprep.mubr.msk.f32.mxu0 %vm4293_vm4, %v25347_v29  ;;  %v21150_v29 = vpack.c.bf16 %v16651_v52, %v16650_v53  ;;  %v7045_v52 = vld [vmem:[#allocation2 + $0xe1] sm:$0xff]  ;;  %v7046_v53 = vld [vmem:[#allocation2 + $0xf1] sm:$0xff] }
 0x3cb   : >> { %19684 = vmatmul.mubr.msk.f32.gmra.mrb[30].mxu0 %vm4293_vm4, %v25353_v7 }
 0x3cc   : >> { %19702 = vmatprep.mubr.msk.f32.mxu0 %vm4293_vm4, %v24870_v3  ;;  %v21154_v3 = vpack.c.bf16 %v16653_v50, %v16652_v1  ;;  %v7041_v1 = vld [vmem:[#allocation2 + $0xb1] sm:$0xff]  ;;  %v7044_v50 = vld [vmem:[#allocation2 + $0xd9] sm:$0xff] }
 0x3cf   : >> { %19703 = vmatmul.mubr.msk.f32.vlgmr.msra.gmra.mrb[0].mxu0 %vm4293_vm4, %v24878_v32  ;;  %v21158_v32 = vpack.c.bf16 %v16687_v19, %v16686_v62  ;;  %v7050_v62 = vld [vmem:[#allocation2 + $0x121] sm:$0xff]  ;;  %v7051_v19 = vld [vmem:[#allocation2 + $0x129] sm:$0xff] }
 0x3d0   : >> { %21145 = vmatpush3.bf16.msra.mxu0 %v21142_v60  ;;  %19705 = vmatprep.mubr.msk.f32.mxu0 %vm4293_vm4, %v24880_v37  ;;  %v16691_v37 = vld [vmem:[%s24578_s20 + $0x228] sm:$0xff] }
 0x3d1   : >> { %21147 = vmatprep.subr.bf16.mxu0 %v21146_v12  ;;  %v7043_v60 = vld [vmem:[#allocation2 + $0xc9] sm:$0xff] }
 0x3d3   : >> { %19706 = vmatmul.mubr.msk.f32.gmra.mrb[2].mxu0 %vm4293_vm4, %v24888_v26  ;;  %v7033_v26 = vld [vmem:[#allocation2 + $0x51] sm:$0xff] }
 0x3d4   : >> { %19708 = vmatprep.mubr.msk.f32.mxu0 %vm4293_vm4, %v24890_v15  ;;  %21149 = vmatpush3.bf16.msra.mxu0 %v21146_v12  ;;  %v7034_v15 = vld [vmem:[#allocation2 + $0x61] sm:$0xff]  ;;  %v7047_v12 = vld [vmem:[#allocation2 + $0xf9] sm:$0xff] }
 0x3d5   : >> { %21151 = vmatprep.subr.bf16.mxu0 %v21150_v29 }
 0x3d7   : >> { %19709 = vmatmul.mubr.msk.f32.gmra.mrb[4].mxu0 %vm4293_vm4, %v24898_v51 }
 0x3d8   : >> { %19711 = vmatprep.mubr.msk.f32.mxu0 %vm4293_vm4, %v24900_v54  ;;  %21153 = vmatpush3.bf16.msra.mxu0 %v21150_v29  ;;  %v16692_v54 = vld [vmem:[%s24578_s20 + $0x230] sm:$0xff] }
 0x3d9   : >> { %21155 = vmatprep.subr.bf16.mxu0 %v21154_v3  ;;  %v7048_v29 = vld [vmem:[#allocation2 + $0x109] sm:$0xff] }
 0x3db   : >> { %19712 = vmatmul.mubr.msk.f32.gmra.mrb[6].mxu0 %vm4293_vm4, %v24907_v45  ;;  %v16693_v45 = vld [vmem:[%s24578_s20 + $0x238] sm:$0xff] }
 0x3dc   : >> { %19714 = vmatprep.mubr.msk.f32.mxu0 %vm4293_vm4, %v24909_v16  ;;  %21157 = vmatpush3.bf16.msra.mxu0 %v21154_v3  ;;  %v7035_v16 = vld [vmem:[#allocation2 + $0x69] sm:$0xff]  ;;  %v7049_v3 = vld [vmem:[#allocation2 + $0x111] sm:$0xff] }
 0x3dd   : >> { %21159 = vmatprep.subr.bf16.mxu0 %v21158_v32 }
 0x3df   : >> { %19715 = vmatmul.mubr.msk.f32.gmra.mrb[8].mxu0 %vm4293_vm4, %v24915_v48  ;;  %v7036_v48 = vld [vmem:[#allocation2 + $0x79] sm:$0xff] }
 0x3e0   : >> { %19717 = vmatprep.mubr.msk.f32.mxu0 %vm4293_vm4, %v24917_v46  ;;  %v21170_v46 = vpack.c.bf16 %v16693_v45, %v16692_v54  ;;  %v25564_v54 = vld [vmem:[%s24567_s13 + $0x1] ss:$0 sm:$0xff] }
 0x3e3   : >> { %19718 = vmatmul.mubr.msk.f32.gmra.mrb[10].mxu0 %vm4293_vm4, %v24923_v25  ;;  %v7037_v25 = vld [vmem:[#allocation2 + $0x81] sm:$0xff] }
 0x3e4   : >> { %19720 = vmatprep.mubr.msk.f32.mxu0 %vm4293_vm4, %v24925_v35 }
 0x3e7   : >> { %19721 = vmatmul.mubr.msk.f32.gmra.mrb[12].mxu0 %vm4293_vm4, %v24931_v33  ;;  %v7032_v33 = vld [vmem:[#allocation2 + $0x49] sm:$0xff] }
 0x3e8   : >> { %19723 = vmatprep.mubr.msk.f32.mxu0 %vm4293_vm4, %v24933_v27 }
 0x3eb   : >> { %19724 = vmatmul.mubr.msk.f32.gmra.mrb[14].mxu0 %vm4293_vm4, %v24939_v24  ;;  %v7031_v24 = vld [vmem:[#allocation2 + $0x39] sm:$0xff] }
 0x3ec   : >> { %19726 = vmatprep.mubr.msk.f32.mxu0 %vm4293_vm4, %v24941_v2  ;;  %v16748_v2 = vld [vmem:[%s24578_s20 + $0x288] sm:$0xff] }
 0x3ef   : >> { %19727 = vmatmul.mubr.msk.f32.gmra.mrb[16].mxu0 %vm4293_vm4, %v24947_v21  ;;  %v16747_v21 = vld [vmem:[%s24578_s20 + $0x280] sm:$0xff] }
 0x3f0   : >> { %19729 = vmatprep.mubr.msk.f32.mxu0 %vm4293_vm4, %v24949_v23  ;;  %v16689_v23 = vld [vmem:[%s24578_s20 + $0x218] sm:$0xff]  ;;  %v21174_v27 = vpack.c.bf16 %v16748_v2, %v16747_v21  ;;  %v7061_v21 = vld [vmem:[#allocation2 + $0x1a1] sm:$0xff] }
 0x3f1   : >> { %v16742_v2 = vld [vmem:[%s24578_s20 + $0x268] sm:$0xff] }
 0x3f2   : >> { %21175 = vmatprep.subr.bf16.mxu1 %v21174_v27 }
 0x3f3   : >> { %19730 = vmatmul.mubr.msk.f32.gmra.mrb[18].mxu0 %vm4293_vm4, %v24955_v22  ;;  %v16688_v22 = vld [vmem:[%s24578_s20 + $0x210] sm:$0xff]  ;;  %21177 = vmatpush3.bf16.msra.mxu1 %v21174_v27 }
 0x3f4   : >> { %19732 = vmatprep.mubr.msk.f32.mxu0 %vm4293_vm4, %v24957_v10  ;;  %v7030_v10 = vld [vmem:[#allocation2 + $0x31] sm:$0xff]  ;;  %v21162_v35 = vpack.c.bf16 %v16689_v23, %v16688_v22  ;;  %v7060_v23 = vld [vmem:[#allocation2 + $0x199] sm:$0xff] }
 0x3f5   : >> { %v7057_v22 = vld [vmem:[#allocation2 + $0x171] sm:$0xff] }
 0x3f6   : >> { %v16743_v27 = vld [vmem:[%s24578_s20 + $0x270] sm:$0xff] }
 0x3f7   : >> { %19733 = vmatmul.mubr.msk.f32.gmra.mrb[20].mxu0 %vm4293_vm4, %v24963_v9  ;;  %v28602_v9 = vld [vmem:[#allocation107_spill] sm:$0xff] }
 0x3f8   : >> { %19735 = vmatprep.mubr.msk.f32.mxu0 %vm4293_vm4, %v24967_v18  ;;  %v6665_v18 = vld [vmem:[#allocation2 + $0x198] sm:$0xff] }
 0x3fb   : >> { %19736 = vmatmul.mubr.msk.f32.gmra.mrb[22].mxu0 %vm4293_vm4, %v24977_v59  ;;  %v6666_v59 = vld [vmem:[#allocation2 + $0x1a0] sm:$0xff] }
 0x3fc   : >> { %19738 = vmatprep.mubr.msk.f32.mxu0 %vm4293_vm4, %v24979_v39  ;;  %v16690_v39 = vld [vmem:[%s24578_s20 + $0x220] sm:$0xff] }
 0x3fd   : >> { %v21166_v51 = vpack.c.bf16 %v16691_v37, %v16690_v39  ;;  %v16821_v39 = vld [vmem:[%s24578_s20 + $0x2c0] sm:$0xff]  ;;  %v16822_v37 = vld [vmem:[%s24578_s20 + $0x2c8] sm:$0xff] }
 0x3ff   : >> { %19739 = vmatmul.mubr.msk.f32.gmra.mrb[24].mxu0 %vm4293_vm4, %v24987_v5  ;;  %v7038_v5 = vld [vmem:[#allocation2 + $0x91] sm:$0xff] }
 0x400   : >> { %19741 = vmatprep.mubr.msk.f32.mxu0 %vm4293_vm4, %v24989_v56  ;;  %v7039_v56 = vld [vmem:[#allocation2 + $0x99] sm:$0xff] }
 0x403   : >> { %19742 = vmatmul.mubr.msk.f32.gmra.mrb[26].mxu0 %vm4293_vm4, %v24995_v61  ;;  %v7040_v61 = vld [vmem:[#allocation2 + $0xa9] sm:$0xff] }
 0x404   : >> { %19744 = vmatprep.mubr.msk.f32.mxu0 %vm4293_vm4, %v28602_v9  ;;  %v7053_v9 = vld [vmem:[#allocation2 + $0x141] sm:$0xff] }
 0x407   : >> { %19745 = vmatmul.mubr.msk.f32.gmra.mrb[28].mxu0 %vm4293_vm4, %v25202_v38  ;;  %v7042_v38 = vld [vmem:[#allocation2 + $0xc1] sm:$0xff] }
 0x408   : >> { %19747 = vmatprep.mubr.msk.f32.mxu0 %vm4293_vm4, %v6665_v18  ;;  %v7054_v18 = vld [vmem:[#allocation2 + $0x151] sm:$0xff] }
 0x40b   : >> { %19748 = vmatmul.mubr.msk.f32.gmra.mrb[30].mxu0 %vm4293_vm4, %v6666_v59  ;;  %v7055_v59 = vld [vmem:[#allocation2 + $0x159] sm:$0xff] }
 0x40c   : >> { %19766 = vmatprep.mubr.msk.f32.mxu0 %vm4293_vm4, %v7030_v10  ;;  %v7056_v10 = vld [vmem:[#allocation2 + $0x169] sm:$0xff] }
 0x40f   : >> { %19767 = vmatmul.mubr.msk.f32.vlgmr.msra.gmra.mrb[0].mxu0 %vm4293_vm4, %v7031_v24 }
 0x410   : >> { %21161 = vmatpush3.bf16.msra.mxu0 %v21158_v32  ;;  %19769 = vmatprep.mubr.msk.f32.mxu0 %vm4293_vm4, %v7032_v33  ;;  %v7052_v32 = vld [vmem:[#allocation2 + $0x139] sm:$0xff] }
 0x411   : >> { %21163 = vmatprep.subr.bf16.mxu0 %v21162_v35  ;;  %v16744_v33 = vld [vmem:[%s24578_s20 + $0x278] sm:$0xff] }
 0x413   : >> { %19770 = vmatmul.mubr.msk.f32.gmra.mrb[2].mxu0 %vm4293_vm4, %v7033_v26  ;;  %v25549_v26 = vpack.c.bf16 %v16822_v37, %v16821_v39 }
 0x414   : >> { %19772 = vmatprep.mubr.msk.f32.mxu0 %vm4293_vm4, %v7034_v15  ;;  %21165 = vmatpush3.bf16.msra.mxu0 %v21162_v35  ;;  %v21202_v35 = vpack.c.bf16 %v16744_v33, %v16743_v27  ;;  %v25561_v15 = vld [vmem:[%s25558_s28] ss:$0 sm:$0xff] }
 0x415   : >> { %21167 = vmatprep.subr.bf16.mxu0 %v21166_v51 }
 0x417   : >> { %19773 = vmatmul.mubr.msk.f32.gmra.mrb[4].mxu0 %vm4293_vm4, %v7035_v16 }
 0x418   : >> { %19775 = vmatprep.mubr.msk.f32.mxu0 %vm4293_vm4, %v7036_v48  ;;  %21169 = vmatpush3.bf16.msra.mxu0 %v21166_v51  ;;  %v25568_v48 = vld [vmem:[%s24575_s26 + $0x1] ss:$0 sm:$0xff] }
 0x419   : >> { %21171 = vmatprep.subr.bf16.mxu0 %v21170_v46 }
 0x41b   : >> { %19776 = vmatmul.mubr.msk.f32.gmra.mrb[6].mxu0 %vm4293_vm4, %v7037_v25 }
 0x41c   : >> { %19778 = vmatprep.mubr.msk.f32.mxu0 %vm4293_vm4, %v7038_v5  ;;  %21173 = vmatpush3.bf16.msra.mxu0 %v21170_v46 }
 0x41f   : >> { %19779 = vmatmul.mubr.msk.f32.gmra.mrb[8].mxu0 %vm4293_vm4, %v7039_v56 }
 0x420   : >> { %19781 = vmatprep.mubr.msk.f32.mxu0 %vm4293_vm4, %v7040_v61 }
 0x423   : >> { %19782 = vmatmul.mubr.msk.f32.gmra.mrb[10].mxu0 %vm4293_vm4, %v7041_v1 }
 0x424   : >> { %19784 = vmatprep.mubr.msk.f32.mxu0 %vm4293_vm4, %v7042_v38 }
 0x427   : >> { %19785 = vmatmul.mubr.msk.f32.gmra.mrb[12].mxu0 %vm4293_vm4, %v7043_v60 }
 0x428   : >> { %19787 = vmatprep.mubr.msk.f32.mxu0 %vm4293_vm4, %v7044_v50 }
 0x42b   : >> { %19788 = vmatmul.mubr.msk.f32.gmra.mrb[14].mxu0 %vm4293_vm4, %v7045_v52 }
 0x42c   : >> { %19790 = vmatprep.mubr.msk.f32.mxu0 %vm4293_vm4, %v7046_v53 }
 0x42f   : >> { %19791 = vmatmul.mubr.msk.f32.gmra.mrb[16].mxu0 %vm4293_vm4, %v7047_v12 }
 0x430   : >> { %19793 = vmatprep.mubr.msk.f32.mxu0 %vm4293_vm4, %v7048_v29 }
 0x433   : >> { %19794 = vmatmul.mubr.msk.f32.gmra.mrb[18].mxu0 %vm4293_vm4, %v7049_v3 }
 0x434   : >> { %19796 = vmatprep.mubr.msk.f32.mxu0 %vm4293_vm4, %v7050_v62 }
 0x437   : >> { %19797 = vmatmul.mubr.msk.f32.gmra.mrb[20].mxu0 %vm4293_vm4, %v7051_v19 }
 0x438   : >> { %19799 = vmatprep.mubr.msk.f32.mxu0 %vm4293_vm4, %v7052_v32 }
 0x43b   : >> { %19800 = vmatmul.mubr.msk.f32.gmra.mrb[22].mxu0 %vm4293_vm4, %v7053_v9 }
 0x43c   : >> { %19802 = vmatprep.mubr.msk.f32.mxu0 %vm4293_vm4, %v7054_v18 }
 0x43f   : >> { %19803 = vmatmul.mubr.msk.f32.gmra.mrb[24].mxu0 %vm4293_vm4, %v7055_v59 }
 0x440   : >> { %19805 = vmatprep.mubr.msk.f32.mxu0 %vm4293_vm4, %v7056_v10 }
 0x443   : >> { %19806 = vmatmul.mubr.msk.f32.gmra.mrb[26].mxu0 %vm4293_vm4, %v7057_v22 }
 0x444   : >> { %19808 = vmatprep.mubr.msk.f32.mxu0 %vm4293_vm4, %v25271_v31  ;;  %v28605_v31 = vld [vmem:[#allocation104_spill] sm:$0xff] }
 0x447   : >> { %19809 = vmatmul.mubr.msk.f32.gmra.mrb[28].mxu0 %vm4293_vm4, %v25277_v44  ;;  %v28606_v44 = vld [vmem:[#allocation105_spill] sm:$0xff] }
 0x448   : >> { %19811 = vmatprep.mubr.msk.f32.mxu0 %vm4293_vm4, %v7060_v23 }
 0x44b   : >> { %19812 = vmatmul.mubr.msk.f32.gmra.mrb[30].mxu0 %vm4293_vm4, %v7061_v21 }
 0x44c   : >> { %19830 = vmatprep.mubr.msk.f32.mxu0 %vm4293_vm4, %v28576_v55  ;;  %v28607_v55 = vld [vmem:[#allocation106_spill] sm:$0xff] }
 0x44f   : >> { %19831 = vmatmul.mubr.msk.f32.vlgmr.msra.gmra.mrb[0].mxu0 %vm4293_vm4, %v25020_v0  ;;  %v28603_v0 = vld [vmem:[#allocation102_spill] sm:$0xff] }
 0x450   : >> { %19833 = vmatprep.mubr.msk.f32.mxu0 %vm4293_vm4, %v25022_v43  ;;  %v28604_v43 = vld [vmem:[#allocation103_spill] sm:$0xff] }
 0x453   : >> { %19834 = vmatmul.mubr.msk.f32.gmra.mrb[2].mxu0 %vm4293_vm4, %v28577_v20  ;;  %v28608_v20 = vld [vmem:[#allocation72_spill] sm:$0xff] }
 0x454   : >> { %19836 = vmatprep.mubr.msk.f32.mxu0 %vm4293_vm4, %v28578_v6  ;;  %v7455_v6 = vld [vmem:[#allocation2 + $0x19a] sm:$0xff] }
 0x457   : >> { %19837 = vmatmul.mubr.msk.f32.gmra.mrb[4].mxu0 %vm4293_vm4, %v28579_v63  ;;  %v7456_v63 = vld [vmem:[#allocation2 + $0x1a2] sm:$0xff] }
 0x458   : >> { %19839 = vmatprep.mubr.msk.f32.mxu0 %vm4293_vm4, %v28580_v4  ;;  %v16749_v4 = vld [vmem:[%s24578_s20 + $0x290] sm:$0xff] }
 0x45b   : >> { %19840 = vmatmul.mubr.msk.f32.gmra.mrb[6].mxu0 %vm4293_vm4, %v28581_v14  ;;  %v16750_v14 = vld [vmem:[%s24578_s20 + $0x298] sm:$0xff] }
 0x45c   : >> { %19842 = vmatprep.mubr.msk.f32.mxu0 %vm4293_vm4, %v28582_v36  ;;  %v21178_v36 = vpack.c.bf16 %v16750_v14, %v16749_v4 }
 0x45e   : >> { %21179 = vmatprep.subr.bf16.mxu1 %v21178_v36 }
 0x45f   : >> { %19843 = vmatmul.mubr.msk.f32.gmra.mrb[8].mxu0 %vm4293_vm4, %v28583_v11  ;;  %21181 = vmatpush3.bf16.msra.mxu1 %v21178_v36  ;;  %v16751_v11 = vld [vmem:[%s24578_s20 + $0x2a0] sm:$0xff] }
 0x460   : >> { %19845 = vmatprep.mubr.msk.f32.mxu0 %vm4293_vm4, %v28584_v28  ;;  %v16752_v28 = vld [vmem:[%s24578_s20 + $0x2a8] sm:$0xff] }
 0x463   : >> { %19846 = vmatmul.mubr.msk.f32.gmra.mrb[10].mxu0 %vm4293_vm4, %v28585_v41  ;;  %v21182_v41 = vpack.c.bf16 %v16752_v28, %v16751_v11 }
 0x464   : >> { %19848 = vmatprep.mubr.msk.f32.mxu0 %vm4293_vm4, %v28586_v58  ;;  %v16753_v58 = vld [vmem:[%s24578_s20 + $0x2b0] sm:$0xff] }
 0x465   : >> { %21183 = vmatprep.subr.bf16.mxu1 %v21182_v41 }
 0x466   : >> { %21185 = vmatpush3.bf16.msra.mxu1 %v21182_v41 }
 0x467   : >> { %19849 = vmatmul.mubr.msk.f32.gmra.mrb[12].mxu0 %vm4293_vm4, %v28587_v13  ;;  %v16754_v13 = vld [vmem:[%s24578_s20 + $0x2b8] sm:$0xff] }
 0x468   : >> { %19851 = vmatprep.mubr.msk.f32.mxu0 %vm4293_vm4, %v28588_v42  ;;  %v21186_v42 = vpack.c.bf16 %v16754_v13, %v16753_v58 }
 0x46a   : >> { %21187 = vmatprep.subr.bf16.mxu1 %v21186_v42 }
 0x46b   : >> { %19852 = vmatmul.mubr.msk.f32.gmra.mrb[14].mxu0 %vm4293_vm4, %v28589_v40  ;;  %21189 = vmatpush3.bf16.msra.mxu1 %v21186_v42  ;;  %v8046_v40 = vld [vmem:[#allocation2 + $0x1] sm:$0xff] }
 0x46c   : >> { %19854 = vmatprep.mubr.msk.f32.mxu0 %vm4293_vm4, %v28590_v30  ;;  %19894 = vmatprep.mubr.msk.f32.mxu1 %vm4293_vm4, %v8046_v40  ;;  %v8047_v30 = vld [vmem:[#allocation2 + $0x9] sm:$0xff] }
 0x46e   : >> { %19895 = vmatmul.mubr.msk.f32.vlgmr.msra.gmra.mrb[0].mxu1 %vm4293_vm4, %v8047_v30 }
 0x46f   : >> { %19855 = vmatmul.mubr.msk.f32.gmra.mrb[16].mxu0 %vm4293_vm4, %v28591_v17  ;;  %v16737_v17 = vld [vmem:[%s24578_s20 + $0x240] sm:$0xff] }
 0x470   : >> { %19857 = vmatprep.mubr.msk.f32.mxu0 %vm4293_vm4, %v28592_v34  ;;  %v16738_v34 = vld [vmem:[%s24578_s20 + $0x248] sm:$0xff] }
 0x473   : >> { %19858 = vmatmul.mubr.msk.f32.gmra.mrb[18].mxu0 %vm4293_vm4, %v28593_v47  ;;  %v21190_v47 = vpack.c.bf16 %v16738_v34, %v16737_v17 }
 0x474   : >> { %19860 = vmatprep.mubr.msk.f32.mxu0 %vm4293_vm4, %v28594_v57  ;;  %v16739_v57 = vld [vmem:[%s24578_s20 + $0x250] sm:$0xff] }
 0x475   : >> { %21191 = vmatprep.subr.bf16.mxu1 %v21190_v47 }
 0x476   : >> { %21193 = vmatpush3.bf16.msra.mxu1 %v21190_v47 }
 0x477   : >> { %19861 = vmatmul.mubr.msk.f32.gmra.mrb[20].mxu0 %vm4293_vm4, %v28595_v49  ;;  %v16740_v49 = vld [vmem:[%s24578_s20 + $0x258] sm:$0xff] }
 0x478   : >> { %19863 = vmatprep.mubr.msk.f32.mxu0 %vm4293_vm4, %v28596_v8  ;;  %v21194_v8 = vpack.c.bf16 %v16740_v49, %v16739_v57 }
 0x47a   : >> { %21195 = vmatprep.subr.bf16.mxu1 %v21194_v8 }
 0x47b   : >> { %19864 = vmatmul.mubr.msk.f32.gmra.mrb[22].mxu0 %vm4293_vm4, %v28603_v0  ;;  %21197 = vmatpush3.bf16.msra.mxu1 %v21194_v8 }
 0x47c   : >> { %19866 = vmatprep.mubr.msk.f32.mxu0 %vm4293_vm4, %v28604_v43 }
 0x47f   : >> { %19867 = vmatmul.mubr.msk.f32.gmra.mrb[24].mxu0 %vm4293_vm4, %v28605_v31 }
 0x480   : >> { %19869 = vmatprep.mubr.msk.f32.mxu0 %vm4293_vm4, %v28606_v44 }
 0x483   : >> { %19870 = vmatmul.mubr.msk.f32.gmra.mrb[26].mxu0 %vm4293_vm4, %v28607_v55 }
 0x484   : >> { %19872 = vmatprep.mubr.msk.f32.mxu0 %vm4293_vm4, %v28608_v20 }
 0x487   : >> { %19873 = vmatmul.mubr.msk.f32.gmra.mrb[28].mxu0 %vm4293_vm4, %v25353_v7  ;;  %v16741_v7 = vld [vmem:[%s24578_s20 + $0x260] sm:$0xff] }
 0x488   : >> { %19875 = vmatprep.mubr.msk.f32.mxu0 %vm4293_vm4, %v7455_v6  ;;  %v21198_v24 = vpack.c.bf16 %v16742_v2, %v16741_v7 }
 0x48a   : >> { %21199 = vmatprep.subr.bf16.mxu1 %v21198_v24 }
 0x48b   : >> { %19876 = vmatmul.mubr.msk.f32.gmra.mrb[30].mxu0 %vm4293_vm4, %v7456_v63  ;;  %21201 = vmatpush3.bf16.msra.mxu1 %v21198_v24 }
 0x48c   : >> { %21203 = vmatprep.subr.bf16.mxu1 %v21202_v35 }
 0x48f   : >> { %21205 = vmatpush3.bf16.msra.mxu1 %v21202_v35 }
 0x490   : >> { %21207 = vmatprep.subr.bf16.mxu1 %v25549_v26 }
 0x522   : >> { %v19832_v51 = vpop.f32.mrb[0].mxu0 }
 0x523   : >> { %v7827_v45 = vadd.f32 %v19832_v51, %v25561_v15  ;;  %v7629_v16 = vpop.f32.mrb[1].mxu0 }
 0x524   : >> { %v7826_v46 = vadd.f32 %v25561_v15, %v7629_v16 }
 0x525   : >> { %v7867_v25 = vmul.f32 %v25564_v54, %v7827_v45 }
 0x526   : >> { %v7866_v5 = vmul.f32 %v25564_v54, %v7826_v46  ;;  %v19835_v56 = vpop.f32.mrb[2].mxu0 }
 0x527   : >> { %v7907_v61 = vadd.f32 %v25568_v48, %v7867_v25  ;;  %v7829_v1 = vadd.f32 %v19835_v56, %v25561_v15  ;;  %v7639_v38 = vpop.f32.mrb[3].mxu0 }
 0x528   : >> { %v7906_v60 = vadd.f32 %v25568_v48, %v7866_v5  ;;  %v7828_v50 = vadd.f32 %v25561_v15, %v7639_v38 }
 0x529   : >> { %v7939_v52 = vmax.f32 %v7907_v61, 0.0  ;;  %v7869_v53 = vmul.f32 %v25564_v54, %v7829_v1 }
 0x52a   : >> { %v7938_v12 = vmax.f32 %v7906_v60, 0.0  ;;  %v7868_v29 = vmul.f32 %v25564_v54, %v7828_v50  ;;  %v19838_v3 = vpop.f32.mrb[4].mxu0 }
 0x52b   : >> { %7971 = vst.msk [vmem:[#allocation2 + $0x21] sm:$0xff] %vm4293_vm4, %v7939_v52  ;;  %v7909_v62 = vadd.f32 %v25568_v48, %v7869_v53  ;;  %v7831_v19 = vadd.f32 %v19838_v3, %v25561_v15  ;;  %v7649_v32 = vpop.f32.mrb[5].mxu0 }
 0x52c   : >> { %7970 = vst.msk [vmem:[#allocation2 + $0x19] sm:$0xff] %vm4293_vm4, %v7938_v12  ;;  %v7908_v9 = vadd.f32 %v25568_v48, %v7868_v29  ;;  %v7830_v18 = vadd.f32 %v25561_v15, %v7649_v32 }
 0x52d   : >> { %v7941_v59 = vmax.f32 %v7909_v62, 0.0  ;;  %v7871_v10 = vmul.f32 %v25564_v54, %v7831_v19 }
 0x52e   : >> { %v7940_v22 = vmax.f32 %v7908_v9, 0.0  ;;  %v7870_v23 = vmul.f32 %v25564_v54, %v7830_v18  ;;  %v19841_v21 = vpop.f32.mrb[6].mxu0 }
 0x52f   : >> { %7973 = vst.msk [vmem:[#allocation2 + $0x39] sm:$0xff] %vm4293_vm4, %v7941_v59  ;;  %v7911_v0 = vadd.f32 %v25568_v48, %v7871_v10  ;;  %v7833_v43 = vadd.f32 %v19841_v21, %v25561_v15  ;;  %v7659_v31 = vpop.f32.mrb[7].mxu0 }
 0x530   : >> { %7972 = vst.msk [vmem:[#allocation2 + $0x31] sm:$0xff] %vm4293_vm4, %v7940_v22  ;;  %v7910_v44 = vadd.f32 %v25568_v48, %v7870_v23  ;;  %v7832_v55 = vadd.f32 %v25561_v15, %v7659_v31 }
 0x531   : >> { %v7943_v20 = vmax.f32 %v7911_v0, 0.0  ;;  %v7873_v6 = vmul.f32 %v25564_v54, %v7833_v43 }
 0x532   : >> { %v7942_v63 = vmax.f32 %v7910_v44, 0.0  ;;  %v7872_v4 = vmul.f32 %v25564_v54, %v7832_v55  ;;  %v19844_v14 = vpop.f32.mrb[8].mxu0  ;;  %v25605_v42 = vld [vmem:[#allocation2 + $0x21] sm:$0xff] }
 0x533   : >> { %7975 = vst.msk [vmem:[#allocation2 + $0x51] sm:$0xff] %vm4293_vm4, %v7943_v20  ;;  %v7913_v36 = vadd.f32 %v25568_v48, %v7873_v6  ;;  %v7835_v11 = vadd.f32 %v19844_v14, %v25561_v15  ;;  %v7669_v28 = vpop.f32.mrb[9].mxu0  ;;  %v25598_v41 = vld [vmem:[#allocation2 + $0x19] sm:$0xff] }
 0x534   : >> { %7974 = vst.msk [vmem:[#allocation2 + $0x49] sm:$0xff] %vm4293_vm4, %v7942_v63  ;;  %v7912_v58 = vadd.f32 %v25568_v48, %v7872_v4  ;;  %v7834_v13 = vadd.f32 %v25561_v15, %v7669_v28  ;;  %19897 = vmatprep.mubr.msk.f32.mxu1 %vm4293_vm4, %v25598_v41 }
 0x535   : >> { %v7945_v40 = vmax.f32 %v7913_v36, 0.0  ;;  %v7875_v30 = vmul.f32 %v25564_v54, %v7835_v11  ;;  %19898 = vmatmul.mubr.msk.f32.gmra.mrb[2].mxu1 %vm4293_vm4, %v25605_v42 }
 0x536   : >> { %v7944_v17 = vmax.f32 %v7912_v58, 0.0  ;;  %v7874_v34 = vmul.f32 %v25564_v54, %v7834_v13  ;;  %v19847_v47 = vpop.f32.mrb[10].mxu0  ;;  %v25621_v27 = vld [vmem:[#allocation2 + $0x39] sm:$0xff] }
 0x537   : >> { %7977 = vst.msk [vmem:[#allocation2 + $0x69] sm:$0xff] %vm4293_vm4, %v7945_v40  ;;  %v7915_v57 = vadd.f32 %v25568_v48, %v7875_v30  ;;  %v7837_v49 = vadd.f32 %v19847_v47, %v25561_v15  ;;  %v7679_v8 = vpop.f32.mrb[11].mxu0  ;;  %v25614_v7 = vld [vmem:[#allocation2 + $0x31] sm:$0xff] }
 0x538   : >> { %7976 = vst.msk [vmem:[#allocation2 + $0x61] sm:$0xff] %vm4293_vm4, %v7944_v17  ;;  %v7914_v2 = vadd.f32 %v25568_v48, %v7874_v34  ;;  %v7836_v24 = vadd.f32 %v25561_v15, %v7679_v8  ;;  %19900 = vmatprep.mubr.msk.f32.mxu1 %vm4293_vm4, %v25614_v7 }
 0x539   : >> { %v7947_v33 = vmax.f32 %v7915_v57, 0.0  ;;  %v7877_v35 = vmul.f32 %v25564_v54, %v7837_v49  ;;  %19901 = vmatmul.mubr.msk.f32.gmra.mrb[4].mxu1 %vm4293_vm4, %v25621_v27 }
 0x53a   : >> { %v7946_v39 = vmax.f32 %v7914_v2, 0.0  ;;  %v7876_v37 = vmul.f32 %v25564_v54, %v7836_v24  ;;  %v19850_v51 = vpop.f32.mrb[12].mxu0  ;;  %v25637_v61 = vld [vmem:[#allocation2 + $0x51] sm:$0xff] }
 0x53b   : >> { %7979 = vst.msk [vmem:[#allocation2 + $0x81] sm:$0xff] %vm4293_vm4, %v7947_v33  ;;  %v7917_v45 = vadd.f32 %v25568_v48, %v7877_v35  ;;  %v7839_v16 = vadd.f32 %v19850_v51, %v25561_v15  ;;  %v7689_v46 = vpop.f32.mrb[13].mxu0  ;;  %v25630_v25 = vld [vmem:[#allocation2 + $0x49] sm:$0xff] }
 0x53c   : >> { %7978 = vst.msk [vmem:[#allocation2 + $0x79] sm:$0xff] %vm4293_vm4, %v7946_v39  ;;  %v7916_v5 = vadd.f32 %v25568_v48, %v7876_v37  ;;  %v7838_v56 = vadd.f32 %v25561_v15, %v7689_v46  ;;  %19903 = vmatprep.mubr.msk.f32.mxu1 %vm4293_vm4, %v25630_v25 }
 0x53d   : >> { %v7949_v1 = vmax.f32 %v7917_v45, 0.0  ;;  %v7879_v38 = vmul.f32 %v25564_v54, %v7839_v16  ;;  %19904 = vmatmul.mubr.msk.f32.gmra.mrb[6].mxu1 %vm4293_vm4, %v25637_v61 }
 0x53e   : >> { %v7948_v60 = vmax.f32 %v7916_v5, 0.0  ;;  %v7878_v50 = vmul.f32 %v25564_v54, %v7838_v56  ;;  %v19853_v52 = vpop.f32.mrb[14].mxu0  ;;  %v25653_v32 = vld [vmem:[#allocation2 + $0x69] sm:$0xff] }
 0x53f   : >> { %7981 = vst.msk [vmem:[#allocation2 + $0x99] sm:$0xff] %vm4293_vm4, %v7949_v1  ;;  %v7919_v53 = vadd.f32 %v25568_v48, %v7879_v38  ;;  %v7841_v12 = vadd.f32 %v19853_v52, %v25561_v15  ;;  %v7699_v29 = vpop.f32.mrb[15].mxu0  ;;  %v25646_v3 = vld [vmem:[#allocation2 + $0x61] sm:$0xff] }
 0x540   : >> { %7980 = vst.msk [vmem:[#allocation2 + $0x91] sm:$0xff] %vm4293_vm4, %v7948_v60  ;;  %v7918_v62 = vadd.f32 %v25568_v48, %v7878_v50  ;;  %v7840_v19 = vadd.f32 %v25561_v15, %v7699_v29  ;;  %19906 = vmatprep.mubr.msk.f32.mxu1 %vm4293_vm4, %v25646_v3 }
 0x541   : >> { %v7951_v9 = vmax.f32 %v7919_v53, 0.0  ;;  %v7881_v18 = vmul.f32 %v25564_v54, %v7841_v12  ;;  %19907 = vmatmul.mubr.msk.f32.gmra.mrb[8].mxu1 %vm4293_vm4, %v25653_v32 }
 0x542   : >> { %v7950_v59 = vmax.f32 %v7918_v62, 0.0  ;;  %v7880_v10 = vmul.f32 %v25564_v54, %v7840_v19  ;;  %v19856_v22 = vpop.f32.mrb[16].mxu0  ;;  %v25669_v55 = vld [vmem:[#allocation2 + $0x81] sm:$0xff] }
 0x543   : >> { %7983 = vst.msk [vmem:[#allocation2 + $0xb1] sm:$0xff] %vm4293_vm4, %v7951_v9  ;;  %v7921_v23 = vadd.f32 %v25568_v48, %v7881_v18  ;;  %v7843_v21 = vadd.f32 %v19856_v22, %v25561_v15  ;;  %v7709_v0 = vpop.f32.mrb[17].mxu0  ;;  %v25662_v43 = vld [vmem:[#allocation2 + $0x79] sm:$0xff] }
 0x544   : >> { %7982 = vst.msk [vmem:[#allocation2 + $0xa9] sm:$0xff] %vm4293_vm4, %v7950_v59  ;;  %v7920_v31 = vadd.f32 %v25568_v48, %v7880_v10  ;;  %v7842_v44 = vadd.f32 %v25561_v15, %v7709_v0  ;;  %19909 = vmatprep.mubr.msk.f32.mxu1 %vm4293_vm4, %v25662_v43 }
 0x545   : >> { %v7953_v20 = vmax.f32 %v7921_v23, 0.0  ;;  %v7883_v6 = vmul.f32 %v25564_v54, %v7843_v21  ;;  %19910 = vmatmul.mubr.msk.f32.gmra.mrb[10].mxu1 %vm4293_vm4, %v25669_v55 }
 0x546   : >> { %v7952_v63 = vmax.f32 %v7920_v31, 0.0  ;;  %v7882_v4 = vmul.f32 %v25564_v54, %v7842_v44  ;;  %v19859_v14 = vpop.f32.mrb[18].mxu0  ;;  %v25685_v30 = vld [vmem:[#allocation2 + $0x99] sm:$0xff] }
 0x547   : >> { %7985 = vst.msk [vmem:[#allocation2 + $0xc9] sm:$0xff] %vm4293_vm4, %v7953_v20  ;;  %v7923_v36 = vadd.f32 %v25568_v48, %v7883_v6  ;;  %v7845_v11 = vadd.f32 %v19859_v14, %v25561_v15  ;;  %v7719_v28 = vpop.f32.mrb[19].mxu0  ;;  %v25678_v58 = vld [vmem:[#allocation2 + $0x91] sm:$0xff] }
 0x548   : >> { %7984 = vst.msk [vmem:[#allocation2 + $0xc1] sm:$0xff] %vm4293_vm4, %v7952_v63  ;;  %v7922_v13 = vadd.f32 %v25568_v48, %v7882_v4  ;;  %v7844_v40 = vadd.f32 %v25561_v15, %v7719_v28  ;;  %19912 = vmatprep.mubr.msk.f32.mxu1 %vm4293_vm4, %v25678_v58 }
 0x549   : >> { %v7955_v17 = vmax.f32 %v7923_v36, 0.0  ;;  %v7885_v34 = vmul.f32 %v25564_v54, %v7845_v11  ;;  %19913 = vmatmul.mubr.msk.f32.gmra.mrb[12].mxu1 %vm4293_vm4, %v25685_v30 }
 0x54a   : >> { %v7954_v47 = vmax.f32 %v7922_v13, 0.0  ;;  %v7884_v57 = vmul.f32 %v25564_v54, %v7844_v40  ;;  %v19862_v49 = vpop.f32.mrb[20].mxu0  ;;  %v25701_v37 = vld [vmem:[#allocation2 + $0xb1] sm:$0xff] }
 0x54b   : >> { %7987 = vst.msk [vmem:[#allocation2 + $0xe1] sm:$0xff] %vm4293_vm4, %v7955_v17  ;;  %v7925_v8 = vadd.f32 %v25568_v48, %v7885_v34  ;;  %v7847_v2 = vadd.f32 %v19862_v49, %v25561_v15  ;;  %v7729_v24 = vpop.f32.mrb[21].mxu0  ;;  %v25694_v33 = vld [vmem:[#allocation2 + $0xa9] sm:$0xff] }
 0x54c   : >> { %7986 = vst.msk [vmem:[#allocation2 + $0xd9] sm:$0xff] %vm4293_vm4, %v7954_v47  ;;  %v7924_v35 = vadd.f32 %v25568_v48, %v7884_v57  ;;  %v7846_v39 = vadd.f32 %v25561_v15, %v7729_v24  ;;  %19915 = vmatprep.mubr.msk.f32.mxu1 %vm4293_vm4, %v25694_v33 }
 0x54d   : >> { %v7957_v51 = vmax.f32 %v7925_v8, 0.0  ;;  %v7887_v45 = vmul.f32 %v25564_v54, %v7847_v2  ;;  %19916 = vmatmul.mubr.msk.f32.gmra.mrb[14].mxu1 %vm4293_vm4, %v25701_v37 }
 0x54e   : >> { %v7956_v16 = vmax.f32 %v7924_v35, 0.0  ;;  %v7886_v46 = vmul.f32 %v25564_v54, %v7846_v39  ;;  %v19865_v5 = vpop.f32.mrb[22].mxu0  ;;  %v25717_v53 = vld [vmem:[#allocation2 + $0xc9] sm:$0xff] }
 0x54f   : >> { %7989 = vst.msk [vmem:[#allocation2 + $0xf9] sm:$0xff] %vm4293_vm4, %v7957_v51  ;;  %v7927_v56 = vadd.f32 %v25568_v48, %v7887_v45  ;;  %v7849_v1 = vadd.f32 %v19865_v5, %v25561_v15  ;;  %v7739_v38 = vpop.f32.mrb[23].mxu0  ;;  %v25710_v60 = vld [vmem:[#allocation2 + $0xc1] sm:$0xff] }
 0x550   : >> { %7988 = vst.msk [vmem:[#allocation2 + $0xf1] sm:$0xff] %vm4293_vm4, %v7956_v16  ;;  %v7926_v50 = vadd.f32 %v25568_v48, %v7886_v46  ;;  %v7848_v52 = vadd.f32 %v25561_v15, %v7739_v38  ;;  %19918 = vmatprep.mubr.msk.f32.mxu1 %vm4293_vm4, %v25710_v60 }
 0x551   : >> { %v7959_v12 = vmax.f32 %v7927_v56, 0.0  ;;  %v7889_v29 = vmul.f32 %v25564_v54, %v7849_v1  ;;  %19919 = vmatmul.mubr.msk.f32.gmra.mrb[16].mxu1 %vm4293_vm4, %v25717_v53 }
 0x552   : >> { %v7958_v62 = vmax.f32 %v7926_v50, 0.0  ;;  %v7888_v19 = vmul.f32 %v25564_v54, %v7848_v52  ;;  %v19868_v9 = vpop.f32.mrb[24].mxu0  ;;  %v25733_v0 = vld [vmem:[#allocation2 + $0xe1] sm:$0xff] }
 0x553   : >> { %7991 = vst.msk [vmem:[#allocation2 + $0x111] sm:$0xff] %vm4293_vm4, %v7959_v12  ;;  %v7929_v18 = vadd.f32 %v25568_v48, %v7889_v29  ;;  %v7851_v59 = vadd.f32 %v19868_v9, %v25561_v15  ;;  %v7749_v10 = vpop.f32.mrb[25].mxu0  ;;  %v25726_v22 = vld [vmem:[#allocation2 + $0xd9] sm:$0xff] }
 0x554   : >> { %7990 = vst.msk [vmem:[#allocation2 + $0x109] sm:$0xff] %vm4293_vm4, %v7958_v62  ;;  %v7928_v23 = vadd.f32 %v25568_v48, %v7888_v19  ;;  %v7850_v21 = vadd.f32 %v25561_v15, %v7749_v10  ;;  %19921 = vmatprep.mubr.msk.f32.mxu1 %vm4293_vm4, %v25726_v22 }
 0x555   : >> { %v7961_v31 = vmax.f32 %v7929_v18, 0.0  ;;  %v7891_v44 = vmul.f32 %v25564_v54, %v7851_v59  ;;  %19922 = vmatmul.mubr.msk.f32.gmra.mrb[18].mxu1 %vm4293_vm4, %v25733_v0 }
 0x556   : >> { %v7960_v20 = vmax.f32 %v7928_v23, 0.0  ;;  %v7890_v6 = vmul.f32 %v25564_v54, %v7850_v21  ;;  %v19871_v63 = vpop.f32.mrb[26].mxu0  ;;  %v25749_v40 = vld [vmem:[#allocation2 + $0xf9] sm:$0xff] }
 0x557   : >> { %7993 = vst.msk [vmem:[#allocation2 + $0x129] sm:$0xff] %vm4293_vm4, %v7961_v31  ;;  %v7931_v4 = vadd.f32 %v25568_v48, %v7891_v44  ;;  %v7853_v14 = vadd.f32 %v19871_v63, %v25561_v15  ;;  %v7759_v36 = vpop.f32.mrb[27].mxu0  ;;  %v25742_v11 = vld [vmem:[#allocation2 + $0xf1] sm:$0xff]  ;;  %v8004_v63 = vld [vmem:[#allocation2] sm:$0xff] }
 0x558   : >> { %7992 = vst.msk [vmem:[#allocation2 + $0x121] sm:$0xff] %vm4293_vm4, %v7960_v20  ;;  %v7930_v28 = vadd.f32 %v25568_v48, %v7890_v6  ;;  %v7852_v13 = vadd.f32 %v25561_v15, %v7759_v36  ;;  %19924 = vmatprep.mubr.msk.f32.mxu1 %vm4293_vm4, %v25742_v11  ;;  %v16824_v36 = vld [vmem:[%s24578_s20 + $0x2d8] sm:$0xff] }
 0x559   : >> { %v7963_v17 = vmax.f32 %v7931_v4, 0.0  ;;  %v7893_v34 = vmul.f32 %v25564_v54, %v7853_v14  ;;  %19925 = vmatmul.mubr.msk.f32.gmra.mrb[20].mxu1 %vm4293_vm4, %v25749_v40  ;;  %v16823_v14 = vld [vmem:[%s24578_s20 + $0x2d0] sm:$0xff] }
 0x55a   : >> { %v7962_v47 = vmax.f32 %v7930_v28, 0.0  ;;  %v7892_v57 = vmul.f32 %v25564_v54, %v7852_v13  ;;  %v19874_v49 = vpop.f32.mrb[28].mxu0  ;;  %v25765_v45 = vld [vmem:[#allocation2 + $0x111] sm:$0xff]  ;;  %v8005_v28 = vld [vmem:[#allocation2 + $0x8] sm:$0xff]  ;;  %v21210_v13 = vpack.c.bf16 %v16824_v36, %v16823_v14 }
 0x55b   : >> { %7995 = vst.msk [vmem:[#allocation2 + $0x141] sm:$0xff] %vm4293_vm4, %v7963_v17  ;;  %v7933_v8 = vadd.f32 %v25568_v48, %v7893_v34  ;;  %v7855_v2 = vadd.f32 %v19874_v49, %v25561_v15  ;;  %v7769_v24 = vpop.f32.mrb[29].mxu0  ;;  %v25758_v35 = vld [vmem:[#allocation2 + $0x109] sm:$0xff]  ;;  %v16825_v17 = vld [vmem:[%s24578_s20 + $0x2e0] sm:$0xff] }
 0x55c   : >> { %7994 = vst.msk [vmem:[#allocation2 + $0x139] sm:$0xff] %vm4293_vm4, %v7962_v47  ;;  %v7932_v39 = vadd.f32 %v25568_v48, %v7892_v57  ;;  %v7854_v51 = vadd.f32 %v25561_v15, %v7769_v24  ;;  %19927 = vmatprep.mubr.msk.f32.mxu1 %vm4293_vm4, %v25758_v35  ;;  %v16826_v34 = vld [vmem:[%s24578_s20 + $0x2e8] sm:$0xff]  ;;  %v25823_v47 = vld [vmem:[#allocation2 + $0x18] sm:$0xff]  ;;  %v25828_v49 = vld [vmem:[#allocation2 + $0x20] sm:$0xff] }
 0x55d   : >> { %v7965_v16 = vmax.f32 %v7933_v8, 0.0  ;;  %v7895_v46 = vmul.f32 %v25564_v54, %v7855_v2  ;;  %19928 = vmatmul.mubr.msk.f32.gmra.mrb[22].mxu1 %vm4293_vm4, %v25765_v45  ;;  %v21214_v57 = vpack.c.bf16 %v16826_v34, %v16825_v17  ;;  %v16827_v8 = vld [vmem:[%s24578_s20 + $0x2f0] sm:$0xff]  ;;  %v16828_v2 = vld [vmem:[%s24578_s20 + $0x2f8] sm:$0xff] }
 0x55e   : >> { %v7964_v5 = vmax.f32 %v7932_v39, 0.0  ;;  %v7894_v56 = vmul.f32 %v25564_v54, %v7854_v51  ;;  %v19877_v1 = vpop.f32.mrb[30].mxu0  ;;  %v25781_v19 = vld [vmem:[#allocation2 + $0x129] sm:$0xff]  ;;  %v21218_v39 = vpack.c.bf16 %v16828_v2, %v16827_v8  ;;  %v25838_v51 = vld [vmem:[#allocation2 + $0x38] sm:$0xff] }
 0x55f   : >> { %7997 = vst.msk [vmem:[#allocation2 + $0x159] sm:$0xff] %vm4293_vm4, %v7965_v16  ;;  %v7935_v38 = vadd.f32 %v25568_v48, %v7895_v46  ;;  %v7857_v50 = vadd.f32 %v19877_v1, %v25561_v15  ;;  %v7779_v52 = vpop.f32.mrb[31].mxu0  ;;  %v25774_v12 = vld [vmem:[#allocation2 + $0x121] sm:$0xff]  ;;  %28611 = vst [vmem:[#allocation74_spill] sm:$0xff] %v25781_v19  ;;  %v25834_v24 = vld [vmem:[#allocation2 + $0x30] sm:$0xff] }
 0x560   : >> { %28610 = vst [vmem:[#allocation73_spill] sm:$0xff] %v25774_v12  ;;  %7996 = vst.msk [vmem:[#allocation2 + $0x151] sm:$0xff] %vm4293_vm4, %v7964_v5  ;;  %v7934_v29 = vadd.f32 %v25568_v48, %v7894_v56  ;;  %v7856_v62 = vadd.f32 %v25561_v15, %v7779_v52  ;;  %19930 = vmatprep.mubr.msk.f32.mxu1 %vm4293_vm4, %v25774_v12  ;;  %v16864_v16 = vld [vmem:[%s24578_s20 + $0x308] sm:$0xff]  ;;  %v25850_v56 = vld [vmem:[#allocation2 + $0x50] sm:$0xff] }
 0x561   : >> { %v7967_v9 = vmax.f32 %v7935_v38, 0.0  ;;  %v7897_v18 = vmul.f32 %v25564_v54, %v7857_v50  ;;  %19931 = vmatmul.mubr.msk.f32.gmra.mrb[24].mxu1 %vm4293_vm4, %v25781_v19  ;;  %v25844_v46 = vld [vmem:[#allocation2 + $0x48] sm:$0xff]  ;;  %v25854_v1 = vld [vmem:[#allocation2 + $0x60] sm:$0xff]  ;;  %v25863_v50 = vld [vmem:[#allocation2 + $0x78] sm:$0xff] }
 0x562   : >> { %v7966_v59 = vmax.f32 %v7934_v29, 0.0  ;;  %v7896_v10 = vmul.f32 %v25564_v54, %v7856_v62  ;;  %v25795_v31 = vld [vmem:[#allocation2 + $0x141] sm:$0xff]  ;;  %v25871_v29 = vld [vmem:[#allocation2 + $0x90] sm:$0xff]  ;;  %v25875_v62 = vld [vmem:[#allocation2 + $0x98] sm:$0xff] }
 0x563   : >> { %7999 = vst.msk [vmem:[#allocation2 + $0x171] sm:$0xff] %vm4293_vm4, %v7967_v9  ;;  %v7937_v23 = vadd.f32 %v25568_v48, %v7897_v18  ;;  %v25789_v21 = vld [vmem:[#allocation2 + $0x139] sm:$0xff]  ;;  %28613 = vst [vmem:[#allocation76_spill] sm:$0xff] %v25795_v31  ;;  %v25859_v38 = vld [vmem:[#allocation2 + $0x68] sm:$0xff] }
 0x564   : >> { %28612 = vst [vmem:[#allocation75_spill] sm:$0xff] %v25789_v21  ;;  %7998 = vst.msk [vmem:[#allocation2 + $0x169] sm:$0xff] %vm4293_vm4, %v7966_v59  ;;  %v7936_v15 = vadd.f32 %v25568_v48, %v7896_v10  ;;  %19933 = vmatprep.mubr.msk.f32.mxu1 %vm4293_vm4, %v25789_v21  ;;  %v25867_v52 = vld [vmem:[#allocation2 + $0x80] sm:$0xff]  ;;  %v25879_v9 = vld [vmem:[#allocation2 + $0xa8] sm:$0xff] }
 0x565   : >> { %v7969_v44 = vmax.f32 %v7937_v23, 0.0  ;;  %19934 = vmatmul.mubr.msk.f32.gmra.mrb[26].mxu1 %vm4293_vm4, %v25795_v31  ;;  %v25883_v18 = vld [vmem:[#allocation2 + $0xb0] sm:$0xff]  ;;  %v25887_v59 = vld [vmem:[#allocation2 + $0xc0] sm:$0xff]  ;;  %v25891_v10 = vld [vmem:[#allocation2 + $0xc8] sm:$0xff] }
 0x566   : >> { %v7968_v54 = vmax.f32 %v7936_v15, 0.0  ;;  %v25805_v48 = vld [vmem:[#allocation2 + $0x159] sm:$0xff]  ;;  %v25915_v14 = vld [vmem:[#allocation2 + $0x110] sm:$0xff]  ;;  %v8730_v2 = vld [vmem:[#allocation2 + $0x2] sm:$0xff] }
 0x567   : >> { %8001 = vst.msk [vmem:[#allocation2 + $0x189] sm:$0xff] %vm4293_vm4, %v7969_v44  ;;  %v25800_v20 = vld [vmem:[#allocation2 + $0x151] sm:$0xff]  ;;  %28615 = vst [vmem:[#allocation78_spill] sm:$0xff] %v25805_v48  ;;  %v25899_v15 = vld [vmem:[#allocation2 + $0xe0] sm:$0xff] }
 0x568   : >> { %28614 = vst [vmem:[#allocation77_spill] sm:$0xff] %v25800_v20  ;;  %8000 = vst.msk [vmem:[#allocation2 + $0x181] sm:$0xff] %vm4293_vm4, %v7968_v54  ;;  %19936 = vmatprep.mubr.msk.f32.mxu1 %vm4293_vm4, %v25800_v20  ;;  %v25895_v23 = vld [vmem:[#allocation2 + $0xd8] sm:$0xff]  ;;  %v25903_v44 = vld [vmem:[#allocation2 + $0xf0] sm:$0xff] }
 0x569   : >> { %19937 = vmatmul.mubr.msk.f32.gmra.mrb[28].mxu1 %vm4293_vm4, %v25805_v48  ;;  %v25907_v54 = vld [vmem:[#allocation2 + $0xf8] sm:$0xff]  ;;  %v25919_v36 = vld [vmem:[#allocation2 + $0x120] sm:$0xff]  ;;  %v25935_v34 = vld [vmem:[#allocation2 + $0x150] sm:$0xff] }
 0x56a   : >> { %v25813_v4 = vld [vmem:[#allocation2 + $0x171] sm:$0xff]  ;;  %v25931_v17 = vld [vmem:[#allocation2 + $0x140] sm:$0xff]  ;;  %v16868_v20 = vld [vmem:[%s24578_s20 + $0x328] sm:$0xff] }
 0x56b   : >> { %v25809_v6 = vld [vmem:[#allocation2 + $0x169] sm:$0xff]  ;;  %28617 = vst [vmem:[#allocation80_spill] sm:$0xff] %v25813_v4  ;;  %v16867_v48 = vld [vmem:[%s24578_s20 + $0x320] sm:$0xff]  ;;  %v16870_v12 = vld [vmem:[%s24578_s20 + $0x338] sm:$0xff] }
 0x56c   : >> { %28616 = vst [vmem:[#allocation79_spill] sm:$0xff] %v25809_v6  ;;  %19939 = vmatprep.mubr.msk.f32.mxu1 %vm4293_vm4, %v25809_v6  ;;  %v25943_v8 = vld [vmem:[#allocation2 + $0x168] sm:$0xff]  ;;  %v25957_v31 = vld [vmem:[#allocation2 + $0x1a] sm:$0xff]  ;;  %v21230_v21 = vpack.c.bf16 %v16868_v20, %v16867_v48 }
 0x56d   : >> { %19940 = vmatmul.mubr.msk.f32.gmra.mrb[30].mxu1 %vm4293_vm4, %v25813_v4  ;;  %v8731_v4 = vld [vmem:[#allocation2 + $0xa] sm:$0xff]  ;;  %28618 = vst [vmem:[#allocation81_spill] sm:$0xff] %v25957_v31  ;;  %v25962_v19 = vld [vmem:[#allocation2 + $0x22] sm:$0xff] }
 0x56e   : >> { %19958 = vmatprep.mubr.msk.f32.mxu1 %vm4293_vm4, %v8004_v63  ;;  %v25911_v63 = vld [vmem:[#allocation2 + $0x108] sm:$0xff]  ;;  %28619 = vst [vmem:[#allocation82_spill] sm:$0xff] %v25962_v19 }
 0x56f   : >> { %v25978_v20 = vld [vmem:[#allocation2 + $0x4a] sm:$0xff] }
 0x570   : >> { %28620 = vst [vmem:[#allocation83_spill] sm:$0xff] %v25978_v20 }
 0x571   : >> { %19959 = vmatmul.mubr.msk.f32.vlgmr.msra.gmra.mrb[0].mxu1 %vm4293_vm4, %v8005_v28  ;;  %v25923_v28 = vld [vmem:[#allocation2 + $0x128] sm:$0xff] }
 0x572   : >> { %19961 = vmatprep.mubr.msk.f32.mxu1 %vm4293_vm4, %v25823_v47  ;;  %21209 = vmatpush3.bf16.msra.mxu1 %v25549_v26  ;;  %v16863_v26 = vld [vmem:[%s24578_s20 + $0x300] sm:$0xff] }
 0x573   : >> { %21211 = vmatprep.subr.bf16.mxu1 %v21210_v13  ;;  %v25848_v5 = vpack.c.bf16 %v16864_v16, %v16863_v26  ;;  %v16865_v26 = vld [vmem:[%s24578_s20 + $0x310] sm:$0xff]  ;;  %v16866_v16 = vld [vmem:[%s24578_s20 + $0x318] sm:$0xff] }
 0x574   : >> { %v21226_v6 = vpack.c.bf16 %v16866_v16, %v16865_v26  ;;  %v25968_v26 = vld [vmem:[#allocation2 + $0x32] sm:$0xff]  ;;  %v25972_v16 = vld [vmem:[#allocation2 + $0x3a] sm:$0xff] }
 0x575   : >> { %19962 = vmatmul.mubr.msk.f32.gmra.mrb[2].mxu1 %vm4293_vm4, %v25828_v49 }
 0x576   : >> { %19964 = vmatprep.mubr.msk.f32.mxu1 %vm4293_vm4, %v25834_v24  ;;  %21213 = vmatpush3.bf16.msra.mxu1 %v21210_v13  ;;  %v25927_v13 = vld [vmem:[#allocation2 + $0x138] sm:$0xff] }
 0x577   : >> { %21215 = vmatprep.subr.bf16.mxu1 %v21214_v57 }
 0x579   : >> { %19965 = vmatmul.mubr.msk.f32.gmra.mrb[4].mxu1 %vm4293_vm4, %v25838_v51 }
 0x57a   : >> { %19967 = vmatprep.mubr.msk.f32.mxu1 %vm4293_vm4, %v25844_v46  ;;  %21217 = vmatpush3.bf16.msra.mxu1 %v21214_v57  ;;  %v25939_v57 = vld [vmem:[#allocation2 + $0x158] sm:$0xff] }
 0x57b   : >> { %21219 = vmatprep.subr.bf16.mxu1 %v21218_v39 }
 0x57d   : >> { %19968 = vmatmul.mubr.msk.f32.gmra.mrb[6].mxu1 %vm4293_vm4, %v25850_v56 }
 0x57e   : >> { %19970 = vmatprep.mubr.msk.f32.mxu1 %vm4293_vm4, %v25854_v1  ;;  %21221 = vmatpush3.bf16.msra.mxu1 %v21218_v39  ;;  %v25947_v39 = vld [vmem:[#allocation2 + $0x170] sm:$0xff] }
 0x57f   : >> { %21223 = vmatprep.subr.bf16.mxu1 %v25848_v5 }
 0x581   : >> { %19971 = vmatmul.mubr.msk.f32.gmra.mrb[8].mxu1 %vm4293_vm4, %v25859_v38 }
 0x582   : >> { %19973 = vmatprep.mubr.msk.f32.mxu1 %vm4293_vm4, %v25863_v50 }
 0x585   : >> { %19974 = vmatmul.mubr.msk.f32.gmra.mrb[10].mxu1 %vm4293_vm4, %v25867_v52 }
 0x586   : >> { %19976 = vmatprep.mubr.msk.f32.mxu1 %vm4293_vm4, %v25871_v29 }
 0x589   : >> { %19977 = vmatmul.mubr.msk.f32.gmra.mrb[12].mxu1 %vm4293_vm4, %v25875_v62 }
 0x58a   : >> { %19979 = vmatprep.mubr.msk.f32.mxu1 %vm4293_vm4, %v25879_v9 }
 0x58d   : >> { %19980 = vmatmul.mubr.msk.f32.gmra.mrb[14].mxu1 %vm4293_vm4, %v25883_v18 }
 0x58e   : >> { %19982 = vmatprep.mubr.msk.f32.mxu1 %vm4293_vm4, %v25887_v59 }
 0x591   : >> { %19983 = vmatmul.mubr.msk.f32.gmra.mrb[16].mxu1 %vm4293_vm4, %v25891_v10 }
 0x592   : >> { %19985 = vmatprep.mubr.msk.f32.mxu1 %vm4293_vm4, %v25895_v23 }
 0x595   : >> { %19986 = vmatmul.mubr.msk.f32.gmra.mrb[18].mxu1 %vm4293_vm4, %v25899_v15 }
 0x596   : >> { %19988 = vmatprep.mubr.msk.f32.mxu1 %vm4293_vm4, %v25903_v44 }
 0x599   : >> { %19989 = vmatmul.mubr.msk.f32.gmra.mrb[20].mxu1 %vm4293_vm4, %v25907_v54 }
 0x59a   : >> { %19991 = vmatprep.mubr.msk.f32.mxu1 %vm4293_vm4, %v25911_v63 }
 0x59d   : >> { %19992 = vmatmul.mubr.msk.f32.gmra.mrb[22].mxu1 %vm4293_vm4, %v25915_v14 }
 0x59e   : >> { %19994 = vmatprep.mubr.msk.f32.mxu1 %vm4293_vm4, %v25919_v36 }
 0x5a1   : >> { %19995 = vmatmul.mubr.msk.f32.gmra.mrb[24].mxu1 %vm4293_vm4, %v25923_v28 }
 0x5a2   : >> { %19997 = vmatprep.mubr.msk.f32.mxu1 %vm4293_vm4, %v25927_v13 }
 0x5a5   : >> { %19998 = vmatmul.mubr.msk.f32.gmra.mrb[26].mxu1 %vm4293_vm4, %v25931_v17 }
 0x5a6   : >> { %20000 = vmatprep.mubr.msk.f32.mxu1 %vm4293_vm4, %v25935_v34 }
 0x5a9   : >> { %20001 = vmatmul.mubr.msk.f32.gmra.mrb[28].mxu1 %vm4293_vm4, %v25939_v57 }
 0x5aa   : >> { %20003 = vmatprep.mubr.msk.f32.mxu1 %vm4293_vm4, %v25943_v8 }
 0x5ad   : >> { %20004 = vmatmul.mubr.msk.f32.gmra.mrb[30].mxu1 %vm4293_vm4, %v25947_v39 }
 0x5ae   : >> { %20022 = vmatprep.mubr.msk.f32.mxu1 %vm4293_vm4, %v8730_v2  ;;  %v16869_v2 = vld [vmem:[%s24578_s20 + $0x330] sm:$0xff] }
 0x5b1   : >> { %20023 = vmatmul.mubr.msk.f32.vlgmr.msra.gmra.mrb[0].mxu1 %vm4293_vm4, %v8731_v4  ;;  %v21234_v4 = vpack.c.bf16 %v16870_v12, %v16869_v2  ;;  %v25986_v12 = vld [vmem:[#allocation2 + $0x62] sm:$0xff]  ;;  %v26002_v2 = vld [vmem:[#allocation2 + $0x92] sm:$0xff] }
 0x5b2   : >> { %20025 = vmatprep.mubr.msk.f32.mxu1 %vm4293_vm4, %v25957_v31  ;;  %21225 = vmatpush3.bf16.msra.mxu1 %v25848_v5  ;;  %v16905_v5 = vld [vmem:[%s24578_s20 + $0x340] sm:$0xff]  ;;  %v16906_v31 = vld [vmem:[%s24578_s20 + $0x348] sm:$0xff]  ;;  %28622 = vst [vmem:[#allocation85_spill] sm:$0xff] %v25986_v12  ;;  %28626 = vst [vmem:[#allocation89_spill] sm:$0xff] %v26002_v2 }
 0x5b3   : >> { %21227 = vmatprep.subr.bf16.mxu1 %v21226_v6  ;;  %v21238_v48 = vpack.c.bf16 %v16906_v31, %v16905_v5  ;;  %v25998_v31 = vld [vmem:[#allocation2 + $0x82] sm:$0xff]  ;;  %v26010_v5 = vld [vmem:[#allocation2 + $0xaa] sm:$0xff] }
 0x5b4   : >> { %28625 = vst [vmem:[#allocation88_spill] sm:$0xff] %v25998_v31  ;;  %28628 = vst [vmem:[#allocation91_spill] sm:$0xff] %v26010_v5 }
 0x5b5   : >> { %20026 = vmatmul.mubr.msk.f32.gmra.mrb[2].mxu1 %vm4293_vm4, %v25962_v19  ;;  %v25982_v19 = vld [vmem:[#allocation2 + $0x52] sm:$0xff] }
 0x5b6   : >> { %20028 = vmatprep.mubr.msk.f32.mxu1 %vm4293_vm4, %v25968_v26  ;;  %21229 = vmatpush3.bf16.msra.mxu1 %v21226_v6  ;;  %28621 = vst [vmem:[#allocation84_spill] sm:$0xff] %v25982_v19  ;;  %v25990_v6 = vld [vmem:[#allocation2 + $0x6a] sm:$0xff] }
 0x5b7   : >> { %21231 = vmatprep.subr.bf16.mxu1 %v21230_v21  ;;  %28623 = vst [vmem:[#allocation86_spill] sm:$0xff] %v25990_v6 }
 0x5b9   : >> { %20029 = vmatmul.mubr.msk.f32.gmra.mrb[4].mxu1 %vm4293_vm4, %v25972_v16 }
 0x5ba   : >> { %20031 = vmatprep.mubr.msk.f32.mxu1 %vm4293_vm4, %v25978_v20  ;;  %21233 = vmatpush3.bf16.msra.mxu1 %v21230_v21  ;;  %v25994_v21 = vld [vmem:[#allocation2 + $0x7a] sm:$0xff] }
 0x5bb   : >> { %21235 = vmatprep.subr.bf16.mxu1 %v21234_v4  ;;  %28624 = vst [vmem:[#allocation87_spill] sm:$0xff] %v25994_v21  ;;  %v16912_v20 = vld [vmem:[%s24578_s20 + $0x378] sm:$0xff] }
 0x5bd   : >> { %20032 = vmatmul.mubr.msk.f32.gmra.mrb[6].mxu1 %vm4293_vm4, %v25982_v19  ;;  %v16911_v19 = vld [vmem:[%s24578_s20 + $0x370] sm:$0xff] }
 0x5be   : >> { %20034 = vmatprep.mubr.msk.f32.mxu1 %vm4293_vm4, %v25986_v12  ;;  %21237 = vmatpush3.bf16.msra.mxu1 %v21234_v4  ;;  %v26006_v4 = vld [vmem:[#allocation2 + $0x9a] sm:$0xff]  ;;  %v16910_v12 = vld [vmem:[%s24578_s20 + $0x368] sm:$0xff] }
 0x5bf   : >> { %21239 = vmatprep.subr.bf16.mxu1 %v21238_v48  ;;  %28627 = vst [vmem:[#allocation90_spill] sm:$0xff] %v26006_v4 }
 0x5c1   : >> { %20035 = vmatmul.mubr.msk.f32.gmra.mrb[8].mxu1 %vm4293_vm4, %v25990_v6  ;;  %v16908_v6 = vld [vmem:[%s24578_s20 + $0x358] sm:$0xff] }
 0x5c2   : >> { %20037 = vmatprep.mubr.msk.f32.mxu1 %vm4293_vm4, %v25994_v21  ;;  %v26014_v21 = vld [vmem:[#allocation2 + $0xb2] sm:$0xff] }
 0x5c3   : >> { %28629 = vst [vmem:[#allocation92_spill] sm:$0xff] %v26014_v21 }
 0x5c5   : >> { %20038 = vmatmul.mubr.msk.f32.gmra.mrb[10].mxu1 %vm4293_vm4, %v25998_v31  ;;  %v26018_v31 = vld [vmem:[#allocation2 + $0xc2] sm:$0xff] }
 0x5c6   : >> { %20040 = vmatprep.mubr.msk.f32.mxu1 %vm4293_vm4, %v26002_v2  ;;  %28630 = vst [vmem:[#allocation93_spill] sm:$0xff] %v26018_v31  ;;  %v26022_v2 = vld [vmem:[#allocation2 + $0xca] sm:$0xff] }
 0x5c7   : >> { %28631 = vst [vmem:[#allocation94_spill] sm:$0xff] %v26022_v2 }
 0x5c9   : >> { %20041 = vmatmul.mubr.msk.f32.gmra.mrb[12].mxu1 %vm4293_vm4, %v26006_v4  ;;  %v26026_v4 = vld [vmem:[#allocation2 + $0xda] sm:$0xff] }
 0x5ca   : >> { %20043 = vmatprep.mubr.msk.f32.mxu1 %vm4293_vm4, %v26010_v5  ;;  %28632 = vst [vmem:[#allocation95_spill] sm:$0xff] %v26026_v4  ;;  %v26030_v5 = vld [vmem:[#allocation2 + $0xe2] sm:$0xff] }
 0x5cb   : >> { %28633 = vst [vmem:[#allocation96_spill] sm:$0xff] %v26030_v5 }
 0x5cd   : >> { %20044 = vmatmul.mubr.msk.f32.gmra.mrb[14].mxu1 %vm4293_vm4, %v26014_v21  ;;  %v26034_v21 = vld [vmem:[#allocation2 + $0xf2] sm:$0xff] }
 0x5ce   : >> { %20046 = vmatprep.mubr.msk.f32.mxu1 %vm4293_vm4, %v26018_v31  ;;  %28634 = vst [vmem:[#allocation97_spill] sm:$0xff] %v26034_v21  ;;  %v26038_v31 = vld [vmem:[#allocation2 + $0xfa] sm:$0xff] }
 0x5cf   : >> { %28635 = vst [vmem:[#allocation98_spill] sm:$0xff] %v26038_v31 }
 0x5d1   : >> { %20047 = vmatmul.mubr.msk.f32.gmra.mrb[16].mxu1 %vm4293_vm4, %v26022_v2  ;;  %v26042_v2 = vld [vmem:[#allocation2 + $0x10a] sm:$0xff] }
 0x5d2   : >> { %20049 = vmatprep.mubr.msk.f32.mxu1 %vm4293_vm4, %v26026_v4  ;;  %28636 = vst [vmem:[#allocation99_spill] sm:$0xff] %v26042_v2  ;;  %v26046_v4 = vld [vmem:[#allocation2 + $0x112] sm:$0xff] }
 0x5d3   : >> { %28637 = vst [vmem:[#allocation100_spill] sm:$0xff] %v26046_v4 }
 0x5d5   : >> { %20050 = vmatmul.mubr.msk.f32.gmra.mrb[18].mxu1 %vm4293_vm4, %v26030_v5  ;;  %v26050_v5 = vld [vmem:[#allocation2 + $0x122] sm:$0xff] }
 0x5d6   : >> { %20052 = vmatprep.mubr.msk.f32.mxu1 %vm4293_vm4, %v26034_v21  ;;  %28638 = vst [vmem:[#allocation101_spill] sm:$0xff] %v26050_v5  ;;  %v26054_v21 = vld [vmem:[#allocation2 + $0x12a] sm:$0xff] }
 0x5d7   : >> { %28639 = vst [vmem:[#allocation107_spill] sm:$0xff] %v26054_v21 }
 0x5d9   : >> { %20053 = vmatmul.mubr.msk.f32.gmra.mrb[20].mxu1 %vm4293_vm4, %v26038_v31  ;;  %v26058_v31 = vld [vmem:[#allocation2 + $0x13a] sm:$0xff] }
 0x5da   : >> { %20055 = vmatprep.mubr.msk.f32.mxu1 %vm4293_vm4, %v26042_v2  ;;  %28640 = vst [vmem:[#allocation102_spill] sm:$0xff] %v26058_v31  ;;  %v26066_v2 = vld [vmem:[#allocation2 + $0x152] sm:$0xff] }
 0x5db   : >> { %28642 = vst [vmem:[#allocation104_spill] sm:$0xff] %v26066_v2 }
 0x5dd   : >> { %20056 = vmatmul.mubr.msk.f32.gmra.mrb[22].mxu1 %vm4293_vm4, %v26046_v4  ;;  %v26062_v4 = vld [vmem:[#allocation2 + $0x142] sm:$0xff] }
 0x5de   : >> { %20058 = vmatprep.mubr.msk.f32.mxu1 %vm4293_vm4, %v26050_v5  ;;  %28641 = vst [vmem:[#allocation103_spill] sm:$0xff] %v26062_v4  ;;  %v26070_v5 = vld [vmem:[#allocation2 + $0x15a] sm:$0xff] }
 0x5df   : >> { %28643 = vst [vmem:[#allocation105_spill] sm:$0xff] %v26070_v5 }
 0x5e1   : >> { %20059 = vmatmul.mubr.msk.f32.gmra.mrb[24].mxu1 %vm4293_vm4, %v26054_v21  ;;  %v26074_v21 = vld [vmem:[#allocation2 + $0x16a] sm:$0xff] }
 0x5e2   : >> { %20061 = vmatprep.mubr.msk.f32.mxu1 %vm4293_vm4, %v26058_v31  ;;  %28644 = vst [vmem:[#allocation106_spill] sm:$0xff] %v26074_v21  ;;  %v26078_v31 = vld [vmem:[#allocation2 + $0x172] sm:$0xff] }
 0x5e3   : >> { %28645 = vst [vmem:[#allocation72_spill] sm:$0xff] %v26078_v31 }
 0x5e5   : >> { %20062 = vmatmul.mubr.msk.f32.gmra.mrb[26].mxu1 %vm4293_vm4, %v26062_v4  ;;  %v16907_v4 = vld [vmem:[%s24578_s20 + $0x350] sm:$0xff] }
 0x5e6   : >> { %20064 = vmatprep.mubr.msk.f32.mxu1 %vm4293_vm4, %v26066_v2  ;;  %v21242_v2 = vpack.c.bf16 %v16908_v6, %v16907_v4  ;;  %v16947_v6 = vld [vmem:[%s24578_s20 + $0x380] sm:$0xff]  ;;  %v16948_v4 = vld [vmem:[%s24578_s20 + $0x388] sm:$0xff] }
 0x5e9   : >> { %20065 = vmatmul.mubr.msk.f32.gmra.mrb[28].mxu1 %vm4293_vm4, %v26070_v5  ;;  %v16909_v5 = vld [vmem:[%s24578_s20 + $0x360] sm:$0xff] }
 0x5ea   : >> { %20067 = vmatprep.mubr.msk.f32.mxu1 %vm4293_vm4, %v26074_v21  ;;  %v21246_v21 = vpack.c.bf16 %v16910_v12, %v16909_v5  ;;  %v16950_v12 = vld [vmem:[%s24578_s20 + $0x398] sm:$0xff]  ;;  %v16952_v5 = vld [vmem:[%s24578_s20 + $0x3a8] sm:$0xff] }
 0x5ed   : >> { %20068 = vmatmul.mubr.msk.f32.gmra.mrb[30].mxu1 %vm4293_vm4, %v26078_v31 }
 0x5ee   : >> { %20086 = vmatprep.mubr.msk.f32.mxu1 %vm4293_vm4, %v25823_v47  ;;  %v21250_v47 = vpack.c.bf16 %v16912_v20, %v16911_v19  ;;  %v26150_v19 = vld [vmem:[#allocation2 + $0x180] sm:$0xff]  ;;  %v26154_v20 = vld [vmem:[#allocation2 + $0x188] sm:$0xff] }
 0x5f1   : >> { %20087 = vmatmul.mubr.msk.f32.vlgmr.msra.gmra.mrb[0].mxu1 %vm4293_vm4, %v25828_v49  ;;  %v21254_v49 = vpack.c.bf16 %v16948_v4, %v16947_v6  ;;  %v16953_v6 = vld [vmem:[%s24578_s20 + $0x3b0] sm:$0xff]  ;;  %v16954_v4 = vld [vmem:[%s24578_s20 + $0x3b8] sm:$0xff] }
 0x5f2   : >> { %20089 = vmatprep.mubr.msk.f32.mxu1 %vm4293_vm4, %v25834_v24  ;;  %21241 = vmatpush3.bf16.msra.mxu1 %v21238_v48  ;;  %v16949_v48 = vld [vmem:[%s24578_s20 + $0x390] sm:$0xff] }
 0x5f3   : >> { %21243 = vmatprep.subr.bf16.mxu1 %v21242_v2 }
 0x5f5   : >> { %20090 = vmatmul.mubr.msk.f32.gmra.mrb[2].mxu1 %vm4293_vm4, %v25838_v51 }
 0x5f6   : >> { %20092 = vmatprep.mubr.msk.f32.mxu1 %vm4293_vm4, %v25844_v46  ;;  %21245 = vmatpush3.bf16.msra.mxu1 %v21242_v2  ;;  %v16951_v2 = vld [vmem:[%s24578_s20 + $0x3a0] sm:$0xff] }
 0x5f7   : >> { %21247 = vmatprep.subr.bf16.mxu1 %v21246_v21 }
 0x5f9   : >> { %20093 = vmatmul.mubr.msk.f32.gmra.mrb[4].mxu1 %vm4293_vm4, %v25850_v56 }
 0x5fa   : >> { %20095 = vmatprep.mubr.msk.f32.mxu1 %vm4293_vm4, %v25854_v1  ;;  %21249 = vmatpush3.bf16.msra.mxu1 %v21246_v21  ;;  %v21258_v21 = vpack.c.bf16 %v16950_v12, %v16949_v48  ;;  %v16989_v48 = vld [vmem:[%s24578_s20 + $0x3c0] sm:$0xff]  ;;  %v16990_v12 = vld [vmem:[%s24578_s20 + $0x3c8] sm:$0xff] }
 0x5fb   : >> { %21251 = vmatprep.subr.bf16.mxu1 %v21250_v47 }
 0x5fd   : >> { %20096 = vmatmul.mubr.msk.f32.gmra.mrb[6].mxu1 %vm4293_vm4, %v25859_v38 }
 0x5fe   : >> { %20098 = vmatprep.mubr.msk.f32.mxu1 %vm4293_vm4, %v25863_v50  ;;  %21253 = vmatpush3.bf16.msra.mxu1 %v21250_v47  ;;  %v21262_v47 = vpack.c.bf16 %v16952_v5, %v16951_v2  ;;  %v17031_v2 = vld [vmem:[%s24578_s20 + $0x400] sm:$0xff]  ;;  %v17032_v5 = vld [vmem:[%s24578_s20 + $0x408] sm:$0xff] }
 0x5ff   : >> { %21255 = vmatprep.subr.bf16.mxu1 %v21254_v49 }
 0x601   : >> { %20099 = vmatmul.mubr.msk.f32.gmra.mrb[8].mxu1 %vm4293_vm4, %v25867_v52 }
 0x602   : >> { %20101 = vmatprep.mubr.msk.f32.mxu1 %vm4293_vm4, %v25871_v29 }
 0x605   : >> { %20102 = vmatmul.mubr.msk.f32.gmra.mrb[10].mxu1 %vm4293_vm4, %v25875_v62 }
 0x606   : >> { %20104 = vmatprep.mubr.msk.f32.mxu1 %vm4293_vm4, %v25879_v9 }
 0x609   : >> { %20105 = vmatmul.mubr.msk.f32.gmra.mrb[12].mxu1 %vm4293_vm4, %v25883_v18 }
 0x60a   : >> { %20107 = vmatprep.mubr.msk.f32.mxu1 %vm4293_vm4, %v25887_v59 }
 0x60d   : >> { %20108 = vmatmul.mubr.msk.f32.gmra.mrb[14].mxu1 %vm4293_vm4, %v25891_v10 }
 0x60e   : >> { %20110 = vmatprep.mubr.msk.f32.mxu1 %vm4293_vm4, %v25895_v23 }
 0x611   : >> { %20111 = vmatmul.mubr.msk.f32.gmra.mrb[16].mxu1 %vm4293_vm4, %v25899_v15 }
 0x612   : >> { %20113 = vmatprep.mubr.msk.f32.mxu1 %vm4293_vm4, %v25903_v44 }
 0x615   : >> { %20114 = vmatmul.mubr.msk.f32.gmra.mrb[18].mxu1 %vm4293_vm4, %v25907_v54 }
 0x616   : >> { %20116 = vmatprep.mubr.msk.f32.mxu1 %vm4293_vm4, %v25911_v63 }
 0x619   : >> { %20117 = vmatmul.mubr.msk.f32.gmra.mrb[20].mxu1 %vm4293_vm4, %v25915_v14 }
 0x61a   : >> { %20119 = vmatprep.mubr.msk.f32.mxu1 %vm4293_vm4, %v25919_v36 }
 0x61d   : >> { %20120 = vmatmul.mubr.msk.f32.gmra.mrb[22].mxu1 %vm4293_vm4, %v25923_v28 }
 0x61e   : >> { %20122 = vmatprep.mubr.msk.f32.mxu1 %vm4293_vm4, %v25927_v13 }
 0x621   : >> { %20123 = vmatmul.mubr.msk.f32.gmra.mrb[24].mxu1 %vm4293_vm4, %v25931_v17 }
 0x622   : >> { %20125 = vmatprep.mubr.msk.f32.mxu1 %vm4293_vm4, %v25935_v34 }
 0x625   : >> { %20126 = vmatmul.mubr.msk.f32.gmra.mrb[26].mxu1 %vm4293_vm4, %v25939_v57 }
 0x626   : >> { %20128 = vmatprep.mubr.msk.f32.mxu1 %vm4293_vm4, %v25943_v8 }
 0x629   : >> { %20129 = vmatmul.mubr.msk.f32.gmra.mrb[28].mxu1 %vm4293_vm4, %v25947_v39 }
 0x62a   : >> { %20131 = vmatprep.mubr.msk.f32.mxu1 %vm4293_vm4, %v26150_v19 }
 0x62d   : >> { %20132 = vmatmul.mubr.msk.f32.gmra.mrb[30].mxu1 %vm4293_vm4, %v26154_v20 }
 0x62e   : >> { %20150 = vmatprep.mubr.msk.f32.mxu1 %vm4293_vm4, %v25598_v41  ;;  %v21266_v41 = vpack.c.bf16 %v16954_v4, %v16953_v6  ;;  %v28658_v6 = vld [vmem:[#allocation85_spill] sm:$0xff]  ;;  %v21286_v4 = vpack.c.bf16 %v17032_v5, %v17031_v2 }
 0x62f   : >> { %v26306_v2 = vld [vmem:[#allocation2 + $0x18a] sm:$0xff] }
 0x630   : >> { %v17033_v5 = vld [vmem:[%s24578_s20 + $0x410] sm:$0xff] }
 0x631   : >> { %20151 = vmatmul.mubr.msk.f32.vlgmr.msra.gmra.mrb[0].mxu1 %vm4293_vm4, %v25605_v42  ;;  %v21270_v42 = vpack.c.bf16 %v16990_v12, %v16989_v48  ;;  %v28660_v48 = vld [vmem:[#allocation87_spill] sm:$0xff]  ;;  %v28661_v12 = vld [vmem:[#allocation88_spill] sm:$0xff] }
 0x632   : >> { %20153 = vmatprep.mubr.msk.f32.mxu1 %vm4293_vm4, %v25614_v7  ;;  %21257 = vmatpush3.bf16.msra.mxu1 %v21254_v49  ;;  %v28646_v7 = vld [vmem:[#allocation73_spill] sm:$0xff]  ;;  %v28656_v49 = vld [vmem:[#allocation83_spill] sm:$0xff] }
 0x633   : >> { %21259 = vmatprep.subr.bf16.mxu1 %v21258_v21 }
 0x635   : >> { %20154 = vmatmul.mubr.msk.f32.gmra.mrb[2].mxu1 %vm4293_vm4, %v25621_v27  ;;  %v28647_v27 = vld [vmem:[#allocation74_spill] sm:$0xff] }
 0x636   : >> { %20156 = vmatprep.mubr.msk.f32.mxu1 %vm4293_vm4, %v25630_v25  ;;  %21261 = vmatpush3.bf16.msra.mxu1 %v21258_v21  ;;  %v28648_v25 = vld [vmem:[#allocation75_spill] sm:$0xff] }
 0x637   : >> { %21263 = vmatprep.subr.bf16.mxu1 %v21262_v47 }
 0x639   : >> { %20157 = vmatmul.mubr.msk.f32.gmra.mrb[4].mxu1 %vm4293_vm4, %v25637_v61  ;;  %v28649_v61 = vld [vmem:[#allocation76_spill] sm:$0xff] }
 0x63a   : >> { %20159 = vmatprep.mubr.msk.f32.mxu1 %vm4293_vm4, %v25646_v3  ;;  %21265 = vmatpush3.bf16.msra.mxu1 %v21262_v47  ;;  %v28650_v3 = vld [vmem:[#allocation77_spill] sm:$0xff]  ;;  %v28657_v47 = vld [vmem:[#allocation84_spill] sm:$0xff] }
 0x63b   : >> { %21267 = vmatprep.subr.bf16.mxu1 %v21266_v41 }
 0x63d   : >> { %20160 = vmatmul.mubr.msk.f32.gmra.mrb[6].mxu1 %vm4293_vm4, %v25653_v32  ;;  %v28651_v32 = vld [vmem:[#allocation78_spill] sm:$0xff] }
 0x63e   : >> { %20162 = vmatprep.mubr.msk.f32.mxu1 %vm4293_vm4, %v25662_v43  ;;  %21269 = vmatpush3.bf16.msra.mxu1 %v21266_v41  ;;  %v28652_v43 = vld [vmem:[#allocation79_spill] sm:$0xff]  ;;  %v28659_v41 = vld [vmem:[#allocation86_spill] sm:$0xff] }
 0x63f   : >> { %21271 = vmatprep.subr.bf16.mxu1 %v21270_v42 }
 0x641   : >> { %20163 = vmatmul.mubr.msk.f32.gmra.mrb[8].mxu1 %vm4293_vm4, %v25669_v55  ;;  %v28653_v55 = vld [vmem:[#allocation80_spill] sm:$0xff] }
 0x642   : >> { %20165 = vmatprep.mubr.msk.f32.mxu1 %vm4293_vm4, %v25678_v58  ;;  %v26226_v58 = vld [vmem:[#allocation2 + $0x181] sm:$0xff] }
 0x645   : >> { %20166 = vmatmul.mubr.msk.f32.gmra.mrb[10].mxu1 %vm4293_vm4, %v25685_v30  ;;  %v26230_v30 = vld [vmem:[#allocation2 + $0x189] sm:$0xff] }
 0x646   : >> { %20168 = vmatprep.mubr.msk.f32.mxu1 %vm4293_vm4, %v25694_v33  ;;  %v16991_v33 = vld [vmem:[%s24578_s20 + $0x3d0] sm:$0xff] }
 0x649   : >> { %20169 = vmatmul.mubr.msk.f32.gmra.mrb[12].mxu1 %vm4293_vm4, %v25701_v37  ;;  %v16992_v37 = vld [vmem:[%s24578_s20 + $0x3d8] sm:$0xff] }
 0x64a   : >> { %20171 = vmatprep.mubr.msk.f32.mxu1 %vm4293_vm4, %v25710_v60  ;;  %v28654_v60 = vld [vmem:[#allocation81_spill] sm:$0xff] }
 0x64d   : >> { %20172 = vmatmul.mubr.msk.f32.gmra.mrb[14].mxu1 %vm4293_vm4, %v25717_v53  ;;  %v21274_v53 = vpack.c.bf16 %v16992_v37, %v16991_v33  ;;  %v28671_v33 = vld [vmem:[#allocation98_spill] sm:$0xff]  ;;  %v28672_v37 = vld [vmem:[#allocation99_spill] sm:$0xff] }
 0x64e   : >> { %20174 = vmatprep.mubr.msk.f32.mxu1 %vm4293_vm4, %v25726_v22  ;;  %v16993_v22 = vld [vmem:[%s24578_s20 + $0x3e0] sm:$0xff] }
 0x651   : >> { %20175 = vmatmul.mubr.msk.f32.gmra.mrb[16].mxu1 %vm4293_vm4, %v25733_v0  ;;  %v16994_v0 = vld [vmem:[%s24578_s20 + $0x3e8] sm:$0xff] }
 0x652   : >> { %20177 = vmatprep.mubr.msk.f32.mxu1 %vm4293_vm4, %v25742_v11  ;;  %v28655_v11 = vld [vmem:[#allocation82_spill] sm:$0xff] }
 0x655   : >> { %20178 = vmatmul.mubr.msk.f32.gmra.mrb[18].mxu1 %vm4293_vm4, %v25749_v40  ;;  %v21278_v40 = vpack.c.bf16 %v16994_v0, %v16993_v22  ;;  %v28675_v22 = vld [vmem:[#allocation107_spill] sm:$0xff]  ;;  %v28676_v0 = vld [vmem:[#allocation102_spill] sm:$0xff] }
 0x656   : >> { %20180 = vmatprep.mubr.msk.f32.mxu1 %vm4293_vm4, %v25758_v35  ;;  %v16995_v35 = vld [vmem:[%s24578_s20 + $0x3f0] sm:$0xff] }
 0x659   : >> { %20181 = vmatmul.mubr.msk.f32.gmra.mrb[20].mxu1 %vm4293_vm4, %v25765_v45  ;;  %v16996_v45 = vld [vmem:[%s24578_s20 + $0x3f8] sm:$0xff] }
 0x65a   : >> { %20183 = vmatprep.mubr.msk.f32.mxu1 %vm4293_vm4, %v28646_v7  ;;  %v21282_v21 = vpack.c.bf16 %v16996_v45, %v16995_v35  ;;  %v28663_v7 = vld [vmem:[#allocation90_spill] sm:$0xff]  ;;  %v28679_v35 = vld [vmem:[#allocation105_spill] sm:$0xff] }
 0x65b   : >> { %v28680_v45 = vld [vmem:[#allocation106_spill] sm:$0xff] }
 0x65d   : >> { %20184 = vmatmul.mubr.msk.f32.gmra.mrb[22].mxu1 %vm4293_vm4, %v28647_v27  ;;  %v28664_v27 = vld [vmem:[#allocation91_spill] sm:$0xff] }
 0x65e   : >> { %20186 = vmatprep.mubr.msk.f32.mxu1 %vm4293_vm4, %v28648_v25  ;;  %v28665_v25 = vld [vmem:[#allocation92_spill] sm:$0xff] }
 0x661   : >> { %20187 = vmatmul.mubr.msk.f32.gmra.mrb[24].mxu1 %vm4293_vm4, %v28649_v61  ;;  %v28666_v61 = vld [vmem:[#allocation93_spill] sm:$0xff] }
 0x662   : >> { %20189 = vmatprep.mubr.msk.f32.mxu1 %vm4293_vm4, %v28650_v3  ;;  %v28667_v3 = vld [vmem:[#allocation94_spill] sm:$0xff] }
 0x665   : >> { %20190 = vmatmul.mubr.msk.f32.gmra.mrb[26].mxu1 %vm4293_vm4, %v28651_v32  ;;  %v28668_v32 = vld [vmem:[#allocation95_spill] sm:$0xff] }
 0x666   : >> { %20192 = vmatprep.mubr.msk.f32.mxu1 %vm4293_vm4, %v28652_v43  ;;  %v28669_v43 = vld [vmem:[#allocation96_spill] sm:$0xff] }
 0x669   : >> { %20193 = vmatmul.mubr.msk.f32.gmra.mrb[28].mxu1 %vm4293_vm4, %v28653_v55  ;;  %v28670_v55 = vld [vmem:[#allocation97_spill] sm:$0xff] }
 0x66a   : >> { %20195 = vmatprep.mubr.msk.f32.mxu1 %vm4293_vm4, %v26226_v58 }
 0x66d   : >> { %20196 = vmatmul.mubr.msk.f32.gmra.mrb[30].mxu1 %vm4293_vm4, %v26230_v30 }
 0x66e   : >> { %20214 = vmatprep.mubr.msk.f32.mxu1 %vm4293_vm4, %v28654_v60  ;;  %v28673_v60 = vld [vmem:[#allocation100_spill] sm:$0xff] }
 0x671   : >> { %20215 = vmatmul.mubr.msk.f32.vlgmr.msra.gmra.mrb[0].mxu1 %vm4293_vm4, %v28655_v11  ;;  %v28677_v11 = vld [vmem:[#allocation103_spill] sm:$0xff] }
 0x672   : >> { %20217 = vmatprep.mubr.msk.f32.mxu1 %vm4293_vm4, %v25968_v26  ;;  %21273 = vmatpush3.bf16.msra.mxu1 %v21270_v42  ;;  %v28662_v42 = vld [vmem:[#allocation89_spill] sm:$0xff] }
 0x673   : >> { %21275 = vmatprep.subr.bf16.mxu1 %v21274_v53 }
 0x675   : >> { %20218 = vmatmul.mubr.msk.f32.gmra.mrb[2].mxu1 %vm4293_vm4, %v25972_v16 }
 0x676   : >> { %20220 = vmatprep.mubr.msk.f32.mxu1 %vm4293_vm4, %v28656_v49  ;;  %21277 = vmatpush3.bf16.msra.mxu1 %v21274_v53  ;;  %v28674_v53 = vld [vmem:[#allocation101_spill] sm:$0xff] }
 0x677   : >> { %21279 = vmatprep.subr.bf16.mxu1 %v21278_v40 }
 0x679   : >> { %20221 = vmatmul.mubr.msk.f32.gmra.mrb[4].mxu1 %vm4293_vm4, %v28657_v47 }
 0x67a   : >> { %20223 = vmatprep.mubr.msk.f32.mxu1 %vm4293_vm4, %v28658_v6  ;;  %21281 = vmatpush3.bf16.msra.mxu1 %v21278_v40  ;;  %v28678_v40 = vld [vmem:[#allocation104_spill] sm:$0xff] }
 0x67b   : >> { %21283 = vmatprep.subr.bf16.mxu1 %v21282_v21 }
 0x67d   : >> { %20224 = vmatmul.mubr.msk.f32.gmra.mrb[6].mxu1 %vm4293_vm4, %v28659_v41 }
 0x67e   : >> { %20226 = vmatprep.mubr.msk.f32.mxu1 %vm4293_vm4, %v28660_v48  ;;  %21285 = vmatpush3.bf16.msra.mxu1 %v21282_v21  ;;  %v26302_v21 = vld [vmem:[#allocation2 + $0x182] sm:$0xff] }
 0x67f   : >> { %21287 = vmatprep.subr.bf16.mxu1 %v21286_v4  ;;  %28681 = vst [vmem:[#allocation73_spill] sm:$0xff] %v26302_v21 }
 0x681   : >> { %20227 = vmatmul.mubr.msk.f32.gmra.mrb[8].mxu1 %vm4293_vm4, %v28661_v12 }
 0x682   : >> { %20229 = vmatprep.mubr.msk.f32.mxu1 %vm4293_vm4, %v28662_v42 }
 0x685   : >> { %20230 = vmatmul.mubr.msk.f32.gmra.mrb[10].mxu1 %vm4293_vm4, %v28663_v7 }
 0x686   : >> { %20232 = vmatprep.mubr.msk.f32.mxu1 %vm4293_vm4, %v28664_v27 }
 0x689   : >> { %20233 = vmatmul.mubr.msk.f32.gmra.mrb[12].mxu1 %vm4293_vm4, %v28665_v25 }
 0x68a   : >> { %20235 = vmatprep.mubr.msk.f32.mxu1 %vm4293_vm4, %v28666_v61 }
 0x68d   : >> { %20236 = vmatmul.mubr.msk.f32.gmra.mrb[14].mxu1 %vm4293_vm4, %v28667_v3 }
 0x68e   : >> { %20238 = vmatprep.mubr.msk.f32.mxu1 %vm4293_vm4, %v28668_v32 }
 0x691   : >> { %20239 = vmatmul.mubr.msk.f32.gmra.mrb[16].mxu1 %vm4293_vm4, %v28669_v43 }
 0x692   : >> { %20241 = vmatprep.mubr.msk.f32.mxu1 %vm4293_vm4, %v28670_v55 }
 0x695   : >> { %20242 = vmatmul.mubr.msk.f32.gmra.mrb[18].mxu1 %vm4293_vm4, %v28671_v33 }
 0x696   : >> { %20244 = vmatprep.mubr.msk.f32.mxu1 %vm4293_vm4, %v28672_v37 }
 0x699   : >> { %20245 = vmatmul.mubr.msk.f32.gmra.mrb[20].mxu1 %vm4293_vm4, %v28673_v60 }
 0x69a   : >> { %20247 = vmatprep.mubr.msk.f32.mxu1 %vm4293_vm4, %v28674_v53 }
 0x69d   : >> { %20248 = vmatmul.mubr.msk.f32.gmra.mrb[22].mxu1 %vm4293_vm4, %v28675_v22 }
 0x69e   : >> { %20250 = vmatprep.mubr.msk.f32.mxu1 %vm4293_vm4, %v28676_v0  ;;  %v17038_v0 = vld [vmem:[%s24578_s20 + $0x438] sm:$0xff] }
 0x6a1   : >> { %20251 = vmatmul.mubr.msk.f32.gmra.mrb[24].mxu1 %vm4293_vm4, %v28677_v11  ;;  %v17037_v11 = vld [vmem:[%s24578_s20 + $0x430] sm:$0xff] }
 0x6a2   : >> { %20253 = vmatprep.mubr.msk.f32.mxu1 %vm4293_vm4, %v28678_v40  ;;  %v17034_v40 = vld [vmem:[%s24578_s20 + $0x418] sm:$0xff] }
 0x6a5   : >> { %20254 = vmatmul.mubr.msk.f32.gmra.mrb[26].mxu1 %vm4293_vm4, %v28679_v35  ;;  %v17036_v35 = vld [vmem:[%s24578_s20 + $0x428] sm:$0xff] }
 0x6a6   : >> { %20256 = vmatprep.mubr.msk.f32.mxu1 %vm4293_vm4, %v28680_v45  ;;  %v21290_v45 = vpack.c.bf16 %v17034_v40, %v17033_v5  ;;  %v17073_v40 = vld [vmem:[%s24578_s20 + $0x440] sm:$0xff]  ;;  %v17074_v5 = vld [vmem:[%s24578_s20 + $0x448] sm:$0xff] }
 0x6a9   : >> { %20257 = vmatmul.mubr.msk.f32.gmra.mrb[28].mxu1 %vm4293_vm4, %v26078_v31  ;;  %v17035_v31 = vld [vmem:[%s24578_s20 + $0x420] sm:$0xff] }
 0x6aa   : >> { %20259 = vmatprep.mubr.msk.f32.mxu1 %vm4293_vm4, %v26302_v21  ;;  %v21294_v21 = vpack.c.bf16 %v17036_v35, %v17035_v31  ;;  %v10720_v31 = vld [vmem:[#allocation2 + $0xe1] sm:$0xff]  ;;  %v10726_v35 = vld [vmem:[#allocation2 + $0x129] sm:$0xff] }
 0x6ad   : >> { %20260 = vmatmul.mubr.msk.f32.gmra.mrb[30].mxu1 %vm4293_vm4, %v26306_v2 }
 0x6ae   : >> { %20278 = vmatprep.mubr.msk.f32.mxu1 %vm4293_vm4, %v25834_v24  ;;  %v21298_v24 = vpack.c.bf16 %v17038_v0, %v17037_v11  ;;  %v10724_v0 = vld [vmem:[#allocation2 + $0x111] sm:$0xff]  ;;  %v10725_v11 = vld [vmem:[#allocation2 + $0x121] sm:$0xff] }
 0x6b1   : >> { %20279 = vmatmul.mubr.msk.f32.vlgmr.msra.gmra.mrb[0].mxu1 %vm4293_vm4, %v25838_v51  ;;  %v21302_v51 = vpack.c.bf16 %v17074_v5, %v17073_v40  ;;  %v10730_v40 = vld [vmem:[#allocation2 + $0x159] sm:$0xff]  ;;  %v10731_v5 = vld [vmem:[#allocation2 + $0x169] sm:$0xff] }
 0x6b2   : >> { %20281 = vmatprep.mubr.msk.f32.mxu1 %vm4293_vm4, %v25844_v46  ;;  %21289 = vmatpush3.bf16.msra.mxu1 %v21286_v4  ;;  %v10340_v46 = vld [vmem:[#allocation2 + $0x198] sm:$0xff]  ;;  %v10723_v4 = vld [vmem:[#allocation2 + $0x109] sm:$0xff] }
 0x6b3   : >> { %21291 = vmatprep.subr.bf16.mxu1 %v21290_v45 }
 0x6b5   : >> { %20282 = vmatmul.mubr.msk.f32.gmra.mrb[2].mxu1 %vm4293_vm4, %v25850_v56  ;;  %v10341_v56 = vld [vmem:[#allocation2 + $0x1a0] sm:$0xff] }
 0x6b6   : >> { %20284 = vmatprep.mubr.msk.f32.mxu1 %vm4293_vm4, %v25854_v1  ;;  %21293 = vmatpush3.bf16.msra.mxu1 %v21290_v45  ;;  %v17075_v1 = vld [vmem:[%s24578_s20 + $0x450] sm:$0xff]  ;;  %v10727_v45 = vld [vmem:[#allocation2 + $0x139] sm:$0xff] }
 0x6b7   : >> { %21295 = vmatprep.subr.bf16.mxu1 %v21294_v21 }
 0x6b9   : >> { %20285 = vmatmul.mubr.msk.f32.gmra.mrb[4].mxu1 %vm4293_vm4, %v25859_v38  ;;  %v17076_v38 = vld [vmem:[%s24578_s20 + $0x458] sm:$0xff] }
 0x6ba   : >> { %20287 = vmatprep.mubr.msk.f32.mxu1 %vm4293_vm4, %v25863_v50  ;;  %21297 = vmatpush3.bf16.msra.mxu1 %v21294_v21  ;;  %v10705_v50 = vld [vmem:[#allocation2 + $0x31] sm:$0xff]  ;;  %v10728_v21 = vld [vmem:[#allocation2 + $0x141] sm:$0xff] }
 0x6bb   : >> { %21299 = vmatprep.subr.bf16.mxu1 %v21298_v24 }
 0x6bd   : >> { %20288 = vmatmul.mubr.msk.f32.gmra.mrb[6].mxu1 %vm4293_vm4, %v25867_v52  ;;  %v21306_v52 = vpack.c.bf16 %v17076_v38, %v17075_v1 }
 0x6be   : >> { %20290 = vmatprep.mubr.msk.f32.mxu1 %vm4293_vm4, %v25871_v29  ;;  %21301 = vmatpush3.bf16.msra.mxu1 %v21298_v24  ;;  %v10706_v29 = vld [vmem:[#allocation2 + $0x39] sm:$0xff]  ;;  %v10729_v24 = vld [vmem:[#allocation2 + $0x151] sm:$0xff] }
 0x6bf   : >> { %21303 = vmatprep.subr.bf16.mxu1 %v21302_v51 }
 0x6c1   : >> { %20291 = vmatmul.mubr.msk.f32.gmra.mrb[8].mxu1 %vm4293_vm4, %v25875_v62  ;;  %v17077_v62 = vld [vmem:[%s24578_s20 + $0x460] sm:$0xff] }
 0x6c2   : >> { %20293 = vmatprep.mubr.msk.f32.mxu1 %vm4293_vm4, %v25879_v9  ;;  %v17078_v9 = vld [vmem:[%s24578_s20 + $0x468] sm:$0xff] }
 0x6c5   : >> { %20294 = vmatmul.mubr.msk.f32.gmra.mrb[10].mxu1 %vm4293_vm4, %v25883_v18  ;;  %v10707_v18 = vld [vmem:[#allocation2 + $0x49] sm:$0xff] }
 0x6c6   : >> { %20296 = vmatprep.mubr.msk.f32.mxu1 %vm4293_vm4, %v25887_v59  ;;  %v21310_v59 = vpack.c.bf16 %v17078_v9, %v17077_v62  ;;  %v28697_v62 = vld [vmem:[#allocation66_spill] sm:$0xff]  ;;  %v28699_v9 = vld [vmem:[#allocation67_spill] sm:$0xff] }
 0x6c9   : >> { %20297 = vmatmul.mubr.msk.f32.gmra.mrb[12].mxu1 %vm4293_vm4, %v25891_v10  ;;  %v10708_v10 = vld [vmem:[#allocation2 + $0x51] sm:$0xff] }
 0x6ca   : >> { %20299 = vmatprep.mubr.msk.f32.mxu1 %vm4293_vm4, %v25895_v23  ;;  %v17079_v23 = vld [vmem:[%s24578_s20 + $0x470] sm:$0xff] }
 0x6cd   : >> { %20300 = vmatmul.mubr.msk.f32.gmra.mrb[14].mxu1 %vm4293_vm4, %v25899_v15  ;;  %v17080_v15 = vld [vmem:[%s24578_s20 + $0x478] sm:$0xff] }
 0x6ce   : >> { %20302 = vmatprep.mubr.msk.f32.mxu1 %vm4293_vm4, %v25903_v44  ;;  %v10709_v44 = vld [vmem:[#allocation2 + $0x61] sm:$0xff] }
 0x6d1   : >> { %20303 = vmatmul.mubr.msk.f32.gmra.mrb[16].mxu1 %vm4293_vm4, %v25907_v54  ;;  %v21314_v54 = vpack.c.bf16 %v17080_v15, %v17079_v23 }
 0x6d2   : >> { %20305 = vmatprep.mubr.msk.f32.mxu1 %vm4293_vm4, %v25911_v63  ;;  %v10710_v63 = vld [vmem:[#allocation2 + $0x69] sm:$0xff] }
 0x6d5   : >> { %20306 = vmatmul.mubr.msk.f32.gmra.mrb[18].mxu1 %vm4293_vm4, %v25915_v14  ;;  %v10711_v14 = vld [vmem:[#allocation2 + $0x79] sm:$0xff] }
 0x6d6   : >> { %20308 = vmatprep.mubr.msk.f32.mxu1 %vm4293_vm4, %v25919_v36  ;;  %v10712_v36 = vld [vmem:[#allocation2 + $0x81] sm:$0xff] }
 0x6d9   : >> { %20309 = vmatmul.mubr.msk.f32.gmra.mrb[20].mxu1 %vm4293_vm4, %v25923_v28  ;;  %v10713_v28 = vld [vmem:[#allocation2 + $0x91] sm:$0xff] }
 0x6da   : >> { %20311 = vmatprep.mubr.msk.f32.mxu1 %vm4293_vm4, %v25927_v13  ;;  %v10714_v13 = vld [vmem:[#allocation2 + $0x99] sm:$0xff] }
 0x6dd   : >> { %20312 = vmatmul.mubr.msk.f32.gmra.mrb[22].mxu1 %vm4293_vm4, %v25931_v17  ;;  %v10715_v17 = vld [vmem:[#allocation2 + $0xa9] sm:$0xff] }
 0x6de   : >> { %20314 = vmatprep.mubr.msk.f32.mxu1 %vm4293_vm4, %v25935_v34  ;;  %v10716_v34 = vld [vmem:[#allocation2 + $0xb1] sm:$0xff] }
 0x6e1   : >> { %20315 = vmatmul.mubr.msk.f32.gmra.mrb[24].mxu1 %vm4293_vm4, %v25939_v57  ;;  %v10717_v57 = vld [vmem:[#allocation2 + $0xc1] sm:$0xff] }
 0x6e2   : >> { %20317 = vmatprep.mubr.msk.f32.mxu1 %vm4293_vm4, %v25943_v8  ;;  %v10718_v8 = vld [vmem:[#allocation2 + $0xc9] sm:$0xff] }
 0x6e5   : >> { %20318 = vmatmul.mubr.msk.f32.gmra.mrb[26].mxu1 %vm4293_vm4, %v25947_v39  ;;  %v10719_v39 = vld [vmem:[#allocation2 + $0xd9] sm:$0xff] }
 0x6e6   : >> { %20320 = vmatprep.mubr.msk.f32.mxu1 %vm4293_vm4, %v26150_v19  ;;  %v10721_v19 = vld [vmem:[#allocation2 + $0xf1] sm:$0xff] }
 0x6e9   : >> { %20321 = vmatmul.mubr.msk.f32.gmra.mrb[28].mxu1 %vm4293_vm4, %v26154_v20  ;;  %v10722_v20 = vld [vmem:[#allocation2 + $0xf9] sm:$0xff] }
 0x6ea   : >> { %20323 = vmatprep.mubr.msk.f32.mxu1 %vm4293_vm4, %v10340_v46  ;;  %v10735_v46 = vld [vmem:[#allocation2 + $0x199] sm:$0xff] }
 0x6ed   : >> { %20324 = vmatmul.mubr.msk.f32.gmra.mrb[30].mxu1 %vm4293_vm4, %v10341_v56  ;;  %v10736_v56 = vld [vmem:[#allocation2 + $0x1a1] sm:$0xff] }
 0x6ee   : >> { %20342 = vmatprep.mubr.msk.f32.mxu1 %vm4293_vm4, %v10705_v50 }
 0x6f1   : >> { %20343 = vmatmul.mubr.msk.f32.vlgmr.msra.gmra.mrb[0].mxu1 %vm4293_vm4, %v10706_v29 }
 0x6f2   : >> { %20345 = vmatprep.mubr.msk.f32.mxu1 %vm4293_vm4, %v10707_v18  ;;  %21305 = vmatpush3.bf16.msra.mxu1 %v21302_v51  ;;  %v10732_v51 = vld [vmem:[#allocation2 + $0x171] sm:$0xff] }
 0x6f3   : >> { %21307 = vmatprep.subr.bf16.mxu1 %v21306_v52 }
 0x6f5   : >> { %20346 = vmatmul.mubr.msk.f32.gmra.mrb[2].mxu1 %vm4293_vm4, %v10708_v10 }
 0x6f6   : >> { %20348 = vmatprep.mubr.msk.f32.mxu1 %vm4293_vm4, %v10709_v44  ;;  %21309 = vmatpush3.bf16.msra.mxu1 %v21306_v52 }
 0x6f7   : >> { %21311 = vmatprep.subr.bf16.mxu1 %v21310_v59 }
 0x6f9   : >> { %20349 = vmatmul.mubr.msk.f32.gmra.mrb[4].mxu1 %vm4293_vm4, %v10710_v63  ;;  %v28703_v63 = vld [vmem:[#allocation65_spill] sm:$0xff] }
 0x6fa   : >> { %20351 = vmatprep.mubr.msk.f32.mxu1 %vm4293_vm4, %v10711_v14  ;;  %21313 = vmatpush3.bf16.msra.mxu1 %v21310_v59 }
 0x6fb   : >> { %21315 = vmatprep.subr.bf16.mxu1 %v21314_v54 }
 0x6fd   : >> { %20352 = vmatmul.mubr.msk.f32.gmra.mrb[6].mxu1 %vm4293_vm4, %v10712_v36 }
 0x6fe   : >> { %20354 = vmatprep.mubr.msk.f32.mxu1 %vm4293_vm4, %v10713_v28  ;;  %21317 = vmatpush3.bf16.msra.mxu1 %v21314_v54  ;;  %v28701_v54 = vld [vmem:[#allocation64_spill] sm:$0xff] }
 0x701   : >> { %20355 = vmatmul.mubr.msk.f32.gmra.mrb[8].mxu1 %vm4293_vm4, %v10714_v13 }
 0x702   : >> { %20357 = vmatprep.mubr.msk.f32.mxu1 %vm4293_vm4, %v10715_v17 }
 0x705   : >> { %20358 = vmatmul.mubr.msk.f32.gmra.mrb[10].mxu1 %vm4293_vm4, %v10716_v34 }
 0x706   : >> { %20360 = vmatprep.mubr.msk.f32.mxu1 %vm4293_vm4, %v10717_v57  ;;  %v28705_v57 = vld [vmem:[#allocation62_spill] sm:$0xff] }
 0x709   : >> { %20361 = vmatmul.mubr.msk.f32.gmra.mrb[12].mxu1 %vm4293_vm4, %v10718_v8 }
 0x70a   : >> { %20363 = vmatprep.mubr.msk.f32.mxu1 %vm4293_vm4, %v10719_v39  ;;  %v28707_v39 = vld [vmem:[#allocation63_spill] sm:$0xff] }
 0x70d   : >> { %20364 = vmatmul.mubr.msk.f32.gmra.mrb[14].mxu1 %vm4293_vm4, %v10720_v31 }
 0x70e   : >> { %20366 = vmatprep.mubr.msk.f32.mxu1 %vm4293_vm4, %v10721_v19 }
 0x711   : >> { %20367 = vmatmul.mubr.msk.f32.gmra.mrb[16].mxu1 %vm4293_vm4, %v10722_v20 }
 0x712   : >> { %20369 = vmatprep.mubr.msk.f32.mxu1 %vm4293_vm4, %v10723_v4 }
 0x715   : >> { %20370 = vmatmul.mubr.msk.f32.gmra.mrb[18].mxu1 %vm4293_vm4, %v10724_v0 }
 0x716   : >> { %20372 = vmatprep.mubr.msk.f32.mxu1 %vm4293_vm4, %v10725_v11  ;;  %v28709_v11 = vld [vmem:[#allocation60_spill] sm:$0xff] }
 0x719   : >> { %20373 = vmatmul.mubr.msk.f32.gmra.mrb[20].mxu1 %vm4293_vm4, %v10726_v35  ;;  %v28711_v35 = vld [vmem:[#allocation61_spill] sm:$0xff] }
 0x71a   : >> { %20375 = vmatprep.mubr.msk.f32.mxu1 %vm4293_vm4, %v10727_v45 }
 0x71d   : >> { %20376 = vmatmul.mubr.msk.f32.gmra.mrb[22].mxu1 %vm4293_vm4, %v10728_v21 }
 0x71e   : >> { %20378 = vmatprep.mubr.msk.f32.mxu1 %vm4293_vm4, %v10729_v24 }
 0x721   : >> { %20379 = vmatmul.mubr.msk.f32.gmra.mrb[24].mxu1 %vm4293_vm4, %v10730_v40 }
 0x722   : >> { %20381 = vmatprep.mubr.msk.f32.mxu1 %vm4293_vm4, %v10731_v5 }
 0x725   : >> { %20382 = vmatmul.mubr.msk.f32.gmra.mrb[26].mxu1 %vm4293_vm4, %v10732_v51 }
 0x726   : >> { %20384 = vmatprep.mubr.msk.f32.mxu1 %vm4293_vm4, %v26226_v58  ;;  %v28684_v58 = vld [vmem:[#allocation104_spill] sm:$0xff] }
 0x729   : >> { %20385 = vmatmul.mubr.msk.f32.gmra.mrb[28].mxu1 %vm4293_vm4, %v26230_v30  ;;  %v28685_v30 = vld [vmem:[#allocation105_spill] sm:$0xff] }
 0x72a   : >> { %20387 = vmatprep.mubr.msk.f32.mxu1 %vm4293_vm4, %v10735_v46  ;;  %v28713_v46 = vld [vmem:[#allocation58_spill] sm:$0xff] }
 0x72d   : >> { %20388 = vmatmul.mubr.msk.f32.gmra.mrb[30].mxu1 %vm4293_vm4, %v10736_v56 }
 0x72e   : >> { %20406 = vmatprep.mubr.msk.f32.mxu1 %vm4293_vm4, %v25968_v26  ;;  %v28682_v26 = vld [vmem:[#allocation102_spill] sm:$0xff] }
 0x731   : >> { %20407 = vmatmul.mubr.msk.f32.vlgmr.msra.gmra.mrb[0].mxu1 %vm4293_vm4, %v25972_v16  ;;  %v28683_v16 = vld [vmem:[#allocation103_spill] sm:$0xff] }
 0x732   : >> { %20409 = vmatprep.mubr.msk.f32.mxu1 %vm4293_vm4, %v28656_v49  ;;  %v28686_v49 = vld [vmem:[#allocation106_spill] sm:$0xff] }
 0x735   : >> { %20410 = vmatmul.mubr.msk.f32.gmra.mrb[2].mxu1 %vm4293_vm4, %v28657_v47  ;;  %v28687_v47 = vld [vmem:[#allocation72_spill] sm:$0xff] }
 0x736   : >> { %20412 = vmatprep.mubr.msk.f32.mxu1 %vm4293_vm4, %v28658_v6  ;;  %v28688_v6 = vld [vmem:[#allocation73_spill] sm:$0xff] }
 0x739   : >> { %20413 = vmatmul.mubr.msk.f32.gmra.mrb[4].mxu1 %vm4293_vm4, %v28659_v41  ;;  %v11130_v41 = vld [vmem:[#allocation2 + $0x19a] sm:$0xff] }
 0x73a   : >> { %20415 = vmatprep.mubr.msk.f32.mxu1 %vm4293_vm4, %v28660_v48  ;;  %v11131_v48 = vld [vmem:[#allocation2 + $0x1a2] sm:$0xff] }
 0x73d   : >> { %20416 = vmatmul.mubr.msk.f32.gmra.mrb[6].mxu1 %vm4293_vm4, %v28661_v12  ;;  %v26483_v12 = vld [vmem:[%s25558_s28 + $0x1] ss:$0 sm:$0xff] }
 0x73e   : >> { %20418 = vmatprep.mubr.msk.f32.mxu1 %vm4293_vm4, %v28662_v42 }
 0x741   : >> { %20419 = vmatmul.mubr.msk.f32.gmra.mrb[8].mxu1 %vm4293_vm4, %v28663_v7 }
 0x742   : >> { %20421 = vmatprep.mubr.msk.f32.mxu1 %vm4293_vm4, %v28664_v27 }
 0x745   : >> { %20422 = vmatmul.mubr.msk.f32.gmra.mrb[10].mxu1 %vm4293_vm4, %v28665_v25 }
 0x746   : >> { %20424 = vmatprep.mubr.msk.f32.mxu1 %vm4293_vm4, %v28666_v61  ;;  %v28689_v61 = vld [vmem:[#allocation70_spill] sm:$0xff] }
 0x749   : >> { %20425 = vmatmul.mubr.msk.f32.gmra.mrb[12].mxu1 %vm4293_vm4, %v28667_v3  ;;  %v28691_v3 = vld [vmem:[#allocation71_spill] sm:$0xff] }
 0x74a   : >> { %20427 = vmatprep.mubr.msk.f32.mxu1 %vm4293_vm4, %v28668_v32 }
 0x74d   : >> { %20428 = vmatmul.mubr.msk.f32.gmra.mrb[14].mxu1 %vm4293_vm4, %v28669_v43 }
 0x74e   : >> { %20430 = vmatprep.mubr.msk.f32.mxu1 %vm4293_vm4, %v28670_v55 }
 0x751   : >> { %20431 = vmatmul.mubr.msk.f32.gmra.mrb[16].mxu1 %vm4293_vm4, %v28671_v33 }
 0x752   : >> { %20433 = vmatprep.mubr.msk.f32.mxu1 %vm4293_vm4, %v28672_v37 }
 0x755   : >> { %20434 = vmatmul.mubr.msk.f32.gmra.mrb[18].mxu1 %vm4293_vm4, %v28673_v60  ;;  %v28693_v60 = vld [vmem:[#allocation68_spill] sm:$0xff] }
 0x756   : >> { %20436 = vmatprep.mubr.msk.f32.mxu1 %vm4293_vm4, %v28674_v53 }
 0x759   : >> { %20437 = vmatmul.mubr.msk.f32.gmra.mrb[20].mxu1 %vm4293_vm4, %v28675_v22  ;;  %v28695_v22 = vld [vmem:[#allocation69_spill] sm:$0xff] }
 0x75a   : >> { %20439 = vmatprep.mubr.msk.f32.mxu1 %vm4293_vm4, %v28682_v26 }
 0x75d   : >> { %20440 = vmatmul.mubr.msk.f32.gmra.mrb[22].mxu1 %vm4293_vm4, %v28683_v16 }
 0x75e   : >> { %20442 = vmatprep.mubr.msk.f32.mxu1 %vm4293_vm4, %v28684_v58 }
 0x761   : >> { %20443 = vmatmul.mubr.msk.f32.gmra.mrb[24].mxu1 %vm4293_vm4, %v28685_v30 }
 0x762   : >> { %20445 = vmatprep.mubr.msk.f32.mxu1 %vm4293_vm4, %v28686_v49 }
 0x765   : >> { %20446 = vmatmul.mubr.msk.f32.gmra.mrb[26].mxu1 %vm4293_vm4, %v28687_v47 }
 0x766   : >> { %20448 = vmatprep.mubr.msk.f32.mxu1 %vm4293_vm4, %v28688_v6  ;;  %v28717_v6 = vld [vmem:[#allocation56_spill] sm:$0xff] }
 0x769   : >> { %20449 = vmatmul.mubr.msk.f32.gmra.mrb[28].mxu1 %vm4293_vm4, %v26306_v2 }
 0x76a   : >> { %20451 = vmatprep.mubr.msk.f32.mxu1 %vm4293_vm4, %v11130_v41 }
 0x76d   : >> { %20452 = vmatmul.mubr.msk.f32.gmra.mrb[30].mxu1 %vm4293_vm4, %v11131_v48  ;;  %v28719_v48 = vld [vmem:[#allocation57_spill] sm:$0xff] }
 0x804   : >> { %v20408_v42 = vpop.f32.mrb[0].mxu1 }
 0x805   : >> { %v11502_v7 = vadd.f32 %v20408_v42, %v26483_v12  ;;  %v11304_v27 = vpop.f32.mrb[1].mxu1 }
 0x806   : >> { %v11501_v25 = vadd.f32 %v26483_v12, %v11304_v27 }
 0x807   : >> { %v26488_v59 = vadd.f32 %v28689_v61, %v11502_v7  }
 0x808   : >> { %v26491_v61 = vadd.f32 %v28691_v3, %v11501_v25   ;;  %v20411_v32 = vpop.f32.mrb[2].mxu1 }
 0x809   : >> { %v28690_v55 = vmov %v26488_v59  ;;  %v11504_v43 = vadd.f32 %v20411_v32, %v26483_v12  ;;  %v11314_v33 = vpop.f32.mrb[3].mxu1  ;;  %v28721_v32 = vld [vmem:[#allocation54_spill] sm:$0xff] }
 0x80a   : >> { %28692 = vst [vmem:[#allocation9_spill] sm:$0xff] %v26491_v61  ;;  %v11503_v37 = vadd.f32 %v26483_v12, %v11314_v33  ;;  %11568 = vst.msk [vmem:[#allocation2 + $0x21] sm:$0xff] (%p26616_p8), %vm4293_vm4, %v28690_v55 }
 0x80b   : >> { %v26496_v4 = vadd.f32 %v28693_v60, %v11504_v43  }
 0x80c   : >> { %v26499_v5 = vadd.f32 %v28695_v22, %v11503_v37   ;;  %v20414_v2 = vpop.f32.mrb[4].mxu1 }
 0x80d   : >> { %v28694_v1 = vmov %v26496_v4  ;;  %v11506_v50 = vadd.f32 %v20414_v2, %v26483_v12  ;;  %v11324_v52 = vpop.f32.mrb[5].mxu1 }
 0x80e   : >> { %v28696_v38 = vmov %v26499_v5  ;;  %v11505_v29 = vadd.f32 %v26483_v12, %v11324_v52  ;;  %11570 = vst.msk [vmem:[#allocation2 + $0x39] sm:$0xff] (%p26616_p8), %vm4293_vm4, %v28694_v1 }
 0x80f   : >> { %v26504_v18 = vadd.f32 %v28697_v62, %v11506_v50   ;;  %v28727_v62 = vld [vmem:[#allocation53_spill] sm:$0xff]  ;;  %11569 = vst.msk [vmem:[#allocation2 + $0x31] sm:$0xff] (%p26616_p8), %vm4293_vm4, %v28696_v38 }
 0x810   : >> { %v26507_v56 = vadd.f32 %v28699_v9, %v11505_v29   ;;  %v20417_v59 = vpop.f32.mrb[6].mxu1 }
 0x811   : >> { %v28698_v44 = vmov %v26504_v18  ;;  %v11508_v10 = vadd.f32 %v20417_v59, %v26483_v12  ;;  %v11334_v23 = vpop.f32.mrb[7].mxu1 }
 0x812   : >> { %v28700_v14 = vmov %v26507_v56  ;;  %v11507_v15 = vadd.f32 %v26483_v12, %v11334_v23  ;;  %v28715_v56 = vld [vmem:[#allocation59_spill] sm:$0xff]  ;;  %11572 = vst.msk [vmem:[#allocation2 + $0x51] sm:$0xff] (%p26616_p8), %vm4293_vm4, %v28698_v44 }
 0x813   : >> { %v26512_v9 = vadd.f32 %v28701_v54, %v11508_v10   ;;  %11571 = vst.msk [vmem:[#allocation2 + $0x49] sm:$0xff] (%p26616_p8), %vm4293_vm4, %v28700_v14 }
 0x814   : >> { %v26515_v10 = vadd.f32 %v28703_v63, %v11507_v15   ;;  %v20420_v13 = vpop.f32.mrb[8].mxu1  ;;  %v28731_v15 = vld [vmem:[#allocation51_spill] sm:$0xff] }
 0x815   : >> { %v28702_v36 = vmov %v26512_v9  ;;  %v11510_v17 = vadd.f32 %v20420_v13, %v26483_v12  ;;  %v11344_v34 = vpop.f32.mrb[9].mxu1 }
 0x816   : >> { %v28704_v28 = vmov %v26515_v10  ;;  %v11509_v18 = vadd.f32 %v26483_v12, %v11344_v34  ;;  %11574 = vst.msk [vmem:[#allocation2 + $0x69] sm:$0xff] (%p26616_p8), %vm4293_vm4, %v28702_v36 }
 0x817   : >> { %v26520_v22 = vadd.f32 %v28705_v57, %v11510_v17   ;;  %11573 = vst.msk [vmem:[#allocation2 + $0x61] sm:$0xff] (%p26616_p8), %vm4293_vm4, %v28704_v28 }
 0x818   : >> { %v26523_v23 = vadd.f32 %v28707_v39, %v11509_v18   ;;  %v20423_v19 = vpop.f32.mrb[10].mxu1 }
 0x819   : >> { %v28706_v8 = vmov %v26520_v22  ;;  %v11512_v20 = vadd.f32 %v20423_v19, %v26483_v12  ;;  %v11354_v4 = vpop.f32.mrb[11].mxu1  ;;  %v28733_v19 = vld [vmem:[#allocation48_spill] sm:$0xff] }
 0x81a   : >> { %v28708_v31 = vmov %v26523_v23  ;;  %v11511_v0 = vadd.f32 %v26483_v12, %v11354_v4  ;;  %v28729_v23 = vld [vmem:[#allocation50_spill] sm:$0xff]  ;;  %11576 = vst.msk [vmem:[#allocation2 + $0x81] sm:$0xff] (%p26616_p8), %vm4293_vm4, %v28706_v8 }
 0x81b   : >> { %v26528_v21 = vadd.f32 %v28709_v11, %v11512_v20   ;;  %11575 = vst.msk [vmem:[#allocation2 + $0x79] sm:$0xff] (%p26616_p8), %vm4293_vm4, %v28708_v31 }
 0x81c   : >> { %v26531_v2 = vadd.f32 %v28711_v35, %v11511_v0   ;;  %v20426_v45 = vpop.f32.mrb[12].mxu1 }
 0x81d   : >> { %v28710_v40 = vmov %v26528_v21  ;;  %v11514_v24 = vadd.f32 %v20426_v45, %v26483_v12  ;;  %v11364_v5 = vpop.f32.mrb[13].mxu1 }
 0x81e   : >> { %v28712_v58 = vmov %v26531_v2  ;;  %v11513_v51 = vadd.f32 %v26483_v12, %v11364_v5  ;;  %v28725_v2 = vld [vmem:[#allocation52_spill] sm:$0xff]  ;;  %v28739_v5 = vld [vmem:[#allocation47_spill] sm:$0xff]  ;;  %11578 = vst.msk [vmem:[#allocation2 + $0x99] sm:$0xff] (%p26616_p8), %vm4293_vm4, %v28710_v40 }
 0x81f   : >> { %v26536_v24 = vadd.f32 %v28713_v46, %v11514_v24   ;;  %11577 = vst.msk [vmem:[#allocation2 + $0x91] sm:$0xff] (%p26616_p8), %vm4293_vm4, %v28712_v58 }
 0x820   : >> { %v26539_v27 = vadd.f32 %v28715_v56, %v11513_v51   ;;  %v20429_v26 = vpop.f32.mrb[14].mxu1 }
 0x821   : >> { %v28714_v30 = vmov %v26536_v24  ;;  %v11516_v16 = vadd.f32 %v20429_v26, %v26483_v12  ;;  %v11374_v47 = vpop.f32.mrb[15].mxu1  ;;  %v28737_v24 = vld [vmem:[#allocation46_spill] sm:$0xff] }
 0x822   : >> { %v28716_v49 = vmov %v26539_v27  ;;  %v11515_v21 = vadd.f32 %v26483_v12, %v11374_v47  ;;  %v28723_v27 = vld [vmem:[#allocation55_spill] sm:$0xff]  ;;  %11580 = vst.msk [vmem:[#allocation2 + $0xb1] sm:$0xff] (%p26616_p8), %vm4293_vm4, %v28714_v30 }
 0x823   : >> { %v26544_v33 = vadd.f32 %v28717_v6, %v11516_v16   ;;  %11579 = vst.msk [vmem:[#allocation2 + $0xa9] sm:$0xff] (%p26616_p8), %vm4293_vm4, %v28716_v49 }
 0x824   : >> { %v26547_v35 = vadd.f32 %v28719_v48, %v11515_v21   ;;  %v20432_v7 = vpop.f32.mrb[16].mxu1  ;;  %v28741_v21 = vld [vmem:[#allocation44_spill] sm:$0xff]  ;;  %v28743_v48 = vld [vmem:[#allocation45_spill] sm:$0xff] }
 0x825   : >> { %v28718_v41 = vmov %v26544_v33  ;;  %v11518_v25 = vadd.f32 %v20432_v7, %v26483_v12  ;;  %v11384_v61 = vpop.f32.mrb[17].mxu1 }
 0x826   : >> { %v28720_v42 = vmov %v26547_v35  ;;  %v11517_v3 = vadd.f32 %v26483_v12, %v11384_v61  ;;  %11582 = vst.msk [vmem:[#allocation2 + $0xc9] sm:$0xff] (%p26616_p8), %vm4293_vm4, %v28718_v41 }
 0x827   : >> { %v26552_v43 = vadd.f32 %v28721_v32, %v11518_v25   ;;  %11581 = vst.msk [vmem:[#allocation2 + $0xc1] sm:$0xff] (%p26616_p8), %vm4293_vm4, %v28720_v42 }
 0x828   : >> { %v26555_v45 = vadd.f32 %v28723_v27, %v11517_v3   ;;  %v20435_v37 = vpop.f32.mrb[18].mxu1  ;;  %v28745_v27 = vld [vmem:[#allocation42_spill] sm:$0xff] }
 0x829   : >> { %v28722_v50 = vmov %v26552_v43  ;;  %v11520_v60 = vadd.f32 %v20435_v37, %v26483_v12  ;;  %v11394_v22 = vpop.f32.mrb[19].mxu1 }
 0x82a   : >> { %v28724_v52 = vmov %v26555_v45  ;;  %v11519_v33 = vadd.f32 %v26483_v12, %v11394_v22  ;;  %11584 = vst.msk [vmem:[#allocation2 + $0xe1] sm:$0xff] (%p26616_p8), %vm4293_vm4, %v28722_v50 }
 0x82b   : >> { %v26560_v51 = vadd.f32 %v28725_v2, %v11520_v60   ;;  %11583 = vst.msk [vmem:[#allocation2 + $0xd9] sm:$0xff] (%p26616_p8), %vm4293_vm4, %v28724_v52 }
 0x82c   : >> { %v26563_v54 = vadd.f32 %v28727_v62, %v11519_v33   ;;  %v20438_v9 = vpop.f32.mrb[20].mxu1 }
 0x82d   : >> { %v28726_v29 = vmov %v26560_v51  ;;  %v11522_v59 = vadd.f32 %v20438_v9, %v26483_v12  ;;  %v11404_v10 = vpop.f32.mrb[21].mxu1  ;;  %v28750_v9 = vld [vmem:[#allocation40_spill] sm:$0xff] }
 0x82e   : >> { %v28728_v13 = vmov %v26563_v54  ;;  %v11521_v43 = vadd.f32 %v26483_v12, %v11404_v10  ;;  %v28735_v54 = vld [vmem:[#allocation49_spill] sm:$0xff]  ;;  %v28784_v10 = vmov %v28704_v28  ;;  %11586 = vst.msk [vmem:[#allocation2 + $0xf9] sm:$0xff] (%p26616_p8), %vm4293_vm4, %v28726_v29  ;;  %v17117_v28 = vld [vmem:[%s23316_s2 + $0x58] sm:$0xff] (%p26616_p8) }
 0x82f   : >> { %v26568_v3 = vadd.f32 %v28729_v23, %v11522_v59   ;;  %v28782_v23 = vmov %v28708_v31  ;;  %v28789_v59 = vmov %v28690_v55  ;;  %11585 = vst.msk [vmem:[#allocation2 + $0xf1] sm:$0xff] (%p26616_p8), %vm4293_vm4, %v28728_v13  ;;  %v17272_v10 = vld [vmem:[%s23316_s2 + $0x130] sm:$0xff] (%p26616_p8) }
 0x830   : >> { %v26571_v7 = vadd.f32 %v28731_v15, %v11521_v43   ;;  %v20441_v63 = vpop.f32.mrb[22].mxu1  ;;  %v28773_v43 = vmov %v28722_v50  ;;  %v17271_v50 = vld [vmem:[%s23316_s2 + $0x128] sm:$0xff] (%p26616_p8)  ;;  %v17121_v59 = vld [vmem:[%s23316_s2 + $0x78] sm:$0xff] (%p26616_p8) }
 0x831   : >> { %v28730_v17 = vmov %v26568_v3  ;;  %v11524_v18 = vadd.f32 %v20441_v63, %v26483_v12  ;;  %v11414_v57 = vpop.f32.mrb[23].mxu1  ;;  %v17273_v43 = vld [vmem:[%s23316_s2 + $0x138] sm:$0xff] (%p26616_p8) }
 0x832   : >> { %v28732_v34 = vmov %v26571_v7  ;;  %v11523_v39 = vadd.f32 %v26483_v12, %v11414_v57  ;;  %11588 = vst.msk [vmem:[#allocation2 + $0x111] sm:$0xff] (%p26616_p8), %vm4293_vm4, %v28730_v17 }
 0x833   : >> { %v26576_v26 = vadd.f32 %v28733_v19, %v11524_v18   ;;  %v28785_v18 = vmov %v28698_v44  ;;  %11587 = vst.msk [vmem:[#allocation2 + $0x109] sm:$0xff] (%p26616_p8), %vm4293_vm4, %v28732_v34 }
 0x834   : >> { %v26579_v15 = vadd.f32 %v28735_v54, %v11523_v39   ;;  %v20444_v4 = vpop.f32.mrb[24].mxu1  ;;  %v28772_v54 = vmov %v28728_v13  ;;  %v17120_v13 = vld [vmem:[%s23316_s2 + $0x70] sm:$0xff] (%p26616_p8)  ;;  %v17306_v18 = vld [vmem:[%s23316_s2 + $0x140] sm:$0xff] (%p26616_p8) }
 0x835   : >> { %v28734_v20 = vmov %v26576_v26  ;;  %v11526_v0 = vadd.f32 %v20444_v4, %v26483_v12  ;;  %v11424_v35 = vpop.f32.mrb[25].mxu1  ;;  %v28787_v4 = vmov %v28694_v1 }
 0x836   : >> { %v28736_v11 = vmov %v26579_v15  ;;  %v11525_v45 = vadd.f32 %v26483_v12, %v11424_v35  ;;  %v28776_v35 = vmov %v28720_v42  ;;  %11590 = vst.msk [vmem:[#allocation2 + $0x129] sm:$0xff] (%p26616_p8), %vm4293_vm4, %v28734_v20  ;;  %v17270_v42 = vld [vmem:[%s23316_s2 + $0x120] sm:$0xff] (%p26616_p8)  ;;  %v17308_v4 = vld [vmem:[%s23316_s2 + $0x150] sm:$0xff] (%p26616_p8) }
 0x837   : >> { %v26584_v16 = vadd.f32 %v28737_v24, %v11526_v0   ;;  %v28768_v15 = vmov %v28736_v11  ;;  %v28777_v24 = vmov %v28714_v30  ;;  %11589 = vst.msk [vmem:[#allocation2 + $0x121] sm:$0xff] (%p26616_p8), %vm4293_vm4, %v28736_v11  ;;  %v17118_v30 = vld [vmem:[%s23316_s2 + $0x60] sm:$0xff] (%p26616_p8)  ;;  %v11641_v35 = vld [vmem:[#allocation2 + $0x9] sm:$0xff] (%p26616_p8) }
 0x838   : >> { %v26587_v60 = vadd.f32 %v28739_v5, %v11525_v45   ;;  %v20447_v51 = vpop.f32.mrb[26].mxu1  ;;  %v28774_v45 = vmov %v28724_v52  ;;  %v28788_v5 = vmov %v28696_v38  ;;  %v11640_v52 = vld [vmem:[#allocation2 + $0x1] sm:$0xff] (%p26616_p8)  ;;  %v26815_v15 = vpack.c.bf16 (%p26616_p8), %v17273_v43, %v17272_v10  ;;  %v11635_v24 = vld [vmem:[%s23316_s2 + $0x18] sm:$0xff] (%p26616_p8) }
 0x839   : >> { %v28738_v47 = vmov %v26584_v16  ;;  %v11528_v46 = vadd.f32 %v20447_v51, %v26483_v12  ;;  %v11434_v56 = vpop.f32.mrb[27].mxu1  ;;  %v28771_v51 = vmov %v28726_v29  ;;  %v26805_v29 = vpack.c.bf16 (%p26616_p8), %v17271_v50, %v17270_v42  ;;  %20470 = vmatprep.mubr.msk.f32.mxu1 (%p26616_p8), %vm4293_vm4, %v11640_v52  ;;  %v11634_v45 = vld [vmem:[%s23316_s2 + $0x10] sm:$0xff] (%p26616_p8)  ;;  %v26937_v42 = vld [vmem:[#allocation2 + $0xd9] sm:$0xff] (%p26616_p8) }
 0x83a   : >> { %v28740_v6 = vmov %v26587_v60  ;;  %v11527_v26 = vadd.f32 %v26483_v12, %v11434_v56  ;;  %v28748_v60 = vld [vmem:[#allocation43_spill] sm:$0xff]  ;;  %v28786_v56 = vmov %v28700_v14  ;;  %11592 = vst.msk [vmem:[#allocation2 + $0x141] sm:$0xff] (%p26616_p8), %vm4293_vm4, %v28738_v47  ;;  %v17267_v14 = vld [vmem:[%s23316_s2 + $0x108] sm:$0xff] (%p26616_p8)  ;;  %28798 = vst [vmem:[#allocation12_spill] sm:$0xff] (%p26616_p8), %v26815_v15  ;;  %v21338_v51 = vpack.c.bf16 (%p26616_p8), %v11635_v24, %v11634_v45 }
 0x83b   : >> { %v26592_v32 = vadd.f32 %v28741_v21, %v11528_v46   ;;  %v28779_v21 = vmov %v28710_v40  ;;  %11591 = vst.msk [vmem:[#allocation2 + $0x139] sm:$0xff] (%p26616_p8), %vm4293_vm4, %v28740_v6  ;;  %v17268_v40 = vld [vmem:[%s23316_s2 + $0x110] sm:$0xff] (%p26616_p8)  ;;  %28797 = vst [vmem:[#allocation24_spill] sm:$0xff] (%p26616_p8), %v26805_v29  ;;  %v17311_v56 = vld [vmem:[%s23316_s2 + $0x168] sm:$0xff] (%p26616_p8) }
 0x83c   : >> { %v26595_v37 = vadd.f32 %v28743_v48, %v11527_v26   ;;  %v20450_v7 = vpop.f32.mrb[28].mxu1  ;;  %v28767_v26 = vmov %v28734_v20  ;;  %v17307_v20 = vld [vmem:[%s23316_s2 + $0x148] sm:$0xff] (%p26616_p8)  ;;  %28801 = vst [vmem:[#allocation26_spill] sm:$0xff] (%p26616_p8), %v26937_v42  ;;  %v26939_v50 = vld [vmem:[#allocation2 + $0x32] sm:$0xff] (%p26616_p8)  ;;  %v17350_v52 = vld [vmem:[%s23316_s2 + $0x1a0] sm:$0xff] (%p26616_p8) }
 0x83d   : >> { %v28742_v25 = vmov %v26592_v32  ;;  %v11530_v61 = vadd.f32 %v20450_v7, %v26483_v12  ;;  %v11444_v3 = vpop.f32.mrb[29].mxu1  ;;  %v28770_v7 = vmov %v28732_v34  ;;  %v11632_v34 = vld [vmem:[%s23316_s2] sm:$0xff] (%p26616_p8)  ;;  %v21398_v11 = vpack.c.bf16 (%p26616_p8), %v17307_v20, %v17306_v18  ;;  %v11637_v21 = vld [vmem:[%s23316_s2 + $0x28] sm:$0xff] (%p26616_p8)  ;;  %v26955_v43 = vld [vmem:[#allocation2 + $0xf1] sm:$0xff] (%p26616_p8) }
 0x83e   : >> { %v28744_v62 = vmov %v26595_v37  ;;  %v11529_v16 = vadd.f32 %v26483_v12, %v11444_v3  ;;  %v28753_v37 = vld [vmem:[#allocation41_spill] sm:$0xff]  ;;  %v28769_v3 = vmov %v28730_v17  ;;  %11594 = vst.msk [vmem:[#allocation2 + $0x159] sm:$0xff] (%p26616_p8), %vm4293_vm4, %v28742_v25  ;;  %v21330_v17 = vpack.c.bf16 (%p26616_p8), %v17121_v59, %v17120_v13  ;;  %v11636_v26 = vld [vmem:[%s23316_s2 + $0x20] sm:$0xff] (%p26616_p8)  ;;  %v17351_v13 = vld [vmem:[%s23316_s2 + $0x1a8] sm:$0xff] (%p26616_p8) }
 0x83f   : >> { %v26600_v46 = vadd.f32 %v28745_v27, %v11530_v61   ;;  %v28778_v27 = vmov %v28716_v49  ;;  %v28790_v61 = vld [vmem:[#allocation9_spill] sm:$0xff]  ;;  %11593 = vst.msk [vmem:[#allocation2 + $0x151] sm:$0xff] (%p26616_p8), %vm4293_vm4, %v28744_v62  ;;  %v21342_v3 = vpack.c.bf16 (%p26616_p8), %v11637_v21, %v11636_v26  ;;  %v26949_v59 = vld [vmem:[#allocation2 + $0xe1] sm:$0xff] (%p26616_p8)  ;;  %28803 = vst [vmem:[#allocation27_spill] sm:$0xff] (%p26616_p8), %v26955_v43 }
 0x840   : >> { %v26603_v48 = vadd.f32 %v28748_v60, %v11529_v16   ;;  %v20453_v22 = vpop.f32.mrb[30].mxu1  ;;  %v28765_v16 = vmov %v28738_v47  ;;  %v28766_v60 = vmov %v28740_v6  ;;  %v13112_v47 = vld [vmem:[#allocation2 + $0x21] sm:$0xff] (%p26616_p8)  ;;  %v26829_v6 = vld [vmem:[#allocation2 + $0x31] sm:$0xff] (%p26616_p8)  ;;  %28802 = vst [vmem:[#allocation14_spill] sm:$0xff] (%p26616_p8), %v26949_v59  ;;  %v26967_v18 = vld [vmem:[#allocation2 + $0xf9] sm:$0xff] (%p26616_p8) }
 0x841   : >> { %28746 = vst [vmem:[#allocation22_spill] sm:$0xff] %v26600_v46  ;;  %v11532_v33 = vadd.f32 %v20453_v22, %v26483_v12  ;;  %v11454_v2 = vpop.f32.mrb[31].mxu1  ;;  %v28760_v57 = vmov %v26600_v46  ;;  %v28781_v22 = vmov %v28706_v8  ;;  %4144 = sbr.rel (!%p26616_p8) target bundleno = 567 (0x237), region = 193  ;;  %v17312_v7 = vld [vmem:[%s23316_s2 + $0x170] sm:$0xff] (%p26616_p8)  ;;  %v17313_v61 = vld [vmem:[%s23316_s2 + $0x178] sm:$0xff] (%p26616_p8)  ;;  %v26856_v60 = vld [vmem:[#allocation2 + $0x61] sm:$0xff] (%p26616_p8) }
 0x842   : >> { %v28749_v39 = vmov %v26603_v48  ;;  %v11531_v32 = vadd.f32 %v26483_v12, %v11454_v2  ;;  %v28761_v46 = vmov %v28760_v57  ;;  %v28780_v2 = vmov %v28712_v58  ;;  %v17114_v12 = vld [vmem:[%s23316_s2 + $0x40] sm:$0xff] (%p26616_p8)  ;;  %v28792_v57 = vld [vmem:[#allocation9_spill] sm:$0xff] (%p26616_p8)  ;;  %v17269_v58 = vld [vmem:[%s23316_s2 + $0x118] sm:$0xff] (%p26616_p8)  ;;  %28804 = vst [vmem:[#allocation15_spill] sm:$0xff] (%p26616_p8), %v26967_v18 }
 0x843   : >> { %v26608_v63 = vadd.f32 %v28750_v9, %v11532_v33   ;;  %v28762_v48 = vmov %v28749_v39  ;;  %v28775_v33 = vmov %v28718_v41  ;;  %v28783_v9 = vmov %v28702_v36  ;;  %11567 = vst.msk [vmem:[#allocation2 + $0x19] sm:$0xff] (%p26616_p8), %vm4293_vm4, %v28792_v57  ;;  %11595 = vst.msk [vmem:[#allocation2 + $0x169] sm:$0xff] (%p26616_p8), %vm4293_vm4, %v28749_v39  ;;  %v17116_v36 = vld [vmem:[%s23316_s2 + $0x50] sm:$0xff] (%p26616_p8)  ;;  %v17119_v41 = vld [vmem:[%s23316_s2 + $0x68] sm:$0xff] (%p26616_p8) }
 0x844   : >> { %v26611_v0 = vadd.f32 %v28753_v37, %v11531_v32   ;;  %v28763_v32 = vmov %v28742_v25  ;;  %v28764_v37 = vmov %v28744_v62  ;;  %v21322_v31 = vpack.c.bf16 (%p26616_p8), %v17117_v28, %v17116_v36  ;;  %v17310_v46 = vld [vmem:[%s23316_s2 + $0x160] sm:$0xff] (%p26616_p8)  ;;  %v26841_v48 = vld [vmem:[#allocation2 + $0x49] sm:$0xff] (%p26616_p8)  ;;  %v11639_v27 = vld [vmem:[%s23316_s2 + $0x38] sm:$0xff] (%p26616_p8) }
 0x845   : >> { %28751 = vst [vmem:[#allocation10_spill] sm:$0xff] %v26608_v63  ;;  %v28752_v19 = vmov %v26608_v63  ;;  %v26797_v49 = vpack.c.bf16 (%p26616_p8), %v17269_v58, %v17268_v40  ;;  %v26837_v25 = vld [vmem:[#allocation2 + $0x39] sm:$0xff] (%p26616_p8)  ;;  %v21406_v62 = vpack.c.bf16 (%p26616_p8), %v17311_v56, %v17310_v46  ;;  %v11638_v16 = vld [vmem:[%s23316_s2 + $0x30] sm:$0xff] (%p26616_p8)  ;;  %v21410_v39 = vpack.c.bf16 (%p26616_p8), %v17313_v61, %v17312_v7  ;;  %v17347_v33 = vld [vmem:[%s23316_s2 + $0x188] sm:$0xff] (%p26616_p8) }
 0x846   : >> { %28754 = vst [vmem:[#allocation23_spill] sm:$0xff] %v26611_v0  ;;  %v28757_v63 = vmov %v28752_v19  ;;  %v28758_v53 = vmov %v26611_v0  ;;  %v17115_v19 = vld [vmem:[%s23316_s2 + $0x48] sm:$0xff] (%p26616_p8)  ;;  %v26854_v57 = vld [vmem:[#allocation2 + $0x51] sm:$0xff] (%p26616_p8)  ;;  %v17346_v22 = vld [vmem:[%s23316_s2 + $0x180] sm:$0xff] (%p26616_p8)  ;;  %v21346_v2 = vpack.c.bf16 (%p26616_p8), %v11639_v27, %v11638_v16 }
 0x847   : >> { %v28759_v0 = vmov %v28758_v53  ;;  %v17266_v53 = vld [vmem:[%s23316_s2 + $0x100] sm:$0xff] (%p26616_p8)  ;;  %v21318_v44 = vpack.c.bf16 (%p26616_p8), %v17115_v19, %v17114_v12  ;;  %28796 = vst [vmem:[#allocation11_spill] sm:$0xff] (%p26616_p8), %v26797_v49  ;;  %v11633_v63 = vld [vmem:[%s23316_s2 + $0x8] sm:$0xff] (%p26616_p8)  ;;  %v21414_v12 = vpack.c.bf16 (%p26616_p8), %v17347_v33, %v17346_v22  ;;  %v26909_v36 = vld [vmem:[#allocation2 + $0xb1] sm:$0xff] (%p26616_p8) }
 0x848   : > { %v28793_v55 = vld [vmem:[#allocation22_spill] sm:$0xff]  ;;  %v26792_v8 = vpack.c.bf16 %v17267_v14, %v17266_v53  ;;  %v21326_v53 = vpack.c.bf16 %v17119_v41, %v17118_v30  ;;  %v21334_v54 = vpack.c.bf16 %v11633_v63, %v11632_v34  ;;  %v26868_v32 = vld [vmem:[#allocation2 + $0x69] sm:$0xff]  ;;  %v17186_v9 = vld [vmem:[%s23316_s2 + $0x80] sm:$0xff]  ;;  %vm15251_vm5 = vcmask (!%p15871_p7), 15360  }
 0x849   : > { %11596 = vst.msk [vmem:[#allocation2 + $0x171] sm:$0xff] %vm4293_vm4, %v28793_v55  ;;  %21319 = vmatprep.subr.bf16.mxu1 %v21318_v44  ;;  %v17309_v0 = vld [vmem:[%s23316_s2 + $0x158] sm:$0xff]  ;;  %v17187_v19 = vld [vmem:[%s23316_s2 + $0x88] sm:$0xff]  ;;  %v17348_v58 = vld [vmem:[%s23316_s2 + $0x190] sm:$0xff] }
 0x84a   : > { %21383 = vmatprep.subr.bf16.mxu0 %v26792_v8  ;;  %21321 = vmatpush3.bf16.msra.mxu1 %v21318_v44  ;;  %v13111_v23 = vld [vmem:[#allocation2 + $0x19] sm:$0xff]  ;;  %v21402_v5 = vpack.c.bf16 %v17309_v0, %v17308_v4  ;;  %v26876_v55 = vpack.c.bf16 %v17187_v19, %v17186_v9  ;;  %v26899_v14 = vld [vmem:[#allocation2 + $0xa9] sm:$0xff]  ;;  %v26911_v28 = vld [vmem:[#allocation2 + $0xc1] sm:$0xff] }
 0x84b   : > { %21385 = vmatpush3.bf16.msra.mxu0 %v26792_v8  ;;  %21323 = vmatprep.subr.bf16.mxu1 %v21322_v31  ;;  %v26872_v37 = vld [vmem:[#allocation2 + $0x79] sm:$0xff]  ;;  %28799 = vst [vmem:[#allocation25_spill] sm:$0xff] %v26911_v28  ;;  %v26935_v41 = vld [vmem:[#allocation2 + $0x22] sm:$0xff]  ;;  %v17352_v34 = vld [vmem:[%s23316_s2 + $0x1b0] sm:$0xff] }
 0x84c   : > { %v28795_v38 = vld [vmem:[#allocation10_spill] sm:$0xff]  ;;  %21387 = vmatprep.subr.bf16.mxu0 %v26797_v49  ;;  %20726 = vmatprep.mubr.msk.f32.mxu0 %vm4293_vm4, %v13111_v23  ;;  %v17386_v0 = vld [vmem:[%s23316_s2 + $0x1c0] sm:$0xff]  ;;  %v26989_v24 = vld [vmem:[#allocation2 + $0x6a] sm:$0xff] }
 0x84d   : > { %v28794_v1 = vld [vmem:[#allocation23_spill] sm:$0xff]  ;;  %11598 = vst.msk [vmem:[#allocation2 + $0x189] sm:$0xff] %vm4293_vm4, %v28795_v38  ;;  %v26886_v38 = vld [vmem:[#allocation2 + $0x91] sm:$0xff]  ;;  %v27003_v46 = vld [vmem:[#allocation2 + $0x129] sm:$0xff] }
 0x84e   : > { %11597 = vst.msk [vmem:[#allocation2 + $0x181] sm:$0xff] %vm4293_vm4, %v28794_v1  ;;  %21325 = vmatpush3.bf16.msra.mxu1 %v21322_v31  ;;  %v26884_v1 = vld [vmem:[#allocation2 + $0x81] sm:$0xff]  ;;  %v26897_v44 = vld [vmem:[#allocation2 + $0x99] sm:$0xff]  ;;  %v26921_v31 = vld [vmem:[#allocation2 + $0xc9] sm:$0xff] }
 0x84f   : > { %21389 = vmatpush3.bf16.msra.mxu0 %v26797_v49  ;;  %21327 = vmatprep.subr.bf16.mxu1 %v21326_v53  ;;  %28800 = vst [vmem:[#allocation13_spill] sm:$0xff] %v26921_v31  ;;  %v26923_v40 = vld [vmem:[#allocation2 + $0x1a] sm:$0xff]  ;;  %v26971_v20 = vld [vmem:[#allocation2 + $0x52] sm:$0xff]  ;;  %28808 = vst [vmem:[#allocation17_spill] sm:$0xff] %v27003_v46 }
 0x850   : > { %21391 = vmatprep.subr.bf16.mxu0 %v26805_v29  ;;  %v17349_v30 = vld [vmem:[%s23316_s2 + $0x198] sm:$0xff]  ;;  %v27007_v56 = vld [vmem:[#allocation2 + $0x82] sm:$0xff] }
 0x851   : > { %v26953_v10 = vld [vmem:[#allocation2 + $0x3a] sm:$0xff]  ;;  %v26985_v45 = vld [vmem:[#allocation2 + $0x111] sm:$0xff]  ;;  %v27044_v22 = vld [vmem:[#allocation2 + $0xc2] sm:$0xff] }
 0x852   : > { %21329 = vmatpush3.bf16.msra.mxu1 %v21326_v53  ;;  %v21418_v53 = vpack.c.bf16 %v17349_v30, %v17348_v58  ;;  %v17353_v63 = vld [vmem:[%s23316_s2 + $0x1b8] sm:$0xff]  ;;  %28806 = vst [vmem:[#allocation16_spill] sm:$0xff] %v26985_v45  ;;  %v11600_v9 = vld [vmem:[#allocation2] sm:$0xff]  ;;  %v11601_v30 = vld [vmem:[#allocation2 + $0x8] sm:$0xff] }
 0x853   : > { %21393 = vmatpush3.bf16.msra.mxu0 %v26805_v29  ;;  %21331 = vmatprep.subr.bf16.mxu1 %v21330_v17  ;;  %v21426_v4 = vpack.c.bf16 %v17353_v63, %v17352_v34  ;;  %v27009_v26 = vld [vmem:[#allocation2 + $0x139] sm:$0xff]  ;;  %v27026_v61 = vld [vmem:[#allocation2 + $0x151] sm:$0xff]  ;;  %v17191_v63 = vld [vmem:[%s23316_s2 + $0xa8] sm:$0xff] }
 0x854   : > { %21395 = vmatprep.subr.bf16.mxu0 %v26815_v15  ;;  %28809 = vst [vmem:[#allocation30_spill] sm:$0xff] %v27009_v26  ;;  %v27011_v21 = vld [vmem:[#allocation2 + $0x92] sm:$0xff]  ;;  %v27024_v7 = vld [vmem:[#allocation2 + $0x9a] sm:$0xff]  ;;  %28811 = vst [vmem:[#allocation31_spill] sm:$0xff] %v27026_v61 }
 0x855   : > { %v27036_v16 = vld [vmem:[#allocation2 + $0x159] sm:$0xff]  ;;  %v27052_v33 = vld [vmem:[#allocation2 + $0x171] sm:$0xff] }
 0x856   : > { %21333 = vmatpush3.bf16.msra.mxu1 %v21330_v17  ;;  %v21422_v17 = vpack.c.bf16 %v17351_v13, %v17350_v52  ;;  %28812 = vst [vmem:[#allocation19_spill] sm:$0xff] %v27036_v16  ;;  %v27040_v27 = vld [vmem:[#allocation2 + $0xb2] sm:$0xff]  ;;  %28814 = vst [vmem:[#allocation33_spill] sm:$0xff] %v27052_v33  ;;  %v27058_v19 = vld [vmem:[#allocation2 + $0xda] sm:$0xff] }
 0x857   : > { %21397 = vmatpush3.bf16.msra.mxu0 %v26815_v15  ;;  %21335 = vmatprep.subr.bf16.mxu1 %v21334_v54  ;;  %v17189_v58 = vld [vmem:[%s23316_s2 + $0x98] sm:$0xff]  ;;  %v17190_v34 = vld [vmem:[%s23316_s2 + $0xa0] sm:$0xff] }
 0x858   : > { %21399 = vmatprep.subr.bf16.mxu0 %v21398_v11  ;;  %v27071_v52 = vld [vmem:[#allocation2 + $0x18] sm:$0xff]  ;;  %v27125_v15 = vld [vmem:[#allocation2 + $0x60] sm:$0xff] }
 0x859   : > { %20471 = vmatmul.mubr.msk.f32.vlgmr.msra.gmra.mrb[0].mxu1 %vm4293_vm4, %v11641_v35  ;;  %v17387_v35 = vld [vmem:[%s23316_s2 + $0x1c8] sm:$0xff]  ;;  %28815 = vst [vmem:[#allocation21_spill] sm:$0xff] %v27071_v52  ;;  %v27073_v13 = vld [vmem:[#allocation2 + $0xf2] sm:$0xff]  ;;  %28821 = vst [vmem:[#allocation36_spill] sm:$0xff] %v27125_v15 }
 0x85a   : > { %20727 = vmatmul.mubr.msk.f32.vlgmr.msra.gmra.mrb[0].mxu0 %vm4293_vm4, %v13112_v47  ;;  %21337 = vmatpush3.bf16.msra.mxu1 %v21334_v54  ;;  %v26973_v54 = vld [vmem:[#allocation2 + $0x109] sm:$0xff]  ;;  %v27158_v29 = vld [vmem:[#allocation2 + $0x15a] sm:$0xff]  ;;  %v27174_v49 = vld [vmem:[#allocation2 + $0x172] sm:$0xff] }
 0x85b   : > { %21401 = vmatpush3.bf16.msra.mxu0 %v21398_v11  ;;  %20473 = vmatprep.mubr.msk.f32.mxu1 %vm4293_vm4, %v13111_v23  ;;  %v26957_v23 = vld [vmem:[#allocation2 + $0x4a] sm:$0xff]  ;;  %28805 = vst [vmem:[#allocation28_spill] sm:$0xff] %v26973_v54  ;;  %v26975_v11 = vld [vmem:[#allocation2 + $0x62] sm:$0xff]  ;;  %28823 = vst [vmem:[#allocation9_spill] sm:$0xff] %v27158_v29 }
 0x85c   : > { %20729 = vmatprep.mubr.msk.f32.mxu0 %vm4293_vm4, %v26829_v6  ;;  %21403 = vmatprep.subr.bf16.mxu0 %v21402_v5  ;;  %28827 = vst [vmem:[#allocation108_spill] sm:$0xff] %v27174_v49 }
 0x85d   : > { %20474 = vmatmul.mubr.msk.f32.gmra.mrb[2].mxu1 %vm4293_vm4, %v13112_v47  ;;  %21339 = vmatprep.subr.bf16.mxu1 %v21338_v51  ;;  %v26991_v47 = vld [vmem:[#allocation2 + $0x121] sm:$0xff] }
 0x85e   : > { %20730 = vmatmul.mubr.msk.f32.gmra.mrb[2].mxu0 %vm4293_vm4, %v26837_v25  ;;  %20476 = vmatprep.mubr.msk.f32.mxu1 %vm4293_vm4, %v26829_v6  ;;  %28807 = vst [vmem:[#allocation29_spill] sm:$0xff] %v26991_v47 }
 0x85f   : > { %20732 = vmatprep.mubr.msk.f32.mxu0 %vm4293_vm4, %v26841_v48  ;;  %21405 = vmatpush3.bf16.msra.mxu0 %v21402_v5  ;;  %v26993_v5 = vld [vmem:[#allocation2 + $0x7a] sm:$0xff] }
 0x860   : > { %21407 = vmatprep.subr.bf16.mxu0 %v21406_v62  ;;  %21341 = vmatpush3.bf16.msra.mxu1 %v21338_v51  ;;  %v26995_v51 = vpack.c.bf16 %v17387_v35, %v17386_v0  ;;  %v27087_v0 = vld [vmem:[#allocation2 + $0xfa] sm:$0xff]  ;;  %v27089_v35 = vld [vmem:[#allocation2 + $0x30] sm:$0xff] }
 0x861   : > { %20477 = vmatmul.mubr.msk.f32.gmra.mrb[4].mxu1 %vm4293_vm4, %v26837_v25  ;;  %21343 = vmatprep.subr.bf16.mxu1 %v21342_v3  ;;  %28817 = vst [vmem:[#allocation37_spill] sm:$0xff] %v27089_v35 }
 0x862   : > { %20733 = vmatmul.mubr.msk.f32.gmra.mrb[4].mxu0 %vm4293_vm4, %v26854_v57  ;;  %20479 = vmatprep.mubr.msk.f32.mxu1 %vm4293_vm4, %v26841_v48 }
 0x863   : > { %20735 = vmatprep.mubr.msk.f32.mxu0 %vm4293_vm4, %v26856_v60  ;;  %21409 = vmatpush3.bf16.msra.mxu0 %v21406_v62  ;;  %v27020_v62 = vld [vmem:[#allocation2 + $0x141] sm:$0xff] }
 0x864   : > { %21411 = vmatprep.subr.bf16.mxu0 %v21410_v39  ;;  %21345 = vmatpush3.bf16.msra.mxu1 %v21342_v3  ;;  %28810 = vst [vmem:[#allocation18_spill] sm:$0xff] %v27020_v62  ;;  %v27028_v3 = vld [vmem:[#allocation2 + $0xaa] sm:$0xff] }
 0x865   : > { %20480 = vmatmul.mubr.msk.f32.gmra.mrb[6].mxu1 %vm4293_vm4, %v26854_v57  ;;  %21347 = vmatprep.subr.bf16.mxu1 %v21346_v2 }
 0x866   : > { %20736 = vmatmul.mubr.msk.f32.gmra.mrb[6].mxu0 %vm4293_vm4, %v26868_v32  ;;  %20482 = vmatprep.mubr.msk.f32.mxu1 %vm4293_vm4, %v26856_v60 }
 0x867   : > { %20738 = vmatprep.mubr.msk.f32.mxu0 %vm4293_vm4, %v26872_v37  ;;  %21413 = vmatpush3.bf16.msra.mxu0 %v21410_v39  ;;  %v27042_v39 = vld [vmem:[#allocation2 + $0x169] sm:$0xff] }
 0x868   : > { %21415 = vmatprep.subr.bf16.mxu0 %v21414_v12  ;;  %21349 = vmatpush3.bf16.msra.mxu1 %v21346_v2  ;;  %28813 = vst [vmem:[#allocation32_spill] sm:$0xff] %v27042_v39  ;;  %v27056_v2 = vld [vmem:[#allocation2 + $0xca] sm:$0xff] }
 0x869   : > { %20483 = vmatmul.mubr.msk.f32.gmra.mrb[8].mxu1 %vm4293_vm4, %v26868_v32  ;;  %21351 = vmatprep.subr.bf16.mxu1 %v26876_v55 }
 0x86a   : > { %20739 = vmatmul.mubr.msk.f32.gmra.mrb[8].mxu0 %vm4293_vm4, %v26884_v1  ;;  %20485 = vmatprep.mubr.msk.f32.mxu1 %vm4293_vm4, %v26872_v37 }
 0x86b   : > { %20741 = vmatprep.mubr.msk.f32.mxu0 %vm4293_vm4, %v26886_v38 }
 0x86d   : > { %20486 = vmatmul.mubr.msk.f32.gmra.mrb[10].mxu1 %vm4293_vm4, %v26884_v1 }
 0x86e   : > { %20742 = vmatmul.mubr.msk.f32.gmra.mrb[10].mxu0 %vm4293_vm4, %v26897_v44  ;;  %20488 = vmatprep.mubr.msk.f32.mxu1 %vm4293_vm4, %v26886_v38 }
 0x86f   : > { %20744 = vmatprep.mubr.msk.f32.mxu0 %vm4293_vm4, %v26899_v14 }
 0x871   : > { %20489 = vmatmul.mubr.msk.f32.gmra.mrb[12].mxu1 %vm4293_vm4, %v26897_v44 }
 0x872   : > { %20745 = vmatmul.mubr.msk.f32.gmra.mrb[12].mxu0 %vm4293_vm4, %v26909_v36  ;;  %20491 = vmatprep.mubr.msk.f32.mxu1 %vm4293_vm4, %v26899_v14 }
 0x873   : > { %20747 = vmatprep.mubr.msk.f32.mxu0 %vm4293_vm4, %v26911_v28 }
 0x875   : > { %20492 = vmatmul.mubr.msk.f32.gmra.mrb[14].mxu1 %vm4293_vm4, %v26909_v36 }
 0x876   : > { %20748 = vmatmul.mubr.msk.f32.gmra.mrb[14].mxu0 %vm4293_vm4, %v26921_v31  ;;  %20494 = vmatprep.mubr.msk.f32.mxu1 %vm4293_vm4, %v26911_v28  ;;  %v17427_v28 = vld [vmem:[%s23316_s2 + $0x208] sm:$0xff] }
 0x877   : > { %20790 = vmatprep.mubr.msk.f32.mxu0 %vm4293_vm4, %v26923_v40 }
 0x879   : > { %20495 = vmatmul.mubr.msk.f32.gmra.mrb[16].mxu1 %vm4293_vm4, %v26921_v31  ;;  %v17390_v31 = vld [vmem:[%s23316_s2 + $0x1e0] sm:$0xff] }
 0x87a   : > { %20791 = vmatmul.mubr.msk.f32.vlgmr.msra.gmra.mrb[0].mxu0 %vm4293_vm4, %v26935_v41  ;;  %20497 = vmatprep.mubr.msk.f32.mxu1 %vm4293_vm4, %v26937_v42  ;;  %v17389_v42 = vld [vmem:[%s23316_s2 + $0x1d8] sm:$0xff] }
 0x87b   : > { %21417 = vmatpush3.bf16.msra.mxu0 %v21414_v12  ;;  %20793 = vmatprep.mubr.msk.f32.mxu0 %vm4293_vm4, %v26939_v50  ;;  %v17188_v12 = vld [vmem:[%s23316_s2 + $0x90] sm:$0xff] }
 0x87c   : > { %21419 = vmatprep.subr.bf16.mxu0 %v21418_v53 }
 0x87d   : > { %20498 = vmatmul.mubr.msk.f32.gmra.mrb[18].mxu1 %vm4293_vm4, %v26949_v59  ;;  %v17388_v59 = vld [vmem:[%s23316_s2 + $0x1d0] sm:$0xff] }
 0x87e   : > { %20794 = vmatmul.mubr.msk.f32.gmra.mrb[2].mxu0 %vm4293_vm4, %v26953_v10  ;;  %20500 = vmatprep.mubr.msk.f32.mxu1 %vm4293_vm4, %v26955_v43  ;;  %v27190_v43 = vld [vmem:[#allocation2 + $0x18a] sm:$0xff] }
 0x87f   : > { %20796 = vmatprep.mubr.msk.f32.mxu0 %vm4293_vm4, %v26957_v23  ;;  %21421 = vmatpush3.bf16.msra.mxu0 %v21418_v53  ;;  %v27069_v53 = vld [vmem:[#allocation2 + $0xe2] sm:$0xff]  ;;  %28831 = vst [vmem:[#allocation112_spill] sm:$0xff] %v27190_v43 }
 0x880   : > { %21423 = vmatprep.subr.bf16.mxu0 %v21422_v17 }
 0x881   : > { %20501 = vmatmul.mubr.msk.f32.gmra.mrb[20].mxu1 %vm4293_vm4, %v26967_v18  ;;  %v27178_v18 = vld [vmem:[#allocation2 + $0x182] sm:$0xff] }
 0x882   : > { %20797 = vmatmul.mubr.msk.f32.gmra.mrb[4].mxu0 %vm4293_vm4, %v26971_v20  ;;  %20503 = vmatprep.mubr.msk.f32.mxu1 %vm4293_vm4, %v26973_v54  ;;  %v27176_v54 = vld [vmem:[#allocation2 + $0xa8] sm:$0xff]  ;;  %28829 = vst [vmem:[#allocation110_spill] sm:$0xff] %v27178_v18 }
 0x883   : > { %20799 = vmatprep.mubr.msk.f32.mxu0 %vm4293_vm4, %v26975_v11  ;;  %21425 = vmatpush3.bf16.msra.mxu0 %v21422_v17  ;;  %v21354_v17 = vpack.c.bf16 %v17189_v58, %v17188_v12  ;;  %v21358_v12 = vpack.c.bf16 %v17191_v63, %v17190_v34  ;;  %v17193_v58 = vld [vmem:[%s23316_s2 + $0xb8] sm:$0xff]  ;;  %v27107_v34 = vld [vmem:[#allocation2 + $0x48] sm:$0xff]  ;;  %28828 = vst [vmem:[#allocation109_spill] sm:$0xff] %v27176_v54 }
 0x884   : > { %21427 = vmatprep.subr.bf16.mxu0 %v21426_v4  ;;  %28819 = vst [vmem:[#allocation34_spill] sm:$0xff] %v27107_v34  ;;  %v27109_v63 = vld [vmem:[#allocation2 + $0x122] sm:$0xff] }
 0x885   : > { %20504 = vmatmul.mubr.msk.f32.gmra.mrb[22].mxu1 %vm4293_vm4, %v26985_v45  ;;  %v27170_v45 = vld [vmem:[#allocation2 + $0x98] sm:$0xff] }
 0x886   : > { %20800 = vmatmul.mubr.msk.f32.gmra.mrb[6].mxu0 %vm4293_vm4, %v26989_v24  ;;  %20506 = vmatprep.mubr.msk.f32.mxu1 %vm4293_vm4, %v26991_v47  ;;  %v27162_v47 = vld [vmem:[#allocation2 + $0x16a] sm:$0xff]  ;;  %28826 = vst [vmem:[#allocation10_spill] sm:$0xff] %v27170_v45 }
 0x887   : > { %20802 = vmatprep.mubr.msk.f32.mxu0 %vm4293_vm4, %v26993_v5  ;;  %21429 = vmatpush3.bf16.msra.mxu0 %v21426_v4  ;;  %v27081_v4 = vld [vmem:[#allocation2 + $0x20] sm:$0xff]  ;;  %28825 = vst [vmem:[#allocation23_spill] sm:$0xff] %v27162_v47 }
 0x888   : > { %21431 = vmatprep.subr.bf16.mxu0 %v26995_v51  ;;  %28816 = vst [vmem:[#allocation35_spill] sm:$0xff] %v27081_v4 }
 0x889   : > { %20507 = vmatmul.mubr.msk.f32.gmra.mrb[24].mxu1 %vm4293_vm4, %v27003_v46  ;;  %v27143_v46 = vld [vmem:[#allocation2 + $0x78] sm:$0xff] }
 0x88a   : > { %20803 = vmatmul.mubr.msk.f32.gmra.mrb[8].mxu0 %vm4293_vm4, %v27007_v56  ;;  %20509 = vmatprep.mubr.msk.f32.mxu1 %vm4293_vm4, %v27009_v26  ;;  %v27137_v26 = vld [vmem:[#allocation2 + $0x68] sm:$0xff] }
 0x88b   : > { %20805 = vmatprep.mubr.msk.f32.mxu0 %vm4293_vm4, %v27011_v21 }
 0x88d   : > { %20510 = vmatmul.mubr.msk.f32.gmra.mrb[26].mxu1 %vm4293_vm4, %v27020_v62  ;;  %v27119_v62 = vld [vmem:[#allocation2 + $0x50] sm:$0xff] }
 0x88e   : > { %20806 = vmatmul.mubr.msk.f32.gmra.mrb[10].mxu0 %vm4293_vm4, %v27024_v7  ;;  %20512 = vmatprep.mubr.msk.f32.mxu1 %vm4293_vm4, %v27026_v61  ;;  %v17227_v61 = vld [vmem:[%s23316_s2 + $0xc8] sm:$0xff]  ;;  %28820 = vst [vmem:[#allocation20_spill] sm:$0xff] %v27119_v62 }
 0x88f   : > { %20808 = vmatprep.mubr.msk.f32.mxu0 %vm4293_vm4, %v27028_v3 }
 0x891   : > { %20513 = vmatmul.mubr.msk.f32.gmra.mrb[28].mxu1 %vm4293_vm4, %v27036_v16  ;;  %v17226_v16 = vld [vmem:[%s23316_s2 + $0xc0] sm:$0xff] }
 0x892   : > { %20809 = vmatmul.mubr.msk.f32.gmra.mrb[12].mxu0 %vm4293_vm4, %v27040_v27  ;;  %20515 = vmatprep.mubr.msk.f32.mxu1 %vm4293_vm4, %v27042_v39 }
 0x893   : > { %20811 = vmatprep.mubr.msk.f32.mxu0 %vm4293_vm4, %v27044_v22 }
 0x895   : > { %20516 = vmatmul.mubr.msk.f32.gmra.mrb[30].mxu1 %vm4293_vm4, %v27052_v33  ;;  %v27105_v33 = vld [vmem:[#allocation2 + $0x112] sm:$0xff] }
 0x896   : > { %20812 = vmatmul.mubr.msk.f32.gmra.mrb[14].mxu0 %vm4293_vm4, %v27056_v2  ;;  %20534 = vmatprep.mubr.msk.f32.mxu1 %vm4293_vm4, %v11600_v9  ;;  %v27091_v9 = vld [vmem:[#allocation2 + $0x10a] sm:$0xff] }
 0x897   : > { %20814 = vmatprep.mubr.msk.f32.mxu0 %vm4293_vm4, %v27058_v19 }
 0x899   : > { %20535 = vmatmul.mubr.msk.f32.vlgmr.msra.gmra.mrb[0].mxu1 %vm4293_vm4, %v11601_v30  ;;  %v27101_v30 = vld [vmem:[#allocation2 + $0x38] sm:$0xff] }
 0x89a   : > { %20815 = vmatmul.mubr.msk.f32.gmra.mrb[16].mxu0 %vm4293_vm4, %v27069_v53  ;;  %21353 = vmatpush3.bf16.msra.mxu1 %v26876_v55  ;;  %v17192_v55 = vld [vmem:[%s23316_s2 + $0xb0] sm:$0xff]  ;;  %28818 = vst [vmem:[#allocation39_spill] sm:$0xff] %v27101_v30 }
 0x89b   : > { %20537 = vmatprep.mubr.msk.f32.mxu1 %vm4293_vm4, %v27071_v52  ;;  %20817 = vmatprep.mubr.msk.f32.mxu0 %vm4293_vm4, %v27073_v13  ;;  %v21362_v39 = vpack.c.bf16 %v17193_v58, %v17192_v55  ;;  %v27127_v55 = vld [vmem:[#allocation2 + $0x13a] sm:$0xff]  ;;  %v27129_v58 = vpack.c.bf16 %v17227_v61, %v17226_v16  ;;  %v27145_v61 = vld [vmem:[#allocation2 + $0x152] sm:$0xff] }
 0x89c   : > { %21355 = vmatprep.subr.bf16.mxu1 %v21354_v17  ;;  %v27154_v16 = vld [vmem:[#allocation2 + $0x80] sm:$0xff] }
 0x89d   : > { %20538 = vmatmul.mubr.msk.f32.gmra.mrb[2].mxu1 %vm4293_vm4, %v27081_v4  ;;  %28822 = vst [vmem:[#allocation38_spill] sm:$0xff] %v27154_v16  ;;  %v27186_v4 = vld [vmem:[#allocation2 + $0xb0] sm:$0xff]  ;;  %v27192_v52 = vld [vmem:[#allocation2 + $0xc0] sm:$0xff] }
 0x89e   : > { %20818 = vmatmul.mubr.msk.f32.gmra.mrb[18].mxu0 %vm4293_vm4, %v27087_v0  ;;  %20540 = vmatprep.mubr.msk.f32.mxu1 %vm4293_vm4, %v27089_v35  ;;  %28830 = vst [vmem:[#allocation111_spill] sm:$0xff] %v27186_v4  ;;  %28832 = vst [vmem:[#allocation113_spill] sm:$0xff] %v27192_v52 }
 0x89f   : > { %20820 = vmatprep.mubr.msk.f32.mxu0 %vm4293_vm4, %v27091_v9  ;;  %21357 = vmatpush3.bf16.msra.mxu1 %v21354_v17  ;;  %v27123_v17 = vld [vmem:[#allocation2 + $0x12a] sm:$0xff] }
 0x8a0   : > { %21359 = vmatprep.subr.bf16.mxu1 %v21358_v12 }
 0x8a1   : > { %20541 = vmatmul.mubr.msk.f32.gmra.mrb[4].mxu1 %vm4293_vm4, %v27101_v30 }
 0x8a2   : > { %20821 = vmatmul.mubr.msk.f32.gmra.mrb[20].mxu0 %vm4293_vm4, %v27105_v33  ;;  %20543 = vmatprep.mubr.msk.f32.mxu1 %vm4293_vm4, %v27107_v34 }
 0x8a3   : > { %20823 = vmatprep.mubr.msk.f32.mxu0 %vm4293_vm4, %v27109_v63  ;;  %21361 = vmatpush3.bf16.msra.mxu1 %v21358_v12  ;;  %v27141_v12 = vld [vmem:[#allocation2 + $0x142] sm:$0xff] }
 0x8a4   : > { %21363 = vmatprep.subr.bf16.mxu1 %v21362_v39 }
 0x8a5   : > { %20544 = vmatmul.mubr.msk.f32.gmra.mrb[6].mxu1 %vm4293_vm4, %v27119_v62 }
 0x8a6   : > { %20824 = vmatmul.mubr.msk.f32.gmra.mrb[22].mxu0 %vm4293_vm4, %v27123_v17  ;;  %20546 = vmatprep.mubr.msk.f32.mxu1 %vm4293_vm4, %v27125_v15 }
 0x8a7   : > { %20826 = vmatprep.mubr.msk.f32.mxu0 %vm4293_vm4, %v27127_v55  ;;  %21365 = vmatpush3.bf16.msra.mxu1 %v21362_v39  ;;  %v27160_v39 = vld [vmem:[#allocation2 + $0x90] sm:$0xff] }
 0x8a8   : > { %21367 = vmatprep.subr.bf16.mxu1 %v27129_v58  ;;  %28824 = vst [vmem:[#allocation22_spill] sm:$0xff] %v27160_v39 }
 0x8a9   : > { %20547 = vmatmul.mubr.msk.f32.gmra.mrb[8].mxu1 %vm4293_vm4, %v27137_v26 }
 0x8aa   : > { %20827 = vmatmul.mubr.msk.f32.gmra.mrb[24].mxu0 %vm4293_vm4, %v27141_v12  ;;  %20549 = vmatprep.mubr.msk.f32.mxu1 %vm4293_vm4, %v27143_v46 }
 0x8ab   : > { %20829 = vmatprep.mubr.msk.f32.mxu0 %vm4293_vm4, %v27145_v61 }
 0x8ad   : > { %20550 = vmatmul.mubr.msk.f32.gmra.mrb[10].mxu1 %vm4293_vm4, %v27154_v16 }
 0x8ae   : > { %20830 = vmatmul.mubr.msk.f32.gmra.mrb[26].mxu0 %vm4293_vm4, %v27158_v29  ;;  %20552 = vmatprep.mubr.msk.f32.mxu1 %vm4293_vm4, %v27160_v39  ;;  %v17391_v29 = vld [vmem:[%s23316_s2 + $0x1e8] sm:$0xff] }
 0x8af   : > { %20832 = vmatprep.mubr.msk.f32.mxu0 %vm4293_vm4, %v27162_v47  ;;  %v21434_v47 = vpack.c.bf16 %v17389_v42, %v17388_v59  ;;  %v27221_v42 = vld [vmem:[#allocation2 + $0xf0] sm:$0xff]  ;;  %v21438_v59 = vpack.c.bf16 %v17391_v29, %v17390_v31  ;;  %v17426_v31 = vld [vmem:[%s23316_s2 + $0x200] sm:$0xff] }
 0x8b1   : > { %20553 = vmatmul.mubr.msk.f32.gmra.mrb[12].mxu1 %vm4293_vm4, %v27170_v45 }
 0x8b2   : > { %20833 = vmatmul.mubr.msk.f32.gmra.mrb[28].mxu0 %vm4293_vm4, %v27174_v49  ;;  %20555 = vmatprep.mubr.msk.f32.mxu1 %vm4293_vm4, %v27176_v54  ;;  %v27202_v49 = vld [vmem:[#allocation2 + $0xc8] sm:$0xff] }
 0x8b3   : > { %20835 = vmatprep.mubr.msk.f32.mxu0 %vm4293_vm4, %v27178_v18  ;;  %28833 = vst [vmem:[#allocation114_spill] sm:$0xff] %v27202_v49  ;;  %v27206_v18 = vld [vmem:[#allocation2 + $0xd8] sm:$0xff] }
 0x8b4   : > { %28834 = vst [vmem:[#allocation115_spill] sm:$0xff] %v27206_v18 }
 0x8b5   : > { %20556 = vmatmul.mubr.msk.f32.gmra.mrb[14].mxu1 %vm4293_vm4, %v27186_v4 }
 0x8b6   : > { %20836 = vmatmul.mubr.msk.f32.gmra.mrb[30].mxu0 %vm4293_vm4, %v27190_v43  ;;  %20558 = vmatprep.mubr.msk.f32.mxu1 %vm4293_vm4, %v27192_v52  ;;  %v27216_v43 = vld [vmem:[#allocation2 + $0xe0] sm:$0xff] }
 0x8b7   : > { %20854 = vmatprep.mubr.msk.f32.mxu0 %vm4293_vm4, %v27089_v35  ;;  %v17393_v35 = vld [vmem:[%s23316_s2 + $0x1f8] sm:$0xff] }
 0x8b9   : > { %20559 = vmatmul.mubr.msk.f32.gmra.mrb[16].mxu1 %vm4293_vm4, %v27202_v49 }
 0x8ba   : > { %20855 = vmatmul.mubr.msk.f32.vlgmr.msra.gmra.mrb[0].mxu0 %vm4293_vm4, %v27101_v30  ;;  %20561 = vmatprep.mubr.msk.f32.mxu1 %vm4293_vm4, %v27206_v18  ;;  %v17392_v30 = vld [vmem:[%s23316_s2 + $0x1f0] sm:$0xff] }
 0x8bb   : > { %21433 = vmatpush3.bf16.msra.mxu0 %v26995_v51  ;;  %20857 = vmatprep.mubr.msk.f32.mxu0 %vm4293_vm4, %v27107_v34  ;;  %v27231_v51 = vld [vmem:[#allocation2 + $0xf8] sm:$0xff]  ;;  %v27235_v34 = vld [vmem:[#allocation2 + $0x108] sm:$0xff]  ;;  %v21442_v29 = vpack.c.bf16 %v17393_v35, %v17392_v30 }
 0x8bc   : > { %21435 = vmatprep.subr.bf16.mxu0 %v21434_v47  ;;  %v27259_v35 = vld [vmem:[#allocation2 + $0x128] sm:$0xff]  ;;  %v27263_v30 = vld [vmem:[#allocation2 + $0x138] sm:$0xff] }
 0x8bd   : > { %20562 = vmatmul.mubr.msk.f32.gmra.mrb[18].mxu1 %vm4293_vm4, %v27216_v43 }
 0x8be   : > { %20858 = vmatmul.mubr.msk.f32.gmra.mrb[2].mxu0 %vm4293_vm4, %v27119_v62  ;;  %20564 = vmatprep.mubr.msk.f32.mxu1 %vm4293_vm4, %v27221_v42  ;;  %v27245_v62 = vld [vmem:[#allocation2 + $0x110] sm:$0xff] }
 0x8bf   : > { %20860 = vmatprep.mubr.msk.f32.mxu0 %vm4293_vm4, %v27125_v15  ;;  %21437 = vmatpush3.bf16.msra.mxu0 %v21434_v47  ;;  %v27249_v15 = vld [vmem:[#allocation2 + $0x120] sm:$0xff]  ;;  %v27251_v47 = vpack.c.bf16 %v17427_v28, %v17426_v31  ;;  %v27288_v31 = vld [vmem:[#allocation2 + $0x168] sm:$0xff] }
 0x8c0   : > { %21439 = vmatprep.subr.bf16.mxu0 %v21438_v59  ;;  %v27272_v28 = vld [vmem:[#allocation2 + $0x140] sm:$0xff] }
 0x8c1   : > { %20565 = vmatmul.mubr.msk.f32.gmra.mrb[20].mxu1 %vm4293_vm4, %v27231_v51 }
 0x8c2   : > { %20861 = vmatmul.mubr.msk.f32.gmra.mrb[4].mxu0 %vm4293_vm4, %v27137_v26  ;;  %20567 = vmatprep.mubr.msk.f32.mxu1 %vm4293_vm4, %v27235_v34 }
 0x8c3   : > { %20863 = vmatprep.mubr.msk.f32.mxu0 %vm4293_vm4, %v27143_v46  ;;  %21441 = vmatpush3.bf16.msra.mxu0 %v21438_v59  ;;  %v27276_v59 = vld [vmem:[#allocation2 + $0x150] sm:$0xff] }
 0x8c4   : > { %21443 = vmatprep.subr.bf16.mxu0 %v21442_v29 }
 0x8c5   : > { %20568 = vmatmul.mubr.msk.f32.gmra.mrb[22].mxu1 %vm4293_vm4, %v27245_v62 }
 0x8c6   : > { %20864 = vmatmul.mubr.msk.f32.gmra.mrb[6].mxu0 %vm4293_vm4, %v27154_v16  ;;  %20570 = vmatprep.mubr.msk.f32.mxu1 %vm4293_vm4, %v27249_v15  ;;  %v17231_v16 = vld [vmem:[%s23316_s2 + $0xe8] sm:$0xff] }
 0x8c7   : > { %20866 = vmatprep.mubr.msk.f32.mxu0 %vm4293_vm4, %v27160_v39  ;;  %21445 = vmatpush3.bf16.msra.mxu0 %v21442_v29  ;;  %v27284_v29 = vld [vmem:[#allocation2 + $0x158] sm:$0xff] }
 0x8c8   : > { %21447 = vmatprep.subr.bf16.mxu0 %v27251_v47 }
 0x8c9   : > { %20571 = vmatmul.mubr.msk.f32.gmra.mrb[24].mxu1 %vm4293_vm4, %v27259_v35 }
 0x8ca   : > { %20867 = vmatmul.mubr.msk.f32.gmra.mrb[8].mxu0 %vm4293_vm4, %v27170_v45  ;;  %20573 = vmatprep.mubr.msk.f32.mxu1 %vm4293_vm4, %v27263_v30  ;;  %v17229_v45 = vld [vmem:[%s23316_s2 + $0xd8] sm:$0xff] }
 0x8cb   : > { %20869 = vmatprep.mubr.msk.f32.mxu0 %vm4293_vm4, %v27176_v54  ;;  %v12323_v54 = vld [vmem:[#allocation2 + $0x2] sm:$0xff] }
 0x8cd   : > { %20574 = vmatmul.mubr.msk.f32.gmra.mrb[26].mxu1 %vm4293_vm4, %v27272_v28 }
 0x8ce   : > { %20870 = vmatmul.mubr.msk.f32.gmra.mrb[10].mxu0 %vm4293_vm4, %v27186_v4  ;;  %20576 = vmatprep.mubr.msk.f32.mxu1 %vm4293_vm4, %v27276_v59  ;;  %v27296_v4 = vld [vmem:[#allocation2 + $0x170] sm:$0xff] }
 0x8cf   : > { %20872 = vmatprep.mubr.msk.f32.mxu0 %vm4293_vm4, %v27192_v52  ;;  %v17228_v52 = vld [vmem:[%s23316_s2 + $0xd0] sm:$0xff] }
 0x8d0   : > { %v21370_v39 = vpack.c.bf16 %v17229_v45, %v17228_v52  ;;  %v17232_v45 = vld [vmem:[%s23316_s2 + $0xf0] sm:$0xff]  ;;  %v13930_v52 = vld [vmem:[#allocation2 + $0x198] sm:$0xff] }
 0x8d1   : > { %20577 = vmatmul.mubr.msk.f32.gmra.mrb[28].mxu1 %vm4293_vm4, %v27284_v29 }
 0x8d2   : > { %20873 = vmatmul.mubr.msk.f32.gmra.mrb[12].mxu0 %vm4293_vm4, %v27202_v49  ;;  %20579 = vmatprep.mubr.msk.f32.mxu1 %vm4293_vm4, %v27288_v31  ;;  %v12324_v49 = vld [vmem:[#allocation2 + $0xa] sm:$0xff] }
 0x8d3   : > { %20875 = vmatprep.mubr.msk.f32.mxu0 %vm4293_vm4, %v27206_v18  ;;  %v17230_v18 = vld [vmem:[%s23316_s2 + $0xe0] sm:$0xff] }
 0x8d5   : > { %20580 = vmatmul.mubr.msk.f32.gmra.mrb[30].mxu1 %vm4293_vm4, %v27296_v4 }
 0x8d6   : > { %20876 = vmatmul.mubr.msk.f32.gmra.mrb[14].mxu0 %vm4293_vm4, %v27216_v43  ;;  %20598 = vmatprep.mubr.msk.f32.mxu1 %vm4293_vm4, %v12323_v54  ;;  %v21374_v54 = vpack.c.bf16 %v17231_v16, %v17230_v18  ;;  %v27364_v18 = vld [vmem:[#allocation2 + $0x188] sm:$0xff]  ;;  %v17428_v16 = vld [vmem:[%s23316_s2 + $0x210] sm:$0xff] }
 0x8d7   : > { %20878 = vmatprep.mubr.msk.f32.mxu0 %vm4293_vm4, %v27221_v42 }
 0x8d9   : > { %20599 = vmatmul.mubr.msk.f32.vlgmr.msra.gmra.mrb[0].mxu1 %vm4293_vm4, %v12324_v49  ;;  %v17233_v49 = vld [vmem:[%s23316_s2 + $0xf8] sm:$0xff] }
 0x8da   : > { %20879 = vmatmul.mubr.msk.f32.gmra.mrb[16].mxu0 %vm4293_vm4, %v27231_v51  ;;  %21369 = vmatpush3.bf16.msra.mxu1 %v27129_v58  ;;  %v13931_v58 = vld [vmem:[#allocation2 + $0x1a0] sm:$0xff] }
 0x8db   : > { %20601 = vmatprep.mubr.msk.f32.mxu1 %vm4293_vm4, %v26923_v40  ;;  %20881 = vmatprep.mubr.msk.f32.mxu0 %vm4293_vm4, %v27235_v34  ;;  %v21378_v40 = vpack.c.bf16 %v17233_v49, %v17232_v45  ;;  %v17430_v45 = vld [vmem:[%s23316_s2 + $0x220] sm:$0xff]  ;;  %v17431_v49 = vld [vmem:[%s23316_s2 + $0x228] sm:$0xff] }
 0x8dc   : > { %21371 = vmatprep.subr.bf16.mxu1 %v21370_v39 }
 0x8dd   : > { %20602 = vmatmul.mubr.msk.f32.gmra.mrb[2].mxu1 %vm4293_vm4, %v26935_v41  ;;  %v27354_v41 = vld [vmem:[#allocation2 + $0x180] sm:$0xff] }
 0x8de   : > { %20882 = vmatmul.mubr.msk.f32.gmra.mrb[18].mxu0 %vm4293_vm4, %v27245_v62  ;;  %20604 = vmatprep.mubr.msk.f32.mxu1 %vm4293_vm4, %v26939_v50 }
 0x8df   : > { %20884 = vmatprep.mubr.msk.f32.mxu0 %vm4293_vm4, %v27249_v15  ;;  %21373 = vmatpush3.bf16.msra.mxu1 %v21370_v39  ;;  %v17429_v39 = vld [vmem:[%s23316_s2 + $0x218] sm:$0xff] }
 0x8e0   : > { %21375 = vmatprep.subr.bf16.mxu1 %v21374_v54 }
 0x8e1   : > { %20605 = vmatmul.mubr.msk.f32.gmra.mrb[4].mxu1 %vm4293_vm4, %v26953_v10 }
 0x8e2   : > { %20885 = vmatmul.mubr.msk.f32.gmra.mrb[20].mxu0 %vm4293_vm4, %v27259_v35  ;;  %20607 = vmatprep.mubr.msk.f32.mxu1 %vm4293_vm4, %v26957_v23 }
 0x8e3   : > { %20887 = vmatprep.mubr.msk.f32.mxu0 %vm4293_vm4, %v27263_v30  ;;  %21377 = vmatpush3.bf16.msra.mxu1 %v21374_v54  ;;  %v21450_v54 = vpack.c.bf16 %v17429_v39, %v17428_v16  ;;  %v28847_v16 = vld [vmem:[#allocation28_spill] sm:$0xff]  ;;  %v28848_v39 = vld [vmem:[#allocation11_spill] sm:$0xff] }
 0x8e4   : > { %21379 = vmatprep.subr.bf16.mxu1 %v21378_v40 }
 0x8e5   : > { %20608 = vmatmul.mubr.msk.f32.gmra.mrb[6].mxu1 %vm4293_vm4, %v26971_v20 }
 0x8e6   : > { %20888 = vmatmul.mubr.msk.f32.gmra.mrb[22].mxu0 %vm4293_vm4, %v27272_v28  ;;  %20610 = vmatprep.mubr.msk.f32.mxu1 %vm4293_vm4, %v26975_v11 }
 0x8e7   : > { %20890 = vmatprep.mubr.msk.f32.mxu0 %vm4293_vm4, %v27276_v59  ;;  %21381 = vmatpush3.bf16.msra.mxu1 %v21378_v40  ;;  %v21454_v40 = vpack.c.bf16 %v17431_v49, %v17430_v45  ;;  %v28850_v45 = vld [vmem:[#allocation16_spill] sm:$0xff]  ;;  %v28851_v49 = vld [vmem:[#allocation34_spill] sm:$0xff] }
 0x8e8   : > { %22232 = vmatprep.subr.bf16.mxu1 %v26792_v8 }
 0x8e9   : > { %20611 = vmatmul.mubr.msk.f32.gmra.mrb[8].mxu1 %vm4293_vm4, %v26989_v24 }
 0x8ea   : > { %20891 = vmatmul.mubr.msk.f32.gmra.mrb[24].mxu0 %vm4293_vm4, %v27284_v29  ;;  %20613 = vmatprep.mubr.msk.f32.mxu1 %vm4293_vm4, %v26993_v5 }
 0x8eb   : > { %20893 = vmatprep.mubr.msk.f32.mxu0 %vm4293_vm4, %v27288_v31 }
 0x8ed   : > { %20614 = vmatmul.mubr.msk.f32.gmra.mrb[10].mxu1 %vm4293_vm4, %v27007_v56 }
 0x8ee   : > { %20894 = vmatmul.mubr.msk.f32.gmra.mrb[26].mxu0 %vm4293_vm4, %v27296_v4  ;;  %20616 = vmatprep.mubr.msk.f32.mxu1 %vm4293_vm4, %v27011_v21 }
 0x8ef   : > { %20896 = vmatprep.mubr.msk.f32.mxu0 %vm4293_vm4, %v27354_v41 }
 0x8f1   : > { %20617 = vmatmul.mubr.msk.f32.gmra.mrb[12].mxu1 %vm4293_vm4, %v27024_v7 }
 0x8f2   : > { %20897 = vmatmul.mubr.msk.f32.gmra.mrb[28].mxu0 %vm4293_vm4, %v27364_v18  ;;  %20619 = vmatprep.mubr.msk.f32.mxu1 %vm4293_vm4, %v27028_v3 }
 0x8f3   : > { %20899 = vmatprep.mubr.msk.f32.mxu0 %vm4293_vm4, %v13930_v52  ;;  %v17433_v52 = vld [vmem:[%s23316_s2 + $0x238] sm:$0xff] }
 0x8f5   : > { %20620 = vmatmul.mubr.msk.f32.gmra.mrb[14].mxu1 %vm4293_vm4, %v27040_v27 }
 0x8f6   : > { %20900 = vmatmul.mubr.msk.f32.gmra.mrb[30].mxu0 %vm4293_vm4, %v13931_v58  ;;  %20622 = vmatprep.mubr.msk.f32.mxu1 %vm4293_vm4, %v27044_v22  ;;  %v28846_v58 = vld [vmem:[#allocation37_spill] sm:$0xff] }
 0x8f7   : > { %20918 = vmatprep.mubr.msk.f32.mxu0 %vm4293_vm4, %v26829_v6  ;;  %v17432_v6 = vld [vmem:[%s23316_s2 + $0x230] sm:$0xff]  ;;  %s28874_s2 = scalar_lea.vmem %s28158_s8, %s23269_s24 }
 0x8f9   : > { %20623 = vmatmul.mubr.msk.f32.gmra.mrb[16].mxu1 %vm4293_vm4, %v27056_v2 }
 0x8fa   : > { %20919 = vmatmul.mubr.msk.f32.vlgmr.msra.gmra.mrb[0].mxu0 %vm4293_vm4, %v26837_v25  ;;  %20625 = vmatprep.mubr.msk.f32.mxu1 %vm4293_vm4, %v27058_v19  ;;  %v21458_v25 = vpack.c.bf16 %v17433_v52, %v17432_v6  ;;  %v28854_v6 = vld [vmem:[#allocation20_spill] sm:$0xff]  ;;  %v28855_v52 = vld [vmem:[#allocation17_spill] sm:$0xff] }
 0x8fb   : > { %21449 = vmatpush3.bf16.msra.mxu0 %v27251_v47  ;;  %20921 = vmatprep.mubr.msk.f32.mxu0 %vm4293_vm4, %v26841_v48  ;;  %v28835_v48 = vld [vmem:[#allocation25_spill] sm:$0xff]  ;;  %v28845_v47 = vld [vmem:[#allocation15_spill] sm:$0xff] }
 0x8fc   : > { %21451 = vmatprep.subr.bf16.mxu0 %v21450_v54 }
 0x8fd   : > { %20626 = vmatmul.mubr.msk.f32.gmra.mrb[18].mxu1 %vm4293_vm4, %v27069_v53 }
 0x8fe   : > { %20922 = vmatmul.mubr.msk.f32.gmra.mrb[2].mxu0 %vm4293_vm4, %v26854_v57  ;;  %20628 = vmatprep.mubr.msk.f32.mxu1 %vm4293_vm4, %v27073_v13  ;;  %v28836_v57 = vld [vmem:[#allocation9_spill] sm:$0xff] }
 0x8ff   : > { %20924 = vmatprep.mubr.msk.f32.mxu0 %vm4293_vm4, %v26856_v60  ;;  %21453 = vmatpush3.bf16.msra.mxu0 %v21450_v54  ;;  %v28837_v60 = vld [vmem:[#allocation13_spill] sm:$0xff]  ;;  %v28849_v54 = vld [vmem:[#allocation39_spill] sm:$0xff] }
 0x900   : > { %21455 = vmatprep.subr.bf16.mxu0 %v21454_v40 }
 0x901   : > { %20629 = vmatmul.mubr.msk.f32.gmra.mrb[20].mxu1 %vm4293_vm4, %v27087_v0 }
 0x902   : > { %20925 = vmatmul.mubr.msk.f32.gmra.mrb[4].mxu0 %vm4293_vm4, %v26868_v32  ;;  %20631 = vmatprep.mubr.msk.f32.mxu1 %vm4293_vm4, %v27091_v9  ;;  %v28838_v32 = vld [vmem:[#allocation23_spill] sm:$0xff] }
 0x903   : > { %20927 = vmatprep.mubr.msk.f32.mxu0 %vm4293_vm4, %v26872_v37  ;;  %21457 = vmatpush3.bf16.msra.mxu0 %v21454_v40  ;;  %v28839_v37 = vld [vmem:[#allocation26_spill] sm:$0xff]  ;;  %v28852_v40 = vld [vmem:[#allocation29_spill] sm:$0xff] }
 0x904   : > { %21459 = vmatprep.subr.bf16.mxu0 %v21458_v25 }
 0x905   : > { %20632 = vmatmul.mubr.msk.f32.gmra.mrb[22].mxu1 %vm4293_vm4, %v27105_v33 }
 0x906   : > { %20928 = vmatmul.mubr.msk.f32.gmra.mrb[6].mxu0 %vm4293_vm4, %v26884_v1  ;;  %20634 = vmatprep.mubr.msk.f32.mxu1 %vm4293_vm4, %v27109_v63  ;;  %v28840_v1 = vld [vmem:[#allocation108_spill] sm:$0xff] }
 0x907   : > { %20930 = vmatprep.mubr.msk.f32.mxu0 %vm4293_vm4, %v26886_v38  ;;  %21461 = vmatpush3.bf16.msra.mxu0 %v21458_v25  ;;  %v28841_v38 = vld [vmem:[#allocation14_spill] sm:$0xff]  ;;  %v28856_v25 = vld [vmem:[#allocation36_spill] sm:$0xff] }
 0x909   : > { %20635 = vmatmul.mubr.msk.f32.gmra.mrb[24].mxu1 %vm4293_vm4, %v27123_v17 }
 0x90a   : > { %20931 = vmatmul.mubr.msk.f32.gmra.mrb[8].mxu0 %vm4293_vm4, %v26897_v44  ;;  %20637 = vmatprep.mubr.msk.f32.mxu1 %vm4293_vm4, %v27127_v55  ;;  %v28842_v44 = vld [vmem:[#allocation21_spill] sm:$0xff] }
 0x90b   : > { %20933 = vmatprep.mubr.msk.f32.mxu0 %vm4293_vm4, %v26899_v14  ;;  %v28843_v14 = vld [vmem:[#allocation27_spill] sm:$0xff] }
 0x90d   : > { %20638 = vmatmul.mubr.msk.f32.gmra.mrb[26].mxu1 %vm4293_vm4, %v27141_v12 }
 0x90e   : > { %20934 = vmatmul.mubr.msk.f32.gmra.mrb[10].mxu0 %vm4293_vm4, %v26909_v36  ;;  %20640 = vmatprep.mubr.msk.f32.mxu1 %vm4293_vm4, %v27145_v61  ;;  %v28844_v36 = vld [vmem:[#allocation35_spill] sm:$0xff] }
 0x90f   : > { %20936 = vmatprep.mubr.msk.f32.mxu0 %vm4293_vm4, %v28835_v48  ;;  %v28857_v48 = vld [vmem:[#allocation30_spill] sm:$0xff] }
 0x911   : > { %20641 = vmatmul.mubr.msk.f32.gmra.mrb[28].mxu1 %vm4293_vm4, %v28836_v57 }
 0x912   : > { %20937 = vmatmul.mubr.msk.f32.gmra.mrb[12].mxu0 %vm4293_vm4, %v28837_v60  ;;  %20643 = vmatprep.mubr.msk.f32.mxu1 %vm4293_vm4, %v28838_v32  ;;  %v28858_v60 = vld [vmem:[#allocation12_spill] sm:$0xff] }
 0x913   : > { %20939 = vmatprep.mubr.msk.f32.mxu0 %vm4293_vm4, %v28839_v37  ;;  %v28859_v37 = vld [vmem:[#allocation18_spill] sm:$0xff] }
 0x915   : > { %20644 = vmatmul.mubr.msk.f32.gmra.mrb[30].mxu1 %vm4293_vm4, %v28840_v1 }
 0x916   : > { %20940 = vmatmul.mubr.msk.f32.gmra.mrb[14].mxu0 %vm4293_vm4, %v28841_v38  ;;  %20662 = vmatprep.mubr.msk.f32.mxu1 %vm4293_vm4, %v28842_v44  ;;  %v28860_v38 = vld [vmem:[#allocation31_spill] sm:$0xff]  ;;  %v28861_v44 = vld [vmem:[#allocation38_spill] sm:$0xff] }
 0x917   : > { %20942 = vmatprep.mubr.msk.f32.mxu0 %vm4293_vm4, %v28843_v14  ;;  %v28862_v14 = vld [vmem:[#allocation19_spill] sm:$0xff] }
 0x919   : > { %20663 = vmatmul.mubr.msk.f32.vlgmr.msra.gmra.mrb[0].mxu1 %vm4293_vm4, %v28844_v36  ;;  %v28863_v36 = vld [vmem:[#allocation22_spill] sm:$0xff] }
 0x91a   : > { %20943 = vmatmul.mubr.msk.f32.gmra.mrb[16].mxu0 %vm4293_vm4, %v28845_v47  ;;  %22236 = vmatpush3.bf16.msra.mxu1 %v26792_v8  ;;  %v28853_v8 = vld [vmem:[#allocation24_spill] sm:$0xff] }
 0x91b   : > { %20665 = vmatprep.mubr.msk.f32.mxu1 %vm4293_vm4, %v28846_v58  ;;  %20945 = vmatprep.mubr.msk.f32.mxu0 %vm4293_vm4, %v28847_v16  ;;  %v27498_v47 = vld [vmem:[#allocation2 + $0x181] sm:$0xff]  ;;  %v28866_v58 = vld [vmem:[#allocation33_spill] sm:$0xff] }
 0x91c   : > { %22233 = vmatprep.subr.bf16.mxu1 %v28848_v39  ;;  %v28867_v16 = vld [vmem:[#allocation109_spill] sm:$0xff] }
 0x91d   : > { %20666 = vmatmul.mubr.msk.f32.gmra.mrb[2].mxu1 %vm4293_vm4, %v28849_v54  ;;  %v14324_v54 = vld [vmem:[#allocation2 + $0x199] sm:$0xff] }
 0x91e   : > { %20946 = vmatmul.mubr.msk.f32.gmra.mrb[18].mxu0 %vm4293_vm4, %v28850_v45  ;;  %20668 = vmatprep.mubr.msk.f32.mxu1 %vm4293_vm4, %v28851_v49  ;;  %v28868_v45 = vld [vmem:[#allocation111_spill] sm:$0xff]  ;;  %v28869_v49 = vld [vmem:[#allocation113_spill] sm:$0xff] }
 0x91f   : > { %20948 = vmatprep.mubr.msk.f32.mxu0 %vm4293_vm4, %v28852_v40  ;;  %22237 = vmatpush3.bf16.msra.mxu1 %v28848_v39  ;;  %v27508_v39 = vld [vmem:[#allocation2 + $0x189] sm:$0xff]  ;;  %v14325_v40 = vld [vmem:[#allocation2 + $0x1a1] sm:$0xff] }
 0x920   : > { %22234 = vmatprep.subr.bf16.mxu1 %v28853_v8 }
 0x921   : > { %20669 = vmatmul.mubr.msk.f32.gmra.mrb[4].mxu1 %vm4293_vm4, %v28854_v6  ;;  %v28871_v6 = vld [vmem:[#allocation115_spill] sm:$0xff] }
 0x922   : > { %20949 = vmatmul.mubr.msk.f32.gmra.mrb[20].mxu0 %vm4293_vm4, %v28855_v52  ;;  %20671 = vmatprep.mubr.msk.f32.mxu1 %vm4293_vm4, %v28856_v25 }
 0x923   : > { %20951 = vmatprep.mubr.msk.f32.mxu0 %vm4293_vm4, %v28857_v48  ;;  %22238 = vmatpush3.bf16.msra.mxu1 %v28853_v8  ;;  %v28870_v8 = vld [vmem:[#allocation114_spill] sm:$0xff] }
 0x924   : > { %22235 = vmatprep.subr.bf16.mxu1 %v28858_v60 }
 0x925   : > { %20672 = vmatmul.mubr.msk.f32.gmra.mrb[6].mxu1 %vm4293_vm4, %v27137_v26  ;;  %v28864_v26 = vld [vmem:[#allocation32_spill] sm:$0xff] }
 0x926   : > { %20952 = vmatmul.mubr.msk.f32.gmra.mrb[22].mxu0 %vm4293_vm4, %v28859_v37  ;;  %20674 = vmatprep.mubr.msk.f32.mxu1 %vm4293_vm4, %v27143_v46  ;;  %v28865_v46 = vld [vmem:[#allocation10_spill] sm:$0xff] }
 0x927   : > { %20954 = vmatprep.mubr.msk.f32.mxu0 %vm4293_vm4, %v28860_v38  ;;  %22239 = vmatpush3.bf16.msra.mxu1 %v28858_v60  ;;  %v15123_v38 = vld [vmem:[%s23322_s10 + $0x18] sm:$0xff] }
 0x929   : > { %20675 = vmatmul.mubr.msk.f32.gmra.mrb[8].mxu1 %vm4293_vm4, %v28861_v44 }
 0x92a   : > { %20955 = vmatmul.mubr.msk.f32.gmra.mrb[24].mxu0 %vm4293_vm4, %v28862_v14  ;;  %20677 = vmatprep.mubr.msk.f32.mxu1 %vm4293_vm4, %v28863_v36  ;;  %v15122_v36 = vld [vmem:[%s23322_s10 + $0x10] sm:$0xff] }
 0x92b   : > { %20957 = vmatprep.mubr.msk.f32.mxu0 %vm4293_vm4, %v28864_v26 }
 0x92d   : > { %20678 = vmatmul.mubr.msk.f32.gmra.mrb[10].mxu1 %vm4293_vm4, %v28865_v46 }
 0x92e   : > { %20958 = vmatmul.mubr.msk.f32.gmra.mrb[26].mxu0 %vm4293_vm4, %v28866_v58  ;;  %20680 = vmatprep.mubr.msk.f32.mxu1 %vm4293_vm4, %v28867_v16 }
 0x92f   : > { %20960 = vmatprep.mubr.msk.f32.mxu0 %vm4293_vm4, %v27498_v47 }
 0x931   : > { %20681 = vmatmul.mubr.msk.f32.gmra.mrb[12].mxu1 %vm4293_vm4, %v28868_v45 }
 0x932   : > { %20961 = vmatmul.mubr.msk.f32.gmra.mrb[28].mxu0 %vm4293_vm4, %v27508_v39  ;;  %20683 = vmatprep.mubr.msk.f32.mxu1 %vm4293_vm4, %v28869_v49 }
 0x933   : > { %20963 = vmatprep.mubr.msk.f32.mxu0 %vm4293_vm4, %v14324_v54  ;;  %v15125_v54 = vld [vmem:[%s23322_s10 + $0x28] sm:$0xff] }
 0x935   : > { %20684 = vmatmul.mubr.msk.f32.gmra.mrb[14].mxu1 %vm4293_vm4, %v28870_v8 }
 0x936   : > { %20964 = vmatmul.mubr.msk.f32.gmra.mrb[30].mxu0 %vm4293_vm4, %v14325_v40  ;;  %20686 = vmatprep.mubr.msk.f32.mxu1 %vm4293_vm4, %v28871_v6  ;;  %v15124_v40 = vld [vmem:[%s23322_s10 + $0x20] sm:$0xff] }
 0x937   : > { %20982 = vmatprep.mubr.msk.f32.mxu0 %vm4293_vm4, %v26939_v50  ;;  %v13128_v50 = vld [vmem:[#allocation2 + $0xe1] sm:$0xff] }
 0x939   : > { %20687 = vmatmul.mubr.msk.f32.gmra.mrb[16].mxu1 %vm4293_vm4, %v27216_v43  ;;  %v13130_v43 = vld [vmem:[#allocation2 + $0xf9] sm:$0xff] }
 0x93a   : > { %20983 = vmatmul.mubr.msk.f32.vlgmr.msra.gmra.mrb[0].mxu0 %vm4293_vm4, %v26953_v10  ;;  %20689 = vmatprep.mubr.msk.f32.mxu1 %vm4293_vm4, %v27221_v42  ;;  %v13129_v10 = vld [vmem:[#allocation2 + $0xf1] sm:$0xff] }
 0x93b   : > { %20985 = vmatprep.mubr.msk.f32.mxu0 %vm4293_vm4, %v26957_v23  ;;  %v13131_v23 = vld [vmem:[#allocation2 + $0x109] sm:$0xff] }
 0x93d   : > { %20690 = vmatmul.mubr.msk.f32.gmra.mrb[18].mxu1 %vm4293_vm4, %v27231_v51 }
 0x93e   : > { %20986 = vmatmul.mubr.msk.f32.gmra.mrb[2].mxu0 %vm4293_vm4, %v26971_v20  ;;  %20692 = vmatprep.mubr.msk.f32.mxu1 %vm4293_vm4, %v27235_v34  ;;  %v13132_v20 = vld [vmem:[#allocation2 + $0x111] sm:$0xff] }
 0x93f   : > { %20988 = vmatprep.mubr.msk.f32.mxu0 %vm4293_vm4, %v26975_v11  ;;  %v13133_v11 = vld [vmem:[#allocation2 + $0x121] sm:$0xff] }
 0x941   : > { %20693 = vmatmul.mubr.msk.f32.gmra.mrb[20].mxu1 %vm4293_vm4, %v27245_v62  ;;  %v13138_v62 = vld [vmem:[#allocation2 + $0x159] sm:$0xff] }
 0x942   : > { %20989 = vmatmul.mubr.msk.f32.gmra.mrb[4].mxu0 %vm4293_vm4, %v26989_v24  ;;  %20695 = vmatprep.mubr.msk.f32.mxu1 %vm4293_vm4, %v27249_v15  ;;  %v13127_v15 = vld [vmem:[#allocation2 + $0xd9] sm:$0xff]  ;;  %v13134_v24 = vld [vmem:[#allocation2 + $0x129] sm:$0xff] }
 0x943   : > { %20991 = vmatprep.mubr.msk.f32.mxu0 %vm4293_vm4, %v26993_v5  ;;  %v13135_v5 = vld [vmem:[#allocation2 + $0x139] sm:$0xff] }
 0x945   : > { %20696 = vmatmul.mubr.msk.f32.gmra.mrb[22].mxu1 %vm4293_vm4, %v27259_v35 }
 0x946   : > { %20992 = vmatmul.mubr.msk.f32.gmra.mrb[6].mxu0 %vm4293_vm4, %v27007_v56  ;;  %20698 = vmatprep.mubr.msk.f32.mxu1 %vm4293_vm4, %v27263_v30  ;;  %v13136_v56 = vld [vmem:[#allocation2 + $0x141] sm:$0xff] }
 0x947   : > { %20994 = vmatprep.mubr.msk.f32.mxu0 %vm4293_vm4, %v27011_v21  ;;  %v13137_v21 = vld [vmem:[#allocation2 + $0x151] sm:$0xff] }
 0x949   : > { %20699 = vmatmul.mubr.msk.f32.gmra.mrb[24].mxu1 %vm4293_vm4, %v27272_v28  ;;  %v27645_v28 = vld [vmem:[%s28874_s2] ss:$0 sm:$0xff] }
 0x94a   : > { %20995 = vmatmul.mubr.msk.f32.gmra.mrb[8].mxu0 %vm4293_vm4, %v27024_v7  ;;  %20701 = vmatprep.mubr.msk.f32.mxu1 %vm4293_vm4, %v27276_v59  ;;  %v13139_v7 = vld [vmem:[#allocation2 + $0x169] sm:$0xff] }
 0x94b   : > { %20997 = vmatprep.mubr.msk.f32.mxu0 %vm4293_vm4, %v27028_v3  ;;  %v13140_v3 = vld [vmem:[#allocation2 + $0x171] sm:$0xff] }
 0x94d   : > { %20702 = vmatmul.mubr.msk.f32.gmra.mrb[26].mxu1 %vm4293_vm4, %v27284_v29 }
 0x94e   : > { %20998 = vmatmul.mubr.msk.f32.gmra.mrb[10].mxu0 %vm4293_vm4, %v27040_v27  ;;  %20704 = vmatprep.mubr.msk.f32.mxu1 %vm4293_vm4, %v27288_v31  ;;  %v28872_v27 = vld [vmem:[#allocation110_spill] sm:$0xff] }
 0x94f   : > { %21000 = vmatprep.mubr.msk.f32.mxu0 %vm4293_vm4, %v27044_v22  ;;  %v14718_v22 = vld [vmem:[#allocation2 + $0x19a] sm:$0xff] }
 0x951   : > { %20705 = vmatmul.mubr.msk.f32.gmra.mrb[28].mxu1 %vm4293_vm4, %v27296_v4 }
 0x952   : > { %21001 = vmatmul.mubr.msk.f32.gmra.mrb[12].mxu0 %vm4293_vm4, %v27056_v2  ;;  %20707 = vmatprep.mubr.msk.f32.mxu1 %vm4293_vm4, %v27354_v41  ;;  %v14719_v2 = vld [vmem:[#allocation2 + $0x1a2] sm:$0xff] }
 0x953   : > { %21003 = vmatprep.mubr.msk.f32.mxu0 %vm4293_vm4, %v27058_v19  ;;  %v15121_v41 = vld [vmem:[%s23322_s10 + $0x8] sm:$0xff] }
 0x955   : > { %20708 = vmatmul.mubr.msk.f32.gmra.mrb[30].mxu1 %vm4293_vm4, %v27364_v18 }
 0x956   : > { %21004 = vmatmul.mubr.msk.f32.gmra.mrb[14].mxu0 %vm4293_vm4, %v27069_v53  ;;  %20750 = vmatprep.mubr.msk.f32.mxu1 %vm4293_vm4, %v13127_v15 }
 0x957   : > { %21006 = vmatprep.mubr.msk.f32.mxu0 %vm4293_vm4, %v27073_v13 }
 0x959   : > { %20751 = vmatmul.mubr.msk.f32.vlgmr.msra.gmra.mrb[16].mxu1 %vm4293_vm4, %v13128_v50 }
 0x95a   : > { %21007 = vmatmul.mubr.msk.f32.gmra.mrb[16].mxu0 %vm4293_vm4, %v27087_v0  ;;  %20753 = vmatprep.mubr.msk.f32.mxu1 %vm4293_vm4, %v13129_v10 }
 0x95b   : > { %21009 = vmatprep.mubr.msk.f32.mxu0 %vm4293_vm4, %v27091_v9 }
 0x95d   : > { %20754 = vmatmul.mubr.msk.f32.gmra.mrb[18].mxu1 %vm4293_vm4, %v13130_v43 }
 0x95e   : > { %21010 = vmatmul.mubr.msk.f32.gmra.mrb[18].mxu0 %vm4293_vm4, %v27105_v33  ;;  %20756 = vmatprep.mubr.msk.f32.mxu1 %vm4293_vm4, %v13131_v23  ;;  %v28873_v33 = vld [vmem:[#allocation112_spill] sm:$0xff]  ;;  %v15127_v23 = vld [vmem:[%s23322_s10 + $0x38] sm:$0xff] }
 0x95f   : > { %21012 = vmatprep.mubr.msk.f32.mxu0 %vm4293_vm4, %v27109_v63 }
 0x961   : > { %20757 = vmatmul.mubr.msk.f32.gmra.mrb[20].mxu1 %vm4293_vm4, %v13132_v20 }
 0x962   : > { %21013 = vmatmul.mubr.msk.f32.gmra.mrb[20].mxu0 %vm4293_vm4, %v27123_v17  ;;  %20759 = vmatprep.mubr.msk.f32.mxu1 %vm4293_vm4, %v13133_v11 }
 0x963   : > { %21015 = vmatprep.mubr.msk.f32.mxu0 %vm4293_vm4, %v27127_v55 }
 0x965   : > { %20760 = vmatmul.mubr.msk.f32.gmra.mrb[22].mxu1 %vm4293_vm4, %v13134_v24  ;;  %v15126_v24 = vld [vmem:[%s23322_s10 + $0x30] sm:$0xff] }
 0x966   : > { %21016 = vmatmul.mubr.msk.f32.gmra.mrb[22].mxu0 %vm4293_vm4, %v27141_v12  ;;  %20762 = vmatprep.mubr.msk.f32.mxu1 %vm4293_vm4, %v13135_v5 }
 0x967   : > { %21018 = vmatprep.mubr.msk.f32.mxu0 %vm4293_vm4, %v27145_v61 }
 0x969   : > { %20763 = vmatmul.mubr.msk.f32.gmra.mrb[24].mxu1 %vm4293_vm4, %v13136_v56 }
 0x96a   : > { %21019 = vmatmul.mubr.msk.f32.gmra.mrb[24].mxu0 %vm4293_vm4, %v28836_v57  ;;  %20765 = vmatprep.mubr.msk.f32.mxu1 %vm4293_vm4, %v13137_v21 }
 0x96b   : > { %21021 = vmatprep.mubr.msk.f32.mxu0 %vm4293_vm4, %v28838_v32  ;;  %v15120_v32 = vld [vmem:[%s23322_s10] sm:$0xff] }
 0x96d   : > { %20766 = vmatmul.mubr.msk.f32.gmra.mrb[26].mxu1 %vm4293_vm4, %v13138_v62 }
 0x96e   : > { %21022 = vmatmul.mubr.msk.f32.gmra.mrb[26].mxu0 %vm4293_vm4, %v28840_v1  ;;  %20768 = vmatprep.mubr.msk.f32.mxu1 %vm4293_vm4, %v13139_v7 }
 0x96f   : > { %21024 = vmatprep.mubr.msk.f32.mxu0 %vm4293_vm4, %v28872_v27  ;;  %v15129_v27 = vld [vmem:[%s23322_s10 + $0x48] sm:$0xff] }
 0x971   : > { %20769 = vmatmul.mubr.msk.f32.gmra.mrb[28].mxu1 %vm4293_vm4, %v13140_v3 }
 0x972   : > { %21025 = vmatmul.mubr.msk.f32.gmra.mrb[28].mxu0 %vm4293_vm4, %v28873_v33  ;;  %20771 = vmatprep.mubr.msk.f32.mxu1 %vm4293_vm4, %v27498_v47 }
 0x973   : > { %21027 = vmatprep.mubr.msk.f32.mxu0 %vm4293_vm4, %v14718_v22 }
 0x975   : > { %20772 = vmatmul.mubr.msk.f32.gmra.mrb[30].mxu1 %vm4293_vm4, %v27508_v39 }
 0x976   : > { %21028 = vmatmul.mubr.msk.f32.gmra.mrb[30].mxu0 %vm4293_vm4, %v14719_v2  ;;  %v15128_v2 = vld [vmem:[%s23322_s10 + $0x40] sm:$0xff] }
 0x9ec   : > { %v20664_v19 = vpop.f32.mrb[0].mxu1 }
 0x9ed   : > { %v12920_v53 = vpop.f32.mrb[1].mxu1 }
 0x9f0   : > { %v20667_v13 = vpop.f32.mrb[2].mxu1 }
 0x9f1   : > { %v12930_v4 = vpop.f32.mrb[3].mxu1 }
 0x9f4   : > { %v20670_v0 = vpop.f32.mrb[4].mxu1 }
 0x9f5   : > { %v12940_v9 = vpop.f32.mrb[5].mxu1 }
 0x9f8   : > { %v20673_v34 = vpop.f32.mrb[6].mxu1 }
 0x9f9   : > { %v12950_v63 = vpop.f32.mrb[7].mxu1 }
 0x9fc   : > { %v20676_v17 = vpop.f32.mrb[8].mxu1 }
 0x9fd   : > { %v12960_v55 = vpop.f32.mrb[9].mxu1 }
 0xa00   : > { %v20679_v12 = vpop.f32.mrb[10].mxu1 }
 0xa01   : > { %v12970_v61 = vpop.f32.mrb[11].mxu1 }
 0xa04   : > { %v27632_v42 = vpop.f32.mrb[12].mxu1 }
 0xa05   : > { %v27634_v51 = vpop.f32.mrb[13].mxu1 }
 0xa08   : > { %v27636_v35 = vpop.f32.mrb[14].mxu1 }
 0xa09   : > { %v27638_v30 = vpop.f32.mrb[15].mxu1 }
 0xa0d   : > { %v20984_v59 = vpop.f32.mrb[0].mxu0 }
 0xa0e   : > { %v22240_v29 = vadd.f32 %v20984_v59, %v20664_v19  ;;  %v14891_v31 = vpop.f32.mrb[1].mxu0  ;;  %v15130_v59 = vld [vmem:[%s23322_s10 + $0x50] sm:$0xff] }
 0xa0f   : > { %v22241_v18 = vadd.f32 %v14891_v31, %v12920_v53 }
 0xa10   : > { %v15089_v57 = vadd.f32 %v22240_v29, %v27645_v28 }
 0xa11   : > { %v15088_v1 = vadd.f32 %v22241_v18, %v27645_v28  ;;  %v20987_v52 = vpop.f32.mrb[2].mxu0 }
 0xa12   : > { %v27651_v25 = vmul.f32 %v15121_v41, %v15089_v57  ;;  %v22242_v48 = vadd.f32 %v20987_v52, %v20667_v13  ;;  %v14901_v60 = vpop.f32.mrb[3].mxu0  ;;  %v15133_v57 = vld [vmem:[%s23322_s10 + $0x68] sm:$0xff] }
 0xa13   : > { %v27653_v37 = vmul.f32 %v15120_v32, %v15088_v1  ;;  %v22243_v44 = vadd.f32 %v14901_v60, %v12930_v4  ;;  %v15132_v1 = vld [vmem:[%s23322_s10 + $0x60] sm:$0xff] }
 0xa14   : > { %v15091_v14 = vadd.f32 %v22242_v48, %v27645_v28 }
 0xa15   : > { %v15090_v26 = vadd.f32 %v22243_v44, %v27645_v28  ;;  %v20990_v47 = vpop.f32.mrb[4].mxu0 }
 0xa16   : > { %v27659_v46 = vmul.f32 %v15123_v38, %v15091_v14  ;;  %v22244_v58 = vadd.f32 %v20990_v47, %v20670_v0  ;;  %v14911_v16 = vpop.f32.mrb[5].mxu0  ;;  %v15135_v14 = vld [vmem:[%s23322_s10 + $0x78] sm:$0xff] }
 0xa17   : > { %v27661_v39 = vmul.f32 %v15122_v36, %v15090_v26  ;;  %v22245_v45 = vadd.f32 %v14911_v16, %v12940_v9  ;;  %v15134_v26 = vld [vmem:[%s23322_s10 + $0x70] sm:$0xff] }
 0xa18   : > { %v15093_v49 = vadd.f32 %v22244_v58, %v27645_v28 }
 0xa19   : > { %v15092_v8 = vadd.f32 %v22245_v45, %v27645_v28  ;;  %v20993_v6 = vpop.f32.mrb[6].mxu0 }
 0xa1a   : > { %v27667_v15 = vmul.f32 %v15125_v54, %v15093_v49  ;;  %v22246_v50 = vadd.f32 %v20993_v6, %v20673_v34  ;;  %v14921_v10 = vpop.f32.mrb[7].mxu0  ;;  %v15131_v34 = vld [vmem:[%s23322_s10 + $0x58] sm:$0xff] }
 0xa1b   : > { %v27669_v43 = vmul.f32 %v15124_v40, %v15092_v8  ;;  %v22247_v20 = vadd.f32 %v14921_v10, %v12950_v63  ;;  %v15137_v8 = vld [vmem:[%s23322_s10 + $0x88] sm:$0xff] }
 0xa1c   : > { %v15095_v11 = vadd.f32 %v22246_v50, %v27645_v28  ;;  %v15136_v50 = vld [vmem:[%s23322_s10 + $0x80] sm:$0xff] }
 0xa1d   : > { %v15094_v5 = vadd.f32 %v22247_v20, %v27645_v28  ;;  %v20996_v56 = vpop.f32.mrb[8].mxu0 }
 0xa1e   : > { %v27675_v21 = vmul.f32 %v15127_v23, %v15095_v11  ;;  %v22248_v62 = vadd.f32 %v20996_v56, %v20676_v17  ;;  %v14931_v7 = vpop.f32.mrb[9].mxu0 }
 0xa1f   : > { %v27677_v3 = vmul.f32 %v15126_v24, %v15094_v5  ;;  %v22249_v22 = vadd.f32 %v14931_v7, %v12960_v55  ;;  %v15139_v7 = vld [vmem:[%s23322_s10 + $0x98] sm:$0xff] }
 0xa20   : > { %v15097_v33 = vadd.f32 %v22248_v62, %v27645_v28 }
 0xa21   : > { %v15096_v19 = vadd.f32 %v22249_v22, %v27645_v28  ;;  %v20999_v53 = vpop.f32.mrb[10].mxu0 }
 0xa22   : > { %v27683_v13 = vmul.f32 %v15129_v27, %v15097_v33  ;;  %v22250_v4 = vadd.f32 %v20999_v53, %v20679_v12  ;;  %v14941_v0 = vpop.f32.mrb[11].mxu0  ;;  %v15138_v33 = vld [vmem:[%s23322_s10 + $0x90] sm:$0xff] }
 0xa23   : > { %v27685_v9 = vmul.f32 %v15128_v2, %v15096_v19  ;;  %v22251_v63 = vadd.f32 %v14941_v0, %v12970_v61 }
 0xa24   : > { %v15099_v17 = vadd.f32 %v22250_v4, %v27645_v28 }
 0xa25   : > { %v15098_v55 = vadd.f32 %v22251_v63, %v27645_v28  ;;  %v21002_v29 = vpop.f32.mrb[12].mxu0 }
 0xa26   : > { %v27691_v31 = vmul.f32 %v15131_v34, %v15099_v17  ;;  %v22252_v41 = vadd.f32 %v21002_v29, %v27632_v42  ;;  %v14951_v18 = vpop.f32.mrb[13].mxu0 }
 0xa27   : > { %v27694_v12 = vmul.f32 %v15130_v59, %v15098_v55  ;;  %v22253_v32 = vadd.f32 %v14951_v18, %v27634_v51  ;;  %v15141_v59 = vld [vmem:[%s23322_s10 + $0xa8] sm:$0xff] }
 0xa28   : > { %v15101_v61 = vadd.f32 %v22252_v41, %v27645_v28  ;;  %v15140_v41 = vld [vmem:[%s23322_s10 + $0xa0] sm:$0xff] }
 0xa29   : > { %v15100_v52 = vadd.f32 %v22253_v32, %v27645_v28  ;;  %v21005_v48 = vpop.f32.mrb[14].mxu0 }
 0xa2a   : > { %v27701_v60 = vmul.f32 %v15133_v57, %v15101_v61  ;;  %v22254_v38 = vadd.f32 %v21005_v48, %v27636_v35  ;;  %v14961_v44 = vpop.f32.mrb[15].mxu0 }
 0xa2b   : > { %v27704_v42 = vmul.f32 %v15132_v1, %v15100_v52  ;;  %v22255_v36 = vadd.f32 %v14961_v44, %v27638_v30  ;;  %v15143_v44 = vld [vmem:[%s23322_s10 + $0xb8] sm:$0xff] }
 0xa2c   : > { %v15103_v51 = vadd.f32 %v22254_v38, %v27645_v28  ;;  %v20752_v47 = vpop.f32.mrb[16].mxu1 }
 0xa2d   : > { %v15102_v58 = vadd.f32 %v22255_v36, %v27645_v28  ;;  %v21008_v16 = vpop.f32.mrb[16].mxu0  ;;  %v13394_v54 = vpop.f32.mrb[17].mxu1 }
 0xa2e   : > { %v27711_v45 = vmul.f32 %v15135_v14, %v15103_v51  ;;  %v22256_v49 = vadd.f32 %v21008_v16, %v20752_v47  ;;  %v14971_v35 = vpop.f32.mrb[17].mxu0  ;;  %v15142_v51 = vld [vmem:[%s23322_s10 + $0xb0] sm:$0xff] }
 0xa2f   : > { %v27713_v40 = vmul.f32 %v15134_v26, %v15102_v58  ;;  %v22257_v6 = vadd.f32 %v14971_v35, %v13394_v54 }
 0xa30   : > { %v15105_v30 = vadd.f32 %v22256_v49, %v27645_v28  ;;  %v20755_v10 = vpop.f32.mrb[18].mxu1 }
 0xa31   : > { %v15104_v23 = vadd.f32 %v22257_v6, %v27645_v28  ;;  %v21011_v20 = vpop.f32.mrb[18].mxu0  ;;  %v13404_v11 = vpop.f32.mrb[19].mxu1  ;;  %v15145_v6 = vld [vmem:[%s23322_s10 + $0xc8] sm:$0xff] }
 0xa32   : > { %v27719_v24 = vmul.f32 %v15137_v8, %v15105_v30  ;;  %v22258_v5 = vadd.f32 %v21011_v20, %v20755_v10  ;;  %v14981_v56 = vpop.f32.mrb[19].mxu0  ;;  %v15144_v10 = vld [vmem:[%s23322_s10 + $0xc0] sm:$0xff] }
 0xa33   : > { %v27721_v62 = vmul.f32 %v15136_v50, %v15104_v23  ;;  %v22259_v27 = vadd.f32 %v14981_v56, %v13404_v11 }
 0xa34   : > { %v15107_v22 = vadd.f32 %v22258_v5, %v27645_v28  ;;  %v20758_v2 = vpop.f32.mrb[20].mxu1 }
 0xa35   : > { %v15106_v19 = vadd.f32 %v22259_v27, %v27645_v28  ;;  %v21014_v53 = vpop.f32.mrb[20].mxu0  ;;  %v13414_v4 = vpop.f32.mrb[21].mxu1 }
 0xa36   : > { %v27727_v0 = vmul.f32 %v15139_v7, %v15107_v22  ;;  %v22260_v34 = vadd.f32 %v21014_v53, %v20758_v2  ;;  %v14991_v63 = vpop.f32.mrb[21].mxu0  ;;  %v15146_v53 = vld [vmem:[%s23322_s10 + $0xd0] sm:$0xff] }
 0xa37   : > { %v27729_v17 = vmul.f32 %v15138_v33, %v15106_v19  ;;  %v22261_v55 = vadd.f32 %v14991_v63, %v13414_v4  ;;  %v15147_v33 = vld [vmem:[%s23322_s10 + $0xd8] sm:$0xff] }
 0xa38   : > { %v15109_v29 = vadd.f32 %v22260_v34, %v27645_v28  ;;  %v20761_v18 = vpop.f32.mrb[22].mxu1 }
 0xa39   : > { %v15108_v57 = vadd.f32 %v22261_v55, %v27645_v28  ;;  %v21017_v32 = vpop.f32.mrb[22].mxu0  ;;  %v13424_v61 = vpop.f32.mrb[23].mxu1 }
 0xa3a   : > { %v27735_v1 = vmul.f32 %v15141_v59, %v15109_v29  ;;  %v22262_v52 = vadd.f32 %v21017_v32, %v20761_v18  ;;  %v15001_v48 = vpop.f32.mrb[23].mxu0 }
 0xa3b   : > { %v27737_v38 = vmul.f32 %v15140_v41, %v15108_v57  ;;  %v22263_v14 = vadd.f32 %v15001_v48, %v13424_v61  ;;  %v15149_v57 = vld [vmem:[%s23322_s10 + $0xe8] sm:$0xff] }
 0xa3c   : > { %v15111_v36 = vadd.f32 %v22262_v52, %v27645_v28  ;;  %v20764_v26 = vpop.f32.mrb[24].mxu1  ;;  %v15148_v52 = vld [vmem:[%s23322_s10 + $0xe0] sm:$0xff] }
 0xa3d   : > { %v15110_v47 = vadd.f32 %v22263_v14, %v27645_v28  ;;  %v21020_v58 = vpop.f32.mrb[24].mxu0  ;;  %v13434_v16 = vpop.f32.mrb[25].mxu1 }
 0xa3e   : > { %v27743_v54 = vmul.f32 %v15143_v44, %v15111_v36  ;;  %v22264_v49 = vadd.f32 %v21020_v58, %v20764_v26  ;;  %v15011_v35 = vpop.f32.mrb[25].mxu0 }
 0xa3f   : > { %v27745_v8 = vmul.f32 %v15142_v51, %v15110_v47  ;;  %v22265_v30 = vadd.f32 %v15011_v35, %v13434_v16  ;;  %v15151_v16 = vld [vmem:[%s23322_s10 + $0xf8] sm:$0xff] }
 0xa40   : > { %v15113_v50 = vadd.f32 %v22264_v49, %v27645_v28  ;;  %v20767_v23 = vpop.f32.mrb[26].mxu1 }
 0xa41   : > { %v15112_v20 = vadd.f32 %v22265_v30, %v27645_v28  ;;  %v21023_v11 = vpop.f32.mrb[26].mxu0  ;;  %v13444_v5 = vpop.f32.mrb[27].mxu1 }
 0xa42   : > { %v27751_v56 = vmul.f32 %v15145_v6, %v15113_v50  ;;  %v22266_v7 = vadd.f32 %v21023_v11, %v20767_v23  ;;  %v15021_v27 = vpop.f32.mrb[27].mxu0  ;;  %v15150_v6 = vld [vmem:[%s23322_s10 + $0xf0] sm:$0xff]  ;;  %v15187_v23 = vld [vmem:[%s23327_s22] sm:$0xff] (!%p15871_p7) }
 0xa43   : > { %v27753_v22 = vmul.f32 %v15144_v10, %v15112_v20  ;;  %v22267_v2 = vadd.f32 %v15021_v27, %v13444_v5  ;;  %v15189_v20 = vld [vmem:[%s23327_s22 + $0x10] sm:$0xff] (!%p15871_p7)  ;;  %v15219_v11 = vadd.f32 (!%p15871_p7), %v15187_v23, %v27653_v37  ;;  %v15190_v27 = vld [vmem:[%s23327_s22 + $0x18] sm:$0xff] (!%p15871_p7)  ;;  %v15204_v23 = vld [vmem:[%s23327_s22 + $0x88] sm:$0xff] (!%p15871_p7) }
 0xa44   : > { %v15115_v19 = vadd.f32 %v22266_v7, %v27645_v28  ;;  %v20770_v4 = vpop.f32.mrb[28].mxu1  ;;  %v15221_v7 = vadd.f32 (!%p15871_p7), %v15189_v20, %v27661_v39 }
 0xa45   : > { %v15114_v34 = vadd.f32 %v22267_v2, %v27645_v28  ;;  %v21026_v63 = vpop.f32.mrb[28].mxu0  ;;  %v13454_v59 = vpop.f32.mrb[29].mxu1  ;;  %v15192_v2 = vld [vmem:[%s23327_s22 + $0x28] sm:$0xff] (!%p15871_p7)  ;;  %15252 = vst.msk [vmem:[%s23332_s12] sm:$0xff] (!%p15871_p7), %vm15251_vm5, %v15219_v11  ;;  %v15236_v11 = vadd.f32 (!%p15871_p7), %v15204_v23, %v27719_v24 }
 0xa46   : > { %v27759_v55 = vmul.f32 %v15147_v33, %v15115_v19  ;;  %v22268_v29 = vadd.f32 %v21026_v63, %v20770_v4  ;;  %v15031_v41 = vpop.f32.mrb[29].mxu0  ;;  %v15191_v33 = vld [vmem:[%s23327_s22 + $0x20] sm:$0xff] (!%p15871_p7)  ;;  %v15222_v19 = vadd.f32 (!%p15871_p7), %v15190_v27, %v27659_v46  ;;  %v15224_v4 = vadd.f32 (!%p15871_p7), %v15192_v2, %v27667_v15  ;;  %v15194_v63 = vld [vmem:[%s23327_s22 + $0x38] sm:$0xff] (!%p15871_p7)  ;;  %15254 = vst.msk [vmem:[%s23332_s12 + $0x10] sm:$0xff] (!%p15871_p7), %vm15251_vm5, %v15221_v7 }
 0xa47   : > { %v27761_v18 = vmul.f32 %v15146_v53, %v15114_v34  ;;  %v22269_v32 = vadd.f32 %v15031_v41, %v13454_v59  ;;  %v15223_v53 = vadd.f32 (!%p15871_p7), %v15191_v33, %v27669_v43  ;;  %v15193_v34 = vld [vmem:[%s23327_s22 + $0x30] sm:$0xff] (!%p15871_p7)  ;;  %v15195_v59 = vld [vmem:[%s23327_s22 + $0x40] sm:$0xff] (!%p15871_p7)  ;;  %v15226_v41 = vadd.f32 (!%p15871_p7), %v15194_v63, %v27675_v21  ;;  %v15206_v7 = vld [vmem:[%s23327_s22 + $0x98] sm:$0xff] (!%p15871_p7)  ;;  %15269 = vst.msk [vmem:[%s23332_s12 + $0x88] sm:$0xff] (!%p15871_p7), %vm15251_vm5, %v15236_v11 }
 0xa48   : > { %v15117_v61 = vadd.f32 %v22268_v29, %v27645_v28  ;;  %v20773_v48 = vpop.f32.mrb[30].mxu1  ;;  %v15225_v29 = vadd.f32 (!%p15871_p7), %v15193_v34, %v27677_v3  ;;  %15255 = vst.msk [vmem:[%s23332_s12 + $0x18] sm:$0xff] (!%p15871_p7), %vm15251_vm5, %v15222_v19  ;;  %15257 = vst.msk [vmem:[%s23332_s12 + $0x28] sm:$0xff] (!%p15871_p7), %vm15251_vm5, %v15224_v4  ;;  %v15207_v27 = vld [vmem:[%s23327_s22 + $0xa0] sm:$0xff] (!%p15871_p7)  ;;  %v15238_v2 = vadd.f32 (!%p15871_p7), %v15206_v7, %v27727_v0  ;;  %v15209_v4 = vld [vmem:[%s23327_s22 + $0xb0] sm:$0xff] (!%p15871_p7) }
 0xa49   : > { %v15116_v44 = vadd.f32 %v22269_v32, %v27645_v28  ;;  %v21029_v14 = vpop.f32.mrb[30].mxu0  ;;  %v13464_v36 = vpop.f32.mrb[31].mxu1  ;;  %15186 = sbr.rel (%p15871_p7) target bundleno = 2649 (0xa59), region = 79  ;;  %v15196_v32 = vld [vmem:[%s23327_s22 + $0x48] sm:$0xff] (!%p15871_p7)  ;;  %15256 = vst.msk [vmem:[%s23332_s12 + $0x20] sm:$0xff] (!%p15871_p7), %vm15251_vm5, %v15223_v53  ;;  %15259 = vst.msk [vmem:[%s23332_s12 + $0x38] sm:$0xff] (!%p15871_p7), %vm15251_vm5, %v15226_v41  ;;  %v15239_v19 = vadd.f32 (!%p15871_p7), %v15207_v27, %v27737_v38 }
 0xa4a   : > { %v27767_v51 = vmul.f32 %v15149_v57, %v15117_v61  ;;  %v22270_v26 = vadd.f32 %v21029_v14, %v20773_v48  ;;  %v15041_v47 = vpop.f32.mrb[31].mxu0  ;;  %v15227_v57 = vadd.f32 (!%p15871_p7), %v15195_v59, %v27685_v9  ;;  %v15197_v61 = vld [vmem:[%s23327_s22 + $0x50] sm:$0xff] (!%p15871_p7)  ;;  %v15228_v48 = vadd.f32 (!%p15871_p7), %v15196_v32, %v27683_v13  ;;  %15258 = vst.msk [vmem:[%s23332_s12 + $0x30] sm:$0xff] (!%p15871_p7), %vm15251_vm5, %v15225_v29  ;;  %v15208_v53 = vld [vmem:[%s23327_s22 + $0xa8] sm:$0xff] (!%p15871_p7)  ;;  %v15210_v34 = vld [vmem:[%s23327_s22 + $0xb8] sm:$0xff] (!%p15871_p7) }
 0xa4b   : > { %v27769_v58 = vmul.f32 %v15148_v52, %v15116_v44  ;;  %v22271_v49 = vadd.f32 %v15041_v47, %v13464_v36  ;;  %v15198_v52 = vld [vmem:[%s23327_s22 + $0x58] sm:$0xff] (!%p15871_p7)  ;;  %v15229_v44 = vadd.f32 (!%p15871_p7), %v15197_v61, %v27694_v12  ;;  %v15199_v36 = vld [vmem:[%s23327_s22 + $0x60] sm:$0xff] (!%p15871_p7)  ;;  %v15201_v47 = vld [vmem:[%s23327_s22 + $0x70] sm:$0xff] (!%p15871_p7)  ;;  %v15240_v63 = vadd.f32 (!%p15871_p7), %v15208_v53, %v27735_v1  ;;  %15271 = vst.msk [vmem:[%s23332_s12 + $0x98] sm:$0xff] (!%p15871_p7), %vm15251_vm5, %v15238_v2 }
 0xa4c   : > { %v15119_v35 = vadd.f32 %v22270_v26, %v27645_v28  ;;  %v15230_v14 = vadd.f32 (!%p15871_p7), %v15198_v52, %v27691_v31  ;;  %v15200_v26 = vld [vmem:[%s23327_s22 + $0x68] sm:$0xff] (!%p15871_p7)  ;;  %15260 = vst.msk [vmem:[%s23332_s12 + $0x40] sm:$0xff] (!%p15871_p7), %vm15251_vm5, %v15227_v57  ;;  %15261 = vst.msk [vmem:[%s23332_s12 + $0x48] sm:$0xff] (!%p15871_p7), %vm15251_vm5, %v15228_v48  ;;  %v15241_v59 = vadd.f32 (!%p15871_p7), %v15209_v4, %v27745_v8  ;;  %v15211_v41 = vld [vmem:[%s23327_s22 + $0xc0] sm:$0xff] (!%p15871_p7) }
 0xa4d   : > { %v15118_v30 = vadd.f32 %v22271_v49, %v27645_v28  ;;  %v15188_v28 = vld [vmem:[%s23327_s22 + $0x8] sm:$0xff] (!%p15871_p7)  ;;  %v15232_v49 = vadd.f32 (!%p15871_p7), %v15200_v26, %v27701_v60  ;;  %15262 = vst.msk [vmem:[%s23332_s12 + $0x50] sm:$0xff] (!%p15871_p7), %vm15251_vm5, %v15229_v44  ;;  %v15242_v29 = vadd.f32 (!%p15871_p7), %v15210_v34, %v27743_v54  ;;  %v15213_v32 = vld [vmem:[%s23327_s22 + $0xd0] sm:$0xff] (!%p15871_p7)  ;;  %15272 = vst.msk [vmem:[%s23332_s12 + $0xa0] sm:$0xff] (!%p15871_p7), %vm15251_vm5, %v15239_v19 }
 0xa4e   : > { %v27775_v50 = vmul.f32 %v15151_v16, %v15119_v35  ;;  %v15220_v5 = vadd.f32 (!%p15871_p7), %v15188_v28, %v27651_v25  ;;  %v15231_v16 = vadd.f32 (!%p15871_p7), %v15199_v36, %v27704_v42  ;;  %v15233_v35 = vadd.f32 (!%p15871_p7), %v15201_v47, %v27713_v40  ;;  %15263 = vst.msk [vmem:[%s23332_s12 + $0x58] sm:$0xff] (!%p15871_p7), %vm15251_vm5, %v15230_v14  ;;  %v15212_v57 = vld [vmem:[%s23327_s22 + $0xc8] sm:$0xff] (!%p15871_p7)  ;;  %v15214_v44 = vld [vmem:[%s23327_s22 + $0xd8] sm:$0xff] (!%p15871_p7)  ;;  %v15215_v14 = vld [vmem:[%s23327_s22 + $0xe0] sm:$0xff] (!%p15871_p7) }
 0xa4f   : > { %v27777_v10 = vmul.f32 %v15150_v6, %v15118_v30  ;;  %v15202_v6 = vld [vmem:[%s23327_s22 + $0x78] sm:$0xff] (!%p15871_p7)  ;;  %v15203_v30 = vld [vmem:[%s23327_s22 + $0x80] sm:$0xff] (!%p15871_p7)  ;;  %15265 = vst.msk [vmem:[%s23332_s12 + $0x68] sm:$0xff] (!%p15871_p7), %vm15251_vm5, %v15232_v49  ;;  %v15243_v61 = vadd.f32 (!%p15871_p7), %v15211_v41, %v27753_v22  ;;  %v15244_v52 = vadd.f32 (!%p15871_p7), %v15212_v57, %v27751_v56  ;;  %v15245_v48 = vadd.f32 (!%p15871_p7), %v15213_v32, %v27761_v18  ;;  %v15216_v36 = vld [vmem:[%s23327_s22 + $0xe8] sm:$0xff] (!%p15871_p7) }
 0xa50   : > { %15253 = vst.msk [vmem:[%s23332_s12 + $0x8] sm:$0xff] %vm15251_vm5, %v15220_v5  ;;  %v15234_v28 = vadd.f32 %v15202_v6, %v27711_v45  ;;  %v15235_v20 = vadd.f32 %v15203_v30, %v27721_v62  ;;  %v15205_v5 = vld [vmem:[%s23327_s22 + $0x90] sm:$0xff]  ;;  %15264 = vst.msk [vmem:[%s23332_s12 + $0x60] sm:$0xff] %vm15251_vm5, %v15231_v16  ;;  %v15246_v26 = vadd.f32 %v15214_v44, %v27759_v55 }
 0xa51   : > { %15266 = vst.msk [vmem:[%s23332_s12 + $0x70] sm:$0xff] %vm15251_vm5, %v15233_v35  ;;  %v15237_v33 = vadd.f32 %v15205_v5, %v27729_v17  ;;  %15273 = vst.msk [vmem:[%s23332_s12 + $0xa8] sm:$0xff] %vm15251_vm5, %v15240_v63  ;;  %v15247_v47 = vadd.f32 %v15215_v14, %v27769_v58  ;;  %v15248_v16 = vadd.f32 %v15216_v36, %v27767_v51  ;;  %v15217_v49 = vld [vmem:[%s23327_s22 + $0xf0] sm:$0xff]  ;;  %v15218_v35 = vld [vmem:[%s23327_s22 + $0xf8] sm:$0xff] }
 0xa52   : > { %15267 = vst.msk [vmem:[%s23332_s12 + $0x78] sm:$0xff] %vm15251_vm5, %v15234_v28  ;;  %15268 = vst.msk [vmem:[%s23332_s12 + $0x80] sm:$0xff] %vm15251_vm5, %v15235_v20  ;;  %v15249_v6 = vadd.f32 %v15217_v49, %v27777_v10  ;;  %v15250_v30 = vadd.f32 %v15218_v35, %v27775_v50 }
 0xa53   : > { %15270 = vst.msk [vmem:[%s23332_s12 + $0x90] sm:$0xff] %vm15251_vm5, %v15237_v33  ;;  %15274 = vst.msk [vmem:[%s23332_s12 + $0xb0] sm:$0xff] %vm15251_vm5, %v15241_v59 }
 0xa54   : > { %15275 = vst.msk [vmem:[%s23332_s12 + $0xb8] sm:$0xff] %vm15251_vm5, %v15242_v29  ;;  %15276 = vst.msk [vmem:[%s23332_s12 + $0xc0] sm:$0xff] %vm15251_vm5, %v15243_v61 }
 0xa55   : > { %15277 = vst.msk [vmem:[%s23332_s12 + $0xc8] sm:$0xff] %vm15251_vm5, %v15244_v52  ;;  %15278 = vst.msk [vmem:[%s23332_s12 + $0xd0] sm:$0xff] %vm15251_vm5, %v15245_v48 }
 0xa56   : > { %15279 = vst.msk [vmem:[%s23332_s12 + $0xd8] sm:$0xff] %vm15251_vm5, %v15246_v26  ;;  %15280 = vst.msk [vmem:[%s23332_s12 + $0xe0] sm:$0xff] %vm15251_vm5, %v15247_v47 }
 0xa57   : > { %15281 = vst.msk [vmem:[%s23332_s12 + $0xe8] sm:$0xff] %vm15251_vm5, %v15248_v16  ;;  %15282 = vst.msk [vmem:[%s23332_s12 + $0xf0] sm:$0xff] %vm15251_vm5, %v15249_v6 }
 0xa58   : > { %15283 = vst.msk [vmem:[%s23332_s12 + $0xf8] sm:$0xff] %vm15251_vm5, %v15250_v30 }
 0xa59 PF: > { %s28876_s10 = sld [smem:[#allocation3_spill]] }
 0xa5f   : > { %p17468_p9 = scmp.eq.s32.totalorder %s28876_s10, 0 }
 0xa60   : > { %v15288_v23 = vld [vmem:[%s23332_s12] sm:$0xff] (!%p17468_p9)  ;;  %vm15352_vm6 = vcmask (!%p17468_p9), 15360   ;;  %v15289_v28 = vld [vmem:[%s23332_s12 + $0x8] sm:$0xff] (!%p17468_p9)  ;;  %v15290_v20 = vld [vmem:[%s23332_s12 + $0x10] sm:$0xff] (!%p17468_p9) }
 0xa61   : > { %15287 = sbr.rel (%p17468_p9) target bundleno = 2675 (0xa73), region = 83  ;;  %v15320_v11 = vadd.f32 (!%p17468_p9), %v15288_v23, %v27653_v37  ;;  %v15321_v5 = vadd.f32 (!%p17468_p9), %v15289_v28, %v27651_v25  ;;  %v15322_v7 = vadd.f32 (!%p17468_p9), %v15290_v20, %v27661_v39  ;;  %v15291_v27 = vld [vmem:[%s23332_s12 + $0x18] sm:$0xff] (!%p17468_p9)  ;;  %v15292_v33 = vld [vmem:[%s23332_s12 + $0x20] sm:$0xff] (!%p17468_p9)  ;;  %v15293_v2 = vld [vmem:[%s23332_s12 + $0x28] sm:$0xff] (!%p17468_p9) }
 0xa62   : > { %v15323_v19 = vadd.f32 (!%p17468_p9), %v15291_v27, %v27659_v46  ;;  %v15324_v53 = vadd.f32 (!%p17468_p9), %v15292_v33, %v27669_v43  ;;  %v15325_v4 = vadd.f32 (!%p17468_p9), %v15293_v2, %v27667_v15  ;;  %v15294_v37 = vld [vmem:[%s23332_s12 + $0x30] sm:$0xff] (!%p17468_p9)  ;;  %v15295_v34 = vld [vmem:[%s23332_s12 + $0x38] sm:$0xff] (!%p17468_p9)  ;;  %v15296_v25 = vld [vmem:[%s23332_s12 + $0x40] sm:$0xff] (!%p17468_p9) }
 0xa63   : > { %15353 = vst.msk [vmem:[%s23332_s12] sm:$0xff] (!%p17468_p9), %vm15352_vm6, %v15320_v11  ;;  %15354 = vst.msk [vmem:[%s23332_s12 + $0x8] sm:$0xff] (!%p17468_p9), %vm15352_vm6, %v15321_v5  ;;  %v15326_v46 = vadd.f32 (!%p17468_p9), %v15294_v37, %v27677_v3  ;;  %v15327_v39 = vadd.f32 (!%p17468_p9), %v15295_v34, %v27675_v21  ;;  %v15328_v15 = vadd.f32 (!%p17468_p9), %v15296_v25, %v27685_v9  ;;  %v15297_v43 = vld [vmem:[%s23332_s12 + $0x48] sm:$0xff] (!%p17468_p9)  ;;  %v15298_v63 = vld [vmem:[%s23332_s12 + $0x50] sm:$0xff] (!%p17468_p9) }
 0xa64   : > { %15355 = vst.msk [vmem:[%s23332_s12 + $0x10] sm:$0xff] (!%p17468_p9), %vm15352_vm6, %v15322_v7  ;;  %v15299_v59 = vld [vmem:[%s23332_s12 + $0x58] sm:$0xff] (!%p17468_p9)  ;;  %15356 = vst.msk [vmem:[%s23332_s12 + $0x18] sm:$0xff] (!%p17468_p9), %vm15352_vm6, %v15323_v19  ;;  %v15329_v3 = vadd.f32 (!%p17468_p9), %v15297_v43, %v27683_v13  ;;  %v15330_v21 = vadd.f32 (!%p17468_p9), %v15298_v63, %v27694_v12  ;;  %v15300_v29 = vld [vmem:[%s23332_s12 + $0x60] sm:$0xff] (!%p17468_p9) }
 0xa65   : > { %15357 = vst.msk [vmem:[%s23332_s12 + $0x20] sm:$0xff] (!%p17468_p9), %vm15352_vm6, %v15324_v53  ;;  %15358 = vst.msk [vmem:[%s23332_s12 + $0x28] sm:$0xff] (!%p17468_p9), %vm15352_vm6, %v15325_v4  ;;  %v15331_v9 = vadd.f32 (!%p17468_p9), %v15299_v59, %v27691_v31  ;;  %v15301_v41 = vld [vmem:[%s23332_s12 + $0x68] sm:$0xff] (!%p17468_p9)  ;;  %v15302_v57 = vld [vmem:[%s23332_s12 + $0x70] sm:$0xff] (!%p17468_p9)  ;;  %v15332_v13 = vadd.f32 (!%p17468_p9), %v15300_v29, %v27704_v42 }
 0xa66   : > { %15359 = vst.msk [vmem:[%s23332_s12 + $0x30] sm:$0xff] (!%p17468_p9), %vm15352_vm6, %v15326_v46  ;;  %15360 = vst.msk [vmem:[%s23332_s12 + $0x38] sm:$0xff] (!%p17468_p9), %vm15352_vm6, %v15327_v39  ;;  %v15333_v12 = vadd.f32 (!%p17468_p9), %v15301_v41, %v27701_v60  ;;  %v15334_v31 = vadd.f32 (!%p17468_p9), %v15302_v57, %v27713_v40  ;;  %v15303_v32 = vld [vmem:[%s23332_s12 + $0x78] sm:$0xff] (!%p17468_p9)  ;;  %v15304_v61 = vld [vmem:[%s23332_s12 + $0x80] sm:$0xff] (!%p17468_p9) }
 0xa67   : > { %15361 = vst.msk [vmem:[%s23332_s12 + $0x40] sm:$0xff] (!%p17468_p9), %vm15352_vm6, %v15328_v15  ;;  %v15305_v52 = vld [vmem:[%s23332_s12 + $0x88] sm:$0xff] (!%p17468_p9)  ;;  %15362 = vst.msk [vmem:[%s23332_s12 + $0x48] sm:$0xff] (!%p17468_p9), %vm15352_vm6, %v15329_v3  ;;  %v15335_v42 = vadd.f32 (!%p17468_p9), %v15303_v32, %v27711_v45  ;;  %v15336_v60 = vadd.f32 (!%p17468_p9), %v15304_v61, %v27721_v62  ;;  %v15306_v48 = vld [vmem:[%s23332_s12 + $0x90] sm:$0xff] (!%p17468_p9) }
 0xa68   : > { %15363 = vst.msk [vmem:[%s23332_s12 + $0x50] sm:$0xff] %vm15352_vm6, %v15330_v21  ;;  %15364 = vst.msk [vmem:[%s23332_s12 + $0x58] sm:$0xff] %vm15352_vm6, %v15331_v9  ;;  %v15337_v40 = vadd.f32 %v15305_v52, %v27719_v24  ;;  %v15307_v44 = vld [vmem:[%s23332_s12 + $0x98] sm:$0xff]  ;;  %v15308_v14 = vld [vmem:[%s23332_s12 + $0xa0] sm:$0xff]  ;;  %v15338_v45 = vadd.f32 %v15306_v48, %v27729_v17 }
 0xa69   : > { %15365 = vst.msk [vmem:[%s23332_s12 + $0x60] sm:$0xff] %vm15352_vm6, %v15332_v13  ;;  %15366 = vst.msk [vmem:[%s23332_s12 + $0x68] sm:$0xff] %vm15352_vm6, %v15333_v12  ;;  %v15339_v62 = vadd.f32 %v15307_v44, %v27727_v0  ;;  %v15340_v24 = vadd.f32 %v15308_v14, %v27737_v38  ;;  %v15309_v36 = vld [vmem:[%s23332_s12 + $0xa8] sm:$0xff]  ;;  %v15310_v26 = vld [vmem:[%s23332_s12 + $0xb0] sm:$0xff] }
 0xa6a   : > { %15367 = vst.msk [vmem:[%s23332_s12 + $0x70] sm:$0xff] %vm15352_vm6, %v15334_v31  ;;  %v15311_v47 = vld [vmem:[%s23332_s12 + $0xb8] sm:$0xff]  ;;  %15368 = vst.msk [vmem:[%s23332_s12 + $0x78] sm:$0xff] %vm15352_vm6, %v15335_v42  ;;  %v15341_v17 = vadd.f32 %v15309_v36, %v27735_v1  ;;  %v15342_v0 = vadd.f32 %v15310_v26, %v27745_v8  ;;  %v15312_v16 = vld [vmem:[%s23332_s12 + $0xc0] sm:$0xff] }
 0xa6b   : > { %15369 = vst.msk [vmem:[%s23332_s12 + $0x80] sm:$0xff] %vm15352_vm6, %v15336_v60  ;;  %15370 = vst.msk [vmem:[%s23332_s12 + $0x88] sm:$0xff] %vm15352_vm6, %v15337_v40  ;;  %v15343_v38 = vadd.f32 %v15311_v47, %v27743_v54  ;;  %v15313_v49 = vld [vmem:[%s23332_s12 + $0xc8] sm:$0xff]  ;;  %v15314_v35 = vld [vmem:[%s23332_s12 + $0xd0] sm:$0xff]  ;;  %v15344_v1 = vadd.f32 %v15312_v16, %v27753_v22 }
 0xa6c   : > { %15371 = vst.msk [vmem:[%s23332_s12 + $0x90] sm:$0xff] %vm15352_vm6, %v15338_v45  ;;  %15372 = vst.msk [vmem:[%s23332_s12 + $0x98] sm:$0xff] %vm15352_vm6, %v15339_v62  ;;  %v15345_v8 = vadd.f32 %v15313_v49, %v27751_v56  ;;  %v15346_v54 = vadd.f32 %v15314_v35, %v27761_v18  ;;  %v15315_v6 = vld [vmem:[%s23332_s12 + $0xd8] sm:$0xff]  ;;  %v15316_v30 = vld [vmem:[%s23332_s12 + $0xe0] sm:$0xff] }
 0xa6d   : > { %15373 = vst.msk [vmem:[%s23332_s12 + $0xa0] sm:$0xff] %vm15352_vm6, %v15340_v24  ;;  %v15317_v23 = vld [vmem:[%s23332_s12 + $0xe8] sm:$0xff]  ;;  %15374 = vst.msk [vmem:[%s23332_s12 + $0xa8] sm:$0xff] %vm15352_vm6, %v15341_v17  ;;  %v15347_v22 = vadd.f32 %v15315_v6, %v27759_v55  ;;  %v15348_v56 = vadd.f32 %v15316_v30, %v27769_v58  ;;  %v15318_v28 = vld [vmem:[%s23332_s12 + $0xf0] sm:$0xff] }
 0xa6e   : > { %15375 = vst.msk [vmem:[%s23332_s12 + $0xb0] sm:$0xff] %vm15352_vm6, %v15342_v0  ;;  %15376 = vst.msk [vmem:[%s23332_s12 + $0xb8] sm:$0xff] %vm15352_vm6, %v15343_v38  ;;  %v15349_v18 = vadd.f32 %v15317_v23, %v27767_v51  ;;  %v15319_v20 = vld [vmem:[%s23332_s12 + $0xf8] sm:$0xff]  ;;  %v15350_v11 = vadd.f32 %v15318_v28, %v27777_v10 }
 0xa6f   : > { %15377 = vst.msk [vmem:[%s23332_s12 + $0xc0] sm:$0xff] %vm15352_vm6, %v15344_v1  ;;  %15378 = vst.msk [vmem:[%s23332_s12 + $0xc8] sm:$0xff] %vm15352_vm6, %v15345_v8  ;;  %v15351_v5 = vadd.f32 %v15319_v20, %v27775_v50 }
 0xa70   : > { %15379 = vst.msk [vmem:[%s23332_s12 + $0xd0] sm:$0xff] %vm15352_vm6, %v15346_v54  ;;  %15380 = vst.msk [vmem:[%s23332_s12 + $0xd8] sm:$0xff] %vm15352_vm6, %v15347_v22 }
 0xa71   : > { %15381 = vst.msk [vmem:[%s23332_s12 + $0xe0] sm:$0xff] %vm15352_vm6, %v15348_v56  ;;  %15382 = vst.msk [vmem:[%s23332_s12 + $0xe8] sm:$0xff] %vm15352_vm6, %v15349_v18 }
 0xa72   : > { %15383 = vst.msk [vmem:[%s23332_s12 + $0xf0] sm:$0xff] %vm15352_vm6, %v15350_v11  ;;  %15384 = vst.msk [vmem:[%s23332_s12 + $0xf8] sm:$0xff] %vm15352_vm6, %v15351_v5 }
 0xa73 PF: > { %s28877_s22 = sld [smem:[#allocation3_spill]] }
 0xa79   : > { %p17469_p10 = scmp.ne.s32.totalorder %s28877_s22, 2 }
 0xa7a   : > { %v15389_v55 = vld [vmem:[%s23332_s12] sm:$0xff] (!%p17469_p10)  ;;  %v15390_v51 = vld [vmem:[%s23332_s12 + $0x8] sm:$0xff] (!%p17469_p10)  ;;  %v15391_v58 = vld [vmem:[%s23332_s12 + $0x10] sm:$0xff] (!%p17469_p10)  ;;  %vm15453_vm7 = vcmask (!%p17469_p10), 15360  }
 0xa7b   : > { %15388 = sbr.rel (%p17469_p10) target bundleno = 2726 (0xaa6), region = 87  ;;  %22806 = vtanh.f32 (!%p17469_p10), %v15389_v55  ;;  %v15392_v50 = vld [vmem:[%s23332_s12 + $0x18] sm:$0xff] (!%p17469_p10)  ;;  %v15393_v10 = vld [vmem:[%s23332_s12 + $0x20] sm:$0xff] (!%p17469_p10)  ;;  %v15394_v7 = vld [vmem:[%s23332_s12 + $0x28] sm:$0xff] (!%p17469_p10) }
 0xa7c   : > { %22808 = vtanh.f32 (!%p17469_p10), %v15390_v51  ;;  %v15395_v27 = vld [vmem:[%s23332_s12 + $0x30] sm:$0xff] (!%p17469_p10)  ;;  %v15396_v33 = vld [vmem:[%s23332_s12 + $0x38] sm:$0xff] (!%p17469_p10)  ;;  %v15397_v2 = vld [vmem:[%s23332_s12 + $0x40] sm:$0xff] (!%p17469_p10) }
 0xa7d   : > { %22810 = vtanh.f32 (!%p17469_p10), %v15391_v58  ;;  %v15398_v19 = vld [vmem:[%s23332_s12 + $0x48] sm:$0xff] (!%p17469_p10)  ;;  %v15399_v53 = vld [vmem:[%s23332_s12 + $0x50] sm:$0xff] (!%p17469_p10)  ;;  %v15400_v4 = vld [vmem:[%s23332_s12 + $0x58] sm:$0xff] (!%p17469_p10) }
 0xa7e   : > { %22812 = vtanh.f32 (!%p17469_p10), %v15392_v50  ;;  %v15401_v37 = vld [vmem:[%s23332_s12 + $0x60] sm:$0xff] (!%p17469_p10)  ;;  %v15402_v25 = vld [vmem:[%s23332_s12 + $0x68] sm:$0xff] (!%p17469_p10)  ;;  %v15403_v39 = vld [vmem:[%s23332_s12 + $0x70] sm:$0xff] (!%p17469_p10) }
 0xa7f   : > { %22814 = vtanh.f32 (!%p17469_p10), %v15393_v10  ;;  %v15404_v43 = vld [vmem:[%s23332_s12 + $0x78] sm:$0xff] (!%p17469_p10)  ;;  %v15405_v59 = vld [vmem:[%s23332_s12 + $0x80] sm:$0xff] (!%p17469_p10)  ;;  %v15406_v21 = vld [vmem:[%s23332_s12 + $0x88] sm:$0xff] (!%p17469_p10) }
 0xa80   : > { %22816 = vtanh.f32 (!%p17469_p10), %v15394_v7  ;;  %v15407_v29 = vld [vmem:[%s23332_s12 + $0x90] sm:$0xff] (!%p17469_p10)  ;;  %v15408_v57 = vld [vmem:[%s23332_s12 + $0x98] sm:$0xff] (!%p17469_p10)  ;;  %v15409_v12 = vld [vmem:[%s23332_s12 + $0xa0] sm:$0xff] (!%p17469_p10) }
 0xa81   : > { %22818 = vtanh.f32 (!%p17469_p10), %v15395_v27  ;;  %v15410_v32 = vld [vmem:[%s23332_s12 + $0xa8] sm:$0xff] (!%p17469_p10)  ;;  %v15411_v52 = vld [vmem:[%s23332_s12 + $0xb0] sm:$0xff] (!%p17469_p10)  ;;  %v15412_v60 = vld [vmem:[%s23332_s12 + $0xb8] sm:$0xff] (!%p17469_p10) }
 0xa82   : > { %22820 = vtanh.f32 %v15396_v33  ;;  %v15413_v48 = vld [vmem:[%s23332_s12 + $0xc0] sm:$0xff]  ;;  %v15414_v14 = vld [vmem:[%s23332_s12 + $0xc8] sm:$0xff]  ;;  %v15415_v62 = vld [vmem:[%s23332_s12 + $0xd0] sm:$0xff] }
 0xa83   : > { %22822 = vtanh.f32 %v15397_v2  ;;  %v15416_v36 = vld [vmem:[%s23332_s12 + $0xd8] sm:$0xff]  ;;  %v15417_v47 = vld [vmem:[%s23332_s12 + $0xe0] sm:$0xff]  ;;  %v15418_v0 = vld [vmem:[%s23332_s12 + $0xe8] sm:$0xff] }
 0xa84   : > { %22824 = vtanh.f32 %v15398_v19  ;;  %v15419_v16 = vld [vmem:[%s23332_s12 + $0xf0] sm:$0xff]  ;;  %v15420_v35 = vld [vmem:[%s23332_s12 + $0xf8] sm:$0xff] }
 0xa85   : > { %v22807_v34 = vpop.eup %22806  ;;  %22826 = vtanh.f32 %v15399_v53 }
 0xa86   : > { %v22809_v46 = vpop.eup %22808  ;;  %15454 = vst.msk [vmem:[%s23332_s12] sm:$0xff] %vm15453_vm7, %v22807_v34  ;;  %22828 = vtanh.f32 %v15400_v4 }
 0xa87   : > { %v22811_v15 = vpop.eup %22810  ;;  %15455 = vst.msk [vmem:[%s23332_s12 + $0x8] sm:$0xff] %vm15453_vm7, %v22809_v46  ;;  %22830 = vtanh.f32 %v15401_v37 }
 0xa88   : > { %v22813_v63 = vpop.eup %22812  ;;  %15456 = vst.msk [vmem:[%s23332_s12 + $0x10] sm:$0xff] %vm15453_vm7, %v22811_v15  ;;  %22832 = vtanh.f32 %v15402_v25 }
 0xa89   : > { %v22815_v3 = vpop.eup %22814  ;;  %15457 = vst.msk [vmem:[%s23332_s12 + $0x18] sm:$0xff] %vm15453_vm7, %v22813_v63  ;;  %22834 = vtanh.f32 %v15403_v39 }
 0xa8a   : > { %v22817_v9 = vpop.eup %22816  ;;  %15458 = vst.msk [vmem:[%s23332_s12 + $0x20] sm:$0xff] %vm15453_vm7, %v22815_v3  ;;  %22836 = vtanh.f32 %v15404_v43 }
 0xa8b   : > { %v22819_v41 = vpop.eup %22818  ;;  %15459 = vst.msk [vmem:[%s23332_s12 + $0x28] sm:$0xff] %vm15453_vm7, %v22817_v9  ;;  %22838 = vtanh.f32 %v15405_v59 }
 0xa8c   : > { %v22821_v13 = vpop.eup %22820  ;;  %15460 = vst.msk [vmem:[%s23332_s12 + $0x30] sm:$0xff] %vm15453_vm7, %v22819_v41  ;;  %22840 = vtanh.f32 %v15406_v21 }
 0xa8d   : > { %v22823_v31 = vpop.eup %22822  ;;  %15461 = vst.msk [vmem:[%s23332_s12 + $0x38] sm:$0xff] %vm15453_vm7, %v22821_v13  ;;  %22842 = vtanh.f32 %v15407_v29 }
 0xa8e   : > { %v22825_v61 = vpop.eup %22824  ;;  %15462 = vst.msk [vmem:[%s23332_s12 + $0x40] sm:$0xff] %vm15453_vm7, %v22823_v31  ;;  %22844 = vtanh.f32 %v15408_v57 }
 0xa8f   : > { %v22827_v42 = vpop.eup %22826  ;;  %15463 = vst.msk [vmem:[%s23332_s12 + $0x48] sm:$0xff] %vm15453_vm7, %v22825_v61  ;;  %22846 = vtanh.f32 %v15409_v12 }
 0xa90   : > { %v22829_v40 = vpop.eup %22828  ;;  %15464 = vst.msk [vmem:[%s23332_s12 + $0x50] sm:$0xff] %vm15453_vm7, %v22827_v42  ;;  %22848 = vtanh.f32 %v15410_v32 }
 0xa91   : > { %v22831_v44 = vpop.eup %22830  ;;  %15465 = vst.msk [vmem:[%s23332_s12 + $0x58] sm:$0xff] %vm15453_vm7, %v22829_v40  ;;  %22850 = vtanh.f32 %v15411_v52 }
 0xa92   : > { %v22833_v45 = vpop.eup %22832  ;;  %15466 = vst.msk [vmem:[%s23332_s12 + $0x60] sm:$0xff] %vm15453_vm7, %v22831_v44  ;;  %22852 = vtanh.f32 %v15412_v60 }
 0xa93   : > { %v22835_v24 = vpop.eup %22834  ;;  %15467 = vst.msk [vmem:[%s23332_s12 + $0x68] sm:$0xff] %vm15453_vm7, %v22833_v45  ;;  %22854 = vtanh.f32 %v15413_v48 }
 0xa94   : > { %v22837_v26 = vpop.eup %22836  ;;  %15468 = vst.msk [vmem:[%s23332_s12 + $0x70] sm:$0xff] %vm15453_vm7, %v22835_v24  ;;  %22856 = vtanh.f32 %v15414_v14 }
 0xa95   : > { %v22839_v17 = vpop.eup %22838  ;;  %15469 = vst.msk [vmem:[%s23332_s12 + $0x78] sm:$0xff] %vm15453_vm7, %v22837_v26  ;;  %22858 = vtanh.f32 %v15415_v62 }
 0xa96   : > { %v22841_v38 = vpop.eup %22840  ;;  %15470 = vst.msk [vmem:[%s23332_s12 + $0x80] sm:$0xff] %vm15453_vm7, %v22839_v17  ;;  %22860 = vtanh.f32 %v15416_v36 }
 0xa97   : > { %v22843_v49 = vpop.eup %22842  ;;  %15471 = vst.msk [vmem:[%s23332_s12 + $0x88] sm:$0xff] %vm15453_vm7, %v22841_v38  ;;  %22862 = vtanh.f32 %v15417_v47 }
 0xa98   : > { %v22845_v1 = vpop.eup %22844  ;;  %15472 = vst.msk [vmem:[%s23332_s12 + $0x90] sm:$0xff] %vm15453_vm7, %v22843_v49  ;;  %22864 = vtanh.f32 %v15418_v0 }
 0xa99   : > { %v22847_v8 = vpop.eup %22846  ;;  %15473 = vst.msk [vmem:[%s23332_s12 + $0x98] sm:$0xff] %vm15453_vm7, %v22845_v1  ;;  %22866 = vtanh.f32 %v15419_v16 }
 0xa9a   : > { %v22849_v54 = vpop.eup %22848  ;;  %15474 = vst.msk [vmem:[%s23332_s12 + $0xa0] sm:$0xff] %vm15453_vm7, %v22847_v8  ;;  %22868 = vtanh.f32 %v15420_v35 }
 0xa9b   : > { %v22851_v6 = vpop.eup %22850  ;;  %15475 = vst.msk [vmem:[%s23332_s12 + $0xa8] sm:$0xff] %vm15453_vm7, %v22849_v54 }
 0xa9c   : > { %v22853_v30 = vpop.eup %22852  ;;  %15476 = vst.msk [vmem:[%s23332_s12 + $0xb0] sm:$0xff] %vm15453_vm7, %v22851_v6 }
 0xa9d   : > { %v22855_v23 = vpop.eup %22854  ;;  %15477 = vst.msk [vmem:[%s23332_s12 + $0xb8] sm:$0xff] %vm15453_vm7, %v22853_v30 }
 0xa9e   : > { %v22857_v22 = vpop.eup %22856  ;;  %15478 = vst.msk [vmem:[%s23332_s12 + $0xc0] sm:$0xff] %vm15453_vm7, %v22855_v23 }
 0xa9f   : > { %v22859_v56 = vpop.eup %22858  ;;  %15479 = vst.msk [vmem:[%s23332_s12 + $0xc8] sm:$0xff] %vm15453_vm7, %v22857_v22 }
 0xaa0   : > { %v22861_v18 = vpop.eup %22860  ;;  %15480 = vst.msk [vmem:[%s23332_s12 + $0xd0] sm:$0xff] %vm15453_vm7, %v22859_v56 }
 0xaa1   : > { %v22863_v28 = vpop.eup %22862  ;;  %15481 = vst.msk [vmem:[%s23332_s12 + $0xd8] sm:$0xff] %vm15453_vm7, %v22861_v18 }
 0xaa2   : > { %v22865_v20 = vpop.eup %22864  ;;  %15482 = vst.msk [vmem:[%s23332_s12 + $0xe0] sm:$0xff] %vm15453_vm7, %v22863_v28 }
 0xaa3   : > { %v22867_v11 = vpop.eup %22866  ;;  %15483 = vst.msk [vmem:[%s23332_s12 + $0xe8] sm:$0xff] %vm15453_vm7, %v22865_v20 }
 0xaa4   : > { %v22869_v5 = vpop.eup %22868  ;;  %15484 = vst.msk [vmem:[%s23332_s12 + $0xf0] sm:$0xff] %vm15453_vm7, %v22867_v11 }
 0xaa5   : > { %15485 = vst.msk [vmem:[%s23332_s12 + $0xf8] sm:$0xff] %vm15453_vm7, %v22869_v5 }
 0xaa6 PF: > { %s28878_s15 = sld [smem:[#allocation6_spill]]  ;;  %s28879_s17 = sld [smem:[#allocation4_spill]] }
 0xaa7   : > { %s28880_s18 = sld [smem:[#allocation5_spill]]  ;;  %s28881_s19 = sld [smem:[#allocation7_spill]] }
 0xaa8   : > { %s28882_s20 = sld [smem:[#allocation8_spill]] }
 0xaac   : > { %s21_s21 = sadd.s32 1, %s28878_s15  }
 0xaad   : > { %p18_p11 = scmp.ge.s32.totalorder %s21_s21, 8  }
 0xaaf   :  { %20 = sbr.rel (!%p18_p11) target bundleno = 5 (0x5), region = 204 }

</bundles_post_ra>
